<compile_context>
chip_gen: v6e
topology: v6e:2x2x1
jax: 0.10.0
libtpu: 0.0.40
codegen_flags: <defaults>
</compile_context>

<pallas_src>
import functools

import jax
import jax.numpy as jnp
import numpy as np
from jax.experimental import pallas as pl
from jax.experimental.pallas import tpu as pltpu


def _default_stem_dtype():
    """bf16 stem math on v6e/v7x (bf16 VALU); f32 on v5e and older."""
    try:
        kind = jax.devices()[0].device_kind.lower()
    except Exception:
        return jnp.bfloat16
    for tag in ("v2", "v3", "v4", "v5"):
        if tag in kind:
            return jnp.float32
    return jnp.bfloat16


# ---------------------------------------------------------------------------
# Fused kernel.
#   Per pixel tile:  1x1-conv stem (VPU FMAs, pixels on lanes, features on
#   sublanes, chunked 128x128) -> bias -> ReLU -> partial pixel sum into an
#   f32 accumulator.
#   On the last tile: mean pool (with analytic pad correction) -> Linear ->
#   train-mode BatchNorm1d, written as one lane-dense [B, E_pad] store.
#
#   x_ref   : [B, Cin, TILE_P]     bf16  streamed image tile (pixels on lanes)
#   wsb_ref : [Cf_pad, Cin+1]      cdt   stem weight columns + bias column
#   pc_ref  : [1, Cf_pad]          f32   pooled-padding correction (n_pad*relu(b)/P)
#   wf_ref  : [Cf_pad, E_pad]      f32   Linear weight
#   bf_ref  : [1, E_pad]           f32   Linear bias
#   g_ref   : [1, E_pad]           f32   BN gamma
#   bt_ref  : [1, E_pad]           f32   BN beta
#   o_ref   : [B, E_pad]           f32
#   acc_ref : [B, Cf_pad]          f32   running pixel-sum of relu(conv)
# ---------------------------------------------------------------------------
def encoder_kernel(x_ref, wsb_ref, pc_ref, wf_ref, bf_ref, g_ref, bt_ref,
                   o_ref, acc_ref, *, cin, chunk_f, chunk_p, inv_true_p,
                   compute_dtype, eps):
    pid = pl.program_id(0)
    cdt = compute_dtype
    b_sz = x_ref.shape[0]
    tile_p = x_ref.shape[2]
    cf_pad = wsb_ref.shape[0]
    n_fc = cf_pad // chunk_f
    n_pc = tile_p // chunk_p

    @pl.when(pid == 0)
    def _init():
        acc_ref[...] = jnp.zeros_like(acc_ref)

    def f_chunk(fc, carry):
        f0 = pl.multiple_of(fc * chunk_f, chunk_f)
        wsb = wsb_ref[pl.ds(f0, chunk_f), :]                   # [CF, Cin+1]
        # hoist loop-invariant weight/bias columns out of the pixel loop
        w_cols = [wsb[:, c:c + 1][None, :, :] for c in range(cin)]  # [1,CF,1]
        b_col = wsb[:, cin:cin + 1][None, :, :]                     # [1,CF,1]

        def p_chunk(pc, psum):
            p0 = pl.multiple_of(pc * chunk_p, chunk_p)
            xc = x_ref[:, :, pl.ds(p0, chunk_p)].astype(cdt)   # [B, Cin, CP]
            # 1x1 conv as `cin` VPU broadcast-FMAs (no K=3 MXU contraction,
            # no cross-lane channel shuffles).
            y = xc[:, 0:1, :] * w_cols[0]                      # [B, CF, CP]
            for c in range(1, cin):
                y = y + xc[:, c:c + 1, :] * w_cols[c]
            y = jnp.maximum(y + b_col, 0.0)                    # bias + ReLU
            # pixel reduction over the lane axis (XLU slot, hidden under FMAs),
            # accumulated in f32.
            return psum + jnp.sum(y.astype(jnp.float32), axis=2)

        psum = jax.lax.fori_loop(
            0, n_pc, p_chunk,
            jnp.zeros((b_sz, chunk_f), jnp.float32),
            unroll=n_pc <= 8)
        acc_ref[:, pl.ds(f0, chunk_f)] += psum
        return carry

    jax.lax.fori_loop(0, n_fc, f_chunk, 0, unroll=n_fc <= 4)

    @pl.when(pid == pl.num_programs(0) - 1)
    def _head():
        # mean pool; padded pixels each contributed relu(stem_bias), which is
        # removed analytically (pc_ref) instead of masking every tile.
        feats = acc_ref[...] * inv_true_p - pc_ref[...]        # [B, Cf_pad] f32
        # features = self.linear(features)   (runs once; tiny-M MXU matmul)
        z = jnp.dot(feats, wf_ref[...],
                    preferred_element_type=jnp.float32) + bf_ref[...]
        # features = self.bn(features) -- train-mode batch statistics,
        # two-pass variance (no E[z^2]-E[z]^2 cancellation).
        mean = jnp.mean(z, axis=0, keepdims=True)
        zc = z - mean
        var = jnp.mean(zc * zc, axis=0, keepdims=True)
        z_hat = zc * jax.lax.rsqrt(var + eps)
        o_ref[...] = (g_ref[...] * z_hat + bt_ref[...]).astype(o_ref.dtype)


# ---------------------------------------------------------------------------
# Wrapper
# ---------------------------------------------------------------------------
def encoder_cnn_forward(images, params, *, tile_p=1024, chunk_f=128,
                        chunk_p=128, compute_dtype=None, bn_eps=1e-5):
    if compute_dtype is None:
        compute_dtype = _default_stem_dtype()
    cdt = compute_dtype

    B, Cin, H, W = images.shape
    P = H * W
    Cfeat = params["w_stem"].shape[1]
    E = params["w_fc"].shape[1]
    E_pad = max(128, ((E + 127) // 128) * 128)          # lane-dense output
    Cf_pad = ((Cfeat + chunk_f - 1) // chunk_f) * chunk_f

    # NCHW -> [B, Cin, P]: free reshape, pixels land on the 128-lane axis;
    # streamed as bf16 (halves HBM traffic).
    xp = images.reshape(B, Cin, P).astype(jnp.bfloat16)

    tile_p = max(chunk_p, (tile_p // chunk_p) * chunk_p)
    p_ceil = ((P + chunk_p - 1) // chunk_p) * chunk_p
    tile_p = min(tile_p, p_ceil)
    n_tiles = pl.cdiv(P, tile_p)
    P_pad = n_tiles * tile_p
    n_pad = P_pad - P
    if n_pad:
        xp = jnp.pad(xp, ((0, 0), (0, 0), (0, n_pad)))

    # stem weights: feature-major, bias folded in as an extra "channel" column.
    w_stem = params["w_stem"].astype(jnp.float32)       # [Cin, Cfeat]
    b_stem = params["b_stem"].astype(jnp.float32)       # [1, Cfeat]
    wsb = jnp.concatenate([w_stem, b_stem], axis=0)     # [Cin+1, Cfeat]
    if Cf_pad != Cfeat:
        wsb = jnp.pad(wsb, ((0, 0), (0, Cf_pad - Cfeat)))
    wsb = jnp.transpose(wsb).astype(cdt)                # [Cf_pad, Cin+1]

    # analytic pooled-padding correction: each padded (zero) pixel contributes
    # relu(stem_bias) to the pixel sum.
    b_cdt = b_stem.astype(cdt).astype(jnp.float32)
    pool_corr = jnp.maximum(b_cdt, 0.0) * (float(n_pad) / float(P))
    if Cf_pad != Cfeat:
        pool_corr = jnp.pad(pool_corr, ((0, 0), (0, Cf_pad - Cfeat)))

    # head weights (zero padding keeps padded Cfeat rows / E columns inert).
    w_fc = params["w_fc"].astype(jnp.float32)
    b_fc = params["b_fc"].astype(jnp.float32)
    gamma = params["bn_gamma"].astype(jnp.float32)
    beta = params["bn_beta"].astype(jnp.float32)
    if Cf_pad != Cfeat:
        w_fc = jnp.pad(w_fc, ((0, Cf_pad - Cfeat), (0, 0)))
    if E_pad != E:
        pe = ((0, 0), (0, E_pad - E))
        w_fc, b_fc = jnp.pad(w_fc, pe), jnp.pad(b_fc, pe)
        gamma, beta = jnp.pad(gamma, pe), jnp.pad(beta, pe)

    cdt_bytes = jnp.dtype(cdt).itemsize
    est = (2 * B * max(Cin, 16) * tile_p * 2            # streamed x, 2 buffers
           + 2 * Cf_pad * 128 * cdt_bytes               # wsb (lane-padded)
           + 2 * Cf_pad * E_pad * 4                     # w_fc
           + 2 * 8 * Cf_pad * 4                         # pool_corr
           + 3 * 2 * 8 * E_pad * 4                      # b_fc, gamma, beta
           + 8 * Cf_pad * 4                             # acc scratch
           + 2 * 8 * E_pad * 4                          # output
           + 4 * B * chunk_f * chunk_p * 4)             # in-flight chunk work
    vmem_limit = int(min(60 * 2 ** 20, max(32 * 2 ** 20, 2 * est)))

    kernel = functools.partial(
        encoder_kernel, cin=Cin, chunk_f=chunk_f, chunk_p=chunk_p,
        inv_true_p=1.0 / float(P), compute_dtype=cdt, eps=bn_eps)

    out = pl.pallas_call(
        kernel,
        grid=(n_tiles,),
        in_specs=[
            pl.BlockSpec((B, Cin, tile_p), lambda i: (0, 0, i)),   # streamed
            # TODO(synk): on v7x, add pipeline_mode=pl.Buffered(1) to the
            # resident (constant-index) weight specs below to halve their VMEM.
            pl.BlockSpec((Cf_pad, Cin + 1), lambda i: (0, 0)),     # resident
            pl.BlockSpec((1, Cf_pad), lambda i: (0, 0)),
            pl.BlockSpec((Cf_pad, E_pad), lambda i: (0, 0)),
            pl.BlockSpec((1, E_pad), lambda i: (0, 0)),
            pl.BlockSpec((1, E_pad), lambda i: (0, 0)),
            pl.BlockSpec((1, E_pad), lambda i: (0, 0)),
        ],
        out_specs=pl.BlockSpec((B, E_pad), lambda i: (0, 0)),
        out_shape=jax.ShapeDtypeStruct((B, E_pad), jnp.float32),
        scratch_shapes=[pltpu.VMEM((B, Cf_pad), jnp.float32)],
        compiler_params=pltpu.CompilerParams(
            dimension_semantics=("arbitrary",),  # pixel reduction + fused head
            vmem_limit_bytes=vmem_limit),
    )(xp, wsb, pool_corr, w_fc, b_fc, gamma, beta)

    return out[:, :E]


def init_params(key, cin, cfeat, embed_size):
    k1, k2, k3, k4 = jax.random.split(key, 4)
    return {
        # backbone stand-in (frozen, synthetic)
        "w_stem": jax.random.normal(k1, (cin, cfeat), jnp.float32) * 0.1,
        "b_stem": jax.random.normal(k2, (1, cfeat), jnp.float32) * 0.1,
        # self.linear = nn.Linear(resnet.fc.in_features, embed_size)
        "w_fc": jax.random.normal(k3, (cfeat, embed_size), jnp.float32)
        * (1.0 / jnp.sqrt(cfeat)),
        "b_fc": jax.random.normal(k4, (1, embed_size), jnp.float32) * 0.01,
        # self.bn = nn.BatchNorm1d(embed_size): weight=1, bias=0 at init
        "bn_gamma": jnp.ones((1, embed_size), jnp.float32),
        "bn_beta": jnp.zeros((1, embed_size), jnp.float32),
    }


def reference_forward(images, params, *, compute_dtype=jnp.float32,
                      bn_eps=1e-5):
    """Pure-JAX reference: bf16 input stream, stem in `compute_dtype`
    (f32 accumulation), f32 Linear + train-mode BatchNorm1d."""
    B, Cin, H, W = images.shape
    P = H * W
    x = images.reshape(B, Cin, P).astype(jnp.bfloat16).astype(compute_dtype)
    w = params["w_stem"].astype(compute_dtype)
    b = params["b_stem"].astype(compute_dtype).astype(jnp.float32)
    y = jnp.einsum("bcp,cf->bpf", x, w,
                   preferred_element_type=jnp.float32,
                   precision=jax.lax.Precision.HIGHEST) + b[:, None, :]
    y = jnp.maximum(y, 0.0)
    feats = jnp.mean(y, axis=1)                                 # [B, Cfeat]
    z = jnp.dot(feats, params["w_fc"].astype(jnp.float32),
                precision=jax.lax.Precision.HIGHEST) + params["b_fc"]
    mean = jnp.mean(z, axis=0, keepdims=True)
    var = jnp.mean((z - mean) ** 2, axis=0, keepdims=True)
    z_hat = (z - mean) * jax.lax.rsqrt(var + bn_eps)
    return params["bn_gamma"] * z_hat + params["bn_beta"]


if __name__ == "__main__":
    B, Cin, H, W = 4, 3, 18, 18        # small NCHW images (P=324)
    Cfeat = 256                        # stand-in for resnet.fc.in_features (2048)
    embed_size = 32

    key = jax.random.PRNGKey(0)
    k_img, k_par = jax.random.split(key)
    images = jax.random.normal(k_img, (B, Cin, H, W), jnp.float32)
    # per-batch scales so BN batch statistics are well conditioned
    images = images * jnp.arange(1.0, B + 1.0).reshape(B, 1, 1, 1)
    params = init_params(k_par, Cin, Cfeat, embed_size)

    # Exact-precision configuration (stem math in f32, tile_p=256 so the grid
    # accumulation + pixel-pad correction paths are exercised): asserted
    # against the pure-JAX reference.
    out = jax.block_until_ready(
        encoder_cnn_forward(images, params, tile_p=256,
                            compute_dtype=jnp.float32))
    ref = jax.block_until_ready(
        reference_forward(images, params, compute_dtype=jnp.float32))
    assert out.shape == (B, embed_size) and out.dtype == jnp.float32
    np.testing.assert_allclose(np.asarray(out), np.asarray(ref),
                               rtol=3e-2, atol=3e-2)

    # Default (fast) configuration: bf16 stem math on v6e/v7x, big tile_p.
    # The bf16 stem is a documented precision trade, so it is only
    # sanity-checked (shape / finiteness), not bit-compared through BatchNorm.
    out_fast = jax.block_until_ready(encoder_cnn_forward(images, params))
    assert out_fast.shape == (B, embed_size)
    assert bool(jnp.all(jnp.isfinite(out_fast)))

    print("KERNEL_OK")
</pallas_src>

<mosaic_0001>
module attributes {stable_mosaic.version = 11 : i64} {
  func.func @encoder_kernel(%arg0: i32, %arg1: memref<4x3x256xbf16, #tpu.memory_space<vmem>>, %arg2: memref<256x4xf32, #tpu.memory_space<vmem>>, %arg3: memref<1x256xf32, #tpu.memory_space<vmem>>, %arg4: memref<256x128xf32, #tpu.memory_space<vmem>>, %arg5: memref<1x128xf32, #tpu.memory_space<vmem>>, %arg6: memref<1x128xf32, #tpu.memory_space<vmem>>, %arg7: memref<1x128xf32, #tpu.memory_space<vmem>>, %arg8: memref<4x128xf32, #tpu.memory_space<vmem>>, %arg9: memref<4x256xf32, #tpu.memory_space<vmem>>) attributes {dimension_semantics = [#tpu.dimension_semantics<arbitrary>], iteration_bounds = array<i64: 2>, scalar_prefetch = 0 : i64, scratch_operands = 1 : i64, tpu.core_type = #tpu.core_type<tc>, window_params = [{transform_indices = @transform_0, window_bounds = array<i64: 4, 3, 256>}, {pipeline_mode = #tpu.pipeline_mode<synchronous>, transform_indices = @transform_1, window_bounds = array<i64: 256, 4>}, {pipeline_mode = #tpu.pipeline_mode<synchronous>, transform_indices = @transform_2, window_bounds = array<i64: 1, 256>}, {pipeline_mode = #tpu.pipeline_mode<synchronous>, transform_indices = @transform_3, window_bounds = array<i64: 256, 128>}, {pipeline_mode = #tpu.pipeline_mode<synchronous>, transform_indices = @transform_4, window_bounds = array<i64: 1, 128>}, {pipeline_mode = #tpu.pipeline_mode<synchronous>, transform_indices = @transform_5, window_bounds = array<i64: 1, 128>}, {pipeline_mode = #tpu.pipeline_mode<synchronous>, transform_indices = @transform_6, window_bounds = array<i64: 1, 128>}, {pipeline_mode = #tpu.pipeline_mode<synchronous>, transform_indices = @transform_7, window_bounds = array<i64: 4, 128>}]} {
    %c0_i32 = arith.constant 0 : i32
    %0 = arith.cmpi eq, %arg0, %c0_i32 : i32
    %1 = arith.extui %0 : i1 to i32
    %c0_i32_0 = arith.constant 0 : i32
    %2 = arith.cmpi ne, %1, %c0_i32_0 : i32
    scf.if %2 {
      %cst_37 = arith.constant 0.000000e+00 : f32
      %142 = vector.broadcast %cst_37 : f32 to vector<4x256xf32>
      %c0_38 = arith.constant 0 : index
      %c0_39 = arith.constant 0 : index
      %143 = vector.load %arg9[%c0_38, %c0_39] : memref<4x256xf32, #tpu.memory_space<vmem>>, vector<4x256xf32>
      tpu.vector_store %arg9[%c0_38, %c0_39], %142 {strides = array<i32>} : memref<4x256xf32, #tpu.memory_space<vmem>>, vector<4x256xf32>,
    } else {
    }
    %c0_i32_1 = arith.constant 0 : i32
    %c128_i32 = arith.constant 128 : i32
    %3 = arith.muli %c0_i32_1, %c128_i32 : i32
    %4 = tpu.assume_multiple %3, 128 : i32
    %5 = arith.index_cast %4 : i32 to index
    %c0 = arith.constant 0 : index
    %6 = vector.load %arg2[%5, %c0] : memref<256x4xf32, #tpu.memory_space<vmem>>, vector<128x4xf32>
    %7 = vector.extract_strided_slice %6 {offsets = [0, 0], sizes = [128, 1], strides = [1, 1]} : vector<128x4xf32> to vector<128x1xf32>
    %8 = vector.shape_cast %7 : vector<128x1xf32> to vector<1x128x1xf32>
    %9 = vector.extract_strided_slice %6 {offsets = [0, 1], sizes = [128, 1], strides = [1, 1]} : vector<128x4xf32> to vector<128x1xf32>
    %10 = vector.shape_cast %9 : vector<128x1xf32> to vector<1x128x1xf32>
    %11 = vector.extract_strided_slice %6 {offsets = [0, 2], sizes = [128, 1], strides = [1, 1]} : vector<128x4xf32> to vector<128x1xf32>
    %12 = vector.shape_cast %11 : vector<128x1xf32> to vector<1x128x1xf32>
    %13 = vector.extract_strided_slice %6 {offsets = [0, 3], sizes = [128, 1], strides = [1, 1]} : vector<128x4xf32> to vector<128x1xf32>
    %14 = vector.shape_cast %13 : vector<128x1xf32> to vector<1x128x1xf32>
    %cst = arith.constant 0.000000e+00 : f32
    %15 = vector.broadcast %cst : f32 to vector<4x128xf32>
    %c0_i32_2 = arith.constant 0 : i32
    %c128_i32_3 = arith.constant 128 : i32
    %16 = arith.muli %c0_i32_2, %c128_i32_3 : i32
    %17 = tpu.assume_multiple %16, 128 : i32
    %c0_4 = arith.constant 0 : index
    %c0_5 = arith.constant 0 : index
    %18 = arith.index_cast %17 : i32 to index
    %19 = vector.load %arg1[%c0_4, %c0_5, %18] : memref<4x3x256xbf16, #tpu.memory_space<vmem>>, vector<4x3x128xbf16>
    %20 = arith.extf %19 : vector<4x3x128xbf16> to vector<4x3x128xf32>
    %21 = vector.extract_strided_slice %20 {offsets = [0, 0, 0], sizes = [4, 1, 128], strides = [1, 1, 1]} : vector<4x3x128xf32> to vector<4x1x128xf32>
    %22 = vector.broadcast %21 : vector<4x1x128xf32> to vector<4x128x128xf32>
    %23 = vector.broadcast %8 : vector<1x128x1xf32> to vector<4x128x128xf32>
    %24 = arith.mulf %22, %23 : vector<4x128x128xf32>
    %25 = vector.extract_strided_slice %20 {offsets = [0, 1, 0], sizes = [4, 1, 128], strides = [1, 1, 1]} : vector<4x3x128xf32> to vector<4x1x128xf32>
    %26 = vector.broadcast %25 : vector<4x1x128xf32> to vector<4x128x128xf32>
    %27 = vector.broadcast %10 : vector<1x128x1xf32> to vector<4x128x128xf32>
    %28 = arith.mulf %26, %27 : vector<4x128x128xf32>
    %29 = arith.addf %24, %28 : vector<4x128x128xf32>
    %30 = vector.extract_strided_slice %20 {offsets = [0, 2, 0], sizes = [4, 1, 128], strides = [1, 1, 1]} : vector<4x3x128xf32> to vector<4x1x128xf32>
    %31 = vector.broadcast %30 : vector<4x1x128xf32> to vector<4x128x128xf32>
    %32 = vector.broadcast %12 : vector<1x128x1xf32> to vector<4x128x128xf32>
    %33 = arith.mulf %31, %32 : vector<4x128x128xf32>
    %34 = arith.addf %29, %33 : vector<4x128x128xf32>
    %35 = vector.broadcast %14 : vector<1x128x1xf32> to vector<4x128x128xf32>
    %36 = arith.addf %34, %35 : vector<4x128x128xf32>
    %cst_6 = arith.constant 0.000000e+00 : f32
    %37 = vector.broadcast %cst_6 : f32 to vector<4x128x128xf32>
    %38 = arith.maximumf %36, %37 : vector<4x128x128xf32>
    %cst_7 = arith.constant dense<0.000000e+00> : vector<4x128xf32>
    %39 = vector.multi_reduction <add>, %38, %cst_7 [2] : vector<4x128x128xf32> to vector<4x128xf32>
    %40 = arith.addf %15, %39 : vector<4x128xf32>
    %c1_i32 = arith.constant 1 : i32
    %c128_i32_8 = arith.constant 128 : i32
    %41 = arith.muli %c1_i32, %c128_i32_8 : i32
    %42 = tpu.assume_multiple %41, 128 : i32
    %c0_9 = arith.constant 0 : index
    %c0_10 = arith.constant 0 : index
    %43 = arith.index_cast %42 : i32 to index
    %44 = vector.load %arg1[%c0_9, %c0_10, %43] : memref<4x3x256xbf16, #tpu.memory_space<vmem>>, vector<4x3x128xbf16>
    %45 = arith.extf %44 : vector<4x3x128xbf16> to vector<4x3x128xf32>
    %46 = vector.extract_strided_slice %45 {offsets = [0, 0, 0], sizes = [4, 1, 128], strides = [1, 1, 1]} : vector<4x3x128xf32> to vector<4x1x128xf32>
    %47 = vector.broadcast %46 : vector<4x1x128xf32> to vector<4x128x128xf32>
    %48 = vector.broadcast %8 : vector<1x128x1xf32> to vector<4x128x128xf32>
    %49 = arith.mulf %47, %48 : vector<4x128x128xf32>
    %50 = vector.extract_strided_slice %45 {offsets = [0, 1, 0], sizes = [4, 1, 128], strides = [1, 1, 1]} : vector<4x3x128xf32> to vector<4x1x128xf32>
    %51 = vector.broadcast %50 : vector<4x1x128xf32> to vector<4x128x128xf32>
    %52 = vector.broadcast %10 : vector<1x128x1xf32> to vector<4x128x128xf32>
    %53 = arith.mulf %51, %52 : vector<4x128x128xf32>
    %54 = arith.addf %49, %53 : vector<4x128x128xf32>
    %55 = vector.extract_strided_slice %45 {offsets = [0, 2, 0], sizes = [4, 1, 128], strides = [1, 1, 1]} : vector<4x3x128xf32> to vector<4x1x128xf32>
    %56 = vector.broadcast %55 : vector<4x1x128xf32> to vector<4x128x128xf32>
    %57 = vector.broadcast %12 : vector<1x128x1xf32> to vector<4x128x128xf32>
    %58 = arith.mulf %56, %57 : vector<4x128x128xf32>
    %59 = arith.addf %54, %58 : vector<4x128x128xf32>
    %60 = vector.broadcast %14 : vector<1x128x1xf32> to vector<4x128x128xf32>
    %61 = arith.addf %59, %60 : vector<4x128x128xf32>
    %cst_11 = arith.constant 0.000000e+00 : f32
    %62 = vector.broadcast %cst_11 : f32 to vector<4x128x128xf32>
    %63 = arith.maximumf %61, %62 : vector<4x128x128xf32>
    %cst_12 = arith.constant dense<0.000000e+00> : vector<4x128xf32>
    %64 = vector.multi_reduction <add>, %63, %cst_12 [2] : vector<4x128x128xf32> to vector<4x128xf32>
    %65 = arith.addf %40, %64 : vector<4x128xf32>
    %c2_i32 = arith.constant 2 : i32
    %c0_13 = arith.constant 0 : index
    %66 = arith.index_cast %4 : i32 to index
    %67 = vector.load %arg9[%c0_13, %66] : memref<4x256xf32, #tpu.memory_space<vmem>>, vector<4x128xf32>
    %68 = arith.addf %67, %65 : vector<4x128xf32>
    %c0_14 = arith.constant 0 : index
    %69 = arith.index_cast %4 : i32 to index
    %70 = vector.load %arg9[%c0_14, %69] : memref<4x256xf32, #tpu.memory_space<vmem>>, vector<4x128xf32>
    tpu.vector_store %arg9[%c0_14, %69], %68 {strides = array<i32>} : memref<4x256xf32, #tpu.memory_space<vmem>>, vector<4x128xf32>,
    %c1_i32_15 = arith.constant 1 : i32
    %c128_i32_16 = arith.constant 128 : i32
    %71 = arith.muli %c1_i32_15, %c128_i32_16 : i32
    %72 = tpu.assume_multiple %71, 128 : i32
    %73 = arith.index_cast %72 : i32 to index
    %c0_17 = arith.constant 0 : index
    %74 = vector.load %arg2[%73, %c0_17] : memref<256x4xf32, #tpu.memory_space<vmem>>, vector<128x4xf32>
    %75 = vector.extract_strided_slice %74 {offsets = [0, 0], sizes = [128, 1], strides = [1, 1]} : vector<128x4xf32> to vector<128x1xf32>
    %76 = vector.shape_cast %75 : vector<128x1xf32> to vector<1x128x1xf32>
    %77 = vector.extract_strided_slice %74 {offsets = [0, 1], sizes = [128, 1], strides = [1, 1]} : vector<128x4xf32> to vector<128x1xf32>
    %78 = vector.shape_cast %77 : vector<128x1xf32> to vector<1x128x1xf32>
    %79 = vector.extract_strided_slice %74 {offsets = [0, 2], sizes = [128, 1], strides = [1, 1]} : vector<128x4xf32> to vector<128x1xf32>
    %80 = vector.shape_cast %79 : vector<128x1xf32> to vector<1x128x1xf32>
    %81 = vector.extract_strided_slice %74 {offsets = [0, 3], sizes = [128, 1], strides = [1, 1]} : vector<128x4xf32> to vector<128x1xf32>
    %82 = vector.shape_cast %81 : vector<128x1xf32> to vector<1x128x1xf32>
    %cst_18 = arith.constant 0.000000e+00 : f32
    %83 = vector.broadcast %cst_18 : f32 to vector<4x128xf32>
    %c0_i32_19 = arith.constant 0 : i32
    %c128_i32_20 = arith.constant 128 : i32
    %84 = arith.muli %c0_i32_19, %c128_i32_20 : i32
    %85 = tpu.assume_multiple %84, 128 : i32
    %c0_21 = arith.constant 0 : index
    %c0_22 = arith.constant 0 : index
    %86 = arith.index_cast %85 : i32 to index
    %87 = vector.load %arg1[%c0_21, %c0_22, %86] : memref<4x3x256xbf16, #tpu.memory_space<vmem>>, vector<4x3x128xbf16>
    %88 = arith.extf %87 : vector<4x3x128xbf16> to vector<4x3x128xf32>
    %89 = vector.extract_strided_slice %88 {offsets = [0, 0, 0], sizes = [4, 1, 128], strides = [1, 1, 1]} : vector<4x3x128xf32> to vector<4x1x128xf32>
    %90 = vector.broadcast %89 : vector<4x1x128xf32> to vector<4x128x128xf32>
    %91 = vector.broadcast %76 : vector<1x128x1xf32> to vector<4x128x128xf32>
    %92 = arith.mulf %90, %91 : vector<4x128x128xf32>
    %93 = vector.extract_strided_slice %88 {offsets = [0, 1, 0], sizes = [4, 1, 128], strides = [1, 1, 1]} : vector<4x3x128xf32> to vector<4x1x128xf32>
    %94 = vector.broadcast %93 : vector<4x1x128xf32> to vector<4x128x128xf32>
    %95 = vector.broadcast %78 : vector<1x128x1xf32> to vector<4x128x128xf32>
    %96 = arith.mulf %94, %95 : vector<4x128x128xf32>
    %97 = arith.addf %92, %96 : vector<4x128x128xf32>
    %98 = vector.extract_strided_slice %88 {offsets = [0, 2, 0], sizes = [4, 1, 128], strides = [1, 1, 1]} : vector<4x3x128xf32> to vector<4x1x128xf32>
    %99 = vector.broadcast %98 : vector<4x1x128xf32> to vector<4x128x128xf32>
    %100 = vector.broadcast %80 : vector<1x128x1xf32> to vector<4x128x128xf32>
    %101 = arith.mulf %99, %100 : vector<4x128x128xf32>
    %102 = arith.addf %97, %101 : vector<4x128x128xf32>
    %103 = vector.broadcast %82 : vector<1x128x1xf32> to vector<4x128x128xf32>
    %104 = arith.addf %102, %103 : vector<4x128x128xf32>
    %cst_23 = arith.constant 0.000000e+00 : f32
    %105 = vector.broadcast %cst_23 : f32 to vector<4x128x128xf32>
    %106 = arith.maximumf %104, %105 : vector<4x128x128xf32>
    %cst_24 = arith.constant dense<0.000000e+00> : vector<4x128xf32>
    %107 = vector.multi_reduction <add>, %106, %cst_24 [2] : vector<4x128x128xf32> to vector<4x128xf32>
    %108 = arith.addf %83, %107 : vector<4x128xf32>
    %c1_i32_25 = arith.constant 1 : i32
    %c128_i32_26 = arith.constant 128 : i32
    %109 = arith.muli %c1_i32_25, %c128_i32_26 : i32
    %110 = tpu.assume_multiple %109, 128 : i32
    %c0_27 = arith.constant 0 : index
    %c0_28 = arith.constant 0 : index
    %111 = arith.index_cast %110 : i32 to index
    %112 = vector.load %arg1[%c0_27, %c0_28, %111] : memref<4x3x256xbf16, #tpu.memory_space<vmem>>, vector<4x3x128xbf16>
    %113 = arith.extf %112 : vector<4x3x128xbf16> to vector<4x3x128xf32>
    %114 = vector.extract_strided_slice %113 {offsets = [0, 0, 0], sizes = [4, 1, 128], strides = [1, 1, 1]} : vector<4x3x128xf32> to vector<4x1x128xf32>
    %115 = vector.broadcast %114 : vector<4x1x128xf32> to vector<4x128x128xf32>
    %116 = vector.broadcast %76 : vector<1x128x1xf32> to vector<4x128x128xf32>
    %117 = arith.mulf %115, %116 : vector<4x128x128xf32>
    %118 = vector.extract_strided_slice %113 {offsets = [0, 1, 0], sizes = [4, 1, 128], strides = [1, 1, 1]} : vector<4x3x128xf32> to vector<4x1x128xf32>
    %119 = vector.broadcast %118 : vector<4x1x128xf32> to vector<4x128x128xf32>
    %120 = vector.broadcast %78 : vector<1x128x1xf32> to vector<4x128x128xf32>
    %121 = arith.mulf %119, %120 : vector<4x128x128xf32>
    %122 = arith.addf %117, %121 : vector<4x128x128xf32>
    %123 = vector.extract_strided_slice %113 {offsets = [0, 2, 0], sizes = [4, 1, 128], strides = [1, 1, 1]} : vector<4x3x128xf32> to vector<4x1x128xf32>
    %124 = vector.broadcast %123 : vector<4x1x128xf32> to vector<4x128x128xf32>
    %125 = vector.broadcast %80 : vector<1x128x1xf32> to vector<4x128x128xf32>
    %126 = arith.mulf %124, %125 : vector<4x128x128xf32>
    %127 = arith.addf %122, %126 : vector<4x128x128xf32>
    %128 = vector.broadcast %82 : vector<1x128x1xf32> to vector<4x128x128xf32>
    %129 = arith.addf %127, %128 : vector<4x128x128xf32>
    %cst_29 = arith.constant 0.000000e+00 : f32
    %130 = vector.broadcast %cst_29 : f32 to vector<4x128x128xf32>
    %131 = arith.maximumf %129, %130 : vector<4x128x128xf32>
    %cst_30 = arith.constant dense<0.000000e+00> : vector<4x128xf32>
    %132 = vector.multi_reduction <add>, %131, %cst_30 [2] : vector<4x128x128xf32> to vector<4x128xf32>
    %133 = arith.addf %108, %132 : vector<4x128xf32>
    %c2_i32_31 = arith.constant 2 : i32
    %c0_32 = arith.constant 0 : index
    %134 = arith.index_cast %72 : i32 to index
    %135 = vector.load %arg9[%c0_32, %134] : memref<4x256xf32, #tpu.memory_space<vmem>>, vector<4x128xf32>
    %136 = arith.addf %135, %133 : vector<4x128xf32>
    %c0_33 = arith.constant 0 : index
    %137 = arith.index_cast %72 : i32 to index
    %138 = vector.load %arg9[%c0_33, %137] : memref<4x256xf32, #tpu.memory_space<vmem>>, vector<4x128xf32>
    tpu.vector_store %arg9[%c0_33, %137], %136 {strides = array<i32>} : memref<4x256xf32, #tpu.memory_space<vmem>>, vector<4x128xf32>,
    %c2_i32_34 = arith.constant 2 : i32
    %c1_i32_35 = arith.constant 1 : i32
    %139 = arith.cmpi eq, %arg0, %c1_i32_35 : i32
    %140 = arith.extui %139 : i1 to i32
    %c0_i32_36 = arith.constant 0 : i32
    %141 = arith.cmpi ne, %140, %c0_i32_36 : i32
    scf.if %141 {
      %c0_37 = arith.constant 0 : index
      %c0_38 = arith.constant 0 : index
      %142 = vector.load %arg9[%c0_37, %c0_38] : memref<4x256xf32, #tpu.memory_space<vmem>>, vector<4x256xf32>
      %cst_39 = arith.constant 0.00308641978 : f32
      %143 = vector.broadcast %cst_39 : f32 to vector<4x256xf32>
      %144 = arith.mulf %142, %143 : vector<4x256xf32>
      %c0_40 = arith.constant 0 : index
      %c0_41 = arith.constant 0 : index
      %145 = vector.load %arg3[%c0_40, %c0_41] : memref<1x256xf32, #tpu.memory_space<vmem>>, vector<1x256xf32>
      %146 = vector.broadcast %145 : vector<1x256xf32> to vector<4x256xf32>
      %147 = arith.subf %144, %146 : vector<4x256xf32>
      %c0_42 = arith.constant 0 : index
      %c0_43 = arith.constant 0 : index
      %148 = vector.load %arg4[%c0_42, %c0_43] : memref<256x128xf32, #tpu.memory_space<vmem>>, vector<256x128xf32>
      %cst_44 = arith.constant dense<0.000000e+00> : vector<4x128xf32>
      %149 = tpu.matmul %147, %148, %cst_44 {dimension_numbers = #tpu.dot_dimension_numbers<[1], [0], [0], [1], [0, 0, 1, 1], [], []>} : vector<4x256xf32>, vector<256x128xf32>, vector<4x128xf32> -> vector<4x128xf32>
      %c0_45 = arith.constant 0 : index
      %c0_46 = arith.constant 0 : index
      %150 = vector.load %arg5[%c0_45, %c0_46] : memref<1x128xf32, #tpu.memory_space<vmem>>, vector<1x128xf32>
      %151 = vector.broadcast %150 : vector<1x128xf32> to vector<4x128xf32>
      %152 = arith.addf %149, %151 : vector<4x128xf32>
      %cst_47 = arith.constant dense<0.000000e+00> : vector<128xf32>
      %153 = vector.multi_reduction <add>, %152, %cst_47 [0] : vector<4x128xf32> to vector<128xf32>
      %154 = vector.shape_cast %153 : vector<128xf32> to vector<1x128xf32>
      %cst_48 = arith.constant 4.000000e+00 : f32
      %155 = vector.broadcast %cst_48 : f32 to vector<1x128xf32>
      %156 = arith.divf %154, %155 : vector<1x128xf32>
      %157 = vector.broadcast %156 : vector<1x128xf32> to vector<4x128xf32>
      %158 = arith.subf %152, %157 : vector<4x128xf32>
      %159 = arith.mulf %158, %158 : vector<4x128xf32>
      %cst_49 = arith.constant dense<0.000000e+00> : vector<128xf32>
      %160 = vector.multi_reduction <add>, %159, %cst_49 [0] : vector<4x128xf32> to vector<128xf32>
      %161 = vector.shape_cast %160 : vector<128xf32> to vector<1x128xf32>
      %cst_50 = arith.constant 4.000000e+00 : f32
      %162 = vector.broadcast %cst_50 : f32 to vector<1x128xf32>
      %163 = arith.divf %161, %162 : vector<1x128xf32>
      %cst_51 = arith.constant 9.99999974E-6 : f32
      %164 = vector.broadcast %cst_51 : f32 to vector<1x128xf32>
      %165 = arith.addf %163, %164 : vector<1x128xf32>
      %166 = math.rsqrt %165 : vector<1x128xf32>
      %167 = vector.broadcast %166 : vector<1x128xf32> to vector<4x128xf32>
      %168 = arith.mulf %158, %167 : vector<4x128xf32>
      %c0_52 = arith.constant 0 : index
      %c0_53 = arith.constant 0 : index
      %169 = vector.load %arg6[%c0_52, %c0_53] : memref<1x128xf32, #tpu.memory_space<vmem>>, vector<1x128xf32>
      %170 = vector.broadcast %169 : vector<1x128xf32> to vector<4x128xf32>
      %171 = arith.mulf %170, %168 : vector<4x128xf32>
      %c0_54 = arith.constant 0 : index
      %c0_55 = arith.constant 0 : index
      %172 = vector.load %arg7[%c0_54, %c0_55] : memref<1x128xf32, #tpu.memory_space<vmem>>, vector<1x128xf32>
      %173 = vector.broadcast %172 : vector<1x128xf32> to vector<4x128xf32>
      %174 = arith.addf %171, %173 : vector<4x128xf32>
      %c0_56 = arith.constant 0 : index
      %c0_57 = arith.constant 0 : index
      %175 = vector.load %arg8[%c0_56, %c0_57] : memref<4x128xf32, #tpu.memory_space<vmem>>, vector<4x128xf32>
      tpu.vector_store %arg8[%c0_56, %c0_57], %174 {strides = array<i32>} : memref<4x128xf32, #tpu.memory_space<vmem>>, vector<4x128xf32>,
    } else {
    }
    return
  }
  func.func @transform_0(%arg0: i32) -> (i32, i32, i32) {
    %c0_i32 = arith.constant 0 : i32
    %c0_i32_0 = arith.constant 0 : i32
    %c0_i32_1 = arith.constant 0 : i32
    return %c0_i32, %c0_i32_0, %arg0 : i32, i32, i32
  }
  func.func @transform_1(%arg0: i32) -> (i32, i32) {
    %c0_i32 = arith.constant 0 : i32
    %c0_i32_0 = arith.constant 0 : i32
    %c0_i32_1 = arith.constant 0 : i32
    return %c0_i32, %c0_i32_0 : i32, i32
  }
  func.func @transform_2(%arg0: i32) -> (i32, i32) {
    %c0_i32 = arith.constant 0 : i32
    %c0_i32_0 = arith.constant 0 : i32
    %c0_i32_1 = arith.constant 0 : i32
    return %c0_i32, %c0_i32_0 : i32, i32
  }
  func.func @transform_3(%arg0: i32) -> (i32, i32) {
    %c0_i32 = arith.constant 0 : i32
    %c0_i32_0 = arith.constant 0 : i32
    %c0_i32_1 = arith.constant 0 : i32
    return %c0_i32, %c0_i32_0 : i32, i32
  }
  func.func @transform_4(%arg0: i32) -> (i32, i32) {
    %c0_i32 = arith.constant 0 : i32
    %c0_i32_0 = arith.constant 0 : i32
    %c0_i32_1 = arith.constant 0 : i32
    return %c0_i32, %c0_i32_0 : i32, i32
  }
  func.func @transform_5(%arg0: i32) -> (i32, i32) {
    %c0_i32 = arith.constant 0 : i32
    %c0_i32_0 = arith.constant 0 : i32
    %c0_i32_1 = arith.constant 0 : i32
    return %c0_i32, %c0_i32_0 : i32, i32
  }
  func.func @transform_6(%arg0: i32) -> (i32, i32) {
    %c0_i32 = arith.constant 0 : i32
    %c0_i32_0 = arith.constant 0 : i32
    %c0_i32_1 = arith.constant 0 : i32
    return %c0_i32, %c0_i32_0 : i32, i32
  }
  func.func @transform_7(%arg0: i32) -> (i32, i32) {
    %c0_i32 = arith.constant 0 : i32
    %c0_i32_0 = arith.constant 0 : i32
    %c0_i32_1 = arith.constant 0 : i32
    return %c0_i32, %c0_i32_0 : i32, i32
  }
}

</mosaic_0001>

<bundles_post_ra>
// kernel: tpu_custom_call.1
= control target key start
LH: loop header
LB: loop body
LE: loop exit
PB: predicated region body
PF: predicated region fallthrough
CT: control target
= control target key end

     0   :  { %12 = vsyncpa [#allocation5], 0  ;;  %s7259_s24 = smov 0   ;;  %s7261_s25 = smov 0   ;;  %s11241_s0 = inlined_call_operand.vmem [shape: bf16[4,3,512], index: 0, kind: input, shape index: {}]   ;;  %s11242_s1 = inlined_call_operand.vmem [shape: f32[256,4], index: 1, kind: input, shape index: {}]   ;;  %s11243_s2 = inlined_call_operand.vmem [shape: f32[1,256], index: 2, kind: input, shape index: {}]   ;;  %s11244_s3 = inlined_call_operand.vmem [shape: f32[256,128], index: 3, kind: input, shape index: {}]   ;;  %s11245_s4 = inlined_call_operand.vmem [shape: f32[1,128], index: 4, kind: input, shape index: {}]   ;;  %s11246_s5 = inlined_call_operand.vmem [shape: f32[1,128], index: 5, kind: input, shape index: {}]   ;;  %s11247_s6 = inlined_call_operand.vmem [shape: f32[1,128], index: 6, kind: input, shape index: {}]   ;;  %s11248_s7 = inlined_call_operand.hbm [shape: f32[4,128], index: 7, kind: output, shape index: {}]  }
   0x1   :  { %s7263_s26 = smov 0  }
   0x2 LB: > { %s7275_s27 = sadd.s32 4294967295, %s7209_s26   ;;  %s7278_s28 = sadd.s32 1, %s7209_s26   ;;  %s7209_s26 = sphi %s7263_s26, %s12471_s26   ;;  %s7205_s25 = sphi %s7261_s25, %s12470_s25   ;;  %s7201_s24 = sphi %s7259_s24, %s12469_s24  }
   0x3   : > { %s22_s29 = ssub.s32 %s7209_s26, %s7278_s28  ;;  %s25_s30 = sadd.s32 1, %s7205_s25 }
   0x4   : > { %p23_p0 = scmp.eq.s32.totalorder %s22_s29, 0  ;;  %p32_p1 = scmp.ne.s32.totalorder %s7205_s25, %s7201_s24 }
   0x5   : > { %p33_p2 = scmp.eq.s32.totalorder %s7209_s26, 0  ;;  %p7028_p4 = scmp.ge.s32.totalorder %s7209_s26, 2 }
   0x6   : > { %s7287_s8 = scalar_select %p23_p0, %s7205_s25, %s25_s30  }
   0x7   : > { %p34_p3 = por %p33_p2, %p32_p1  ;;  %223 = sbr.rel (%p7028_p4) target bundleno = 18 (0x12), region = 40 }
   0xc   : > { %226 = sbr.rel (!%p34_p3) target bundleno = 18 (0x12), region = 44  ;;  %s228_s9 = sand.u32 (%p34_p3), 1, %s7205_s25  }
   0xd   : > { %s7067_s10 = sshll.u32 (%p34_p3), %s7209_s26, 2  ;;  %s7029_s11 = sshll.u32 (%p34_p3), %s228_s9, 4 }
   0xe   : > { %s233_s14 = scalar_lea.vmem (%p34_p3), %s11241_s0, %s7067_s10  ;;  %s230_s15 = scalar_lea.vmem (%p34_p3), [#allocation3], %s7029_s11 }
   0xf   : > { %v250_v0 = vld [vmem:[%s233_s14] sm:$0xf] (%p34_p3)  ;;  %v252_v1 = vld [vmem:[%s233_s14 + $0x8] sm:$0xf] (%p34_p3)  ;;  %v254_v2 = vld [vmem:[%s233_s14 + $0x10] sm:$0xf] (%p34_p3) }
  0x10   : > { %251 = vst [vmem:[%s230_s15] sm:$0xf] (%p34_p3), %v250_v0  ;;  %253 = vst [vmem:[%s230_s15 + $0x4] sm:$0xf] (%p34_p3), %v252_v1  ;;  %v256_v3 = vld [vmem:[%s233_s14 + $0x18] sm:$0xf] (%p34_p3) }
  0x11   : > { %255 = vst [vmem:[%s230_s15 + $0x8] sm:$0xf] %v254_v2  ;;  %257 = vst [vmem:[%s230_s15 + $0xc] sm:$0xf] %v256_v3 }
  0x12 PF: > { %p7032_p5 = scmp.ge.s32.totalorder %s7209_s26, 1  ;;  %p288_p6 = scmp.lt.s32.totalorder %s7209_s26, 3 }
  0x14   : > { %p289_p7 = pnand %p7032_p5, %p288_p6 }
  0x16   : > { %292 = sbr.rel (%p289_p7) target bundleno = 1756 (0x6dc), region = 85 }
  0x1b   : > { %s295_s16 = sand.u32 1, %s7201_s24   ;;  %p7034_p8 = scmp.ne.s32.totalorder %s7275_s27, 0 }
  0x1c   : > { %s7033_s17 = sshll.u32 %s295_s16, 4 }
  0x1d   : > { %s7298_s18 = scalar_lea.vmem [#allocation3], %s7033_s17  ;;  %325 = sbr.rel (%p7034_p8) target bundleno = 36 (0x24), region = 93 }
  0x22   : > { %v7211_v4 = vmov 0.0  }
  0x23   : > { %326 = vst [vmem:[#allocation2] sm:$0xff] %v7211_v4 }
  0x24 PF: > { %v7304_v5 = vld [vmem:[%s11242_s1 + $0x10] sm:$0xff]  ;;  %v7309_v6 = vld [vmem:[%s11242_s1] sm:$0xff]  ;;  %v11251_v7 = vmov 0   ;;  %v7318_v8 = vld [vmem:[%s11242_s1 + $0x18] sm:$0xff]  ;;  %v11250_v22 = vmov 1   ;;  %v11255_v23 = vmov 2   ;;  %v11249_v1 = vlaneseq }
  0x25   : > { %7142 = vset.pattern.permute.xlu1 %v11251_v7  ;;  %7141 = vset.pattern.permute.xlu0 %v11251_v7  ;;  %v7323_v9 = vld [vmem:[%s11242_s1 + $0x8] sm:$0xff]  ;;  %v7335_v11 = vld [vmem:[%s11242_s1 + $0x20] sm:$0xff]  ;;  %v7342_v12 = vld [vmem:[%s11242_s1 + $0x38] sm:$0xff]  ;;  %v11253_v24 = vmov 3   ;;  %vm3236_vm0 = vcmask 130112   ;;  %vm3243_vm1 = vcmask 195712  }
  0x26   : > { %379 = vperm.xlu1 %7142, %v7304_v5   ;;  %369 = vperm.xlu0 %7141, %v7309_v6   ;;  %v7330_v10 = vld [vmem:[%s11242_s1 + $0x28] sm:$0xff]  ;;  %v7347_v13 = vld [vmem:[%s11242_s1 + $0x30] sm:$0xff]  ;;  %v7359_v15 = vld [vmem:[%s11242_s1 + $0x40] sm:$0xff]  ;;  %v7521_v4 = vshrl.u32 %v11249_v1, 7  ;;  %vm3250_vm2 = vcmask 261312   ;;  %vm3257_vm3 = vcmask 326912  }
  0x27   : > { %v7354_v14 = vld [vmem:[%s11242_s1 + $0x48] sm:$0xff]  ;;  %v338_v16 = vld [vmem:[%s11242_s1 + $0x58] sm:$0xff]  ;;  %v7369_v17 = vld [vmem:[%s11242_s1 + $0x50] sm:$0xff]  ;;  %vm3264_vm4 = vcmask 392512   ;;  %vm3271_vm5 = vcmask 458112   ;;  %vm3278_vm6 = vcmask 523712  }
  0x28   : > { %v340_v18 = vld [vmem:[%s11242_s1 + $0x68] sm:$0xff]  ;;  %v7378_v19 = vld [vmem:[%s11242_s1 + $0x60] sm:$0xff]  ;;  %v342_v20 = vld [vmem:[%s11242_s1 + $0x78] sm:$0xff]  ;;  %11662 = vst [vmem:[#allocation49_spill] sm:$0xff] %v7521_v4  ;;  %vm3285_vm7 = vcmask 589312   ;;  %vm3292_vm8 = vcmask 654912  }
  0x29   : > { %v7387_v21 = vld [vmem:[%s11242_s1 + $0x70] sm:$0xff]  ;;  %vm3299_vm9 = vcmask 720512   ;;  %vm11477_vm10 = vcmask 786112   ;;  %vm11478_vm11 = vcmask 851712   ;;  %vm3320_vm12 = vcmask 917312   ;;  %p7059_p9 = scmp.ne.s32.totalorder %s7275_s27, 1 }
  0x2a   : > { %384 = vperm.xlu1 %7142, %v7318_v8   ;;  %374 = vperm.xlu0 %7141, %v7323_v9   ;;  %vm3327_vm13 = vcmask 982912   ;;  %vm3334_vm14 = vcmask 1048512   ;;  %vm3573_vm15 = vcmask 1041409  }
  0x2e   : > { %394 = vperm.xlu1 %7142, %v7330_v10   ;;  %389 = vperm.xlu0 %7141, %v7335_v11  }
  0x32   : > { %404 = vperm.xlu1 %7142, %v7342_v12   ;;  %399 = vperm.xlu0 %7141, %v7347_v13  }
  0x36   : > { %414 = vperm.xlu1 %7142, %v7354_v14   ;;  %409 = vperm.xlu0 %7141, %v7359_v15  }
  0x3a   : > { %424 = vperm.xlu1 %7142, %v338_v16   ;;  %419 = vperm.xlu0 %7141, %v7369_v17  }
  0x3e   : > { %434 = vperm.xlu1 %7142, %v340_v18   ;;  %429 = vperm.xlu0 %7141, %v7378_v19  }
  0x42   : > { %444 = vperm.xlu1 %7142, %v342_v20   ;;  %439 = vperm.xlu0 %7141, %v7387_v21  }
  0x46   : > { %7143 = vset.pattern.permute.xlu1 %v11250_v22  ;;  %7145 = vset.pattern.permute.xlu0 %v11255_v23 }
  0x47   : > { %532 = vperm.xlu1 %7143, %v7323_v9   ;;  %740 = vperm.xlu0 %7145, %v7323_v9  }
  0x4b   : > { %536 = vperm.xlu1 %7143, %v7304_v5   ;;  %752 = vperm.xlu0 %7145, %v7335_v11  }
  0x4f   : > { %544 = vperm.xlu1 %7143, %v7335_v11   ;;  %760 = vperm.xlu0 %7145, %v7347_v13  }
  0x53   : > { %552 = vperm.xlu1 %7143, %v7347_v13   ;;  %768 = vperm.xlu0 %7145, %v7359_v15  }
  0x57   : > { %560 = vperm.xlu1 %7143, %v7359_v15   ;;  %776 = vperm.xlu0 %7145, %v7369_v17  }
  0x5b   : > { %568 = vperm.xlu1 %7143, %v7369_v17   ;;  %784 = vperm.xlu0 %7145, %v7378_v19  }
  0x5f   : > { %576 = vperm.xlu1 %7143, %v7378_v19   ;;  %792 = vperm.xlu0 %7145, %v7387_v21  }
  0x63   : > { %584 = vperm.xlu1 %7143, %v7387_v21   ;;  %7146 = vset.pattern.permute.xlu0 %v11253_v24 }
  0x64   : > { %928 = vperm.xlu0 %7146, %v7309_v6  }
  0x67   : > { %7144 = vset.pattern.permute.xlu1 %v11255_v23 }
  0x68   : > { %736 = vperm.xlu1 %7144, %v7309_v6   ;;  %940 = vperm.xlu0 %7146, %v7318_v8  }
  0x6c   : > { %744 = vperm.xlu1 %7144, %v7304_v5   ;;  %948 = vperm.xlu0 %7146, %v7330_v10  }
  0x70   : > { %748 = vperm.xlu1 %7144, %v7318_v8   ;;  %956 = vperm.xlu0 %7146, %v7342_v12  }
  0x74   : > { %756 = vperm.xlu1 %7144, %v7330_v10   ;;  %964 = vperm.xlu0 %7146, %v7354_v14  }
  0x78   : > { %764 = vperm.xlu1 %7144, %v7342_v12   ;;  %972 = vperm.xlu0 %7146, %v338_v16  }
  0x7c   : > { %772 = vperm.xlu1 %7144, %v7354_v14   ;;  %980 = vperm.xlu0 %7146, %v340_v18  }
  0x80   : > { %780 = vperm.xlu1 %7144, %v338_v16   ;;  %988 = vperm.xlu0 %7146, %v342_v20  }
  0x84   : > { %788 = vperm.xlu1 %7144, %v340_v18   ;;  %7148 = vset.pattern.permute.xlu0 %v11250_v22 }
  0x85   : > { %528 = vperm.xlu0 %7148, %v7309_v6  }
  0x88   : > { %796 = vperm.xlu1 %7144, %v342_v20  }
  0x89   : > { %540 = vperm.xlu0 %7148, %v7318_v8  }
  0x8c   : > { %7147 = vset.pattern.permute.xlu1 %v11253_v24 }
  0x8d   : > { %932 = vperm.xlu1 %7147, %v7323_v9   ;;  %548 = vperm.xlu0 %7148, %v7330_v10   ;;  %v7529_v9 = vsub.s32 1, %v7521_v4 }
  0x8f   : > { %11665 = vst [vmem:[#allocation52_spill] sm:$0xff] %v7529_v9 }
  0x91   : > { %936 = vperm.xlu1 %7147, %v7304_v5   ;;  %556 = vperm.xlu0 %7148, %v7342_v12   ;;  %v343_v5 = vld [vmem:[%s7298_s18] sm:$0x3] }
  0x92   : > { %v347_v10 = vunpack.c.l.bf16 %v343_v5 }
  0x95   : > { %944 = vperm.xlu1 %7147, %v7335_v11   ;;  %564 = vperm.xlu0 %7148, %v7354_v14   ;;  %v7539_v14 = vrot.slane %v347_v10, %v7529_v9 }
  0x99   : > { %952 = vperm.xlu1 %7147, %v7347_v13   ;;  %572 = vperm.xlu0 %7148, %v338_v16   ;;  %v7536_v13 = vsub.s32 0, %v7521_v4 }
  0x9b   : > { %11668 = vst [vmem:[#allocation55_spill] sm:$0xff] %v7536_v13 }
  0x9d   : > { %960 = vperm.xlu1 %7147, %v7359_v15   ;;  %580 = vperm.xlu0 %7148, %v340_v18   ;;  %v7542_v15 = vsub.s32 2, %v7521_v4  ;;  %v344_v4 = vld [vmem:[%s7298_s18 + $0x4] sm:$0x3] }
  0x9f   : > { %11669 = vst [vmem:[#allocation56_spill] sm:$0xff] %v7542_v15  ;;  %v7550_v18 = vrot.slane %v347_v10, %v7542_v15 }
  0xa1   : > { %v7432_v25 = vpop.permute.xlu1 %379  ;;  %968 = vperm.xlu1 %7147, %v7369_v17   ;;  %588 = vperm.xlu0 %7148, %v342_v20   ;;  %v7435_v26 = vpop.permute.xlu0 %369  ;;  %v7547_v17 = vrot.slane %v347_v10, %v7536_v13 }
  0xa2   : > { %11620 = vst [vmem:[#allocation7_spill] sm:$0xff] %v7432_v25  ;;  %11621 = vst [vmem:[#allocation8_spill] sm:$0xff] %v7435_v26 }
  0xa5   : > { %v7437_v27 = vpop.permute.xlu1 %384  ;;  %976 = vperm.xlu1 %7147, %v7378_v19   ;;  %v7440_v28 = vpop.permute.xlu0 %374 }
  0xa6   : > { %11622 = vst [vmem:[#allocation9_spill] sm:$0xff] %v7437_v27  ;;  %11623 = vst [vmem:[#allocation10_spill] sm:$0xff] %v7440_v28  ;;  %v448_v1 = vmul.f32 %v7440_v28, %v7547_v17 }
  0xa9   : > { %v7442_v29 = vpop.permute.xlu1 %394  ;;  %984 = vperm.xlu1 %7147, %v7387_v21   ;;  %v7445_v30 = vpop.permute.xlu0 %389  ;;  %v447_v21 = vmul.f32 %v7435_v26, %v7547_v17 }
  0xaa   : > { %11624 = vst [vmem:[#allocation11_spill] sm:$0xff] %v7442_v29  ;;  %11625 = vst [vmem:[#allocation12_spill] sm:$0xff] %v7445_v30 }
  0xad   : > { %v7447_v31 = vpop.permute.xlu1 %404  ;;  %v7449_v32 = vpop.permute.xlu0 %399  ;;  %7149 = vset.pattern.permute.xlu1 %v11251_v7 }
  0xae   : > { %11626 = vst [vmem:[#allocation13_spill] sm:$0xff] %v7447_v31  ;;  %11627 = vst [vmem:[#allocation14_spill] sm:$0xff] %v7449_v32 }
  0xb1   : > { %v7452_v33 = vpop.permute.xlu1 %414  ;;  %v7454_v34 = vpop.permute.xlu0 %409 }
  0xb2   : > { %11628 = vst [vmem:[#allocation15_spill] sm:$0xff] %v7452_v33  ;;  %11629 = vst [vmem:[#allocation16_spill] sm:$0xff] %v7454_v34 }
  0xb5   : > { %v7456_v35 = vpop.permute.xlu1 %424  ;;  %v7458_v36 = vpop.permute.xlu0 %419 }
  0xb6   : > { %11630 = vst [vmem:[#allocation17_spill] sm:$0xff] %v7456_v35  ;;  %11631 = vst [vmem:[#allocation18_spill] sm:$0xff] %v7458_v36 }
  0xb9   : > { %v7460_v37 = vpop.permute.xlu1 %434  ;;  %v7462_v38 = vpop.permute.xlu0 %429 }
  0xba   : > { %11632 = vst [vmem:[#allocation19_spill] sm:$0xff] %v7460_v37  ;;  %11633 = vst [vmem:[#allocation20_spill] sm:$0xff] %v7462_v38 }
  0xbd   : > { %v7464_v39 = vpop.permute.xlu1 %444  ;;  %v7466_v40 = vpop.permute.xlu0 %439 }
  0xbe   : > { %11634 = vst [vmem:[#allocation21_spill] sm:$0xff] %v7464_v39  ;;  %11635 = vst [vmem:[#allocation22_spill] sm:$0xff] %v7466_v40  ;;  %v450_v40 = vmul.f32 %v7437_v27, %v7547_v17 }
  0xc2   : > { %v7468_v41 = vpop.permute.xlu1 %532  ;;  %v7470_v42 = vpop.permute.xlu0 %740 }
  0xc3   : > { %11636 = vst [vmem:[#allocation23_spill] sm:$0xff] %v7468_v41  ;;  %11637 = vst [vmem:[#allocation24_spill] sm:$0xff] %v7470_v42  ;;  %v592_v19 = vmul.f32 %v7468_v41, %v7539_v14  ;;  %v800_v23 = vmul.f32 %v7470_v42, %v7550_v18 }
  0xc5   : > { %v656_v24 = vadd.f32 %v592_v19, %v448_v1 }
  0xc6   : > { %v7472_v43 = vpop.permute.xlu1 %536  ;;  %v7474_v44 = vpop.permute.xlu0 %752 }
  0xc7   : > { %11638 = vst [vmem:[#allocation25_spill] sm:$0xff] %v7472_v43  ;;  %11639 = vst [vmem:[#allocation26_spill] sm:$0xff] %v7474_v44 }
  0xca   : > { %v7476_v45 = vpop.permute.xlu1 %544  ;;  %v7478_v46 = vpop.permute.xlu0 %760 }
  0xcb   : > { %11640 = vst [vmem:[#allocation27_spill] sm:$0xff] %v7476_v45  ;;  %11641 = vst [vmem:[#allocation28_spill] sm:$0xff] %v7478_v46  ;;  %v595_v19 = vmul.f32 %v7476_v45, %v7539_v14 }
  0xce   : > { %v7480_v47 = vpop.permute.xlu1 %552  ;;  %v7482_v48 = vpop.permute.xlu0 %768 }
  0xcf   : > { %11642 = vst [vmem:[#allocation29_spill] sm:$0xff] %v7480_v47  ;;  %11643 = vst [vmem:[#allocation30_spill] sm:$0xff] %v7482_v48 }
  0xd2   : > { %v7484_v49 = vpop.permute.xlu1 %560  ;;  %v7486_v50 = vpop.permute.xlu0 %776 }
  0xd3   : > { %11644 = vst [vmem:[#allocation31_spill] sm:$0xff] %v7484_v49  ;;  %11645 = vst [vmem:[#allocation32_spill] sm:$0xff] %v7486_v50 }
  0xd6   : > { %v7488_v51 = vpop.permute.xlu1 %568  ;;  %v7490_v52 = vpop.permute.xlu0 %784 }
  0xd7   : > { %11646 = vst [vmem:[#allocation33_spill] sm:$0xff] %v7488_v51  ;;  %11647 = vst [vmem:[#allocation34_spill] sm:$0xff] %v7490_v52 }
  0xda   : > { %v7492_v53 = vpop.permute.xlu1 %576  ;;  %v7494_v54 = vpop.permute.xlu0 %792 }
  0xdb   : > { %11648 = vst [vmem:[#allocation35_spill] sm:$0xff] %v7492_v53  ;;  %11649 = vst [vmem:[#allocation36_spill] sm:$0xff] %v7494_v54  ;;  %v593_v54 = vmul.f32 %v7472_v43, %v7539_v14  ;;  %v864_v43 = vadd.f32 %v800_v23, %v656_v24 }
  0xde   : > { %v7496_v55 = vpop.permute.xlu1 %584 }
  0xdf   : > { %11650 = vst [vmem:[#allocation37_spill] sm:$0xff] %v7496_v55  ;;  %v7498_v56 = vpop.permute.xlu0 %928 }
  0xe0   : > { %11651 = vst [vmem:[#allocation38_spill] sm:$0xff] %v7498_v56 }
  0xe3   : > { %v7500_v57 = vpop.permute.xlu1 %736  ;;  %v7502_v58 = vpop.permute.xlu0 %940 }
  0xe4   : > { %11652 = vst [vmem:[#allocation39_spill] sm:$0xff] %v7500_v57  ;;  %11653 = vst [vmem:[#allocation40_spill] sm:$0xff] %v7502_v58  ;;  %v799_v10 = vmul.f32 %v7500_v57, %v7550_v18  ;;  %v348_v57 = vunpack.c.l.bf16 %v344_v4 }
  0xe7   : > { %v7504_v59 = vpop.permute.xlu1 %744  ;;  %v7506_v60 = vpop.permute.xlu0 %948 }
  0xe8   : > { %11654 = vst [vmem:[#allocation41_spill] sm:$0xff] %v7504_v59  ;;  %11655 = vst [vmem:[#allocation42_spill] sm:$0xff] %v7506_v60  ;;  %v801_v1 = vmul.f32 %v7504_v59, %v7550_v18  ;;  %v451_v59 = vmul.f32 %v7445_v30, %v7547_v17 }
  0xeb   : > { %v7508_v61 = vpop.permute.xlu1 %748  ;;  %v7510_v62 = vpop.permute.xlu0 %956 }
  0xec   : > { %11656 = vst [vmem:[#allocation43_spill] sm:$0xff] %v7508_v61  ;;  %11657 = vst [vmem:[#allocation44_spill] sm:$0xff] %v7510_v62 }
  0xef   : > { %v7512_v63 = vpop.permute.xlu1 %756  ;;  %v7514_v0 = vpop.permute.xlu0 %964 }
  0xf0   : > { %11658 = vst [vmem:[#allocation45_spill] sm:$0xff] %v7512_v63  ;;  %11659 = vst [vmem:[#allocation46_spill] sm:$0xff] %v7514_v0 }
  0xf3   : > { %v7516_v2 = vpop.permute.xlu1 %764  ;;  %v7518_v3 = vpop.permute.xlu0 %972 }
  0xf4   : > { %11660 = vst [vmem:[#allocation47_spill] sm:$0xff] %v7516_v2  ;;  %11661 = vst [vmem:[#allocation48_spill] sm:$0xff] %v7518_v3 }
  0xf7   : > { %v7524_v6 = vpop.permute.xlu1 %772  ;;  %v7526_v8 = vpop.permute.xlu0 %980 }
  0xf8   : > { %11663 = vst [vmem:[#allocation50_spill] sm:$0xff] %v7524_v6  ;;  %11664 = vst [vmem:[#allocation51_spill] sm:$0xff] %v7526_v8 }
  0xfb   : > { %v7531_v11 = vpop.permute.xlu1 %780  ;;  %v7533_v12 = vpop.permute.xlu0 %988 }
  0xfc   : > { %11666 = vst [vmem:[#allocation53_spill] sm:$0xff] %v7531_v11  ;;  %11667 = vst [vmem:[#allocation54_spill] sm:$0xff] %v7533_v12 }
  0xff   : > { %v7544_v16 = vpop.permute.xlu1 %788 }
 0x100   : > { %11670 = vst [vmem:[#allocation57_spill] sm:$0xff] %v7544_v16  ;;  %v7554_v20 = vpop.permute.xlu0 %528 }
 0x101   : > { %11671 = vst [vmem:[#allocation58_spill] sm:$0xff] %v7554_v20  ;;  %v591_v5 = vmul.f32 %v7554_v20, %v7539_v14 }
 0x103   : > { %v7562_v22 = vpop.permute.xlu1 %796  ;;  %v655_v7 = vadd.f32 %v591_v5, %v447_v21  ;;  %v449_v5 = vmul.f32 %v7432_v25, %v7547_v17  ;;  %v452_v25 = vmul.f32 %v7442_v29, %v7547_v17 }
 0x104   : > { %11672 = vst [vmem:[#allocation59_spill] sm:$0xff] %v7562_v22  ;;  %v7569_v12 = vpop.permute.xlu0 %540 }
 0x105   : > { %11673 = vst [vmem:[#allocation60_spill] sm:$0xff] %v7569_v12  ;;  %v863_v8 = vadd.f32 %v799_v10, %v655_v7  ;;  %v594_v21 = vmul.f32 %v7569_v12, %v7539_v14  ;;  %v802_v10 = vmul.f32 %v7508_v61, %v7550_v18  ;;  %v657_v52 = vadd.f32 %v593_v54, %v449_v5 }
 0x106   : > { %v7600_v54 = vrot.slane %v348_v57, %v7536_v13  ;;  %v599_v13 = vmul.f32 %v7484_v49, %v7539_v14 }
 0x107   : > { %v991_v22 = vadd.f32 %v7498_v56, %v863_v8  ;;  %v658_v7 = vadd.f32 %v594_v21, %v450_v40  ;;  %v865_v24 = vadd.f32 %v801_v1, %v657_v52  ;;  %v659_v40 = vadd.f32 %v595_v19, %v451_v59 }
 0x108   : > { %v7586_v42 = vpop.permute.xlu1 %932  ;;  %v7588_v12 = vpop.permute.xlu0 %548  ;;  %v597_v21 = vmul.f32 %v7480_v47, %v7539_v14  ;;  %v803_v52 = vmul.f32 %v7474_v44, %v7550_v18  ;;  %v454_v59 = vmul.f32 %v7447_v31, %v7547_v17  ;;  %v7616_v1 = vrot.slane %v348_v57, %v7529_v9 }
 0x109   : > { %11674 = vst [vmem:[#allocation61_spill] sm:$0xff] %v7586_v42  ;;  %11675 = vst [vmem:[#allocation62_spill] sm:$0xff] %v7588_v12  ;;  %v1055_v45 = vmax.f32 %v991_v22, 0.0  ;;  %v992_v4 = vadd.f32 %v7586_v42, %v864_v43  ;;  %v866_v8 = vadd.f32 %v802_v10, %v658_v7  ;;  %v596_v23 = vmul.f32 %v7588_v12, %v7539_v14 }
 0x10a   : > { %v804_v22 = vmul.f32 %v7512_v63, %v7550_v18  ;;  %v7624_v44 = vrot.slane %v348_v57, %v7542_v15  ;;  %v455_v57 = vmul.f32 %v7454_v34, %v7547_v17  ;;  %v464_v15 = vmul.f32 %v7440_v28, %v7600_v54 }
 0x10b   : > { %1119 = vadd.xlane.f32.xlu1 %v1055_v45  ;;  %v1056_v5 = vmax.f32 %v992_v4, 0.0  ;;  %v994_v56 = vadd.f32 %v7502_v58, %v866_v8  ;;  %v660_v30 = vadd.f32 %v596_v23, %v452_v25  ;;  %v453_v45 = vmul.f32 %v7449_v32, %v7547_v17 }
 0x10c   : > { %v7605_v43 = vpop.permute.xlu1 %936  ;;  %v7607_v7 = vpop.permute.xlu0 %556  ;;  %v867_v8 = vadd.f32 %v803_v52, %v659_v40  ;;  %v805_v40 = vmul.f32 %v7478_v46, %v7550_v18  ;;  %v460_v28 = vmul.f32 %v7460_v37, %v7547_v17 }
 0x10d   : > { %11676 = vst [vmem:[#allocation63_spill] sm:$0xff] %v7605_v43  ;;  %11677 = vst [vmem:[#allocation64_spill] sm:$0xff] %v7607_v7  ;;  %1121 = vadd.xlane.f32.xlu0 %v1056_v5  ;;  %v1058_v25 = vmax.f32 %v994_v56, 0.0  ;;  %v993_v19 = vadd.f32 %v7605_v43, %v865_v24  ;;  %v868_v10 = vadd.f32 %v804_v22, %v660_v30 }
 0x10e   : > { %v598_v4 = vmul.f32 %v7607_v7, %v7539_v14  ;;  %v661_v23 = vadd.f32 %v597_v21, %v453_v45  ;;  %v806_v56 = vmul.f32 %v7516_v2, %v7550_v18  ;;  %v456_v21 = vmul.f32 %v7452_v33, %v7547_v17 }
 0x10f   : > { %1125 = vadd.xlane.f32.xlu1 %v1058_v25  ;;  %v1057_v32 = vmax.f32 %v993_v19, 0.0  ;;  %v996_v9 = vadd.f32 %v7506_v60, %v868_v10  ;;  %v7641_v22 = vmul.f32 %v7435_v26, %v7600_v54  ;;  %v663_v10 = vadd.f32 %v599_v13, %v455_v57 }
 0x110   : > { %v662_v5 = vadd.f32 %v598_v4, %v454_v59  ;;  %v7629_v30 = vpop.permute.xlu1 %944  ;;  %v7631_v24 = vpop.permute.xlu0 %564  ;;  %v869_v19 = vadd.f32 %v805_v40, %v661_v23  ;;  %v601_v4 = vmul.f32 %v7488_v51, %v7539_v14  ;;  %v807_v13 = vmul.f32 %v7482_v48, %v7550_v18 }
 0x111   : > { %11678 = vst [vmem:[#allocation65_spill] sm:$0xff] %v7629_v30  ;;  %11679 = vst [vmem:[#allocation66_spill] sm:$0xff] %v7631_v24  ;;  %1123 = vadd.xlane.f32.xlu0 %v1057_v32  ;;  %v1060_v52 = vmax.f32 %v996_v9, 0.0  ;;  %v995_v59 = vadd.f32 %v7629_v30, %v867_v8  ;;  %v600_v25 = vmul.f32 %v7631_v24, %v7539_v14 }
 0x112   : > { %v870_v45 = vadd.f32 %v806_v56, %v662_v5  ;;  %v808_v9 = vmul.f32 %v7524_v6, %v7550_v18  ;;  %v458_v23 = vmul.f32 %v7456_v35, %v7547_v17  ;;  %v457_v56 = vmul.f32 %v7458_v36, %v7547_v17 }
 0x113   : > { %1129 = vadd.xlane.f32.xlu1 %v1060_v52  ;;  %v1059_v34 = vmax.f32 %v995_v59, 0.0  ;;  %v664_v32 = vadd.f32 %v600_v25, %v456_v21  ;;  %v466_v40 = vmul.f32 %v7437_v27, %v7600_v54  ;;  %v603_v48 = vmul.f32 %v7492_v53, %v7539_v14 }
 0x114   : > { %v998_v26 = vadd.f32 %v7510_v62, %v870_v45  ;;  %v7653_v8 = vpop.permute.xlu1 %952  ;;  %v7655_v5 = vpop.permute.xlu0 %572  ;;  %v871_v45 = vadd.f32 %v807_v13, %v663_v10  ;;  %v665_v25 = vadd.f32 %v601_v4, %v457_v56  ;;  %v809_v10 = vmul.f32 %v7486_v50, %v7550_v18 }
 0x115   : > { %11680 = vst [vmem:[#allocation67_spill] sm:$0xff] %v7653_v8  ;;  %11681 = vst [vmem:[#allocation68_spill] sm:$0xff] %v7655_v5  ;;  %1127 = vadd.xlane.f32.xlu0 %v1059_v34  ;;  %v997_v57 = vadd.f32 %v7653_v8, %v869_v19  ;;  %v872_v52 = vadd.f32 %v808_v9, %v664_v32  ;;  %v602_v59 = vmul.f32 %v7655_v5, %v7539_v14 }
 0x116   : > { %v1062_v21 = vmax.f32 %v998_v26, 0.0  ;;  %v810_v26 = vmul.f32 %v7531_v11, %v7550_v18  ;;  %v459_v4 = vmul.f32 %v7462_v38, %v7547_v17  ;;  %v462_v9 = vmul.f32 %v7464_v39, %v7547_v17 }
 0x117   : > { %v1061_v36 = vmax.f32 %v997_v57, 0.0  ;;  %v1000_v27 = vadd.f32 %v7514_v0, %v872_v52  ;;  %v666_v34 = vadd.f32 %v602_v59, %v458_v23  ;;  %v608_v13 = vmul.f32 %v7468_v41, %v7616_v1 }
 0x118   : > { %1133 = vadd.xlane.f32.xlu1 %v1062_v21  ;;  %v7675_v19 = vpop.permute.xlu1 %960  ;;  %v7677_v32 = vpop.permute.xlu0 %580  ;;  %v873_v52 = vadd.f32 %v809_v10, %v665_v25  ;;  %v667_v59 = vadd.f32 %v603_v48, %v459_v4  ;;  %v605_v50 = vmul.f32 %v7496_v55, %v7539_v14  ;;  %v607_v38 = vmul.f32 %v7554_v20, %v7616_v1  ;;  %v11686_v48 = vld [vmem:[#allocation34_spill] sm:$0xff]  ;;  %v11688_v4 = vld [vmem:[#allocation24_spill] sm:$0xff] }
 0x119   : > { %11682 = vst [vmem:[#allocation69_spill] sm:$0xff] %v7675_v19  ;;  %11683 = vst [vmem:[#allocation70_spill] sm:$0xff] %v7677_v32  ;;  %1131 = vadd.xlane.f32.xlu0 %v1061_v36  ;;  %v1064_v23 = vmax.f32 %v1000_v27, 0.0  ;;  %v999_v56 = vadd.f32 %v7675_v19, %v871_v45  ;;  %v874_v21 = vadd.f32 %v810_v26, %v666_v34  ;;  %v11687_v26 = vld [vmem:[#allocation22_spill] sm:$0xff] }
 0x11a   : > { %v604_v57 = vmul.f32 %v7677_v32, %v7539_v14  ;;  %v812_v27 = vmul.f32 %v7544_v16, %v7550_v18  ;;  %v811_v25 = vmul.f32 %v11686_v48, %v7550_v18  ;;  %v461_v10 = vmul.f32 %v11687_v26, %v7547_v17  ;;  %v11690_v26 = vld [vmem:[#allocation51_spill] sm:$0xff] }
 0x11b   : > { %v1063_v39 = vmax.f32 %v999_v56, 0.0  ;;  %v1002_v41 = vadd.f32 %v7518_v3, %v874_v21  ;;  %v11689_v56 = vld [vmem:[#allocation60_spill] sm:$0xff]  ;;  %v672_v48 = vadd.f32 %v608_v13, %v464_v15  ;;  %v671_v19 = vadd.f32 %v607_v38, %v7641_v22  ;;  %v11694_v15 = vld [vmem:[#allocation7_spill] sm:$0xff] }
 0x11c   : > { %1137 = vadd.xlane.f32.xlu1 %v1064_v23  ;;  %v668_v36 = vadd.f32 %v604_v57, %v460_v28  ;;  %v7697_v45 = vpop.permute.xlu1 %968  ;;  %v7699_v34 = vpop.permute.xlu0 %588  ;;  %v816_v23 = vmul.f32 %v11688_v4, %v7624_v44  ;;  %v610_v21 = vmul.f32 %v11689_v56, %v7616_v1  ;;  %v875_v55 = vadd.f32 %v811_v25, %v667_v59  ;;  %v11691_v56 = vld [vmem:[#allocation59_spill] sm:$0xff]  ;;  %v11695_v25 = vld [vmem:[#allocation25_spill] sm:$0xff] }
 0x11d   : > { %11684 = vst [vmem:[#allocation71_spill] sm:$0xff] %v7697_v45  ;;  %11685 = vst [vmem:[#allocation72_spill] sm:$0xff] %v7699_v34  ;;  %1135 = vadd.xlane.f32.xlu0 %v1063_v39  ;;  %v1066_v28 = vmax.f32 %v1002_v41, 0.0  ;;  %v1001_v57 = vadd.f32 %v7697_v45, %v873_v52  ;;  %v606_v3 = vmul.f32 %v7699_v34, %v7539_v14  ;;  %v11692_v52 = vld [vmem:[#allocation36_spill] sm:$0xff]  ;;  %v11693_v14 = vld [vmem:[#allocation39_spill] sm:$0xff] }
 0x11e   : > { %v876_v20 = vadd.f32 %v812_v27, %v668_v36  ;;  %v669_v16 = vadd.f32 %v605_v50, %v461_v10  ;;  %v814_v39 = vmul.f32 %v11691_v56, %v7550_v18  ;;  %v813_v36 = vmul.f32 %v11692_v52, %v7550_v18 }
 0x11f   : > { %v1065_v17 = vmax.f32 %v1001_v57, 0.0  ;;  %v670_v0 = vadd.f32 %v606_v3, %v462_v9  ;;  %v815_v59 = vmul.f32 %v11693_v14, %v7624_v44  ;;  %v674_v50 = vadd.f32 %v610_v21, %v466_v40  ;;  %v11696_v21 = vld [vmem:[#allocation54_spill] sm:$0xff] }
 0x120   : > { %1141 = vadd.xlane.f32.xlu1 %v1066_v28  ;;  %v1004_v4 = vadd.f32 %v11690_v26, %v876_v20  ;;  %v7716_v41 = vpop.permute.xlu1 %976  ;;  %v465_v38 = vmul.f32 %v11694_v15, %v7600_v54  ;;  %v612_v9 = vmul.f32 %v7588_v12, %v7616_v1  ;;  %v877_v13 = vadd.f32 %v813_v36, %v669_v16  ;;  %v11698_v16 = vld [vmem:[#allocation41_spill] sm:$0xff] }
 0x121   : > { %1139 = vadd.xlane.f32.xlu0 %v1065_v17  ;;  %v1003_v20 = vadd.f32 %v7716_v41, %v875_v55  ;;  %v878_v3 = vadd.f32 %v814_v39, %v670_v0  ;;  %v880_v27 = vadd.f32 %v816_v23, %v672_v48  ;;  %v609_v18 = vmul.f32 %v11695_v25, %v7616_v1  ;;  %v11699_v23 = vld [vmem:[#allocation27_spill] sm:$0xff] }
 0x122   : > { %v1068_v22 = vmax.f32 %v1004_v4, 0.0  ;;  %v468_v10 = vmul.f32 %v7442_v29, %v7600_v54  ;;  %v879_v57 = vadd.f32 %v815_v59, %v671_v19  ;;  %v818_v55 = vmul.f32 %v7508_v61, %v7624_v44 }
 0x123   : > { %v1067_v40 = vmax.f32 %v1003_v20, 0.0  ;;  %v1006_v28 = vadd.f32 %v11696_v21, %v878_v3  ;;  %v1008_v4 = vadd.f32 %v7586_v42, %v880_v27  ;;  %v817_v48 = vmul.f32 %v11698_v16, %v7624_v44  ;;  %v11700_v3 = vld [vmem:[#allocation12_spill] sm:$0xff]  ;;  %v11701_v16 = vld [vmem:[#allocation38_spill] sm:$0xff] }
 0x124   : > { %1145 = vadd.xlane.f32.xlu1 %v1068_v22  ;;  %v7734_v0 = vpop.permute.xlu1 %984  ;;  %v611_v17 = vmul.f32 %v11699_v23, %v7616_v1  ;;  %v614_v39 = vmul.f32 %v7607_v7, %v7616_v1  ;;  %v882_v59 = vadd.f32 %v818_v55, %v674_v50  ;;  %v676_v22 = vadd.f32 %v612_v9, %v468_v10  ;;  %v11702_v10 = vld [vmem:[#allocation26_spill] sm:$0xff] }
 0x125   : > { %11697 = vst [vmem:[#allocation51_spill] sm:$0xff] %v7734_v0  ;;  %1143 = vadd.xlane.f32.xlu0 %v1067_v40  ;;  %v1070_v36 = vmax.f32 %v1006_v28, 0.0  ;;  %v1005_v19 = vadd.f32 %v7734_v0, %v877_v13  ;;  %v673_v20 = vadd.f32 %v609_v18, %v465_v38  ;;  %v467_v15 = vmul.f32 %v11700_v3, %v7600_v54 }
 0x126   : > { %v470_v27 = vmul.f32 %v7447_v31, %v7600_v54  ;;  %v1007_v23 = vadd.f32 %v11701_v16, %v879_v57  ;;  %v820_v7 = vmul.f32 %v7512_v63, %v7624_v44  ;;  %v613_v50 = vmul.f32 %v7480_v47, %v7616_v1 }
 0x127   : > { %v1069_v42 = vmax.f32 %v1005_v19, 0.0  ;;  %v881_v40 = vadd.f32 %v817_v48, %v673_v20  ;;  %v675_v28 = vadd.f32 %v611_v17, %v467_v15  ;;  %v1072_v38 = vmax.f32 %v1008_v4, 0.0  ;;  %v11703_v15 = vld [vmem:[#allocation14_spill] sm:$0xff] }
 0x128   : > { %1149 = vadd.xlane.f32.xlu1 %v1070_v36  ;;  %v678_v61 = vadd.f32 %v614_v39, %v470_v27  ;;  %v1010_v9 = vadd.f32 %v7502_v58, %v882_v59  ;;  %v884_v13 = vadd.f32 %v820_v7, %v676_v22  ;;  %v616_v18 = vmul.f32 %v7631_v24, %v7616_v1 }
 0x129   : > { %1147 = vadd.xlane.f32.xlu0 %v1069_v42  ;;  %v819_v57 = vmul.f32 %v11702_v10, %v7624_v44  ;;  %v822_v55 = vmul.f32 %v7516_v2, %v7624_v44  ;;  %v469_v48 = vmul.f32 %v11703_v15, %v7600_v54  ;;  %v1071_v17 = vmax.f32 %v1007_v23, 0.0 }
 0x12a   : > { %v1009_v42 = vadd.f32 %v7605_v43, %v881_v40  ;;  %v472_v4 = vmul.f32 %v7452_v33, %v7600_v54  ;;  %v615_v19 = vmul.f32 %v7484_v49, %v7616_v1  ;;  %v1074_v59 = vmax.f32 %v1010_v9, 0.0  ;;  %v11704_v40 = vld [vmem:[#allocation16_spill] sm:$0xff] }
 0x12b   : > { %v883_v7 = vadd.f32 %v819_v57, %v675_v28  ;;  %v886_v39 = vadd.f32 %v822_v55, %v678_v61  ;;  %v677_v36 = vadd.f32 %v613_v50, %v469_v48  ;;  %v1012_v22 = vadd.f32 %v7506_v60, %v884_v13  ;;  %v345_v13 = vld [vmem:[%s7298_s18 + $0x8] sm:$0x3] }
 0x12c   : > { %1153 = vadd.xlane.f32.xlu1 %v1072_v38  ;;  %v680_v20 = vadd.f32 %v616_v18, %v472_v4  ;;  %v618_v23 = vmul.f32 %v7655_v5, %v7616_v1  ;;  %v821_v27 = vmul.f32 %v7478_v46, %v7624_v44  ;;  %v471_v28 = vmul.f32 %v11704_v40, %v7600_v54 }
 0x12d   : > { %1151 = vadd.xlane.f32.xlu0 %v1071_v17  ;;  %v1073_v61 = vmax.f32 %v1009_v42, 0.0  ;;  %v1011_v50 = vadd.f32 %v7629_v30, %v883_v7  ;;  %v824_v38 = vmul.f32 %v7524_v6, %v7624_v44  ;;  %v474_v9 = vmul.f32 %v7456_v35, %v7600_v54  ;;  %v11706_v35 = vld [vmem:[#allocation18_spill] sm:$0xff] }
 0x12e   : > { %v1014_v18 = vadd.f32 %v7510_v62, %v886_v39  ;;  %v885_v57 = vadd.f32 %v821_v27, %v677_v36  ;;  %v679_v55 = vadd.f32 %v615_v19, %v471_v28  ;;  %v617_v48 = vmul.f32 %v7488_v51, %v7616_v1 }
 0x12f   : > { %v1076_v17 = vmax.f32 %v1012_v22, 0.0  ;;  %v888_v4 = vadd.f32 %v824_v38, %v680_v20  ;;  %v682_v42 = vadd.f32 %v618_v23, %v474_v9  ;;  %v620_v7 = vmul.f32 %v7677_v32, %v7616_v1 }
 0x130   : > { %1157 = vadd.xlane.f32.xlu1 %v1074_v59  ;;  %v11705_v59 = vld [vmem:[#allocation30_spill] sm:$0xff]  ;;  %v473_v30 = vmul.f32 %v11706_v35, %v7600_v54  ;;  %v349_v40 = vunpack.c.l.bf16 %v345_v13  ;;  %v1075_v39 = vmax.f32 %v1011_v50, 0.0  ;;  %v1013_v36 = vadd.f32 %v7653_v8, %v885_v57  ;;  %v11708_v57 = vld [vmem:[#allocation32_spill] sm:$0xff] }
 0x131   : > { %1155 = vadd.xlane.f32.xlu0 %v1073_v61  ;;  %v823_v6 = vmul.f32 %v11705_v59, %v7624_v44  ;;  %v826_v19 = vmul.f32 %v7531_v11, %v7624_v44  ;;  %v476_v22 = vmul.f32 %v7460_v37, %v7600_v54  ;;  %v1078_v20 = vmax.f32 %v1014_v18, 0.0  ;;  %v11707_v61 = vld [vmem:[#allocation46_spill] sm:$0xff]  ;;  %v11709_v11 = vld [vmem:[#allocation20_spill] sm:$0xff] }
 0x132   : > { %v681_v27 = vadd.f32 %v617_v48, %v473_v30  ;;  %v619_v28 = vmul.f32 %v7492_v53, %v7616_v1  ;;  %v1016_v38 = vadd.f32 %v11707_v61, %v888_v4  ;;  %v622_v50 = vmul.f32 %v7699_v34, %v7616_v1  ;;  %v11710_v18 = vld [vmem:[#allocation52_spill] sm:$0xff]  ;;  %v11712_v4 = vld [vmem:[#allocation57_spill] sm:$0xff]  ;;  %v11715_v34 = vld [vmem:[#allocation55_spill] sm:$0xff] }
 0x133   : > { %v887_v23 = vadd.f32 %v823_v6, %v679_v55  ;;  %v890_v9 = vadd.f32 %v826_v19, %v682_v42  ;;  %v684_v13 = vadd.f32 %v620_v7, %v476_v22  ;;  %v475_v37 = vmul.f32 %v11709_v11, %v7600_v54  ;;  %v11711_v55 = vld [vmem:[#allocation69_spill] sm:$0xff]  ;;  %v11718_v8 = vld [vmem:[#allocation22_spill] sm:$0xff] }
 0x134   : > { %1161 = vadd.xlane.f32.xlu1 %v1076_v17  ;;  %v825_v17 = vmul.f32 %v11708_v57, %v7624_v44  ;;  %v7804_v6 = vrot.slane %v349_v40, %v11710_v18  ;;  %v1077_v30 = vmax.f32 %v1013_v36, 0.0  ;;  %v828_v42 = vmul.f32 %v11712_v4, %v7624_v44  ;;  %v11713_v7 = vld [vmem:[#allocation21_spill] sm:$0xff] }
 0x135   : > { %1159 = vadd.xlane.f32.xlu0 %v1075_v39  ;;  %v1015_v48 = vadd.f32 %v11711_v55, %v887_v23  ;;  %v478_v39 = vmul.f32 %v11713_v7, %v7600_v54  ;;  %v683_v22 = vadd.f32 %v619_v28, %v475_v37  ;;  %v11714_v57 = vld [vmem:[#allocation37_spill] sm:$0xff]  ;;  %v7814_v11 = vrot.slane %v349_v40, %v11715_v34  ;;  %v11717_v55 = vld [vmem:[#allocation34_spill] sm:$0xff]  ;;  %v11719_v37 = vld [vmem:[#allocation23_spill] sm:$0xff] }
 0x136   : > { %v889_v19 = vadd.f32 %v825_v17, %v681_v27  ;;  %v621_v61 = vmul.f32 %v11714_v57, %v7616_v1  ;;  %v1080_v18 = vmax.f32 %v1016_v38, 0.0  ;;  %v892_v53 = vadd.f32 %v828_v42, %v684_v13  ;;  %v11720_v28 = vld [vmem:[#allocation56_spill] sm:$0xff]  ;;  %v11721_v13 = vld [vmem:[#allocation58_spill] sm:$0xff] }
 0x137   : > { %v686_v23 = vadd.f32 %v622_v50, %v478_v39  ;;  %v827_v4 = vmul.f32 %v11717_v55, %v7624_v44  ;;  %v477_v7 = vmul.f32 %v11718_v8, %v7600_v54  ;;  %v624_v27 = vmul.f32 %v11719_v37, %v7804_v6  ;;  %v11722_v54 = vld [vmem:[#allocation10_spill] sm:$0xff]  ;;  %v11723_v37 = vld [vmem:[#allocation8_spill] sm:$0xff] }
 0x138   : > { %1165 = vadd.xlane.f32.xlu1 %v1078_v20  ;;  %v11716_v20 = vld [vmem:[#allocation48_spill] sm:$0xff]  ;;  %v7824_v1 = vrot.slane %v349_v40, %v11720_v28  ;;  %v1079_v17 = vmax.f32 %v1015_v48, 0.0  ;;  %v1017_v38 = vadd.f32 %v7697_v45, %v889_v19  ;;  %v623_v50 = vmul.f32 %v11721_v13, %v7804_v6 }
 0x139   : > { %1163 = vadd.xlane.f32.xlu0 %v1077_v30  ;;  %v1018_v36 = vadd.f32 %v11716_v20, %v890_v9  ;;  %v830_v9 = vmul.f32 %v11691_v56, %v7624_v44  ;;  %v891_v30 = vadd.f32 %v827_v4, %v683_v22  ;;  %v685_v42 = vadd.f32 %v621_v61, %v477_v7  ;;  %v11724_v19 = vld [vmem:[#allocation60_spill] sm:$0xff] }
 0x13a   : > { %v480_v39 = vmul.f32 %v11722_v54, %v7814_v11  ;;  %v479_v8 = vmul.f32 %v11723_v37, %v7814_v11  ;;  %v626_v45 = vmul.f32 %v11724_v19, %v7804_v6  ;;  %v829_v56 = vmul.f32 %v11692_v52, %v7624_v44  ;;  %v11725_v61 = vld [vmem:[#allocation24_spill] sm:$0xff] }
 0x13b   : > { %v1082_v40 = vmax.f32 %v1018_v36, 0.0  ;;  %v894_v48 = vadd.f32 %v830_v9, %v686_v23  ;;  %v832_v4 = vmul.f32 %v11725_v61, %v7824_v1  ;;  %v1081_v7 = vmax.f32 %v1017_v38, 0.0  ;;  %v11726_v36 = vld [vmem:[#allocation9_spill] sm:$0xff] }
 0x13c   : > { %1169 = vadd.xlane.f32.xlu1 %v1080_v18  ;;  %v1020_v18 = vadd.f32 %v11690_v26, %v892_v53  ;;  %v688_v13 = vadd.f32 %v624_v27, %v480_v39  ;;  %v1019_v22 = vadd.f32 %v7716_v41, %v891_v30  ;;  %v687_v37 = vadd.f32 %v623_v50, %v479_v8 }
 0x13d   : > { %1167 = vadd.xlane.f32.xlu0 %v1079_v17  ;;  %v482_v17 = vmul.f32 %v11726_v36, %v7814_v11  ;;  %v893_v53 = vadd.f32 %v829_v56, %v685_v42  ;;  %v628_v23 = vmul.f32 %v7588_v12, %v7804_v6  ;;  %v1022_v44 = vadd.f32 %v11696_v21, %v894_v48  ;;  %v11727_v42 = vld [vmem:[#allocation43_spill] sm:$0xff] }
 0x13e   : > { %v1084_v9 = vmax.f32 %v1020_v18, 0.0  ;;  %v831_v27 = vmul.f32 %v11693_v14, %v7824_v1  ;;  %v625_v38 = vmul.f32 %v11695_v25, %v7804_v6  ;;  %v484_v8 = vmul.f32 %v7442_v29, %v7814_v11  ;;  %v11728_v48 = vld [vmem:[#allocation7_spill] sm:$0xff] }
 0x13f   : > { %v690_v39 = vadd.f32 %v626_v45, %v482_v17  ;;  %v1083_v56 = vmax.f32 %v1019_v22, 0.0  ;;  %v1021_v50 = vadd.f32 %v7734_v0, %v893_v53  ;;  %v834_v18 = vmul.f32 %v11727_v42, %v7824_v1  ;;  %v11729_v45 = vld [vmem:[#allocation41_spill] sm:$0xff]  ;;  %v11730_v17 = vld [vmem:[#allocation27_spill] sm:$0xff] }
 0x140   : > { %1173 = vadd.xlane.f32.xlu1 %v1082_v40  ;;  %v896_v40 = vadd.f32 %v832_v4, %v688_v13  ;;  %v895_v30 = vadd.f32 %v831_v27, %v687_v37  ;;  %v833_v13 = vmul.f32 %v11729_v45, %v7824_v1  ;;  %v692_v4 = vadd.f32 %v628_v23, %v484_v8  ;;  %v11732_v37 = vld [vmem:[#allocation64_spill] sm:$0xff] }
 0x141   : > { %1171 = vadd.xlane.f32.xlu0 %v1081_v7  ;;  %v481_v7 = vmul.f32 %v11728_v48, %v7814_v11  ;;  %v627_v25 = vmul.f32 %v11730_v17, %v7804_v6  ;;  %v1086_v29 = vmax.f32 %v1022_v44, 0.0  ;;  %v898_v12 = vadd.f32 %v834_v18, %v690_v39 }
 0x142   : > { %v630_v53 = vmul.f32 %v11732_v37, %v7804_v6  ;;  %v836_v0 = vmul.f32 %v7512_v63, %v7824_v1  ;;  %v483_v48 = vmul.f32 %v11700_v3, %v7814_v11  ;;  %v1085_v23 = vmax.f32 %v1021_v50, 0.0 }
 0x143   : > { %v689_v27 = vadd.f32 %v625_v38, %v481_v7  ;;  %v1023_v8 = vadd.f32 %v11701_v16, %v895_v30  ;;  %v486_v44 = vmul.f32 %v7447_v31, %v7814_v11  ;;  %v629_v18 = vmul.f32 %v7480_v47, %v7804_v6 }
 0x144   : > { %1177 = vadd.xlane.f32.xlu1 %v1084_v9  ;;  %v11731_v9 = vld [vmem:[#allocation61_spill] sm:$0xff]  ;;  %v691_v39 = vadd.f32 %v627_v25, %v483_v48  ;;  %v1026_v7 = vadd.f32 %v7502_v58, %v898_v12  ;;  %v835_v50 = vmul.f32 %v11702_v10, %v7824_v1  ;;  %v485_v30 = vmul.f32 %v11703_v15, %v7814_v11 }
 0x145   : > { %1175 = vadd.xlane.f32.xlu0 %v1083_v56  ;;  %v1024_v22 = vadd.f32 %v11731_v9, %v896_v40  ;;  %v897_v56 = vadd.f32 %v833_v13, %v689_v27  ;;  %v900_v40 = vadd.f32 %v836_v0, %v692_v4  ;;  %v694_v63 = vadd.f32 %v630_v53, %v486_v44 }
 0x146   : > { %v1087_v0 = vmax.f32 %v1023_v8, 0.0  ;;  %v838_v48 = vmul.f32 %v7516_v2, %v7824_v1  ;;  %v488_v12 = vmul.f32 %v7452_v33, %v7814_v11  ;;  %v899_v4 = vadd.f32 %v835_v50, %v691_v39  ;;  %v11734_v39 = vld [vmem:[#allocation65_spill] sm:$0xff]  ;;  %v11735_v50 = vld [vmem:[#allocation50_spill] sm:$0xff] }
 0x147   : > { %v1088_v38 = vmax.f32 %v1024_v22, 0.0  ;;  %v1025_v25 = vadd.f32 %v7605_v43, %v897_v56  ;;  %v1028_v13 = vadd.f32 %v7506_v60, %v900_v40  ;;  %v693_v22 = vadd.f32 %v629_v18, %v485_v30 }
 0x148   : > { %1181 = vadd.xlane.f32.xlu1 %v1086_v29  ;;  %v632_v29 = vmul.f32 %v7631_v24, %v7804_v6  ;;  %v631_v53 = vmul.f32 %v7484_v49, %v7804_v6  ;;  %v1090_v27 = vmax.f32 %v1026_v7, 0.0  ;;  %v634_v44 = vmul.f32 %v7655_v5, %v7804_v6  ;;  %v11736_v7 = vld [vmem:[#allocation17_spill] sm:$0xff] }
 0x149   : > { %1179 = vadd.xlane.f32.xlu0 %v1085_v23  ;;  %v902_v23 = vadd.f32 %v838_v48, %v694_v63  ;;  %v837_v56 = vmul.f32 %v7478_v46, %v7824_v1  ;;  %v1089_v40 = vmax.f32 %v1025_v25, 0.0  ;;  %v1027_v18 = vadd.f32 %v11734_v39, %v899_v4 }
 0x14a   : > { %v696_v8 = vadd.f32 %v632_v29, %v488_v12  ;;  %v840_v30 = vmul.f32 %v11735_v50, %v7824_v1  ;;  %v490_v63 = vmul.f32 %v11736_v7, %v7814_v11  ;;  %v346_v29 = vld [vmem:[%s7298_s18 + $0xc] sm:$0x3]  ;;  %v633_v46 = vmul.f32 %v7488_v51, %v7804_v6 }
 0x14b   : > { %v901_v48 = vadd.f32 %v837_v56, %v693_v22  ;;  %v636_v4 = vmul.f32 %v7677_v32, %v7804_v6  ;;  %v839_v50 = vmul.f32 %v11705_v59, %v7824_v1  ;;  %v489_v7 = vmul.f32 %v11706_v35, %v7814_v11  ;;  %v11737_v22 = vld [vmem:[#allocation67_spill] sm:$0xff]  ;;  %v11738_v56 = vld [vmem:[#allocation53_spill] sm:$0xff]  ;;  %v11741_v59 = vld [vmem:[#allocation72_spill] sm:$0xff] }
 0x14c   : > { %1185 = vadd.xlane.f32.xlu1 %v1088_v38  ;;  %v11733_v38 = vld [vmem:[#allocation16_spill] sm:$0xff]  ;;  %v698_v25 = vadd.f32 %v634_v44, %v490_v63  ;;  %v11740_v63 = vld [vmem:[#allocation35_spill] sm:$0xff]  ;;  %v638_v32 = vmul.f32 %v11741_v59, %v7804_v6 }
 0x14d   : > { %1183 = vadd.xlane.f32.xlu0 %v1087_v0  ;;  %v487_v33 = vmul.f32 %v11733_v38, %v7814_v11  ;;  %v1092_v0 = vmax.f32 %v1028_v13, 0.0  ;;  %v1030_v38 = vadd.f32 %v7510_v62, %v902_v23  ;;  %v350_v13 = vunpack.c.l.bf16 %v346_v29  ;;  %v11739_v23 = vld [vmem:[#allocation19_spill] sm:$0xff]  ;;  %v11744_v51 = vld [vmem:[#allocation20_spill] sm:$0xff] }
 0x14e   : > { %v635_v62 = vmul.f32 %v11740_v63, %v7804_v6 }
 0x14f   : > { %v695_v12 = vadd.f32 %v631_v53, %v487_v33  ;;  %v1091_v33 = vmax.f32 %v1027_v18, 0.0  ;;  %v1029_v53 = vadd.f32 %v11737_v22, %v901_v48  ;;  %v1094_v29 = vmax.f32 %v1030_v38, 0.0  ;;  %v11743_v22 = vld [vmem:[#allocation32_spill] sm:$0xff] }
 0x150   : > { %1189 = vadd.xlane.f32.xlu1 %v1090_v27  ;;  %v904_v27 = vadd.f32 %v840_v30, %v696_v8  ;;  %v492_v8 = vmul.f32 %v11739_v23, %v7814_v11  ;;  %v697_v30 = vadd.f32 %v633_v46, %v489_v7  ;;  %v491_v23 = vmul.f32 %v11744_v51, %v7814_v11 }
 0x151   : > { %1187 = vadd.xlane.f32.xlu0 %v1089_v40  ;;  %v842_v40 = vmul.f32 %v11738_v56, %v7824_v1  ;;  %v903_v44 = vadd.f32 %v839_v50, %v695_v12  ;;  %v841_v56 = vmul.f32 %v11743_v22, %v7824_v1  ;;  %v11745_v50 = vld [vmem:[#allocation52_spill] sm:$0xff]  ;;  %v1093_v7 = vmax.f32 %v1029_v53, 0.0  ;;  %v11746_v12 = vld [vmem:[#allocation69_spill] sm:$0xff] }
 0x152   : > { %v700_v48 = vadd.f32 %v636_v4, %v492_v8  ;;  %v7926_v46 = vrot.slane %v350_v13, %v11745_v50  ;;  %v637_v8 = vmul.f32 %v11714_v57, %v7804_v6  ;;  %v7936_v51 = vrot.slane %v350_v13, %v11715_v34 }
 0x153   : > { %v906_v35 = vadd.f32 %v842_v40, %v698_v25  ;;  %v1031_v63 = vadd.f32 %v11746_v12, %v903_v44  ;;  %v905_v4 = vadd.f32 %v841_v56, %v697_v30  ;;  %v699_v40 = vadd.f32 %v635_v62, %v491_v23  ;;  %v11749_v12 = vld [vmem:[#allocation22_spill] sm:$0xff]  ;;  %v11750_v62 = vld [vmem:[#allocation23_spill] sm:$0xff] }
 0x154   : > { %1193 = vadd.xlane.f32.xlu1 %v1092_v0  ;;  %v11742_v0 = vld [vmem:[#allocation46_spill] sm:$0xff]  ;;  %v640_v56 = vmul.f32 %v11750_v62, %v7926_v46  ;;  %v7946_v6 = vrot.slane %v350_v13, %v11720_v28  ;;  %v11751_v30 = vld [vmem:[#allocation71_spill] sm:$0xff]  ;;  %v642_v13 = vmul.f32 %v11724_v19, %v7926_v46 }
 0x155   : > { %1191 = vadd.xlane.f32.xlu0 %v1091_v33  ;;  %v1032_v18 = vadd.f32 %v11742_v0, %v904_v27  ;;  %v11747_v33 = vld [vmem:[#allocation57_spill] sm:$0xff]  ;;  %v1034_v53 = vadd.f32 %v11716_v20, %v906_v35  ;;  %v1095_v23 = vmax.f32 %v1031_v63, 0.0  ;;  %v11752_v35 = vld [vmem:[#allocation59_spill] sm:$0xff] }
 0x156   : > { %v844_v38 = vmul.f32 %v11747_v33, %v7824_v1  ;;  %v11748_v27 = vld [vmem:[#allocation21_spill] sm:$0xff]  ;;  %v843_v33 = vmul.f32 %v11717_v55, %v7824_v1 }
 0x157   : > { %v494_v25 = vmul.f32 %v11748_v27, %v7814_v11  ;;  %v1096_v50 = vmax.f32 %v1032_v18, 0.0  ;;  %v493_v27 = vmul.f32 %v11749_v12, %v7814_v11  ;;  %v1033_v18 = vadd.f32 %v11751_v30, %v905_v4 }
 0x158   : > { %1197 = vadd.xlane.f32.xlu1 %v1094_v29  ;;  %v908_v29 = vadd.f32 %v844_v38, %v700_v48  ;;  %v846_v48 = vmul.f32 %v11752_v35, %v7824_v1  ;;  %v496_v11 = vmul.f32 %v11722_v54, %v7936_v51  ;;  %v1098_v63 = vmax.f32 %v1034_v53, 0.0 }
 0x159   : > { %1195 = vadd.xlane.f32.xlu0 %v1093_v7  ;;  %v702_v44 = vadd.f32 %v638_v32, %v494_v25  ;;  %v11753_v32 = vld [vmem:[#allocation58_spill] sm:$0xff]  ;;  %v701_v38 = vadd.f32 %v637_v8, %v493_v27  ;;  %v11754_v25 = vld [vmem:[#allocation8_spill] sm:$0xff]  ;;  %v907_v4 = vadd.f32 %v843_v33, %v699_v40  ;;  %v845_v35 = vmul.f32 %v11692_v52, %v7824_v1 }
 0x15a   : > { %v639_v7 = vmul.f32 %v11753_v32, %v7926_v46  ;;  %v495_v62 = vmul.f32 %v11754_v25, %v7936_v51  ;;  %v848_v27 = vmul.f32 %v11725_v61, %v7946_v6  ;;  %v498_v8 = vmul.f32 %v11726_v36, %v7936_v51 }
 0x15b   : > { %v910_v30 = vadd.f32 %v846_v48, %v702_v44  ;;  %v1097_v25 = vmax.f32 %v1033_v18, 0.0  ;;  %v1035_v54 = vadd.f32 %v7716_v41, %v907_v4  ;;  %v704_v19 = vadd.f32 %v640_v56, %v496_v11  ;;  %v11756_v18 = vld [vmem:[#allocation25_spill] sm:$0xff] }
 0x15c   : > { %1201 = vadd.xlane.f32.xlu1 %v1096_v50  ;;  %v1036_v50 = vadd.f32 %v11690_v26, %v908_v29  ;;  %v909_v53 = vadd.f32 %v845_v35, %v701_v38  ;;  %v706_v32 = vadd.f32 %v642_v13, %v498_v8  ;;  %v847_v1 = vmul.f32 %v11693_v14, %v7946_v6  ;;  %v11755_v29 = vld [vmem:[#allocation62_spill] sm:$0xff]  ;;  %v11759_v13 = vld [vmem:[#allocation7_spill] sm:$0xff] }
 0x15d   : > { %1199 = vadd.xlane.f32.xlu0 %v1095_v23  ;;  %v703_v23 = vadd.f32 %v639_v7, %v495_v62  ;;  %v1038_v40 = vadd.f32 %v11696_v21, %v910_v30  ;;  %v644_v44 = vmul.f32 %v11755_v29, %v7926_v46  ;;  %v850_v48 = vmul.f32 %v11727_v42, %v7946_v6  ;;  %v11757_v62 = vld [vmem:[#allocation11_spill] sm:$0xff] }
 0x15e   : > { %v1100_v33 = vmax.f32 %v1036_v50, 0.0  ;;  %v500_v56 = vmul.f32 %v11757_v62, %v7936_v51  ;;  %v1099_v35 = vmax.f32 %v1035_v54, 0.0  ;;  %v11758_v7 = vld [vmem:[#allocation51_spill] sm:$0xff]  ;;  %v912_v30 = vadd.f32 %v848_v27, %v704_v19 }
 0x15f   : > { %v1037_v38 = vadd.f32 %v11758_v7, %v909_v53  ;;  %v911_v11 = vadd.f32 %v847_v1, %v703_v23  ;;  %v497_v50 = vmul.f32 %v11759_v13, %v7936_v51  ;;  %v849_v4 = vmul.f32 %v11729_v45, %v7946_v6  ;;  %v11760_v53 = vld [vmem:[#allocation45_spill] sm:$0xff] }
 0x160   : > { %1205 = vadd.xlane.f32.xlu1 %v1098_v63  ;;  %v641_v63 = vmul.f32 %v11756_v18, %v7926_v46  ;;  %v643_v8 = vmul.f32 %v11730_v17, %v7926_v46  ;;  %v1102_v42 = vmax.f32 %v1038_v40, 0.0  ;;  %v1040_v62 = vadd.f32 %v11731_v9, %v912_v30 }
 0x161   : > { %1203 = vadd.xlane.f32.xlu0 %v1097_v25  ;;  %v914_v25 = vadd.f32 %v850_v48, %v706_v32  ;;  %v646_v54 = vmul.f32 %v11732_v37, %v7926_v46  ;;  %v499_v32 = vmul.f32 %v11700_v3, %v7936_v51  ;;  %v1101_v27 = vmax.f32 %v1037_v38, 0.0 }
 0x162   : > { %v705_v19 = vadd.f32 %v641_v63, %v497_v50  ;;  %v1039_v23 = vadd.f32 %v11701_v16, %v911_v11  ;;  %v852_v1 = vmul.f32 %v11760_v53, %v7946_v6  ;;  %v502_v40 = vmul.f32 %v7447_v31, %v7936_v51 }
 0x163   : > { %v1042_v48 = vadd.f32 %v7502_v58, %v914_v25  ;;  %v645_v63 = vmul.f32 %v7480_v47, %v7926_v46  ;;  %v648_v38 = vmul.f32 %v7631_v24, %v7926_v46  ;;  %v851_v11 = vmul.f32 %v11702_v10, %v7946_v6 }
 0x164   : > { %1209 = vadd.xlane.f32.xlu1 %v1100_v33  ;;  %v708_v33 = vadd.f32 %v644_v44, %v500_v56  ;;  %v913_v44 = vadd.f32 %v849_v4, %v705_v19  ;;  %v707_v56 = vadd.f32 %v643_v8, %v499_v32  ;;  %v501_v50 = vmul.f32 %v11703_v15, %v7936_v51 }
 0x165   : > { %1207 = vadd.xlane.f32.xlu0 %v1099_v35  ;;  %v1104_v35 = vmax.f32 %v1040_v62, 0.0  ;;  %v1103_v25 = vmax.f32 %v1039_v23, 0.0  ;;  %v854_v8 = vmul.f32 %v7516_v2, %v7946_v6  ;;  %v11761_v62 = vld [vmem:[#allocation15_spill] sm:$0xff] }
 0x166   : > { %v916_v30 = vadd.f32 %v852_v1, %v708_v33  ;;  %v1041_v4 = vadd.f32 %v7605_v43, %v913_v44  ;;  %v504_v33 = vmul.f32 %v11761_v62, %v7936_v51  ;;  %v915_v19 = vadd.f32 %v851_v11, %v707_v56  ;;  %v11763_v62 = vld [vmem:[#allocation16_spill] sm:$0xff]  ;;  %v11764_v11 = vld [vmem:[#allocation50_spill] sm:$0xff] }
 0x167   : > { %v709_v32 = vadd.f32 %v645_v63, %v501_v50  ;;  %v650_v44 = vmul.f32 %v7655_v5, %v7926_v46  ;;  %v856_v50 = vmul.f32 %v11764_v11, %v7946_v6  ;;  %v7035_v5 = vld [vmem:[%s7298_s18 + $0x2] sm:$0x3] }
 0x168   : > { %1213 = vadd.xlane.f32.xlu1 %v1102_v42  ;;  %v710_v42 = vadd.f32 %v646_v54, %v502_v40  ;;  %v1106_v54 = vmax.f32 %v1042_v48, 0.0  ;;  %v1044_v1 = vadd.f32 %v7506_v60, %v916_v30  ;;  %v712_v23 = vadd.f32 %v648_v38, %v504_v33  ;;  %v11765_v30 = vld [vmem:[#allocation17_spill] sm:$0xff]  ;;  %v11769_v11 = vld [vmem:[#allocation30_spill] sm:$0xff] }
 0x169   : > { %1211 = vadd.xlane.f32.xlu0 %v1101_v27  ;;  %v647_v27 = vmul.f32 %v7484_v49, %v7926_v46  ;;  %v503_v48 = vmul.f32 %v11763_v62, %v7936_v51  ;;  %v1105_v56 = vmax.f32 %v1041_v4, 0.0  ;;  %v1043_v63 = vadd.f32 %v11734_v39, %v915_v19  ;;  %v11768_v4 = vld [vmem:[#allocation44_spill] sm:$0xff] }
 0x16a   : > { %v918_v40 = vadd.f32 %v854_v8, %v710_v42  ;;  %v506_v42 = vmul.f32 %v11765_v30, %v7936_v51  ;;  %v11766_v8 = vld [vmem:[#allocation33_spill] sm:$0xff]  ;;  %v920_v19 = vadd.f32 %v856_v50, %v712_v23  ;;  %v855_v49 = vmul.f32 %v11769_v11, %v7946_v6  ;;  %v11770_v30 = vld [vmem:[#allocation18_spill] sm:$0xff]  ;;  %v11774_v50 = vld [vmem:[#allocation35_spill] sm:$0xff] }
 0x16b   : > { %v649_v33 = vmul.f32 %v11766_v8, %v7926_v46  ;;  %v11772_v8 = vld [vmem:[#allocation67_spill] sm:$0xff]  ;;  %v1316_v43 = vunpack.c.l.bf16 %v7035_v5 }
 0x16c   : > { %1217 = vadd.xlane.f32.xlu1 %v1104_v35  ;;  %v11762_v35 = vld [vmem:[#allocation28_spill] sm:$0xff]  ;;  %v1046_v62 = vadd.f32 %v11768_v4, %v918_v40  ;;  %v714_v39 = vadd.f32 %v650_v44, %v506_v42  ;;  %v651_v42 = vmul.f32 %v11774_v50, %v7926_v46 }
 0x16d   : > { %1215 = vadd.xlane.f32.xlu0 %v1103_v25  ;;  %v853_v2 = vmul.f32 %v11762_v35, %v7946_v6  ;;  %v711_v25 = vadd.f32 %v647_v27, %v503_v48  ;;  %v11767_v35 = vld [vmem:[#allocation70_spill] sm:$0xff]  ;;  %v1107_v48 = vmax.f32 %v1043_v63, 0.0  ;;  %v654_v63 = vmul.f32 %v11741_v59, %v7926_v46 }
 0x16e   : > { %v652_v60 = vmul.f32 %v11767_v35, %v7926_v46  ;;  %v1110_v11 = vmax.f32 %v1046_v62, 0.0  ;;  %v11778_v62 = vld [vmem:[#allocation57_spill] sm:$0xff] }
 0x16f   : > { %v917_v38 = vadd.f32 %v853_v2, %v709_v32  ;;  %v505_v2 = vmul.f32 %v11770_v30, %v7936_v51  ;;  %v11771_v32 = vld [vmem:[#allocation19_spill] sm:$0xff]  ;;  %v919_v40 = vadd.f32 %v855_v49, %v711_v25  ;;  %v1048_v30 = vadd.f32 %v11742_v0, %v920_v19  ;;  %v11776_v49 = vld [vmem:[#allocation52_spill] sm:$0xff] }
 0x170   : > { %1221 = vadd.xlane.f32.xlu1 %v1106_v54  ;;  %v1108_v54 = vmax.f32 %v1044_v1, 0.0  ;;  %v508_v27 = vmul.f32 %v11771_v32, %v7936_v51  ;;  %v8048_v25 = vrot.slane %v1316_v43, %v11776_v49  ;;  %v860_v19 = vmul.f32 %v11778_v62, %v7946_v6 }
 0x171   : > { %1219 = vadd.xlane.f32.xlu0 %v1105_v56  ;;  %v1045_v35 = vadd.f32 %v11772_v8, %v917_v38  ;;  %v11773_v56 = vld [vmem:[#allocation53_spill] sm:$0xff]  ;;  %v713_v23 = vadd.f32 %v649_v33, %v505_v2  ;;  %v857_v38 = vmul.f32 %v11743_v22, %v7946_v6  ;;  %v653_v22 = vmul.f32 %v11714_v57, %v7926_v46 }
 0x172   : > { %v858_v1 = vmul.f32 %v11773_v56, %v7946_v6  ;;  %v716_v44 = vadd.f32 %v652_v60, %v508_v27  ;;  %v11777_v33 = vld [vmem:[#allocation69_spill] sm:$0xff]  ;;  %v1112_v49 = vmax.f32 %v1048_v30, 0.0  ;;  %v859_v62 = vmul.f32 %v11717_v55, %v7946_v6  ;;  %v11784_v55 = vld [vmem:[#allocation10_spill] sm:$0xff] }
 0x173   : > { %v1109_v60 = vmax.f32 %v1045_v35, 0.0  ;;  %v1047_v2 = vadd.f32 %v11777_v33, %v919_v40  ;;  %v8068_v46 = vrot.slane %v1316_v43, %v11720_v28 }
 0x174   : > { %1225 = vadd.xlane.f32.xlu1 %v1108_v54  ;;  %v922_v4 = vadd.f32 %v858_v1, %v714_v39  ;;  %v11775_v54 = vld [vmem:[#allocation20_spill] sm:$0xff]  ;;  %v11779_v39 = vld [vmem:[#allocation21_spill] sm:$0xff] }
 0x175   : > { %1223 = vadd.xlane.f32.xlu0 %v1107_v48  ;;  %v507_v5 = vmul.f32 %v11775_v54, %v7936_v51  ;;  %v510_v27 = vmul.f32 %v11779_v39, %v7936_v51  ;;  %v921_v48 = vadd.f32 %v857_v38, %v713_v23  ;;  %v8058_v54 = vrot.slane %v1316_v43, %v11715_v34  ;;  %v11780_v23 = vld [vmem:[#allocation23_spill] sm:$0xff] }
 0x176   : > { %v1050_v35 = vadd.f32 %v11716_v20, %v922_v4  ;;  %v509_v39 = vmul.f32 %v11749_v12, %v7936_v51  ;;  %v1111_v38 = vmax.f32 %v1047_v2, 0.0  ;;  %v11782_v4 = vld [vmem:[#allocation59_spill] sm:$0xff]  ;;  %v11785_v12 = vld [vmem:[#allocation8_spill] sm:$0xff] }
 0x177   : > { %v715_v1 = vadd.f32 %v651_v42, %v507_v5  ;;  %v718_v40 = vadd.f32 %v654_v63, %v510_v27  ;;  %v1417_v42 = vmul.f32 %v8048_v25, %v11780_v23  ;;  %v11781_v5 = vld [vmem:[#allocation71_spill] sm:$0xff]  ;;  %v11783_v63 = vld [vmem:[#allocation58_spill] sm:$0xff]  ;;  %v1337_v51 = vmul.f32 %v8058_v54, %v11784_v55 }
 0x178   : > { %1229 = vadd.xlane.f32.xlu1 %v1110_v11  ;;  %v924_v11 = vadd.f32 %v860_v19, %v716_v44  ;;  %v1049_v30 = vadd.f32 %v11781_v5, %v921_v48  ;;  %v862_v44 = vmul.f32 %v11782_v4, %v7946_v6  ;;  %v717_v27 = vadd.f32 %v653_v22, %v509_v39  ;;  %v11786_v48 = vld [vmem:[#allocation60_spill] sm:$0xff] }
 0x179   : > { %1227 = vadd.xlane.f32.xlu0 %v1109_v60  ;;  %v1416_v60 = vmul.f32 %v8048_v25, %v11783_v63  ;;  %v923_v19 = vadd.f32 %v859_v62, %v715_v1  ;;  %v1336_v23 = vmul.f32 %v8058_v54, %v11785_v12  ;;  %v1114_v43 = vmax.f32 %v1050_v35, 0.0 }
 0x17a   : > { %v926_v2 = vadd.f32 %v862_v44, %v718_v40  ;;  %v1419_v5 = vmul.f32 %v8048_v25, %v11786_v48  ;;  %v861_v4 = vmul.f32 %v11692_v52, %v7946_v6  ;;  %v1481_v63 = vadd.f32 %v1417_v42, %v1337_v51 }
 0x17b   : > { %v1561_v22 = vmul.f32 %v8068_v46, %v11725_v61  ;;  %v1113_v62 = vmax.f32 %v1049_v30, 0.0  ;;  %v1051_v39 = vadd.f32 %v7716_v41, %v923_v19  ;;  %v1480_v1 = vadd.f32 %v1416_v60, %v1336_v23  ;;  %v11787_v23 = vld [vmem:[#allocation11_spill] sm:$0xff] }
 0x17c   : > { %1233 = vadd.xlane.f32.xlu1 %v1112_v49  ;;  %v1052_v49 = vadd.f32 %v11690_v26, %v924_v11  ;;  %v1339_v35 = vmul.f32 %v8058_v54, %v11726_v36  ;;  %v925_v11 = vadd.f32 %v861_v4, %v717_v27  ;;  %v1560_v40 = vmul.f32 %v8068_v46, %v11693_v14 }
 0x17d   : > { %1231 = vadd.xlane.f32.xlu0 %v1111_v38  ;;  %v1054_v6 = vadd.f32 %v11696_v21, %v926_v2  ;;  %v1421_v44 = vmul.f32 %v8048_v25, %v11755_v29  ;;  %v1625_v51 = vadd.f32 %v1561_v22, %v1481_v63  ;;  %v1418_v30 = vmul.f32 %v8048_v25, %v11756_v18 }
 0x17e   : > { %v1116_v38 = vmax.f32 %v1052_v49, 0.0  ;;  %v1483_v42 = vadd.f32 %v1419_v5, %v1339_v35  ;;  %v1341_v60 = vmul.f32 %v8058_v54, %v11787_v23  ;;  %v1115_v4 = vmax.f32 %v1051_v39, 0.0 }
 0x17f   : > { %v1053_v19 = vadd.f32 %v11758_v7, %v925_v11  ;;  %v1624_v27 = vadd.f32 %v1560_v40, %v1480_v1  ;;  %v1689_v5 = vadd.f32 %v1625_v51, %v11731_v9  ;;  %v1338_v2 = vmul.f32 %v8058_v54, %v11759_v13 }
 0x180   : > { %1237 = vadd.xlane.f32.xlu1 %v1114_v43  ;;  %v11788_v43 = vld [vmem:[#allocation43_spill] sm:$0xff]  ;;  %v1562_v63 = vmul.f32 %v8068_v46, %v11729_v45  ;;  %v1420_v22 = vmul.f32 %v8048_v25, %v11730_v17  ;;  %v1485_v35 = vadd.f32 %v1421_v44, %v1341_v60  ;;  %v1423_v1 = vmul.f32 %v8048_v25, %v11732_v37 }
 0x181   : > { %1235 = vadd.xlane.f32.xlu0 %v1113_v62  ;;  %v1563_v49 = vmul.f32 %v8068_v46, %v11788_v43  ;;  %v1118_v62 = vmax.f32 %v1054_v6, 0.0  ;;  %v1482_v11 = vadd.f32 %v1418_v30, %v1338_v2  ;;  %v1340_v40 = vmul.f32 %v8058_v54, %v11700_v3 }
 0x182   : > { %v1688_v51 = vadd.f32 %v1624_v27, %v11701_v16  ;;  %v1565_v45 = vmul.f32 %v8068_v46, %v11760_v53  ;;  %v1753_v6 = vmax.f32 %v1689_v5, 0.0  ;;  %v1422_v60 = vmul.f32 %v8048_v25, %v7480_v47  ;;  %v11796_v47 = vld [vmem:[#allocation16_spill] sm:$0xff] }
 0x183   : > { %v1627_v39 = vadd.f32 %v1563_v49, %v1483_v42  ;;  %v1626_v42 = vadd.f32 %v1562_v63, %v1482_v11  ;;  %v1484_v44 = vadd.f32 %v1420_v22, %v1340_v40  ;;  %v1564_v27 = vmul.f32 %v8068_v46, %v11702_v10  ;;  %v11789_v63 = vld [vmem:[#allocation63_spill] sm:$0xff] }
 0x184   : > { %1241 = vadd.xlane.f32.xlu1 %v1116_v38  ;;  %v1117_v38 = vmax.f32 %v1053_v19, 0.0  ;;  %v1629_v49 = vadd.f32 %v1565_v45, %v1485_v35  ;;  %v1425_v19 = vmul.f32 %v8048_v25, %v7631_v24  ;;  %v1752_v5 = vmax.f32 %v1688_v51, 0.0  ;;  %v11790_v11 = vld [vmem:[#allocation47_spill] sm:$0xff]  ;;  %v11793_v24 = vld [vmem:[#allocation68_spill] sm:$0xff]  ;;  %v11794_v51 = vld [vmem:[#allocation42_spill] sm:$0xff] }
 0x185   : > { %1239 = vadd.xlane.f32.xlu0 %v1115_v4  ;;  %v1343_v4 = vmul.f32 %v8058_v54, %v7447_v31  ;;  %v1691_v30 = vadd.f32 %v1627_v39, %v7502_v58  ;;  %v1690_v22 = vadd.f32 %v1626_v42, %v11789_v63  ;;  %v1567_v40 = vmul.f32 %v8068_v46, %v11790_v11  ;;  %v11795_v58 = vld [vmem:[#allocation28_spill] sm:$0xff]  ;;  %v11804_v31 = vld [vmem:[#allocation18_spill] sm:$0xff] }
 0x186   : > { %v1628_v39 = vadd.f32 %v1564_v27, %v1484_v44  ;;  %v1427_v10 = vmul.f32 %v8048_v25, %v11793_v24  ;;  %v1566_v11 = vmul.f32 %v8068_v46, %v11795_v58  ;;  %v1344_v44 = vmul.f32 %v8058_v54, %v11796_v47  ;;  %v11797_v27 = vld [vmem:[#allocation65_spill] sm:$0xff] }
 0x187   : > { %v1487_v2 = vadd.f32 %v1423_v1, %v1343_v4  ;;  %v11792_v1 = vld [vmem:[#allocation31_spill] sm:$0xff] }
 0x188   : > { %1245 = vadd.xlane.f32.xlu1 %v1118_v62  ;;  %v1342_v62 = vmul.f32 %v8058_v54, %v11703_v15  ;;  %v1424_v4 = vmul.f32 %v8048_v25, %v11792_v1  ;;  %v1693_v15 = vadd.f32 %v1629_v49, %v11794_v51  ;;  %v11798_v1 = vld [vmem:[#allocation50_spill] sm:$0xff]  ;;  %v7036_v58 = vld [vmem:[%s7298_s18 + $0x6] sm:$0x3] }
 0x189   : > { %1243 = vadd.xlane.f32.xlu0 %v1117_v38  ;;  %v11791_v38 = vld [vmem:[#allocation15_spill] sm:$0xff]  ;;  %v1631_v42 = vadd.f32 %v1567_v40, %v1487_v2  ;;  %v1569_v24 = vmul.f32 %v8068_v46, %v11798_v1  ;;  %v11800_v2 = vld [vmem:[#allocation33_spill] sm:$0xff]  ;;  %v11801_v40 = vld [vmem:[#allocation70_spill] sm:$0xff] }
 0x18a   : > { %v1345_v45 = vmul.f32 %v8058_v54, %v11791_v38  ;;  %v1486_v35 = vadd.f32 %v1422_v60, %v1342_v62  ;;  %v1754_v60 = vmax.f32 %v1690_v22, 0.0  ;;  %v1692_v62 = vadd.f32 %v1628_v39, %v11797_v27  ;;  %v11802_v22 = vld [vmem:[#allocation44_spill] sm:$0xff]  ;;  %v11803_v51 = vld [vmem:[#allocation30_spill] sm:$0xff] }
 0x18b   : > { %v1488_v49 = vadd.f32 %v1424_v4, %v1344_v44  ;;  %v1695_v47 = vadd.f32 %v1631_v42, %v11802_v22  ;;  %v1568_v1 = vmul.f32 %v8068_v46, %v11803_v51 }
 0x18c   : > { %1818 = vadd.xlane.f32.xlu1 %v1753_v6  ;;  %v1755_v6 = vmax.f32 %v1691_v30, 0.0  ;;  %v1489_v63 = vadd.f32 %v1425_v19, %v1345_v45  ;;  %v1630_v38 = vadd.f32 %v1566_v11, %v1486_v35  ;;  %v1426_v19 = vmul.f32 %v8048_v25, %v11800_v2 }
 0x18d   : > { %1816 = vadd.xlane.f32.xlu0 %v1752_v5  ;;  %v11799_v5 = vld [vmem:[#allocation17_spill] sm:$0xff]  ;;  %v1429_v45 = vmul.f32 %v8048_v25, %v11801_v40  ;;  %v1346_v11 = vmul.f32 %v8058_v54, %v11804_v31  ;;  %v1349_v35 = vmul.f32 %v8058_v54, %v11771_v32  ;;  %v1756_v4 = vmax.f32 %v1692_v62, 0.0 }
 0x18e   : > { %v1347_v30 = vmul.f32 %v8058_v54, %v11799_v5  ;;  %v1633_v39 = vadd.f32 %v1569_v24, %v1489_v63  ;;  %v1694_v44 = vadd.f32 %v1630_v38, %v11772_v8  ;;  %v1632_v24 = vadd.f32 %v1568_v1, %v1488_v49  ;;  %v11809_v49 = vld [vmem:[#allocation52_spill] sm:$0xff] }
 0x18f   : > { %v1493_v63 = vadd.f32 %v1429_v45, %v1349_v35  ;;  %v1759_v31 = vmax.f32 %v1695_v47, 0.0  ;;  %v1431_v38 = vmul.f32 %v8048_v25, %v11741_v59 }
 0x190   : > { %1822 = vadd.xlane.f32.xlu1 %v1755_v6  ;;  %v1757_v6 = vmax.f32 %v1693_v15, 0.0  ;;  %v1491_v27 = vadd.f32 %v1427_v10, %v1347_v30  ;;  %v1571_v15 = vmul.f32 %v8068_v46, %v11773_v56  ;;  %v1490_v10 = vadd.f32 %v1426_v19, %v1346_v11  ;;  %v11807_v56 = vld [vmem:[#allocation32_spill] sm:$0xff]  ;;  %v11811_v11 = vld [vmem:[#allocation21_spill] sm:$0xff] }
 0x191   : > { %1820 = vadd.xlane.f32.xlu0 %v1754_v60  ;;  %v1317_v60 = vunpack.c.l.bf16 %v7036_v58  ;;  %v1428_v30 = vmul.f32 %v8048_v25, %v11774_v50  ;;  %v1697_v32 = vadd.f32 %v1633_v39, %v11742_v0  ;;  %v1570_v58 = vmul.f32 %v8068_v46, %v11807_v56  ;;  %v11810_v39 = vld [vmem:[#allocation57_spill] sm:$0xff]  ;;  %v11814_v56 = vld [vmem:[#allocation34_spill] sm:$0xff] }
 0x192   : > { %v1758_v45 = vmax.f32 %v1694_v44, 0.0  ;;  %v1696_v47 = vadd.f32 %v1632_v24, %v11777_v33  ;;  %v1351_v35 = vmul.f32 %v8058_v54, %v11811_v11  ;;  %v1572_v11 = vmul.f32 %v8068_v46, %v11814_v56 }
 0x193   : > { %v8174_v19 = vrot.slane %v1317_v60, %v11809_v49  ;;  %v8186_v49 = vrot.slane %v1317_v60, %v11715_v34 }
 0x194   : > { %1826 = vadd.xlane.f32.xlu1 %v1757_v6  ;;  %v8160_v42 = vpop.xlane.xlu1 %1119  ;;  %v1635_v6 = vadd.f32 %v1571_v15, %v1491_v27  ;;  %v1573_v27 = vmul.f32 %v8068_v46, %v11810_v39  ;;  %v1634_v15 = vadd.f32 %v1570_v58, %v1490_v10  ;;  %v1495_v33 = vadd.f32 %v1431_v38, %v1351_v35 }
 0x195   : > { %11805 = vst [vmem:[#allocation36_spill] sm:$0xff] %v8160_v42  ;;  %1824 = vadd.xlane.f32.xlu0 %v1756_v4  ;;  %v11808_v42 = vld [vmem:[#allocation20_spill] sm:$0xff]  ;;  %v8198_v58 = vrot.slane %v1317_v60, %v11720_v28  ;;  %v1352_v60 = vmul.f32 %v8186_v49, %v11785_v12 }
 0x196   : > { %v8167_v62 = vpop.xlane.xlu0 %1121  ;;  %v1348_v1 = vmul.f32 %v8058_v54, %v11808_v42  ;;  %v1430_v42 = vmul.f32 %v8048_v25, %v11714_v57  ;;  %v1699_v44 = vadd.f32 %v1635_v6, %v11716_v20  ;;  %v1637_v24 = vadd.f32 %v1573_v27, %v1493_v63  ;;  %v11818_v63 = vld [vmem:[#allocation59_spill] sm:$0xff] }
 0x197   : > { %11806 = vst [vmem:[#allocation39_spill] sm:$0xff] %v8167_v62  ;;  %v1575_v38 = vmul.f32 %v8068_v46, %v11818_v63  ;;  %v1435_v63 = vmul.f32 %v8174_v19, %v11786_v48 }
 0x198   : > { %1830 = vadd.xlane.f32.xlu1 %v1759_v31  ;;  %v8181_v4 = vpop.xlane.xlu1 %1125  ;;  %v1492_v62 = vadd.f32 %v1428_v30, %v1348_v1  ;;  %v1761_v31 = vmax.f32 %v1697_v32, 0.0  ;;  %v11816_v30 = vld [vmem:[#allocation23_spill] sm:$0xff]  ;;  %v1760_v32 = vmax.f32 %v1696_v47, 0.0  ;;  %v1763_v47 = vmax.f32 %v1699_v44, 0.0 }
 0x199   : > { %11812 = vst [vmem:[#allocation54_spill] sm:$0xff] %v8181_v4  ;;  %1828 = vadd.xlane.f32.xlu0 %v1758_v45  ;;  %v11815_v4 = vld [vmem:[#allocation22_spill] sm:$0xff]  ;;  %v1433_v25 = vmul.f32 %v8174_v19, %v11816_v30  ;;  %v11817_v1 = vld [vmem:[#allocation71_spill] sm:$0xff]  ;;  %v1353_v30 = vmul.f32 %v8186_v49, %v11784_v55 }
 0x19a   : > { %v8189_v39 = vpop.xlane.xlu0 %1123  ;;  %v1350_v10 = vmul.f32 %v8058_v54, %v11815_v4  ;;  %v1698_v6 = vadd.f32 %v1634_v15, %v11817_v1  ;;  %v11819_v45 = vld [vmem:[#allocation58_spill] sm:$0xff]  ;;  %v1701_v15 = vadd.f32 %v1637_v24, %v11690_v26 }
 0x19b   : > { %11813 = vst [vmem:[#allocation37_spill] sm:$0xff] %v8189_v39  ;;  %v1432_v27 = vmul.f32 %v8174_v19, %v11819_v45  ;;  %v1636_v39 = vadd.f32 %v1572_v11, %v1492_v62  ;;  %v1574_v62 = vmul.f32 %v8068_v46, %v11692_v52  ;;  %v1577_v11 = vmul.f32 %v8198_v58, %v11725_v61 }
 0x19c   : > { %1834 = vadd.xlane.f32.xlu1 %v1761_v31  ;;  %v8205_v35 = vpop.xlane.xlu1 %1129  ;;  %v1494_v54 = vadd.f32 %v1430_v42, %v1350_v10  ;;  %v1639_v31 = vadd.f32 %v1575_v38, %v1495_v33  ;;  %v1497_v42 = vadd.f32 %v1433_v25, %v1353_v30  ;;  %v1762_v10 = vmax.f32 %v1698_v6, 0.0 }
 0x19d   : > { %11820 = vst [vmem:[#allocation48_spill] sm:$0xff] %v8205_v35  ;;  %1832 = vadd.xlane.f32.xlu0 %v1760_v32  ;;  %v1700_v32 = vadd.f32 %v1636_v39, %v7716_v41  ;;  %v1496_v44 = vadd.f32 %v1432_v27, %v1352_v60  ;;  %v1355_v33 = vmul.f32 %v8186_v49, %v11726_v36  ;;  %v1765_v46 = vmax.f32 %v1701_v15, 0.0 }
 0x19e   : > { %v8214_v1 = vpop.xlane.xlu0 %1127  ;;  %v1638_v38 = vadd.f32 %v1574_v62, %v1494_v54  ;;  %v1576_v35 = vmul.f32 %v8198_v58, %v11693_v14  ;;  %v1703_v30 = vadd.f32 %v1639_v31, %v11696_v21  ;;  %v1437_v6 = vmul.f32 %v8174_v19, %v11755_v29 }
 0x19f   : > { %11821 = vst [vmem:[#allocation24_spill] sm:$0xff] %v8214_v1  ;;  %v1499_v25 = vadd.f32 %v1435_v63, %v1355_v33  ;;  %v1641_v39 = vadd.f32 %v1577_v11, %v1497_v42  ;;  %v1434_v27 = vmul.f32 %v8174_v19, %v11756_v18  ;;  %v1357_v54 = vmul.f32 %v8186_v49, %v11787_v23  ;;  %v11825_v11 = vld [vmem:[#allocation41_spill] sm:$0xff] }
 0x1a0   : > { %1838 = vadd.xlane.f32.xlu1 %v1763_v47  ;;  %v1764_v60 = vmax.f32 %v1700_v32, 0.0  ;;  %v1702_v62 = vadd.f32 %v1638_v38, %v11758_v7  ;;  %v1640_v15 = vadd.f32 %v1576_v35, %v1496_v44  ;;  %v1579_v63 = vmul.f32 %v8198_v58, %v11788_v43 }
 0x1a1   : > { %v8223_v24 = vpop.xlane.xlu1 %1133  ;;  %1836 = vadd.xlane.f32.xlu0 %v1762_v10  ;;  %v1705_v10 = vadd.f32 %v1641_v39, %v11731_v9  ;;  %v1354_v42 = vmul.f32 %v8186_v49, %v11759_v13  ;;  %v1578_v33 = vmul.f32 %v8198_v58, %v11825_v11  ;;  %v1767_v32 = vmax.f32 %v1703_v30, 0.0  ;;  %v11833_v11 = vld [vmem:[#allocation26_spill] sm:$0xff] }
 0x1a2   : > { %11822 = vst [vmem:[#allocation9_spill] sm:$0xff] %v8223_v24  ;;  %v8230_v47 = vpop.xlane.xlu0 %1131  ;;  %v1643_v38 = vadd.f32 %v1579_v63, %v1499_v25  ;;  %v1501_v35 = vadd.f32 %v1437_v6, %v1357_v54  ;;  %v1439_v44 = vmul.f32 %v8174_v19, %v11732_v37  ;;  %v1356_v39 = vmul.f32 %v8186_v49, %v11700_v3 }
 0x1a3   : > { %11823 = vst [vmem:[#allocation46_spill] sm:$0xff] %v8230_v47  ;;  %v1766_v47 = vmax.f32 %v1702_v62, 0.0  ;;  %v1704_v1 = vadd.f32 %v1640_v15, %v11701_v16  ;;  %v1769_v6 = vmax.f32 %v1705_v10, 0.0  ;;  %v11831_v15 = vld [vmem:[#allocation66_spill] sm:$0xff] }
 0x1a4   : > { %1842 = vadd.xlane.f32.xlu1 %v1765_v46  ;;  %v1436_v46 = vmul.f32 %v8174_v19, %v11730_v17  ;;  %v1581_v17 = vmul.f32 %v8198_v58, %v11760_v53  ;;  %v1441_v16 = vmul.f32 %v8174_v19, %v11831_v15 }
 0x1a5   : > { %v8239_v31 = vpop.xlane.xlu1 %1137  ;;  %1840 = vadd.xlane.f32.xlu0 %v1764_v60  ;;  %v11827_v60 = vld [vmem:[#allocation13_spill] sm:$0xff]  ;;  %v1768_v10 = vmax.f32 %v1704_v1, 0.0 }
 0x1a6   : > { %11824 = vst [vmem:[#allocation62_spill] sm:$0xff] %v8239_v31  ;;  %v8250_v24 = vpop.xlane.xlu0 %1135  ;;  %v1498_v31 = vadd.f32 %v1434_v27, %v1354_v42  ;;  %v1359_v30 = vmul.f32 %v8186_v49, %v11827_v60  ;;  %v1500_v63 = vadd.f32 %v1436_v46, %v1356_v39  ;;  %v11830_v42 = vld [vmem:[#allocation40_spill] sm:$0xff]  ;;  %v1645_v62 = vadd.f32 %v1581_v17, %v1501_v35  ;;  %v11837_v17 = vld [vmem:[#allocation15_spill] sm:$0xff] }
 0x1a7   : > { %11826 = vst [vmem:[#allocation51_spill] sm:$0xff] %v8250_v24  ;;  %v11829_v24 = vld [vmem:[#allocation29_spill] sm:$0xff]  ;;  %v1580_v60 = vmul.f32 %v8198_v58, %v11833_v11  ;;  %v1361_v35 = vmul.f32 %v8186_v49, %v11837_v17  ;;  %v11843_v17 = vld [vmem:[#allocation28_spill] sm:$0xff] }
 0x1a8   : > { %1846 = vadd.xlane.f32.xlu1 %v1767_v32  ;;  %v1642_v54 = vadd.f32 %v1578_v33, %v1498_v31  ;;  %v1438_v27 = vmul.f32 %v8174_v19, %v11829_v24  ;;  %v1707_v32 = vadd.f32 %v1643_v38, %v11830_v42  ;;  %v1503_v3 = vadd.f32 %v1439_v44, %v1359_v30  ;;  %v11835_v33 = vld [vmem:[#allocation63_spill] sm:$0xff]  ;;  %v11840_v42 = vld [vmem:[#allocation68_spill] sm:$0xff] }
 0x1a9   : > { %v8259_v25 = vpop.xlane.xlu1 %1141  ;;  %1844 = vadd.xlane.f32.xlu0 %v1766_v47  ;;  %v11836_v47 = vld [vmem:[#allocation47_spill] sm:$0xff]  ;;  %v1644_v39 = vadd.f32 %v1580_v60, %v1500_v63  ;;  %v1505_v15 = vadd.f32 %v1441_v16, %v1361_v35  ;;  %v11844_v60 = vld [vmem:[#allocation16_spill] sm:$0xff]  ;;  %v1445_v35 = vmul.f32 %v8174_v19, %v11801_v40 }
 0x1aa   : > { %11828 = vst [vmem:[#allocation35_spill] sm:$0xff] %v8259_v25  ;;  %v8266_v53 = vpop.xlane.xlu0 %1139  ;;  %v11834_v25 = vld [vmem:[#allocation14_spill] sm:$0xff]  ;;  %v1706_v46 = vadd.f32 %v1642_v54, %v11835_v33  ;;  %v1583_v38 = vmul.f32 %v8198_v58, %v11836_v47  ;;  %v1771_v1 = vmax.f32 %v1707_v32, 0.0  ;;  %v1360_v63 = vmul.f32 %v8186_v49, %v11844_v60 }
 0x1ab   : > { %11832 = vst [vmem:[#allocation10_spill] sm:$0xff] %v8266_v53  ;;  %v1358_v31 = vmul.f32 %v8186_v49, %v11834_v25  ;;  %v11839_v53 = vld [vmem:[#allocation31_spill] sm:$0xff]  ;;  %v1443_v25 = vmul.f32 %v8174_v19, %v11840_v42  ;;  %v11846_v42 = vld [vmem:[#allocation50_spill] sm:$0xff] }
 0x1ac   : > { %1850 = vadd.xlane.f32.xlu1 %v1769_v6  ;;  %v1440_v11 = vmul.f32 %v8174_v19, %v11839_v53  ;;  %v11841_v6 = vld [vmem:[#allocation42_spill] sm:$0xff]  ;;  %v1647_v33 = vadd.f32 %v1583_v38, %v1503_v3  ;;  %v1585_v32 = vmul.f32 %v8198_v58, %v11846_v42  ;;  %v1442_v38 = vmul.f32 %v8174_v19, %v11800_v2 }
 0x1ad   : > { %v8277_v44 = vpop.xlane.xlu1 %1145  ;;  %v1502_v30 = vadd.f32 %v1438_v27, %v1358_v31  ;;  %1848 = vadd.xlane.f32.xlu0 %v1768_v10  ;;  %v1709_v54 = vadd.f32 %v1645_v62, %v11841_v6  ;;  %v1770_v27 = vmax.f32 %v1706_v46, 0.0  ;;  %v11845_v31 = vld [vmem:[#allocation65_spill] sm:$0xff]  ;;  %v1363_v62 = vmul.f32 %v8186_v49, %v11799_v5 }
 0x1ae   : > { %11838 = vst [vmem:[#allocation8_spill] sm:$0xff] %v8277_v44  ;;  %v8284_v24 = vpop.xlane.xlu0 %1143  ;;  %v1582_v44 = vmul.f32 %v8198_v58, %v11843_v17  ;;  %v1708_v53 = vadd.f32 %v1644_v39, %v11845_v31  ;;  %v1504_v10 = vadd.f32 %v1440_v11, %v1360_v63  ;;  %v1711_v39 = vadd.f32 %v1647_v33, %v11802_v22 }
 0x1af   : > { %11842 = vst [vmem:[#allocation60_spill] sm:$0xff] %v8284_v24  ;;  %v1773_v46 = vmax.f32 %v1709_v54, 0.0  ;;  %v1649_v24 = vadd.f32 %v1585_v32, %v1505_v15  ;;  %v1507_v31 = vadd.f32 %v1443_v25, %v1363_v62  ;;  %v11851_v54 = vld [vmem:[#allocation53_spill] sm:$0xff]  ;;  %v1444_v2 = vmul.f32 %v8174_v19, %v11774_v50 }
 0x1b0   : > { %1854 = vadd.xlane.f32.xlu1 %v1771_v1  ;;  %v1646_v16 = vadd.f32 %v1582_v44, %v1502_v30  ;;  %v7037_v1 = vld [vmem:[%s7298_s18 + $0xa] sm:$0x3]  ;;  %v11849_v44 = vld [vmem:[#allocation18_spill] sm:$0xff]  ;;  %v1772_v40 = vmax.f32 %v1708_v53, 0.0  ;;  %v1587_v33 = vmul.f32 %v8198_v58, %v11851_v54  ;;  %v1447_v53 = vmul.f32 %v8174_v19, %v11741_v59  ;;  %v11854_v54 = vld [vmem:[#allocation32_spill] sm:$0xff] }
 0x1b1   : > { %v8295_v3 = vpop.xlane.xlu1 %1149  ;;  %1852 = vadd.xlane.f32.xlu0 %v1770_v27  ;;  %v1362_v11 = vmul.f32 %v8186_v49, %v11849_v44  ;;  %v11850_v30 = vld [vmem:[#allocation19_spill] sm:$0xff]  ;;  %v1318_v15 = vunpack.c.l.bf16 %v7037_v1  ;;  %v1775_v44 = vmax.f32 %v1711_v39, 0.0  ;;  %v1586_v1 = vmul.f32 %v8198_v58, %v11854_v54 }
 0x1b2   : > { %11847 = vst [vmem:[#allocation43_spill] sm:$0xff] %v8295_v3  ;;  %v8303_v42 = vpop.xlane.xlu0 %1147  ;;  %v1584_v3 = vmul.f32 %v8198_v58, %v11803_v51  ;;  %v1365_v63 = vmul.f32 %v8186_v49, %v11850_v30  ;;  %v1710_v27 = vadd.f32 %v1646_v16, %v11772_v8  ;;  %v1713_v30 = vadd.f32 %v1649_v24, %v11742_v0  ;;  %v11858_v24 = vld [vmem:[#allocation57_spill] sm:$0xff] }
 0x1b3   : > { %11848 = vst [vmem:[#allocation44_spill] sm:$0xff] %v8303_v42  ;;  %v1506_v62 = vadd.f32 %v1442_v38, %v1362_v11  ;;  %v11859_v11 = vld [vmem:[#allocation21_spill] sm:$0xff] }
 0x1b4   : > { %1858 = vadd.xlane.f32.xlu1 %v1773_v46  ;;  %v1648_v32 = vadd.f32 %v1584_v3, %v1504_v10  ;;  %v1509_v42 = vadd.f32 %v1445_v35, %v1365_v63  ;;  %v1651_v46 = vadd.f32 %v1587_v33, %v1507_v31  ;;  %v11856_v10 = vld [vmem:[#allocation52_spill] sm:$0xff]  ;;  %v11857_v35 = vld [vmem:[#allocation69_spill] sm:$0xff]  ;;  %v1589_v31 = vmul.f32 %v8198_v58, %v11858_v24 }
 0x1b5   : > { %v8314_v25 = vpop.xlane.xlu1 %1153  ;;  %1856 = vadd.xlane.f32.xlu0 %v1772_v40  ;;  %v8328_v38 = vrot.slane %v1318_v15, %v11856_v10  ;;  %v1774_v40 = vmax.f32 %v1710_v27, 0.0  ;;  %v1367_v63 = vmul.f32 %v8186_v49, %v11859_v11  ;;  %v8340_v10 = vrot.slane %v1318_v15, %v11715_v34 }
 0x1b6   : > { %11852 = vst [vmem:[#allocation34_spill] sm:$0xff] %v8314_v25  ;;  %v8321_v16 = vpop.xlane.xlu0 %1151  ;;  %v11855_v25 = vld [vmem:[#allocation20_spill] sm:$0xff]  ;;  %v1712_v39 = vadd.f32 %v1648_v32, %v11857_v35  ;;  %v1715_v27 = vadd.f32 %v1651_v46, %v11716_v20  ;;  %v1653_v32 = vadd.f32 %v1589_v31, %v1509_v42  ;;  %v1588_v11 = vmul.f32 %v8198_v58, %v11814_v56  ;;  %v11864_v42 = vld [vmem:[#allocation59_spill] sm:$0xff] }
 0x1b7   : > { %11853 = vst [vmem:[#allocation22_spill] sm:$0xff] %v8321_v16  ;;  %v1364_v3 = vmul.f32 %v8186_v49, %v11855_v25  ;;  %v1650_v16 = vadd.f32 %v1586_v1, %v1506_v62  ;;  %v1446_v25 = vmul.f32 %v8174_v19, %v11714_v57  ;;  %v1511_v59 = vadd.f32 %v1447_v53, %v1367_v63  ;;  %v11862_v62 = vld [vmem:[#allocation23_spill] sm:$0xff] }
 0x1b8   : > { %1862 = vadd.xlane.f32.xlu1 %v1775_v44  ;;  %v1777_v44 = vmax.f32 %v1713_v30, 0.0  ;;  %v1449_v19 = vmul.f32 %v8328_v38, %v11862_v62  ;;  %v8352_v1 = vrot.slane %v1318_v15, %v11720_v28  ;;  %v1776_v30 = vmax.f32 %v1712_v39, 0.0 }
 0x1b9   : > { %v8335_v33 = vpop.xlane.xlu1 %1157  ;;  %v1508_v54 = vadd.f32 %v1444_v2, %v1364_v3  ;;  %1860 = vadd.xlane.f32.xlu0 %v1774_v40  ;;  %v1366_v2 = vmul.f32 %v8186_v49, %v11815_v4  ;;  %v11863_v3 = vld [vmem:[#allocation71_spill] sm:$0xff]  ;;  %v1591_v53 = vmul.f32 %v8198_v58, %v11864_v42  ;;  %v1448_v40 = vmul.f32 %v8328_v38, %v11819_v45 }
 0x1ba   : > { %11860 = vst [vmem:[#allocation58_spill] sm:$0xff] %v8335_v33  ;;  %v8343_v24 = vpop.xlane.xlu0 %1155  ;;  %v1714_v46 = vadd.f32 %v1650_v16, %v11863_v3  ;;  %v1369_v33 = vmul.f32 %v8340_v10, %v11784_v55  ;;  %v1368_v15 = vmul.f32 %v8340_v10, %v11785_v12  ;;  %v1779_v39 = vmax.f32 %v1715_v27, 0.0 }
 0x1bb   : > { %11861 = vst [vmem:[#allocation42_spill] sm:$0xff] %v8343_v24  ;;  %v1652_v63 = vadd.f32 %v1588_v11, %v1508_v54  ;;  %v1510_v49 = vadd.f32 %v1446_v25, %v1366_v2  ;;  %v1717_v16 = vadd.f32 %v1653_v32, %v11690_v26  ;;  %v1451_v24 = vmul.f32 %v8328_v38, %v11786_v48 }
 0x1bc   : > { %1866 = vadd.xlane.f32.xlu1 %v1777_v44  ;;  %v1655_v44 = vadd.f32 %v1591_v53, %v1511_v59  ;;  %v1590_v54 = vmul.f32 %v8198_v58, %v11692_v52  ;;  %v1513_v25 = vadd.f32 %v1449_v19, %v1369_v33  ;;  %v1593_v11 = vmul.f32 %v8352_v1, %v11725_v61 }
 0x1bd   : > { %v8359_v31 = vpop.xlane.xlu1 %1161  ;;  %1864 = vadd.xlane.f32.xlu0 %v1776_v30  ;;  %v1778_v2 = vmax.f32 %v1714_v46, 0.0  ;;  %v1716_v30 = vadd.f32 %v1652_v63, %v7716_v41  ;;  %v1512_v27 = vadd.f32 %v1448_v40, %v1368_v15  ;;  %v1371_v59 = vmul.f32 %v8340_v10, %v11726_v36 }
 0x1be   : > { %11865 = vst [vmem:[#allocation23_spill] sm:$0xff] %v8359_v31  ;;  %v8368_v42 = vpop.xlane.xlu0 %1159  ;;  %v1654_v53 = vadd.f32 %v1590_v54, %v1510_v49  ;;  %v1592_v31 = vmul.f32 %v8352_v1, %v11693_v14  ;;  %v1781_v58 = vmax.f32 %v1717_v16, 0.0  ;;  %v1719_v33 = vadd.f32 %v1655_v44, %v11696_v21 }
 0x1bf   : > { %11866 = vst [vmem:[#allocation71_spill] sm:$0xff] %v8368_v42  ;;  %v1515_v19 = vadd.f32 %v1451_v24, %v1371_v59  ;;  %v1453_v46 = vmul.f32 %v8328_v38, %v11755_v29  ;;  %v1657_v40 = vadd.f32 %v1593_v11, %v1513_v25  ;;  %v1595_v63 = vmul.f32 %v8352_v1, %v11788_v43  ;;  %v11870_v59 = vld [vmem:[#allocation41_spill] sm:$0xff] }
 0x1c0   : > { %1870 = vadd.xlane.f32.xlu1 %v1779_v39  ;;  %v1450_v49 = vmul.f32 %v8328_v38, %v11756_v18  ;;  %v1373_v15 = vmul.f32 %v8340_v10, %v11787_v23  ;;  %v1780_v16 = vmax.f32 %v1716_v30, 0.0  ;;  %v1718_v44 = vadd.f32 %v1654_v53, %v11758_v7  ;;  %v11875_v23 = vld [vmem:[#allocation38_spill] sm:$0xff]  ;;  %v11876_v18 = vld [vmem:[#allocation45_spill] sm:$0xff] }
 0x1c1   : > { %v8377_v32 = vpop.xlane.xlu1 %1165  ;;  %1868 = vadd.xlane.f32.xlu0 %v1778_v2  ;;  %v1656_v24 = vadd.f32 %v1592_v31, %v1512_v27  ;;  %v1455_v54 = vmul.f32 %v8328_v38, %v11732_v37  ;;  %v1721_v25 = vadd.f32 %v1657_v40, %v11731_v9  ;;  %v1370_v11 = vmul.f32 %v8340_v10, %v11759_v13  ;;  %v11872_v27 = vld [vmem:[#allocation27_spill] sm:$0xff]  ;;  %v11874_v40 = vld [vmem:[#allocation12_spill] sm:$0xff] }
 0x1c2   : > { %11867 = vst [vmem:[#allocation73_spill] sm:$0xff] %v8377_v32  ;;  %v8384_v39 = vpop.xlane.xlu0 %1163  ;;  %v1594_v32 = vmul.f32 %v8352_v1, %v11870_v59  ;;  %v1783_v30 = vmax.f32 %v1719_v33, 0.0  ;;  %v1659_v53 = vadd.f32 %v1595_v63, %v1515_v19  ;;  %v1517_v31 = vadd.f32 %v1453_v46, %v1373_v15  ;;  %v11878_v63 = vld [vmem:[#allocation29_spill] sm:$0xff]  ;;  %v11879_v15 = vld [vmem:[#allocation66_spill] sm:$0xff] }
 0x1c3   : > { %11868 = vst [vmem:[#allocation74_spill] sm:$0xff] %v8384_v39  ;;  %v11871_v39 = vld [vmem:[#allocation13_spill] sm:$0xff]  ;;  %v1452_v42 = vmul.f32 %v8328_v38, %v11872_v27  ;;  %v1372_v9 = vmul.f32 %v8340_v10, %v11874_v40  ;;  %v1782_v13 = vmax.f32 %v1718_v44, 0.0  ;;  %v1720_v59 = vadd.f32 %v1656_v24, %v11875_v23  ;;  %v11880_v44 = vld [vmem:[#allocation40_spill] sm:$0xff]  ;;  %v11886_v27 = vld [vmem:[#allocation26_spill] sm:$0xff] }
 0x1c4   : > { %1874 = vadd.xlane.f32.xlu1 %v1781_v58  ;;  %v1375_v58 = vmul.f32 %v8340_v10, %v11871_v39  ;;  %v1597_v39 = vmul.f32 %v8352_v1, %v11876_v18  ;;  %v1785_v19 = vmax.f32 %v1721_v25, 0.0  ;;  %v1599_v46 = vmul.f32 %v8352_v1, %v11836_v47  ;;  %v11884_v47 = vld [vmem:[#allocation31_spill] sm:$0xff] }
 0x1c5   : > { %v8395_v2 = vpop.xlane.xlu1 %1169  ;;  %1872 = vadd.xlane.f32.xlu0 %v1780_v16  ;;  %v1516_v40 = vadd.f32 %v1452_v42, %v1372_v9  ;;  %v1784_v23 = vmax.f32 %v1720_v59, 0.0 }
 0x1c6   : > { %11869 = vst [vmem:[#allocation75_spill] sm:$0xff] %v8395_v2  ;;  %v8406_v37 = vpop.xlane.xlu0 %1167  ;;  %v1514_v2 = vadd.f32 %v1450_v49, %v1370_v11  ;;  %v1519_v16 = vadd.f32 %v1455_v54, %v1375_v58  ;;  %v1454_v49 = vmul.f32 %v8328_v38, %v11878_v63  ;;  %v1457_v11 = vmul.f32 %v8328_v38, %v11879_v15  ;;  %v11882_v54 = vld [vmem:[#allocation14_spill] sm:$0xff]  ;;  %v11883_v58 = vld [vmem:[#allocation15_spill] sm:$0xff] }
 0x1c7   : > { %11873 = vst [vmem:[#allocation76_spill] sm:$0xff] %v8406_v37  ;;  %v1661_v37 = vadd.f32 %v1597_v39, %v1517_v31  ;;  %v1374_v25 = vmul.f32 %v8340_v10, %v11882_v54  ;;  %v1456_v63 = vmul.f32 %v8328_v38, %v11884_v47  ;;  %v11885_v15 = vld [vmem:[#allocation63_spill] sm:$0xff]  ;;  %v11888_v31 = vld [vmem:[#allocation68_spill] sm:$0xff] }
 0x1c8   : > { %1878 = vadd.xlane.f32.xlu1 %v1783_v30  ;;  %v1723_v30 = vadd.f32 %v1659_v53, %v11880_v44  ;;  %v1658_v24 = vadd.f32 %v1594_v32, %v1514_v2  ;;  %v1596_v32 = vmul.f32 %v8352_v1, %v11886_v27  ;;  %v1663_v39 = vadd.f32 %v1599_v46, %v1519_v16  ;;  %v11890_v46 = vld [vmem:[#allocation50_spill] sm:$0xff] }
 0x1c9   : > { %v8413_v33 = vpop.xlane.xlu1 %1173  ;;  %1876 = vadd.xlane.f32.xlu0 %v1782_v13  ;;  %v1518_v42 = vadd.f32 %v1454_v49, %v1374_v25  ;;  %v1376_v53 = vmul.f32 %v8340_v10, %v11844_v60  ;;  %v1725_v59 = vadd.f32 %v1661_v37, %v11841_v6  ;;  %v1598_v16 = vmul.f32 %v8352_v1, %v11843_v17 }
 0x1ca   : > { %11877 = vst [vmem:[#allocation77_spill] sm:$0xff] %v8413_v33  ;;  %v8422_v18 = vpop.xlane.xlu0 %1171  ;;  %v1377_v33 = vmul.f32 %v8340_v10, %v11883_v58  ;;  %v1722_v13 = vadd.f32 %v1658_v24, %v11885_v15  ;;  %v1787_v47 = vmax.f32 %v1723_v30, 0.0  ;;  %v1601_v49 = vmul.f32 %v8352_v1, %v11890_v46 }
 0x1cb   : > { %11881 = vst [vmem:[#allocation40_spill] sm:$0xff] %v8422_v18  ;;  %v1459_v18 = vmul.f32 %v8328_v38, %v11888_v31  ;;  %v1727_v37 = vadd.f32 %v1663_v39, %v11802_v22  ;;  %v1789_v60 = vmax.f32 %v1725_v59, 0.0 }
 0x1cc   : > { %1882 = vadd.xlane.f32.xlu1 %v1785_v19  ;;  %v1521_v2 = vadd.f32 %v1457_v11, %v1377_v33  ;;  %v1660_v19 = vadd.f32 %v1596_v32, %v1516_v40  ;;  %v1520_v33 = vadd.f32 %v1456_v63, %v1376_v53  ;;  %v1379_v11 = vmul.f32 %v8340_v10, %v11799_v5  ;;  %v11893_v63 = vld [vmem:[#allocation33_spill] sm:$0xff]  ;;  %v11894_v5 = vld [vmem:[#allocation70_spill] sm:$0xff] }
 0x1cd   : > { %v8433_v9 = vpop.xlane.xlu1 %1177  ;;  %1880 = vadd.xlane.f32.xlu0 %v1784_v23  ;;  %v1786_v25 = vmax.f32 %v1722_v13, 0.0  ;;  %v11891_v23 = vld [vmem:[#allocation65_spill] sm:$0xff]  ;;  %v1662_v32 = vadd.f32 %v1598_v16, %v1518_v42  ;;  %v1458_v53 = vmul.f32 %v8328_v38, %v11893_v63  ;;  %v7038_v13 = vld [vmem:[%s7298_s18 + $0xe] sm:$0x3] }
 0x1ce   : > { %11887 = vst [vmem:[#allocation14_spill] sm:$0xff] %v8433_v9  ;;  %v8440_v24 = vpop.xlane.xlu0 %1175  ;;  %v1724_v30 = vadd.f32 %v1660_v19, %v11891_v23  ;;  %v1665_v9 = vadd.f32 %v1601_v49, %v1521_v2  ;;  %v1523_v17 = vadd.f32 %v1459_v18, %v1379_v11  ;;  %v11896_v42 = vld [vmem:[#allocation53_spill] sm:$0xff]  ;;  %v1791_v18 = vmax.f32 %v1727_v37, 0.0  ;;  %v11897_v49 = vld [vmem:[#allocation18_spill] sm:$0xff]  ;;  %v11898_v11 = vld [vmem:[#allocation19_spill] sm:$0xff] }
 0x1cf   : > { %11889 = vst [vmem:[#allocation15_spill] sm:$0xff] %v8440_v24  ;;  %v1600_v24 = vmul.f32 %v8352_v1, %v11803_v51  ;;  %v1726_v39 = vadd.f32 %v1662_v32, %v11772_v8  ;;  %v1603_v2 = vmul.f32 %v8352_v1, %v11896_v42  ;;  %v1378_v59 = vmul.f32 %v8340_v10, %v11897_v49  ;;  %v11902_v42 = vld [vmem:[#allocation52_spill] sm:$0xff] }
 0x1d0   : > { %1886 = vadd.xlane.f32.xlu1 %v1787_v47  ;;  %v1461_v47 = vmul.f32 %v8328_v38, %v11894_v5  ;;  %v1788_v16 = vmax.f32 %v1724_v30, 0.0  ;;  %v1729_v5 = vadd.f32 %v1665_v9, %v11742_v0  ;;  %v11900_v30 = vld [vmem:[#allocation72_spill] sm:$0xff] }
 0x1d1   : > { %v8450_v40 = vpop.xlane.xlu1 %1181  ;;  %1884 = vadd.xlane.f32.xlu0 %v1786_v25  ;;  %v1381_v25 = vmul.f32 %v8340_v10, %v11898_v11  ;;  %v1667_v32 = vadd.f32 %v1603_v2, %v1523_v17  ;;  %v1463_v37 = vmul.f32 %v8328_v38, %v11900_v30  ;;  %v1790_v11 = vmax.f32 %v1726_v39, 0.0  ;;  %v11903_v9 = vld [vmem:[#allocation32_spill] sm:$0xff]  ;;  %v11906_v2 = vld [vmem:[#allocation21_spill] sm:$0xff] }
 0x1d2   : > { %11892 = vst [vmem:[#allocation63_spill] sm:$0xff] %v8450_v40  ;;  %v8459_v19 = vpop.xlane.xlu0 %1179  ;;  %v1664_v40 = vadd.f32 %v1600_v24, %v1520_v33  ;;  %v1319_v24 = vunpack.c.l.bf16 %v7038_v13  ;;  %v1522_v33 = vadd.f32 %v1458_v53, %v1378_v59  ;;  %v1602_v17 = vmul.f32 %v8352_v1, %v11903_v9 }
 0x1d3   : > { %11895 = vst [vmem:[#allocation26_spill] sm:$0xff] %v8459_v19  ;;  %v1525_v8 = vadd.f32 %v1461_v47, %v1381_v25  ;;  %v11905_v47 = vld [vmem:[#allocation20_spill] sm:$0xff]  ;;  %v1793_v25 = vmax.f32 %v1729_v5, 0.0 }
 0x1d4   : > { %1890 = vadd.xlane.f32.xlu1 %v1789_v60  ;;  %v1728_v19 = vadd.f32 %v1664_v40, %v11857_v35  ;;  %v1460_v60 = vmul.f32 %v8328_v38, %v11774_v50  ;;  %v11904_v40 = vld [vmem:[#allocation57_spill] sm:$0xff]  ;;  %v1380_v13 = vmul.f32 %v8340_v10, %v11905_v47  ;;  %v1382_v47 = vmul.f32 %v8340_v10, %v11815_v4 }
 0x1d5   : > { %v8468_v51 = vpop.xlane.xlu1 %1185  ;;  %1888 = vadd.xlane.f32.xlu0 %v1788_v16  ;;  %v1605_v53 = vmul.f32 %v8352_v1, %v11904_v40  ;;  %v1383_v16 = vmul.f32 %v8340_v10, %v11906_v2  ;;  %v8499_v2 = vrot.slane %v1319_v24, %v11715_v34  ;;  %v11965_v34 = vld [vmem:[#allocation22_spill] sm:$0xff] }
 0x1d6   : > { %11899 = vst [vmem:[#allocation68_spill] sm:$0xff] %v8468_v51  ;;  %v8476_v49 = vpop.xlane.xlu0 %1183  ;;  %v8479_v51 = vrot.slane %v1319_v24, %v11902_v42  ;;  %v1792_v39 = vmax.f32 %v1728_v19, 0.0  ;;  %v1731_v42 = vadd.f32 %v1667_v32, %v11716_v20  ;;  %v1524_v35 = vadd.f32 %v1460_v60, %v1380_v13 }
 0x1d7   : > { %11901 = vst [vmem:[#allocation50_spill] sm:$0xff] %v8476_v49  ;;  %v1666_v49 = vadd.f32 %v1602_v17, %v1522_v33  ;;  %v1669_v9 = vadd.f32 %v1605_v53, %v1525_v8  ;;  %v1527_v40 = vadd.f32 %v1463_v37, %v1383_v16  ;;  %v8504_v19 = vrot.slane %v1319_v24, %v11720_v28 }
 0x1d8   : > { %1894 = vadd.xlane.f32.xlu1 %v1791_v18  ;;  %v1462_v18 = vmul.f32 %v8328_v38, %v11714_v57  ;;  %v1465_v5 = vmul.f32 %v8479_v51, %v11862_v62  ;;  %v1604_v8 = vmul.f32 %v8352_v1, %v11814_v56  ;;  %v1464_v10 = vmul.f32 %v8479_v51, %v11819_v45 }
 0x1d9   : > { %v8489_v59 = vpop.xlane.xlu1 %1189  ;;  %1892 = vadd.xlane.f32.xlu0 %v1790_v11  ;;  %v1730_v38 = vadd.f32 %v1666_v49, %v11863_v3  ;;  %v11907_v11 = vld [vmem:[#allocation59_spill] sm:$0xff]  ;;  %v1795_v60 = vmax.f32 %v1731_v42, 0.0  ;;  %v1385_v62 = vmul.f32 %v8499_v2, %v11784_v55  ;;  %v1467_v24 = vmul.f32 %v8479_v51, %v11786_v48 }
 0x1da   : > { %v8494_v30 = vpop.xlane.xlu0 %1187  ;;  %v1607_v32 = vmul.f32 %v8352_v1, %v11907_v11  ;;  %v1526_v37 = vadd.f32 %v1462_v18, %v1382_v47  ;;  %v1733_v49 = vadd.f32 %v1669_v9, %v11690_v26  ;;  %v1668_v17 = vadd.f32 %v1604_v8, %v1524_v35 }
 0x1db   : > { %v1384_v13 = vmul.f32 %v8499_v2, %v11785_v12  ;;  %v1606_v45 = vmul.f32 %v8352_v1, %v11692_v52  ;;  %v1529_v42 = vadd.f32 %v1465_v5, %v1385_v62  ;;  %v1609_v55 = vmul.f32 %v8504_v19, %v11725_v61  ;;  %v11909_v62 = vld [vmem:[#allocation11_spill] sm:$0xff] }
 0x1dc   : > { %1898 = vadd.xlane.f32.xlu1 %v1793_v25  ;;  %v1671_v53 = vadd.f32 %v1607_v32, %v1527_v40  ;;  %v1387_v48 = vmul.f32 %v8499_v2, %v11726_v36  ;;  %v1794_v47 = vmax.f32 %v1730_v38, 0.0  ;;  %v1732_v35 = vadd.f32 %v1668_v17, %v7716_v41  ;;  %v11908_v32 = vld [vmem:[#allocation25_spill] sm:$0xff] }
 0x1dd   : > { %v8513_v33 = vpop.xlane.xlu1 %1193  ;;  %1896 = vadd.xlane.f32.xlu0 %v1792_v39  ;;  %v1528_v9 = vadd.f32 %v1464_v10, %v1384_v13  ;;  %v1670_v12 = vadd.f32 %v1606_v45, %v1526_v37  ;;  %v1797_v39 = vmax.f32 %v1733_v49, 0.0  ;;  %v1608_v18 = vmul.f32 %v8504_v19, %v11693_v14  ;;  %v11912_v45 = vld [vmem:[#allocation41_spill] sm:$0xff] }
 0x1de   : > { %v8522_v16 = vpop.xlane.xlu0 %1191  ;;  %v1531_v25 = vadd.f32 %v1467_v24, %v1387_v48  ;;  %v1735_v1 = vadd.f32 %v1671_v53, %v11696_v21  ;;  %v1469_v61 = vmul.f32 %v8479_v51, %v11755_v29  ;;  %v1673_v38 = vadd.f32 %v1609_v55, %v1529_v42  ;;  %v11910_v29 = vld [vmem:[#allocation61_spill] sm:$0xff]  ;;  %v11911_v53 = vld [vmem:[#allocation7_spill] sm:$0xff] }
 0x1df   : > { %v1734_v5 = vadd.f32 %v1670_v12, %v11758_v7  ;;  %v1611_v8 = vmul.f32 %v8504_v19, %v11788_v43  ;;  %v1466_v10 = vmul.f32 %v8479_v51, %v11908_v32  ;;  %v1672_v37 = vadd.f32 %v1608_v18, %v1528_v9  ;;  %v11913_v48 = vld [vmem:[#allocation27_spill] sm:$0xff] }
 0x1e0   : > { %1902 = vadd.xlane.f32.xlu1 %v1795_v60  ;;  %v1796_v60 = vmax.f32 %v1732_v35, 0.0  ;;  %v1389_v14 = vmul.f32 %v8499_v2, %v11909_v62  ;;  %v1737_v49 = vadd.f32 %v1673_v38, %v11910_v29  ;;  %v1386_v13 = vmul.f32 %v8499_v2, %v11911_v53  ;;  %v11914_v35 = vld [vmem:[#allocation64_spill] sm:$0xff] }
 0x1e1   : > { %v8531_v40 = vpop.xlane.xlu1 %1197  ;;  %1900 = vadd.xlane.f32.xlu0 %v1794_v47  ;;  %v1675_v17 = vadd.f32 %v1611_v8, %v1531_v25  ;;  %v1610_v43 = vmul.f32 %v8504_v19, %v11912_v45  ;;  %v1799_v42 = vmax.f32 %v1735_v1, 0.0  ;;  %v1468_v47 = vmul.f32 %v8479_v51, %v11913_v48  ;;  %v11915_v25 = vld [vmem:[#allocation38_spill] sm:$0xff]  ;;  %v11916_v8 = vld [vmem:[#allocation45_spill] sm:$0xff]  ;;  %v11917_v62 = vld [vmem:[#allocation12_spill] sm:$0xff] }
 0x1e2   : > { %v8538_v36 = vpop.xlane.xlu0 %1195  ;;  %v1533_v55 = vadd.f32 %v1469_v61, %v1389_v14  ;;  %v1471_v9 = vmul.f32 %v8479_v51, %v11914_v35  ;;  %v1530_v18 = vadd.f32 %v1466_v10, %v1386_v13  ;;  %v1736_v38 = vadd.f32 %v1672_v37, %v11915_v25  ;;  %v11918_v61 = vld [vmem:[#allocation13_spill] sm:$0xff] }
 0x1e3   : > { %v1613_v32 = vmul.f32 %v8504_v19, %v11916_v8  ;;  %v1388_v1 = vmul.f32 %v8499_v2, %v11917_v62  ;;  %v1801_v29 = vmax.f32 %v1737_v49, 0.0  ;;  %v1739_v53 = vadd.f32 %v1675_v17, %v11880_v44  ;;  %v11920_v48 = vld [vmem:[#allocation29_spill] sm:$0xff] }
 0x1e4   : > { %1906 = vadd.xlane.f32.xlu1 %v1797_v39  ;;  %v1798_v39 = vmax.f32 %v1734_v5, 0.0  ;;  %v1674_v45 = vadd.f32 %v1610_v43, %v1530_v18  ;;  %v11919_v5 = vld [vmem:[#allocation66_spill] sm:$0xff]  ;;  %v1470_v35 = vmul.f32 %v8479_v51, %v11920_v48  ;;  %v1612_v8 = vmul.f32 %v8504_v19, %v11886_v27  ;;  %v11921_v43 = vld [vmem:[#allocation47_spill] sm:$0xff] }
 0x1e5   : > { %v8547_v24 = vpop.xlane.xlu1 %1201  ;;  %1904 = vadd.xlane.f32.xlu0 %v1796_v60  ;;  %v1391_v60 = vmul.f32 %v8499_v2, %v11918_v61  ;;  %v1473_v10 = vmul.f32 %v8479_v51, %v11919_v5  ;;  %v1677_v37 = vadd.f32 %v1613_v32, %v1533_v55  ;;  %v1532_v13 = vadd.f32 %v1468_v47, %v1388_v1  ;;  %v11922_v32 = vld [vmem:[#allocation31_spill] sm:$0xff] }
 0x1e6   : > { %v8558_v12 = vpop.xlane.xlu0 %1199  ;;  %v1393_v49 = vmul.f32 %v8499_v2, %v11883_v58  ;;  %v1800_v44 = vmax.f32 %v1736_v38, 0.0  ;;  %v1738_v17 = vadd.f32 %v1674_v45, %v11885_v15  ;;  %v1615_v55 = vmul.f32 %v8504_v19, %v11921_v43  ;;  %v11928_v43 = vld [vmem:[#allocation30_spill] sm:$0xff] }
 0x1e7   : > { %v1390_v47 = vmul.f32 %v8499_v2, %v11882_v54  ;;  %v1472_v27 = vmul.f32 %v8479_v51, %v11922_v32  ;;  %v1475_v58 = vmul.f32 %v8479_v51, %v11888_v31  ;;  %v1741_v38 = vadd.f32 %v1677_v37, %v11841_v6 }
 0x1e8   : > { %1910 = vadd.xlane.f32.xlu1 %v1799_v42  ;;  %v1535_v42 = vadd.f32 %v1471_v9, %v1391_v60  ;;  %v1537_v18 = vadd.f32 %v1473_v10, %v1393_v49  ;;  %v1676_v15 = vadd.f32 %v1612_v8, %v1532_v13  ;;  %v1617_v54 = vmul.f32 %v8504_v19, %v11890_v46  ;;  %v11923_v60 = vld [vmem:[#allocation16_spill] sm:$0xff] }
 0x1e9   : > { %v8567_v14 = vpop.xlane.xlu1 %1205  ;;  %1908 = vadd.xlane.f32.xlu0 %v1798_v39  ;;  %v1803_v39 = vmax.f32 %v1739_v53, 0.0  ;;  %v1534_v1 = vadd.f32 %v1470_v35, %v1390_v47  ;;  %v11924_v53 = vld [vmem:[#allocation17_spill] sm:$0xff]  ;;  %v1802_v5 = vmax.f32 %v1738_v17, 0.0  ;;  %v11925_v10 = vld [vmem:[#allocation28_spill] sm:$0xff]  ;;  %v1474_v46 = vmul.f32 %v8479_v51, %v11893_v63 }
 0x1ea   : > { %v8574_v25 = vpop.xlane.xlu0 %1203  ;;  %v1679_v62 = vadd.f32 %v1615_v55, %v1535_v42  ;;  %v1395_v45 = vmul.f32 %v8499_v2, %v11924_v53  ;;  %v1740_v31 = vadd.f32 %v1676_v15, %v11891_v23  ;;  %v1614_v6 = vmul.f32 %v8504_v19, %v11925_v10  ;;  %v11929_v47 = vld [vmem:[#allocation53_spill] sm:$0xff] }
 0x1eb   : > { %v1681_v13 = vadd.f32 %v1617_v54, %v1537_v18  ;;  %v1805_v35 = vmax.f32 %v1741_v38, 0.0  ;;  %v1616_v55 = vmul.f32 %v8504_v19, %v11928_v43  ;;  %v11930_v18 = vld [vmem:[#allocation18_spill] sm:$0xff]  ;;  %v11963_v28 = vmov 2  }
 0x1ec   : > { %1914 = vadd.xlane.f32.xlu1 %v1801_v29  ;;  %v1392_v29 = vmul.f32 %v8499_v2, %v11923_v60  ;;  %v1539_v48 = vadd.f32 %v1475_v58, %v1395_v45  ;;  %v1743_v8 = vadd.f32 %v1679_v62, %v11802_v22  ;;  %v1678_v49 = vadd.f32 %v1614_v6, %v1534_v1  ;;  %v11932_v22 = vld [vmem:[#allocation19_spill] sm:$0xff]  ;;  %v11935_v6 = vld [vmem:[#allocation69_spill] sm:$0xff] }
 0x1ed   : > { %v8585_v9 = vpop.xlane.xlu1 %1209  ;;  %1912 = vadd.xlane.f32.xlu0 %v1800_v44  ;;  %v11927_v44 = vld [vmem:[#allocation70_spill] sm:$0xff]  ;;  %v1394_v32 = vmul.f32 %v8499_v2, %v11930_v18  ;;  %v1804_v63 = vmax.f32 %v1740_v31, 0.0  ;;  %v1397_v38 = vmul.f32 %v8499_v2, %v11932_v22  ;;  %v1745_v62 = vadd.f32 %v1681_v13, %v11742_v0  ;;  %v11937_v13 = vld [vmem:[#allocation57_spill] sm:$0xff] }
 0x1ee   : > { %v8592_v61 = vpop.xlane.xlu0 %1207  ;;  %v1536_v42 = vadd.f32 %v1472_v27, %v1392_v29  ;;  %v1477_v17 = vmul.f32 %v8479_v51, %v11927_v44  ;;  %v11931_v27 = vld [vmem:[#allocation67_spill] sm:$0xff]  ;;  %v1807_v29 = vmax.f32 %v1743_v8, 0.0  ;;  %v1476_v45 = vmul.f32 %v8479_v51, %v11774_v50  ;;  %v11939_v8 = vld [vmem:[#allocation21_spill] sm:$0xff] }
 0x1ef   : > { %v1742_v58 = vadd.f32 %v1678_v49, %v11931_v27  ;;  %v1538_v60 = vadd.f32 %v1474_v46, %v1394_v32  ;;  %v11936_v49 = vld [vmem:[#allocation32_spill] sm:$0xff]  ;;  %v1399_v50 = vmul.f32 %v8499_v2, %v11939_v8  ;;  %v1809_v43 = vmax.f32 %v1745_v62, 0.0 }
 0x1f0   : > { %1918 = vadd.xlane.f32.xlu1 %v1803_v39  ;;  %v1619_v39 = vmul.f32 %v8504_v19, %v11929_v47  ;;  %v1680_v1 = vadd.f32 %v1616_v55, %v1536_v42  ;;  %v1541_v53 = vadd.f32 %v1477_v17, %v1397_v38  ;;  %v1618_v44 = vmul.f32 %v8504_v19, %v11936_v49 }
 0x1f1   : > { %v8603_v37 = vpop.xlane.xlu1 %1213  ;;  %1916 = vadd.xlane.f32.xlu0 %v1802_v5  ;;  %v11934_v5 = vld [vmem:[#allocation72_spill] sm:$0xff]  ;;  %v1806_v0 = vmax.f32 %v1742_v58, 0.0  ;;  %v1621_v42 = vmul.f32 %v8504_v19, %v11937_v13  ;;  %v1620_v38 = vmul.f32 %v8504_v19, %v11814_v56  ;;  %v1398_v62 = vmul.f32 %v8499_v2, %v11815_v4 }
 0x1f2   : > { %11926 = vst [vmem:[#allocation65_spill] sm:$0xff] %v8603_v37  ;;  %v8610_v23 = vpop.xlane.xlu0 %1211  ;;  %v1683_v54 = vadd.f32 %v1619_v39, %v1539_v48  ;;  %v1479_v31 = vmul.f32 %v8479_v51, %v11934_v5  ;;  %v11938_v48 = vld [vmem:[#allocation20_spill] sm:$0xff]  ;;  %v1682_v47 = vadd.f32 %v1618_v44, %v1538_v60  ;;  %v7217_v13 = vmov 1985246804  }
 0x1f3   : > { %v1396_v46 = vmul.f32 %v8499_v2, %v11938_v48  ;;  %v1685_v39 = vadd.f32 %v1621_v42, %v1541_v53  ;;  %v2081_v42 = vunpack.c.l.s4 %v7217_v13 }
 0x1f4   : > { %1922 = vadd.xlane.f32.xlu1 %v1805_v35  ;;  %v1744_v35 = vadd.f32 %v1680_v1, %v11935_v6  ;;  %v1747_v55 = vadd.f32 %v1683_v54, %v11716_v20  ;;  %v1543_v32 = vadd.f32 %v1479_v31, %v1399_v50  ;;  %v1746_v22 = vadd.f32 %v1682_v47, %v11863_v3 }
 0x1f5   : > { %v8621_v15 = vpop.xlane.xlu1 %1217  ;;  %1920 = vadd.xlane.f32.xlu0 %v1804_v63  ;;  %v1540_v18 = vadd.f32 %v1476_v45, %v1396_v46  ;;  %v1478_v63 = vmul.f32 %v8479_v51, %v11714_v57  ;;  %v1623_v20 = vmul.f32 %v8504_v19, %v11907_v11  ;;  %v1749_v57 = vadd.f32 %v1685_v39, %v11690_v26 }
 0x1f6   : > { %11933 = vst [vmem:[#allocation33_spill] sm:$0xff] %v8621_v15  ;;  %v8628_v10 = vpop.xlane.xlu0 %1215  ;;  %v1808_v58 = vmax.f32 %v1744_v35, 0.0  ;;  %v1811_v54 = vmax.f32 %v1747_v55, 0.0  ;;  %v1810_v3 = vmax.f32 %v1746_v22, 0.0  ;;  %v1622_v11 = vmul.f32 %v8504_v19, %v11692_v52  ;;  %v11947_v55 = vld [vmem:[#allocation49_spill] sm:$0xff]  ;;  %v11978_v15 = vld [vmem:[#allocation26_spill] sm:$0xff] }
 0x1f7   : > { %v1684_v51 = vadd.f32 %v1620_v38, %v1540_v18  ;;  %v1687_v60 = vadd.f32 %v1623_v20, %v1543_v32  ;;  %v1813_v4 = vmax.f32 %v1749_v57, 0.0  ;;  %v2082_v8 = vunpack.c.0.s8 %v2081_v42  ;;  %v11950_v32 = vld [vmem:[#allocation39_spill] sm:$0xff]  ;;  %v11951_v57 = vld [vmem:[#allocation54_spill] sm:$0xff] }
 0x1f8   : > { %1926 = vadd.xlane.f32.xlu1 %v1807_v29  ;;  %v1542_v29 = vadd.f32 %v1478_v63, %v1398_v62 }
 0x1f9   : > { %v8639_v17 = vpop.xlane.xlu1 %1221  ;;  %1924 = vadd.xlane.f32.xlu0 %v1806_v0  ;;  %v1748_v56 = vadd.f32 %v1684_v51, %v7716_v41  ;;  %v1751_v2 = vadd.f32 %v1687_v60, %v11696_v21  ;;  %v7216_v21 = vmov 839922192   ;;  %v8687_v39 = vsub.s32 %v2082_v8, %v11947_v55  ;;  %v11952_v60 = vld [vmem:[#allocation37_spill] sm:$0xff] }
 0x1fa   : > { %11940 = vst [vmem:[#allocation59_spill] sm:$0xff] %v8639_v17  ;;  %v8644_v27 = vpop.xlane.xlu0 %1219  ;;  %v1686_v5 = vadd.f32 %v1622_v11, %v1542_v29  ;;  %v2074_v0 = vunpack.c.l.s4 %v7216_v21 }
 0x1fb   : > { %v1812_v31 = vmax.f32 %v1748_v56, 0.0  ;;  %v1815_v41 = vmax.f32 %v1751_v2, 0.0  ;;  %11949 = vst [vmem:[#allocation38_spill] sm:$0xff] %v8687_v39  ;;  %v8699_v56 = vld [vmem:[%s11242_s1 + $0x88] sm:$0xff] }
 0x1fc   : > { %1930 = vadd.xlane.f32.xlu1 %v1809_v43  ;;  %v1750_v6 = vadd.f32 %v1686_v5, %v11758_v7  ;;  %v2075_v46 = vunpack.c.0.s8 %v2074_v0  ;;  %11953 = vst [vmem:[#allocation45_spill] sm:$0xff] %v8699_v56  ;;  %v8710_v0 = vld [vmem:[%s11242_s1 + $0xa0] sm:$0xff] }
 0x1fd   : > { %v8653_v1 = vpop.xlane.xlu1 %1225  ;;  %1928 = vadd.xlane.f32.xlu0 %v1808_v58 }
 0x1fe   : > { %11941 = vst [vmem:[#allocation25_spill] sm:$0xff] %v8653_v1  ;;  %v8656_v53 = vpop.xlane.xlu0 %1223  ;;  %v1814_v52 = vmax.f32 %v1750_v6, 0.0  ;;  %v8684_v47 = vsub.s32 %v2075_v46, %v11947_v55  ;;  %v11955_v46 = vld [vmem:[#allocation48_spill] sm:$0xff] }
 0x200   : > { %1934 = vadd.xlane.f32.xlu1 %v1811_v54  ;;  %11948 = vst [vmem:[#allocation64_spill] sm:$0xff] %v8684_v47 }
 0x201   : > { %v8661_v45 = vpop.xlane.xlu1 %1229  ;;  %1932 = vadd.xlane.f32.xlu0 %v1810_v3 }
 0x202   : > { %11942 = vst [vmem:[#allocation11_spill] sm:$0xff] %v8661_v45  ;;  %v8664_v26 = vpop.xlane.xlu0 %1227 }
 0x204   : > { %1938 = vadd.xlane.f32.xlu1 %v1813_v4 }
 0x205   : > { %v8667_v35 = vpop.xlane.xlu1 %1233  ;;  %1936 = vadd.xlane.f32.xlu0 %v1812_v31 }
 0x206   : > { %11943 = vst [vmem:[#allocation61_spill] sm:$0xff] %v8667_v35  ;;  %v8669_v49 = vpop.xlane.xlu0 %1231 }
 0x208   : > { %1942 = vadd.xlane.f32.xlu1 %v1815_v41  ;;  %v11954_v41 = vld [vmem:[#allocation24_spill] sm:$0xff] }
 0x209   : > { %v8671_v19 = vpop.xlane.xlu1 %1237  ;;  %1940 = vadd.xlane.f32.xlu0 %v1814_v52 }
 0x20a   : > { %11944 = vst [vmem:[#allocation7_spill] sm:$0xff] %v8671_v19  ;;  %v8673_v44 = vpop.xlane.xlu0 %1235  ;;  %v11969_v19 = vld [vmem:[#allocation71_spill] sm:$0xff] }
 0x20d   : > { %v8675_v48 = vpop.xlane.xlu1 %1241 }
 0x20e   : > { %11945 = vst [vmem:[#allocation41_spill] sm:$0xff] %v8675_v48  ;;  %v8677_v7 = vpop.xlane.xlu0 %1239 }
 0x211   : > { %v8679_v50 = vpop.xlane.xlu1 %1245 }
 0x212   : > { %11946 = vst [vmem:[#allocation27_spill] sm:$0xff] %v8679_v50  ;;  %v8681_v43 = vpop.xlane.xlu0 %1243  ;;  %v11967_v50 = vld [vmem:[#allocation42_spill] sm:$0xff] }
 0x215   : > { %v1819_v18 = vpop.xlane.xlu1 %1818 }
 0x216   : > { %v1945_v63 = vadd.f32 %v1819_v18, %v11950_v32  ;;  %v8690_v58 = vpop.xlane.xlu0 %1816 }
 0x218   : > { %v2093_v22 = vrot.slane %v1945_v63, %v8684_v47  ;;  %v2100_v38 = vrot.slane %v1945_v63, %v8687_v39 }
 0x219   : > { %v1823_v20 = vpop.xlane.xlu1 %1822 }
 0x21a   : > { %v2970_v62 = vcombine.low %v2093_v22, %v2100_v38  ;;  %v1821_v54 = vpop.xlane.xlu0 %1820  ;;  %v1947_v51 = vadd.f32 %v1823_v20, %v11951_v57  ;;  %v8721_v22 = vld [vmem:[%s11242_s1 + $0xb0] sm:$0xff]  ;;  %v11956_v57 = vld [vmem:[#allocation46_spill] sm:$0xff] }
 0x21b   : > { %v1946_v29 = vadd.f32 %v1821_v54, %v11952_v60 }
 0x21c   : > { %3037 = vperm.xlu1 %7149, %v2970_v62   ;;  %v2121_v5 = vrot.slane %v1947_v51, %v8684_v47  ;;  %v2128_v31 = vrot.slane %v1947_v51, %v8687_v39 }
 0x21d   : > { %v1827_v3 = vpop.xlane.xlu1 %1826  ;;  %v2107_v11 = vrot.slane %v1946_v29, %v8684_v47  ;;  %v2114_v4 = vrot.slane %v1946_v29, %v8687_v39  ;;  %v8732_v29 = vld [vmem:[%s11242_s1 + $0xc0] sm:$0xff] }
 0x21e   : > { %v1825_v2 = vpop.xlane.xlu0 %1824  ;;  %v2972_v42 = vcombine.low %v2121_v5, %v2128_v31  ;;  %v1949_v8 = vadd.f32 %v1827_v3, %v11955_v46  ;;  %v11958_v46 = vld [vmem:[#allocation51_spill] sm:$0xff] }
 0x21f   : > { %v2971_v6 = vcombine.low %v2107_v11, %v2114_v4  ;;  %v1948_v52 = vadd.f32 %v1825_v2, %v11954_v41  ;;  %3788 = vperm.xlu0 %7148, %v8699_v56   ;;  %v11957_v4 = vld [vmem:[#allocation9_spill] sm:$0xff]  ;;  %v8743_v41 = vld [vmem:[%s11242_s1 + $0xd0] sm:$0xff] }
 0x220   : > { %v2149_v20 = vrot.slane %v1949_v8, %v8684_v47  ;;  %v2156_v62 = vrot.slane %v1949_v8, %v8687_v39 }
 0x221   : > { %v1831_v21 = vpop.xlane.xlu1 %1830  ;;  %3040 = vperm.xlu1 %7149, %v2971_v6   ;;  %v2135_v18 = vrot.slane %v1948_v52, %v8684_v47  ;;  %v2142_v32 = vrot.slane %v1948_v52, %v8687_v39 }
 0x222   : > { %v1829_v13 = vpop.xlane.xlu0 %1828  ;;  %v2974_v11 = vcombine.low %v2149_v20, %v2156_v62  ;;  %v1951_v2 = vadd.f32 %v1831_v21, %v11957_v4  ;;  %v8765_v4 = vld [vmem:[%s11242_s1 + $0xf0] sm:$0xff] }
 0x223   : > { %3800 = vperm.xlu0 %7148, %v8710_v0   ;;  %v2973_v54 = vcombine.low %v2135_v18, %v2142_v32  ;;  %v1950_v51 = vadd.f32 %v1829_v13, %v11956_v57  ;;  %v8754_v32 = vld [vmem:[%s11242_s1 + $0xe0] sm:$0xff] }
 0x224   : > { %v2177_v13 = vrot.slane %v1951_v2, %v8684_v47  ;;  %11959 = vst [vmem:[#allocation12_spill] sm:$0xff] %v8754_v32 }
 0x225   : > { %v8716_v63 = vpop.xlane.xlu1 %1834  ;;  %3043 = vperm.xlu1 %7149, %v2972_v42   ;;  %v2163_v5 = vrot.slane %v1950_v51, %v8684_v47  ;;  %v2170_v31 = vrot.slane %v1950_v51, %v8687_v39  ;;  %v2184_v42 = vrot.slane %v1951_v2, %v8687_v39  ;;  %v11960_v51 = vld [vmem:[#allocation10_spill] sm:$0xff] }
 0x226   : > { %v1833_v38 = vpop.xlane.xlu0 %1832 }
 0x227   : > { %3808 = vperm.xlu0 %7148, %v8721_v22   ;;  %v2975_v21 = vcombine.low %v2163_v5, %v2170_v31  ;;  %v1952_v8 = vadd.f32 %v1833_v38, %v11958_v46  ;;  %v2976_v62 = vcombine.low %v2177_v13, %v2184_v42  ;;  %v11961_v42 = vld [vmem:[#allocation60_spill] sm:$0xff]  ;;  %v8776_v46 = vld [vmem:[%s11242_s1 + $0x80] sm:$0xff] }
 0x229   : > { %v8727_v60 = vpop.xlane.xlu1 %1838  ;;  %3046 = vperm.xlu1 %7149, %v2973_v54   ;;  %v2191_v54 = vrot.slane %v1952_v8, %v8684_v47  ;;  %v2198_v57 = vrot.slane %v1952_v8, %v8687_v39 }
 0x22a   : > { %v1837_v3 = vpop.xlane.xlu0 %1836 }
 0x22b   : > { %3816 = vperm.xlu0 %7148, %v8732_v29   ;;  %v2977_v5 = vcombine.low %v2191_v54, %v2198_v57 }
 0x22d   : > { %v8738_v6 = vpop.xlane.xlu1 %1842  ;;  %3049 = vperm.xlu1 %7149, %v2974_v11   ;;  %v1954_v11 = vadd.f32 %v1837_v3, %v11960_v51  ;;  %v11962_v51 = vld [vmem:[#allocation44_spill] sm:$0xff] }
 0x22e   : > { %v1841_v52 = vpop.xlane.xlu0 %1840 }
 0x22f   : > { %3824 = vperm.xlu0 %7148, %v8743_v41   ;;  %v2219_v31 = vrot.slane %v1954_v11, %v8684_v47  ;;  %v2226_v13 = vrot.slane %v1954_v11, %v8687_v39 }
 0x231   : > { %v8749_v18 = vpop.xlane.xlu1 %1846  ;;  %3052 = vperm.xlu1 %7149, %v2975_v21   ;;  %v1956_v21 = vadd.f32 %v1841_v52, %v11961_v42 }
 0x232   : > { %v1845_v20 = vpop.xlane.xlu0 %1844 }
 0x233   : > { %3832 = vperm.xlu0 %7148, %v8754_v32   ;;  %v2247_v54 = vrot.slane %v1956_v21, %v8684_v47  ;;  %v2254_v57 = vrot.slane %v1956_v21, %v8687_v39  ;;  %v1958_v11 = vadd.f32 %v1845_v20, %v11962_v51 }
 0x235   : > { %v8760_v38 = vpop.xlane.xlu1 %1850  ;;  %3055 = vperm.xlu1 %7149, %v2976_v62   ;;  %v2979_v62 = vcombine.low %v2219_v31, %v2226_v13  ;;  %v2981_v31 = vcombine.low %v2247_v54, %v2254_v57  ;;  %v2275_v13 = vrot.slane %v1958_v11, %v8684_v47  ;;  %v2282_v21 = vrot.slane %v1958_v11, %v8687_v39 }
 0x236   : > { %v1849_v2 = vpop.xlane.xlu0 %1848 }
 0x237   : > { %3840 = vperm.xlu0 %7148, %v8765_v4   ;;  %v1960_v20 = vadd.f32 %v1849_v2, %v11965_v34  ;;  %v8810_v34 = vld [vmem:[%s11242_s1 + $0xb8] sm:$0xff] }
 0x238   : > { %11968 = vst [vmem:[#allocation29_spill] sm:$0xff] %v8810_v34 }
 0x239   : > { %v8771_v3 = vpop.xlane.xlu1 %1854  ;;  %3058 = vperm.xlu1 %7149, %v2977_v5   ;;  %v8788_v5 = vld [vmem:[%s11242_s1 + $0x98] sm:$0xff]  ;;  %v2303_v54 = vrot.slane %v1960_v20, %v8684_v47  ;;  %v2310_v57 = vrot.slane %v1960_v20, %v8687_v39 }
 0x23a   : > { %v1853_v8 = vpop.xlane.xlu0 %1852  ;;  %11964 = vst [vmem:[#allocation13_spill] sm:$0xff] %v8788_v5 }
 0x23b   : > { %7151 = vset.pattern.permute.xlu0 %v11963_v28  ;;  %v2983_v28 = vcombine.low %v2275_v13, %v2282_v21  ;;  %v1962_v11 = vadd.f32 %v1853_v8, %v11967_v50 }
 0x23c   : > { %3992 = vperm.xlu0 %7151, %v8776_v46  }
 0x23d   : > { %v8782_v52 = vpop.xlane.xlu1 %1858  ;;  %3064 = vperm.xlu1 %7149, %v2979_v62   ;;  %v8799_v62 = vld [vmem:[%s11242_s1 + $0xa8] sm:$0xff]  ;;  %v2331_v13 = vrot.slane %v1962_v11, %v8684_v47  ;;  %v2338_v21 = vrot.slane %v1962_v11, %v8687_v39 }
 0x23e   : > { %v1857_v42 = vpop.xlane.xlu0 %1856  ;;  %11966 = vst [vmem:[#allocation66_spill] sm:$0xff] %v8799_v62 }
 0x23f   : > { %v1964_v20 = vadd.f32 %v1857_v42, %v11969_v19  ;;  %v2987_v8 = vcombine.low %v2331_v13, %v2338_v21  ;;  %v8832_v19 = vld [vmem:[%s11242_s1 + $0xd8] sm:$0xff] }
 0x240   : > { %4004 = vperm.xlu0 %7151, %v8788_v5   ;;  %11972 = vst [vmem:[#allocation31_spill] sm:$0xff] %v8832_v19 }
 0x241   : > { %v8793_v51 = vpop.xlane.xlu1 %1862  ;;  %3070 = vperm.xlu1 %7149, %v2981_v31   ;;  %v2985_v31 = vcombine.low %v2303_v54, %v2310_v57  ;;  %v2359_v54 = vrot.slane %v1964_v20, %v8684_v47  ;;  %v2366_v57 = vrot.slane %v1964_v20, %v8687_v39 }
 0x242   : > { %v1861_v55 = vpop.xlane.xlu0 %1860 }
 0x244   : > { %4012 = vperm.xlu0 %7151, %v8799_v62   ;;  %v11971_v62 = vld [vmem:[#allocation74_spill] sm:$0xff] }
 0x245   : > { %v8804_v48 = vpop.xlane.xlu1 %1866  ;;  %3076 = vperm.xlu1 %7149, %v2983_v28   ;;  %v8821_v28 = vld [vmem:[%s11242_s1 + $0xc8] sm:$0xff]  ;;  %v1966_v11 = vadd.f32 %v1861_v55, %v11971_v62 }
 0x246   : > { %v1865_v2 = vpop.xlane.xlu0 %1864  ;;  %11970 = vst [vmem:[#allocation47_spill] sm:$0xff] %v8821_v28  ;;  %v8843_v55 = vld [vmem:[%s11242_s1 + $0xe8] sm:$0xff] }
 0x247   : > { %v2387_v13 = vrot.slane %v1966_v11, %v8684_v47  ;;  %v2394_v21 = vrot.slane %v1966_v11, %v8687_v39  ;;  %11974 = vst [vmem:[#allocation16_spill] sm:$0xff] %v8843_v55 }
 0x248   : > { %4020 = vperm.xlu0 %7151, %v8810_v34   ;;  %v11973_v34 = vld [vmem:[#allocation76_spill] sm:$0xff] }
 0x249   : > { %v8815_v35 = vpop.xlane.xlu1 %1870  ;;  %3082 = vperm.xlu1 %7149, %v2985_v31   ;;  %v2989_v31 = vcombine.low %v2359_v54, %v2366_v57  ;;  %v1968_v20 = vadd.f32 %v1865_v2, %v11973_v34  ;;  %v8854_v34 = vld [vmem:[%s11242_s1 + $0xf8] sm:$0xff] }
 0x24a   : > { %v1869_v50 = vpop.xlane.xlu0 %1868  ;;  %11976 = vst [vmem:[#allocation17_spill] sm:$0xff] %v8854_v34 }
 0x24b   : > { %v2415_v54 = vrot.slane %v1968_v20, %v8684_v47  ;;  %v2422_v57 = vrot.slane %v1968_v20, %v8687_v39 }
 0x24c   : > { %4028 = vperm.xlu0 %7151, %v8821_v28   ;;  %v11975_v28 = vld [vmem:[#allocation40_spill] sm:$0xff] }
 0x24d   : > { %v8826_v5 = vpop.xlane.xlu1 %1874  ;;  %3088 = vperm.xlu1 %7149, %v2987_v8   ;;  %v2991_v8 = vcombine.low %v2387_v13, %v2394_v21  ;;  %v1970_v11 = vadd.f32 %v1869_v50, %v11975_v28 }
 0x24e   : > { %v1873_v42 = vpop.xlane.xlu0 %1872 }
 0x24f   : > { %v2443_v13 = vrot.slane %v1970_v11, %v8684_v47  ;;  %v2450_v21 = vrot.slane %v1970_v11, %v8687_v39 }
 0x250   : > { %4036 = vperm.xlu0 %7151, %v8832_v19   ;;  %v11977_v19 = vld [vmem:[#allocation15_spill] sm:$0xff] }
 0x251   : > { %v8837_v45 = vpop.xlane.xlu1 %1878  ;;  %3094 = vperm.xlu1 %7149, %v2989_v31   ;;  %v2993_v31 = vcombine.low %v2415_v54, %v2422_v57  ;;  %v1972_v20 = vadd.f32 %v1873_v42, %v11977_v19  ;;  %v2995_v50 = vcombine.low %v2443_v13, %v2450_v21  ;;  %v11979_v57 = vmov 3   ;;  %v11980_v13 = vld [vmem:[#allocation50_spill] sm:$0xff] }
 0x252   : > { %v1877_v62 = vpop.xlane.xlu0 %1876 }
 0x253   : > { %v1974_v37 = vadd.f32 %v1877_v62, %v11978_v15 }
 0x254   : > { %4044 = vperm.xlu0 %7151, %v8843_v55   ;;  %v2478_v55 = vrot.slane %v1972_v20, %v8687_v39 }
 0x255   : > { %v8848_v1 = vpop.xlane.xlu1 %1882  ;;  %3100 = vperm.xlu1 %7149, %v2991_v8   ;;  %v2471_v8 = vrot.slane %v1972_v20, %v8684_v47  ;;  %v2499_v11 = vrot.slane %v1974_v37, %v8684_v47 }
 0x256   : > { %v1881_v2 = vpop.xlane.xlu0 %1880 }
 0x257   : > { %v2997_v42 = vcombine.low %v2471_v8, %v2478_v55  ;;  %v1976_v21 = vadd.f32 %v1881_v2, %v11980_v13 }
 0x258   : > { %4052 = vperm.xlu0 %7151, %v8854_v34  }
 0x259   : > { %v8859_v17 = vpop.xlane.xlu1 %1886  ;;  %3106 = vperm.xlu1 %7149, %v2993_v31   ;;  %v2506_v31 = vrot.slane %v1974_v37, %v8687_v39  ;;  %v2527_v20 = vrot.slane %v1976_v21, %v8684_v47 }
 0x25a   : > { %v1885_v28 = vpop.xlane.xlu0 %1884 }
 0x25b   : > { %v2999_v62 = vcombine.low %v2499_v11, %v2506_v31 }
 0x25c   : > { %7154 = vset.pattern.permute.xlu0 %v11979_v57  ;;  %v2534_v57 = vrot.slane %v1976_v21, %v8687_v39 }
 0x25d   : > { %v8865_v54 = vpop.xlane.xlu1 %1890  ;;  %4188 = vperm.xlu0 %7154, %v8699_v56   ;;  %3112 = vperm.xlu1 %7149, %v2995_v50   ;;  %v1978_v50 = vadd.f32 %v1885_v28, %v8494_v30 }
 0x25e   : > { %v1889_v19 = vpop.xlane.xlu0 %1888  ;;  %v3001_v2 = vcombine.low %v2527_v20, %v2534_v57 }
 0x25f   : > { %v2555_v8 = vrot.slane %v1978_v50, %v8684_v47  ;;  %v2562_v13 = vrot.slane %v1978_v50, %v8687_v39 }
 0x261   : > { %v8872_v34 = vpop.xlane.xlu1 %1894  ;;  %4200 = vperm.xlu0 %7154, %v8710_v0   ;;  %3118 = vperm.xlu1 %7149, %v2997_v42   ;;  %v1980_v42 = vadd.f32 %v1889_v19, %v8522_v16  ;;  %v3003_v30 = vcombine.low %v2555_v8, %v2562_v13  ;;  %v11981_v16 = vld [vmem:[#allocation36_spill] sm:$0xff] }
 0x262   : > { %v1893_v15 = vpop.xlane.xlu0 %1892  ;;  %v1944_v19 = vadd.f32 %v8690_v58, %v11981_v16 }
 0x263   : > { %v2583_v28 = vrot.slane %v1980_v42, %v8684_v47  ;;  %v2590_v21 = vrot.slane %v1980_v42, %v8687_v39 }
 0x264   : > { %v2086_v42 = vrot.slane %v1944_v19, %v8687_v39 }
 0x265   : > { %v8878_v55 = vpop.xlane.xlu1 %1898  ;;  %4208 = vperm.xlu0 %7154, %v8721_v22   ;;  %3124 = vperm.xlu1 %7149, %v2999_v62   ;;  %v1982_v62 = vadd.f32 %v1893_v15, %v8538_v36  ;;  %v3005_v50 = vcombine.low %v2583_v28, %v2590_v21  ;;  %v2079_v15 = vrot.slane %v1944_v19, %v8684_v47 }
 0x266   : > { %v1897_v37 = vpop.xlane.xlu0 %1896 }
 0x267   : > { %v2618_v8 = vrot.slane %v1982_v62, %v8687_v39  ;;  %v1984_v13 = vadd.f32 %v1897_v37, %v8558_v12 }
 0x269   : > { %v8884_v11 = vpop.xlane.xlu1 %1902  ;;  %4216 = vperm.xlu0 %7154, %v8732_v29   ;;  %3130 = vperm.xlu1 %7149, %v3001_v2   ;;  %v2611_v2 = vrot.slane %v1982_v62, %v8684_v47  ;;  %v2639_v21 = vrot.slane %v1984_v13, %v8684_v47  ;;  %v2646_v62 = vrot.slane %v1984_v13, %v8687_v39 }
 0x26a   : > { %v1901_v31 = vpop.xlane.xlu0 %1900 }
 0x26b   : > { %v3007_v28 = vcombine.low %v2611_v2, %v2618_v8  ;;  %v1986_v12 = vadd.f32 %v1901_v31, %v8574_v25  ;;  %v3009_v2 = vcombine.low %v2639_v21, %v2646_v62 }
 0x26d   : > { %v8890_v57 = vpop.xlane.xlu1 %1906  ;;  %4224 = vperm.xlu0 %7154, %v8743_v41   ;;  %3136 = vperm.xlu1 %7149, %v3003_v30   ;;  %v11983_v30 = vld [vmem:[#allocation62_spill] sm:$0xff]  ;;  %v2667_v8 = vrot.slane %v1986_v12, %v8684_v47  ;;  %v2674_v13 = vrot.slane %v1986_v12, %v8687_v39 }
 0x26e   : > { %v1905_v20 = vpop.xlane.xlu0 %1904  ;;  %v1953_v58 = vadd.f32 %v8716_v63, %v11983_v30  ;;  %v11985_v30 = vmov 0  }
 0x26f   : > { %v1988_v25 = vadd.f32 %v1905_v20, %v8592_v61  ;;  %v3011_v21 = vcombine.low %v2667_v8, %v2674_v13 }
 0x270   : > { %v2212_v19 = vrot.slane %v1953_v58, %v8687_v39 }
 0x271   : > { %v8898_v56 = vpop.xlane.xlu1 %1910  ;;  %4232 = vperm.xlu0 %7154, %v8754_v32   ;;  %3142 = vperm.xlu1 %7149, %v3005_v50   ;;  %v2969_v50 = vcombine.low %v2079_v15, %v2086_v42  ;;  %v2205_v32 = vrot.slane %v1953_v58, %v8684_v47  ;;  %v2695_v62 = vrot.slane %v1988_v25, %v8684_v47 }
 0x272   : > { %11982 = vst [vmem:[#allocation28_spill] sm:$0xff] %v8898_v56  ;;  %v1909_v36 = vpop.xlane.xlu0 %1908  ;;  %v11984_v56 = vld [vmem:[#allocation35_spill] sm:$0xff]  ;;  %v2702_v61 = vrot.slane %v1988_v25, %v8687_v39 }
 0x273   : > { %v1955_v63 = vadd.f32 %v8727_v60, %v11984_v56  ;;  %v2978_v42 = vcombine.low %v2205_v32, %v2212_v19  ;;  %v11986_v56 = vld [vmem:[#allocation8_spill] sm:$0xff]  ;;  %v1990_v20 = vadd.f32 %v1909_v36, %v8610_v23 }
 0x274   : > { %v1957_v60 = vadd.f32 %v8738_v6, %v11986_v56  ;;  %v3013_v8 = vcombine.low %v2695_v62, %v2702_v61 }
 0x275   : > { %v8908_v37 = vpop.xlane.xlu1 %1914  ;;  %4240 = vperm.xlu0 %7154, %v8765_v4   ;;  %3148 = vperm.xlu1 %7149, %v3007_v28   ;;  %v2233_v58 = vrot.slane %v1955_v63, %v8684_v47  ;;  %v2240_v28 = vrot.slane %v1955_v63, %v8687_v39  ;;  %v2723_v13 = vrot.slane %v1990_v20, %v8684_v47 }
 0x276   : > { %v1913_v16 = vpop.xlane.xlu0 %1912  ;;  %v2261_v19 = vrot.slane %v1957_v60, %v8684_v47  ;;  %v2268_v63 = vrot.slane %v1957_v60, %v8687_v39  ;;  %v2730_v25 = vrot.slane %v1990_v20, %v8687_v39  ;;  %v11988_v60 = vld [vmem:[#allocation34_spill] sm:$0xff] }
 0x277   : > { %v2980_v32 = vcombine.low %v2233_v58, %v2240_v28  ;;  %v1992_v23 = vadd.f32 %v1913_v16, %v8628_v10 }
 0x278   : > { %v2982_v58 = vcombine.low %v2261_v19, %v2268_v63 }
 0x279   : > { %v8918_v31 = vpop.xlane.xlu1 %1918  ;;  %7155 = vset.pattern.permute.xlu0 %v11985_v30  ;;  %3154 = vperm.xlu1 %7149, %v3009_v2   ;;  %v11987_v2 = vld [vmem:[#allocation43_spill] sm:$0xff]  ;;  %v2751_v62 = vrot.slane %v1992_v23, %v8684_v47  ;;  %v2758_v61 = vrot.slane %v1992_v23, %v8687_v39 }
 0x27a   : > { %3034 = vperm.xlu0 %7155, %v2969_v50   ;;  %v1917_v15 = vpop.xlane.xlu0 %1916  ;;  %v1959_v6 = vadd.f32 %v8749_v18, %v11987_v2  ;;  %v1961_v18 = vadd.f32 %v8760_v38, %v11988_v60  ;;  %v11989_v2 = vld [vmem:[#allocation58_spill] sm:$0xff] }
 0x27b   : > { %v1994_v10 = vadd.f32 %v1917_v15, %v8644_v27  ;;  %v1963_v38 = vadd.f32 %v8771_v3, %v11989_v2 }
 0x27c   : > { %v2289_v28 = vrot.slane %v1959_v6, %v8684_v47  ;;  %v2296_v56 = vrot.slane %v1959_v6, %v8687_v39  ;;  %v2317_v19 = vrot.slane %v1961_v18, %v8684_v47  ;;  %v2324_v63 = vrot.slane %v1961_v18, %v8687_v39 }
 0x27d   : > { %v8928_v12 = vpop.xlane.xlu1 %1922  ;;  %3160 = vperm.xlu1 %7149, %v3011_v21   ;;  %v3015_v21 = vcombine.low %v2723_v13, %v2730_v25  ;;  %v3017_v6 = vcombine.low %v2751_v62, %v2758_v61  ;;  %v2786_v13 = vrot.slane %v1994_v10, %v8687_v39 }
 0x27e   : > { %3061 = vperm.xlu0 %7155, %v2978_v42   ;;  %v1921_v50 = vpop.xlane.xlu0 %1920  ;;  %v2986_v23 = vcombine.low %v2317_v19, %v2324_v63 }
 0x27f   : > { %v1996_v27 = vadd.f32 %v1921_v50, %v8656_v53 }
 0x281   : > { %v8937_v36 = vpop.xlane.xlu1 %1926  ;;  %3166 = vperm.xlu1 %7149, %v3013_v8   ;;  %v2779_v8 = vrot.slane %v1994_v10, %v8684_v47  ;;  %v2807_v18 = vrot.slane %v1996_v27, %v8684_v47 }
 0x282   : > { %3067 = vperm.xlu0 %7155, %v2980_v32   ;;  %v1925_v42 = vpop.xlane.xlu0 %1924  ;;  %v2984_v32 = vcombine.low %v2289_v28, %v2296_v56  ;;  %v2352_v28 = vrot.slane %v1963_v38, %v8687_v39  ;;  %v11990_v56 = vld [vmem:[#allocation23_spill] sm:$0xff] }
 0x283   : > { %v1965_v3 = vadd.f32 %v8782_v52, %v11990_v56  ;;  %v3019_v60 = vcombine.low %v2779_v8, %v2786_v13  ;;  %v1998_v53 = vadd.f32 %v1925_v42, %v8664_v26  ;;  %v11992_v13 = vld [vmem:[#allocation75_spill] sm:$0xff] }
 0x285   : > { %v8946_v16 = vpop.xlane.xlu1 %1930  ;;  %3172 = vperm.xlu1 %7149, %v3015_v21   ;;  %v2814_v21 = vrot.slane %v1996_v27, %v8687_v39  ;;  %v2373_v61 = vrot.slane %v1965_v3, %v8684_v47  ;;  %v2380_v10 = vrot.slane %v1965_v3, %v8687_v39  ;;  %v2835_v63 = vrot.slane %v1998_v53, %v8684_v47 }
 0x286   : > { %3073 = vperm.xlu0 %7155, %v2982_v58   ;;  %v1929_v20 = vpop.xlane.xlu0 %1928  ;;  %v2345_v58 = vrot.slane %v1963_v38, %v8684_v47  ;;  %v2842_v2 = vrot.slane %v1998_v53, %v8687_v39  ;;  %v1969_v27 = vadd.f32 %v8804_v48, %v11992_v13 }
 0x287   : > { %v3021_v52 = vcombine.low %v2807_v18, %v2814_v21  ;;  %v2000_v38 = vadd.f32 %v1929_v20, %v8669_v49  ;;  %v2990_v42 = vcombine.low %v2373_v61, %v2380_v10  ;;  %v11993_v18 = vld [vmem:[#allocation77_spill] sm:$0xff] }
 0x288   : > { %v2988_v62 = vcombine.low %v2345_v58, %v2352_v28  ;;  %v2429_v3 = vrot.slane %v1969_v27, %v8684_v47  ;;  %v1971_v48 = vadd.f32 %v8815_v35, %v11993_v18 }
 0x289   : > { %v8955_v15 = vpop.xlane.xlu1 %1934  ;;  %3178 = vperm.xlu1 %7149, %v3017_v6   ;;  %v2870_v58 = vrot.slane %v2000_v38, %v8687_v39 }
 0x28a   : > { %3079 = vperm.xlu0 %7155, %v2984_v32   ;;  %v1933_v25 = vpop.xlane.xlu0 %1932  ;;  %v11991_v32 = vld [vmem:[#allocation73_spill] sm:$0xff] }
 0x28b   : > { %v1967_v19 = vadd.f32 %v8793_v51, %v11991_v32  ;;  %v2863_v51 = vrot.slane %v2000_v38, %v8684_v47  ;;  %v2002_v28 = vadd.f32 %v1933_v25, %v8673_v44  ;;  %v2457_v32 = vrot.slane %v1971_v48, %v8684_v47 }
 0x28d   : > { %v8964_v50 = vpop.xlane.xlu1 %1938  ;;  %3184 = vperm.xlu1 %7149, %v3019_v60   ;;  %v2401_v6 = vrot.slane %v1967_v19, %v8684_v47  ;;  %v2408_v8 = vrot.slane %v1967_v19, %v8687_v39  ;;  %v2436_v60 = vrot.slane %v1969_v27, %v8687_v39  ;;  %v3025_v21 = vcombine.low %v2863_v51, %v2870_v58  ;;  %v11997_v27 = vld [vmem:[#allocation63_spill] sm:$0xff] }
 0x28e   : > { %3085 = vperm.xlu0 %7155, %v2986_v23   ;;  %v1937_v26 = vpop.xlane.xlu0 %1936  ;;  %v3023_v23 = vcombine.low %v2835_v63, %v2842_v2  ;;  %v2891_v53 = vrot.slane %v2002_v28, %v8684_v47  ;;  %v2464_v19 = vrot.slane %v1971_v48, %v8687_v39 }
 0x28f   : > { %v2992_v20 = vcombine.low %v2401_v6, %v2408_v8  ;;  %v2004_v44 = vadd.f32 %v1937_v26, %v8677_v7  ;;  %v2994_v10 = vcombine.low %v2429_v3, %v2436_v60  ;;  %v11999_v60 = vld [vmem:[#allocation68_spill] sm:$0xff] }
 0x290   : > { %v2996_v6 = vcombine.low %v2457_v32, %v2464_v19  ;;  %v1977_v18 = vadd.f32 %v8848_v1, %v11999_v60  ;;  %v9034_v19 = vld [vmem:[%s11242_s1 + $0x90] sm:$0xff] }
 0x291   : > { %3190 = vperm.xlu1 %7149, %v3021_v52   ;;  %v8980_v56 = vpop.xlane.xlu1 %1942  ;;  %v11995_v52 = vld [vmem:[#allocation14_spill] sm:$0xff]  ;;  %v2919_v2 = vrot.slane %v2004_v44, %v8684_v47  ;;  %v2926_v38 = vrot.slane %v2004_v44, %v8687_v39 }
 0x292   : > { %3091 = vperm.xlu0 %7155, %v2988_v62   ;;  %v1941_v49 = vpop.xlane.xlu0 %1940  ;;  %v2898_v62 = vrot.slane %v2002_v28, %v8687_v39  ;;  %v1973_v35 = vadd.f32 %v8826_v5, %v11995_v52  ;;  %v1975_v5 = vadd.f32 %v8837_v45, %v11997_v27  ;;  %v2548_v44 = vrot.slane %v1977_v18, %v8687_v39 }
 0x293   : > { %v2006_v7 = vadd.f32 %v1941_v49, %v8681_v43 }
 0x294   : > { %v3027_v63 = vcombine.low %v2891_v53, %v2898_v62  ;;  %v2485_v8 = vrot.slane %v1973_v35, %v8684_v47  ;;  %v2492_v13 = vrot.slane %v1973_v35, %v8687_v39  ;;  %v2520_v3 = vrot.slane %v1975_v5, %v8687_v39 }
 0x295   : > { %3196 = vperm.xlu1 %7149, %v3023_v23   ;;  %v3029_v23 = vcombine.low %v2919_v2, %v2926_v38  ;;  %v2947_v51 = vrot.slane %v2006_v7, %v8684_v47  ;;  %v2954_v58 = vrot.slane %v2006_v7, %v8687_v39  ;;  %v2541_v62 = vrot.slane %v1977_v18, %v8684_v47 }
 0x296   : > { %3097 = vperm.xlu0 %7155, %v2990_v42   ;;  %v2998_v49 = vcombine.low %v2485_v8, %v2492_v13  ;;  %v1983_v8 = vadd.f32 %v8872_v34, %v8531_v40 }
 0x297   : > { %v8989_v25 = vpop.permute.xlu1 %3037  ;;  %v3031_v45 = vcombine.low %v2947_v51, %v2954_v58  ;;  %v3002_v52 = vcombine.low %v2541_v62, %v2548_v44 }
 0x298   : > { %v2625_v27 = vrot.slane %v1983_v8, %v8684_v47 }
 0x299   : > { %3202 = vperm.xlu1 %7149, %v3025_v21  }
 0x29a   : > { %3103 = vperm.xlu0 %7155, %v2992_v20   ;;  %v8991_v61 = vpop.permute.xlu0 %3788  ;;  %v2513_v20 = vrot.slane %v1975_v5, %v8684_v47  ;;  %v2632_v5 = vrot.slane %v1983_v8, %v8687_v39 }
 0x29b   : > { %11994 = vst [vmem:[#allocation70_spill] sm:$0xff] %v8991_v61 }
 0x29c   : > { %v9000_v26 = vpop.permute.xlu1 %3040  ;;  %v3000_v53 = vcombine.low %v2513_v20, %v2520_v3  ;;  %v3008_v34 = vcombine.low %v2625_v27, %v2632_v5  ;;  %v1987_v20 = vadd.f32 %v8884_v11, %v8567_v14 }
 0x29d   : > { %3208 = vperm.xlu1 %7149, %v3027_v63  }
 0x29e   : > { %3109 = vperm.xlu0 %7155, %v2994_v10   ;;  %v9002_v42 = vpop.permute.xlu0 %3800  ;;  %v1979_v10 = vadd.f32 %v8859_v17, %v8489_v59  ;;  %v1981_v59 = vadd.f32 %v8865_v54, %v8513_v33  ;;  %v2681_v60 = vrot.slane %v1987_v20, %v8684_v47  ;;  %v2688_v18 = vrot.slane %v1987_v20, %v8687_v39 }
 0x29f   : > { %11996 = vst [vmem:[#allocation30_spill] sm:$0xff] %v9002_v42 }
 0x2a0   : > { %v9010_v43 = vpop.permute.xlu1 %3043  ;;  %v2569_v35 = vrot.slane %v1979_v10, %v8684_v47  ;;  %v2576_v63 = vrot.slane %v1979_v10, %v8687_v39  ;;  %v2597_v7 = vrot.slane %v1981_v59, %v8684_v47  ;;  %v3012_v11 = vcombine.low %v2681_v60, %v2688_v18  ;;  %v12007_v10 = vld [vmem:[#allocation65_spill] sm:$0xff] }
 0x2a1   : > { %3214 = vperm.xlu1 %7149, %v3029_v23   ;;  %v1985_v23 = vadd.f32 %v8878_v55, %v8547_v24 }
 0x2a2   : > { %3115 = vperm.xlu0 %7155, %v2996_v6   ;;  %v9012_v28 = vpop.permute.xlu0 %3808  ;;  %v3004_v38 = vcombine.low %v2569_v35, %v2576_v63  ;;  %v2604_v6 = vrot.slane %v1981_v59, %v8687_v39  ;;  %v12010_v59 = vld [vmem:[#allocation12_spill] sm:$0xff] }
 0x2a3   : > { %11998 = vst [vmem:[#allocation53_spill] sm:$0xff] %v9012_v28  ;;  %v2653_v58 = vrot.slane %v1985_v23, %v8684_v47  ;;  %v12055_v28 = vld [vmem:[#allocation49_spill] sm:$0xff] }
 0x2a4   : > { %v9018_v48 = vpop.permute.xlu1 %3046  ;;  %v3006_v54 = vcombine.low %v2597_v7, %v2604_v6  ;;  %v12012_v6 = vld [vmem:[#allocation33_spill] sm:$0xff] }
 0x2a5   : > { %3220 = vperm.xlu1 %7149, %v3031_v45   ;;  %v1989_v45 = vadd.f32 %v8890_v57, %v8585_v9  ;;  %v1993_v8 = vadd.f32 %v8908_v37, %v12012_v6  ;;  %v12020_v6 = vld [vmem:[#allocation13_spill] sm:$0xff] }
 0x2a6   : > { %3121 = vperm.xlu0 %7155, %v2998_v49   ;;  %v9020_v21 = vpop.permute.xlu0 %3816  ;;  %v2660_v49 = vrot.slane %v1985_v23, %v8687_v39 }
 0x2a7   : > { %12000 = vst [vmem:[#allocation18_spill] sm:$0xff] %v9020_v21  ;;  %v2709_v62 = vrot.slane %v1989_v45, %v8684_v47  ;;  %v2716_v44 = vrot.slane %v1989_v45, %v8687_v39  ;;  %v2765_v23 = vrot.slane %v1993_v8, %v8684_v47 }
 0x2a8   : > { %v9026_v32 = vpop.permute.xlu1 %3049  ;;  %v3010_v55 = vcombine.low %v2653_v58, %v2660_v49  ;;  %v12014_v58 = vld [vmem:[#allocation59_spill] sm:$0xff] }
 0x2a9   : > { %3625 = vperm.xlu1 %7149, %v8776_v46   ;;  %v3014_v57 = vcombine.low %v2709_v62, %v2716_v44  ;;  %v1995_v49 = vadd.f32 %v8918_v31, %v12014_v58 }
 0x2aa   : > { %3127 = vperm.xlu0 %7155, %v3000_v53   ;;  %v9029_v1 = vpop.permute.xlu0 %3824 }
 0x2ab   : > { %12001 = vst [vmem:[#allocation67_spill] sm:$0xff] %v9029_v1  ;;  %v2793_v18 = vrot.slane %v1995_v49, %v8684_v47  ;;  %v2800_v45 = vrot.slane %v1995_v49, %v8687_v39 }
 0x2ac   : > { %v9040_v17 = vpop.permute.xlu1 %3052 }
 0x2ad   : > { %3635 = vperm.xlu1 %7149, %v9034_v19  }
 0x2ae   : > { %3133 = vperm.xlu0 %7155, %v3002_v52   ;;  %v9043_v2 = vpop.permute.xlu0 %3832  ;;  %v12008_v52 = vld [vmem:[#allocation28_spill] sm:$0xff] }
 0x2af   : > { %12002 = vst [vmem:[#allocation19_spill] sm:$0xff] %v9043_v2  ;;  %v1991_v35 = vadd.f32 %v12008_v52, %v12007_v10  ;;  %v3020_v10 = vcombine.low %v2793_v18, %v2800_v45  ;;  %v12024_v45 = vld [vmem:[#allocation7_spill] sm:$0xff] }
 0x2b0   : > { %v9049_v13 = vpop.permute.xlu1 %3055 }
 0x2b1   : > { %3645 = vperm.xlu1 %7149, %v8710_v0   ;;  %v2744_v7 = vrot.slane %v1991_v35, %v8687_v39 }
 0x2b2   : > { %3139 = vperm.xlu0 %7155, %v3004_v38   ;;  %v9052_v33 = vpop.permute.xlu0 %3840  ;;  %v2737_v38 = vrot.slane %v1991_v35, %v8684_v47 }
 0x2b3   : > { %12003 = vst [vmem:[#allocation72_spill] sm:$0xff] %v9052_v33 }
 0x2b4   : > { %v9058_v51 = vpop.permute.xlu1 %3058  ;;  %v3016_v5 = vcombine.low %v2737_v38, %v2744_v7 }
 0x2b5   : > { %3655 = vperm.xlu1 %7149, %v8721_v22  }
 0x2b6   : > { %3145 = vperm.xlu0 %7155, %v3006_v54  }
 0x2b7   : > { %v9061_v40 = vpop.permute.xlu0 %3992 }
 0x2b8   : > { %12004 = vst [vmem:[#allocation69_spill] sm:$0xff] %v9061_v40  ;;  %v9067_v3 = vpop.permute.xlu1 %3064 }
 0x2b9   : > { %3665 = vperm.xlu1 %7149, %v8732_v29  }
 0x2ba   : > { %3151 = vperm.xlu0 %7155, %v3008_v34   ;;  %v2772_v34 = vrot.slane %v1993_v8, %v8687_v39 }
 0x2bb   : > { %v9070_v24 = vpop.permute.xlu0 %4004 }
 0x2bc   : > { %12005 = vst [vmem:[#allocation32_spill] sm:$0xff] %v9070_v24  ;;  %v9076_v53 = vpop.permute.xlu1 %3070  ;;  %v3018_v60 = vcombine.low %v2765_v23, %v2772_v34  ;;  %v12022_v34 = vld [vmem:[#allocation61_spill] sm:$0xff] }
 0x2bd   : > { %3675 = vperm.xlu1 %7149, %v8743_v41   ;;  %v2001_v58 = vadd.f32 %v8946_v16, %v12022_v34 }
 0x2be   : > { %3157 = vperm.xlu0 %7155, %v3010_v55   ;;  %v12015_v55 = vmov 1  }
 0x2bf   : > { %v9079_v14 = vpop.permute.xlu0 %4012  ;;  %v2884_v18 = vrot.slane %v2001_v58, %v8687_v39 }
 0x2c0   : > { %12006 = vst [vmem:[#allocation57_spill] sm:$0xff] %v9079_v14  ;;  %v9085_v63 = vpop.permute.xlu1 %3076 }
 0x2c1   : > { %12009 = vst [vmem:[#allocation20_spill] sm:$0xff] %v9085_v63  ;;  %3685 = vperm.xlu1 %7149, %v12010_v59  }
 0x2c2   : > { %3163 = vperm.xlu0 %7155, %v3012_v11   ;;  %v12017_v11 = vld [vmem:[#allocation25_spill] sm:$0xff] }
 0x2c3   : > { %v9088_v9 = vpop.permute.xlu0 %4020  ;;  %v1997_v62 = vadd.f32 %v8928_v12, %v12017_v11  ;;  %v2003_v11 = vadd.f32 %v8955_v15, %v12024_v45  ;;  %v12029_v15 = vld [vmem:[#allocation47_spill] sm:$0xff] }
 0x2c4   : > { %12011 = vst [vmem:[#allocation21_spill] sm:$0xff] %v9088_v9  ;;  %v9094_v54 = vpop.permute.xlu1 %3082 }
 0x2c5   : > { %3695 = vperm.xlu1 %7149, %v8765_v4   ;;  %v2821_v52 = vrot.slane %v1997_v62, %v8684_v47  ;;  %v2828_v35 = vrot.slane %v1997_v62, %v8687_v39 }
 0x2c6   : > { %3169 = vperm.xlu0 %7155, %v3014_v57   ;;  %v12019_v57 = vld [vmem:[#allocation11_spill] sm:$0xff] }
 0x2c7   : > { %v9097_v27 = vpop.permute.xlu0 %4028  ;;  %v1999_v38 = vadd.f32 %v8937_v36, %v12019_v57  ;;  %v3022_v8 = vcombine.low %v2821_v52, %v2828_v35  ;;  %v12026_v52 = vld [vmem:[#allocation29_spill] sm:$0xff]  ;;  %v2905_v35 = vrot.slane %v2003_v11, %v8684_v47  ;;  %v2912_v57 = vrot.slane %v2003_v11, %v8687_v39 }
 0x2c8   : > { %12013 = vst [vmem:[#allocation39_spill] sm:$0xff] %v9097_v27  ;;  %v9103_v20 = vpop.permute.xlu1 %3088 }
 0x2c9   : > { %7150 = vset.pattern.permute.xlu1 %v12015_v55  ;;  %v2856_v23 = vrot.slane %v1999_v38, %v8687_v39  ;;  %v12023_v55 = vld [vmem:[#allocation66_spill] sm:$0xff]  ;;  %v3028_v34 = vcombine.low %v2905_v35, %v2912_v57 }
 0x2ca   : > { %3175 = vperm.xlu0 %7155, %v3016_v5   ;;  %3784 = vperm.xlu1 %7150, %v8776_v46   ;;  %v2849_v5 = vrot.slane %v1999_v38, %v8684_v47  ;;  %v12027_v38 = vld [vmem:[#allocation41_spill] sm:$0xff] }
 0x2cb   : > { %v9107_v37 = vpop.permute.xlu0 %4036 }
 0x2cc   : > { %12016 = vst [vmem:[#allocation54_spill] sm:$0xff] %v9107_v37  ;;  %v9113_v44 = vpop.permute.xlu1 %3094  ;;  %v3024_v36 = vcombine.low %v2849_v5, %v2856_v23 }
 0x2ce   : > { %3181 = vperm.xlu0 %7155, %v3018_v60   ;;  %3792 = vperm.xlu1 %7150, %v9034_v19   ;;  %v2877_v60 = vrot.slane %v2001_v58, %v8684_v47 }
 0x2cf   : > { %v9116_v31 = vpop.permute.xlu0 %4044 }
 0x2d0   : > { %12018 = vst [vmem:[#allocation37_spill] sm:$0xff] %v9116_v31  ;;  %v9122_v7 = vpop.permute.xlu1 %3100  ;;  %v3026_v16 = vcombine.low %v2877_v60, %v2884_v18  ;;  %v12030_v60 = vld [vmem:[#allocation27_spill] sm:$0xff] }
 0x2d1   : > { %v2007_v18 = vadd.f32 %v8980_v56, %v12030_v60 }
 0x2d2   : > { %3187 = vperm.xlu0 %7155, %v3020_v10   ;;  %3796 = vperm.xlu1 %7150, %v12020_v6  }
 0x2d3   : > { %v9125_v12 = vpop.permute.xlu0 %4052 }
 0x2d4   : > { %12021 = vst [vmem:[#allocation24_spill] sm:$0xff] %v9125_v12  ;;  %v9131_v49 = vpop.permute.xlu1 %3106  ;;  %v2968_v12 = vrot.slane %v2007_v18, %v8687_v39 }
 0x2d6   : > { %3193 = vperm.xlu0 %7155, %v3022_v8   ;;  %3804 = vperm.xlu1 %7150, %v12023_v55   ;;  %v2005_v8 = vadd.f32 %v8964_v50, %v12027_v38  ;;  %v12033_v50 = vld [vmem:[#allocation31_spill] sm:$0xff] }
 0x2d8   : > { %v9138_v62 = vpop.permute.xlu0 %4188  ;;  %v9140_v10 = vpop.permute.xlu1 %3112  ;;  %v2933_v58 = vrot.slane %v2005_v8, %v8684_v47 }
 0x2d9   : > { %12025 = vst [vmem:[#allocation48_spill] sm:$0xff] %v9138_v62 }
 0x2da   : > { %3199 = vperm.xlu0 %7155, %v3024_v36   ;;  %3812 = vperm.xlu1 %7150, %v12026_v52   ;;  %v2940_v36 = vrot.slane %v2005_v8, %v8687_v39  ;;  %v12035_v8 = vld [vmem:[#allocation16_spill] sm:$0xff]  ;;  %v12040_v39 = vmov 2  }
 0x2dc   : > { %v9147_v5 = vpop.permute.xlu0 %4200  ;;  %v9149_v23 = vpop.permute.xlu1 %3118  ;;  %v3030_v38 = vcombine.low %v2933_v58, %v2940_v36 }
 0x2dd   : > { %12028 = vst [vmem:[#allocation46_spill] sm:$0xff] %v9147_v5 }
 0x2de   : > { %3205 = vperm.xlu0 %7155, %v3026_v16   ;;  %3820 = vperm.xlu1 %7150, %v12029_v15   ;;  %v2961_v16 = vrot.slane %v2007_v18, %v8684_v47  ;;  %v12039_v18 = vld [vmem:[#allocation45_spill] sm:$0xff] }
 0x2e0   : > { %v9156_v45 = vpop.permute.xlu0 %4208  ;;  %v9158_v11 = vpop.permute.xlu1 %3124  ;;  %v3032_v56 = vcombine.low %v2961_v16, %v2968_v12 }
 0x2e1   : > { %12031 = vst [vmem:[#allocation9_spill] sm:$0xff] %v9156_v45  ;;  %12032 = vst [vmem:[#allocation51_spill] sm:$0xff] %v9158_v11 }
 0x2e2   : > { %3211 = vperm.xlu0 %7155, %v3028_v34   ;;  %3828 = vperm.xlu1 %7150, %v12033_v50   ;;  %v12037_v34 = vld [vmem:[#allocation17_spill] sm:$0xff] }
 0x2e4   : > { %v9163_v35 = vpop.permute.xlu0 %4216  ;;  %v9165_v57 = vpop.permute.xlu1 %3130 }
 0x2e5   : > { %12034 = vst [vmem:[#allocation10_spill] sm:$0xff] %v9163_v35 }
 0x2e6   : > { %3217 = vperm.xlu0 %7155, %v3030_v38   ;;  %3836 = vperm.xlu1 %7150, %v12035_v8  }
 0x2e8   : > { %v9168_v60 = vpop.permute.xlu0 %4224  ;;  %v9170_v31 = vpop.permute.xlu1 %3136 }
 0x2e9   : > { %12036 = vst [vmem:[#allocation60_spill] sm:$0xff] %v9168_v60 }
 0x2ea   : > { %3223 = vperm.xlu0 %7155, %v3032_v56   ;;  %3844 = vperm.xlu1 %7150, %v12037_v34  }
 0x2ec   : > { %v9173_v58 = vpop.permute.xlu0 %4232  ;;  %v9175_v36 = vpop.permute.xlu1 %3142 }
 0x2ed   : > { %12038 = vst [vmem:[#allocation44_spill] sm:$0xff] %v9173_v58 }
 0x2ee   : > { %3630 = vperm.xlu0 %7155, %v12039_v18   ;;  %7152 = vset.pattern.permute.xlu1 %v12040_v39 }
 0x2ef   : > { %3996 = vperm.xlu1 %7152, %v12039_v18  }
 0x2f0   : > { %v9180_v38 = vpop.permute.xlu0 %4240  ;;  %v9182_v12 = vpop.permute.xlu1 %3148 }
 0x2f1   : > { %12041 = vst [vmem:[#allocation22_spill] sm:$0xff] %v9180_v38 }
 0x2f2   : > { %3640 = vperm.xlu0 %7155, %v12020_v6  }
 0x2f3   : > { %4000 = vperm.xlu1 %7152, %v9034_v19  }
 0x2f4   : > { %v9186_v16 = vpop.permute.xlu1 %3154 }
 0x2f5   : > { %v9188_v56 = vpop.permute.xlu0 %3034 }
 0x2f6   : > { %3650 = vperm.xlu0 %7155, %v12023_v55  }
 0x2f7   : > { %4008 = vperm.xlu1 %7152, %v8710_v0  }
 0x2f8   : > { %v9192_v47 = vpop.permute.xlu1 %3160 }
 0x2f9   : > { %v9194_v39 = vpop.permute.xlu0 %3061 }
 0x2fa   : > { %3660 = vperm.xlu0 %7155, %v12026_v52  }
 0x2fb   : > { %4016 = vperm.xlu1 %7152, %v8721_v22  }
 0x2fc   : > { %v9198_v18 = vpop.permute.xlu1 %3166 }
 0x2fd   : > { %12042 = vst [vmem:[#allocation42_spill] sm:$0xff] %v9198_v18  ;;  %v9200_v37 = vpop.permute.xlu0 %3067 }
 0x2fe   : > { %3670 = vperm.xlu0 %7155, %v12029_v15  }
 0x2ff   : > { %4024 = vperm.xlu1 %7152, %v8732_v29  }
 0x300   : > { %v9204_v27 = vpop.permute.xlu1 %3172 }
 0x301   : > { %12043 = vst [vmem:[#allocation71_spill] sm:$0xff] %v9204_v27  ;;  %v9206_v9 = vpop.permute.xlu0 %3073 }
 0x302   : > { %12044 = vst [vmem:[#allocation74_spill] sm:$0xff] %v9206_v9  ;;  %3680 = vperm.xlu0 %7155, %v12033_v50  }
 0x303   : > { %4032 = vperm.xlu1 %7152, %v8743_v41   ;;  %v12046_v41 = vmov 3  }
 0x304   : > { %v9210_v0 = vpop.permute.xlu1 %3178 }
 0x305   : > { %v9212_v14 = vpop.permute.xlu0 %3079 }
 0x306   : > { %12045 = vst [vmem:[#allocation76_spill] sm:$0xff] %v9212_v14  ;;  %3690 = vperm.xlu0 %7155, %v12035_v8  }
 0x307   : > { %4040 = vperm.xlu1 %7152, %v12010_v59  }
 0x308   : > { %v9216_v22 = vpop.permute.xlu1 %3184 }
 0x309   : > { %v9218_v24 = vpop.permute.xlu0 %3085 }
 0x30a   : > { %3700 = vperm.xlu0 %7155, %v12037_v34  }
 0x30b   : > { %4048 = vperm.xlu1 %7152, %v8765_v4  }
 0x30c   : > { %v9222_v29 = vpop.permute.xlu1 %3190 }
 0x30d   : > { %v9224_v38 = vpop.permute.xlu0 %3091 }
 0x30f   : > { %7153 = vset.pattern.permute.xlu1 %v12046_v41 }
 0x310   : > { %v9227_v40 = vpop.permute.xlu1 %3196  ;;  %4184 = vperm.xlu1 %7153, %v8776_v46  }
 0x311   : > { %v9230_v58 = vpop.permute.xlu0 %3097 }
 0x314   : > { %v9232_v59 = vpop.permute.xlu1 %3202  ;;  %4192 = vperm.xlu1 %7153, %v9034_v19  }
 0x315   : > { %v9235_v33 = vpop.permute.xlu0 %3103 }
 0x318   : > { %v9237_v60 = vpop.permute.xlu1 %3208  ;;  %4196 = vperm.xlu1 %7153, %v12020_v6  }
 0x319   : > { %v9240_v4 = vpop.permute.xlu0 %3109 }
 0x31c   : > { %v9242_v2 = vpop.permute.xlu1 %3214  ;;  %4204 = vperm.xlu1 %7153, %v12023_v55   ;;  %v12052_v55 = vlaneseq }
 0x31d   : > { %12047 = vst [vmem:[#allocation40_spill] sm:$0xff] %v9242_v2  ;;  %v9245_v41 = vpop.permute.xlu0 %3115 }
 0x31e   : > { %v9263_v21 = vand.u32 127, %v12052_v55 }
 0x320   : > { %4212 = vperm.xlu1 %7153, %v12026_v52   ;;  %v9248_v46 = vpop.permute.xlu1 %3220  ;;  %v3245_v55 = vadd.s32 4294967272, %v9263_v21  ;;  %v3252_v61 = vadd.s32 4294967264, %v9263_v21 }
 0x321   : > { %12048 = vst [vmem:[#allocation15_spill] sm:$0xff] %v9248_v46  ;;  %v9250_v35 = vpop.permute.xlu0 %3121 }
 0x322   : > { %v9299_v46 = vsub.s32 %v3245_v55, %v12055_v28  ;;  %v9310_v14 = vsub.s32 %v3252_v61, %v12055_v28 }
 0x324   : > { %4220 = vperm.xlu1 %7153, %v12029_v15   ;;  %v9253_v19 = vpop.permute.xlu1 %3625  ;;  %v3231_v15 = vadd.s32 4294967288, %v9263_v21  ;;  %12060 = vst [vmem:[#allocation23_spill] sm:$0xff] %v9299_v46  ;;  %12062 = vst [vmem:[#allocation75_spill] sm:$0xff] %v9310_v14  ;;  %v3249_v55 = vrot.slane %v9010_v43, %v9299_v46  ;;  %v3256_v61 = vrot.slane %v9018_v48, %v9310_v14  ;;  %v3280_v43 = vadd.s32 4294967232, %v9263_v21 }
 0x325   : > { %12049 = vst [vmem:[#allocation26_spill] sm:$0xff] %v9253_v19  ;;  %v9255_v1 = vpop.permute.xlu0 %3127 }
 0x326   : > { %12050 = vst [vmem:[#allocation50_spill] sm:$0xff] %v9255_v1  ;;  %v9278_v42 = vsub.s32 %v3231_v15, %v12055_v28  ;;  %v3308_v1 = vadd.s32 4294967200, %v9263_v21  ;;  %v9347_v11 = vsub.s32 %v3280_v43, %v12055_v28 }
 0x328   : > { %4228 = vperm.xlu1 %7153, %v12033_v50   ;;  %v9258_v6 = vpop.permute.xlu1 %3635  ;;  %12056 = vst [vmem:[#allocation8_spill] sm:$0xff] %v9278_v42  ;;  %v3235_v15 = vrot.slane %v8989_v25, %v9278_v42  ;;  %12068 = vst [vmem:[#allocation28_spill] sm:$0xff] %v9347_v11  ;;  %v9360_v18 = vsub.s32 %v3308_v1, %v12055_v28 }
 0x329   : > { %12051 = vst [vmem:[#allocation36_spill] sm:$0xff] %v9258_v6  ;;  %v9260_v45 = vpop.permute.xlu0 %3133  ;;  %v3238_v6 = vadd.s32 4294967280, %v9263_v21 }
 0x32a   : > { %12071 = vst [vmem:[#allocation59_spill] sm:$0xff] %v9360_v18 }
 0x32c   : > { %4236 = vperm.xlu1 %7153, %v12035_v8   ;;  %v9266_v52 = vpop.permute.xlu1 %3645  ;;  %v9282_v8 = vsub.s32 %v9263_v21, %v12055_v28 }
 0x32d   : > { %12053 = vst [vmem:[#allocation62_spill] sm:$0xff] %v9266_v52  ;;  %v9268_v5 = vpop.permute.xlu0 %3139 }
 0x32e   : > { %12057 = vst [vmem:[#allocation43_spill] sm:$0xff] %v9282_v8  ;;  %v3230_v52 = vrot.slane %v9188_v56, %v9282_v8 }
 0x330   : > { %4244 = vperm.xlu1 %7153, %v12037_v34   ;;  %v9272_v19 = vpop.permute.xlu1 %3655  ;;  %v3237_v56 = vsel %vm3236_vm0, %v3235_v15, %v3230_v52  ;;  %v3266_v52 = vadd.s32 4294967248, %v9263_v21 }
 0x331   : > { %12054 = vst [vmem:[#allocation35_spill] sm:$0xff] %v9272_v19  ;;  %v9274_v50 = vpop.permute.xlu0 %3145  ;;  %v9293_v19 = vsub.s32 %v3238_v6, %v12055_v28  ;;  %v3259_v6 = vadd.s32 4294967256, %v9263_v21 }
 0x333   : > { %12059 = vst [vmem:[#allocation58_spill] sm:$0xff] %v9293_v19  ;;  %v9321_v27 = vsub.s32 %v3259_v6, %v12055_v28  ;;  %v3294_v6 = vadd.s32 4294967216, %v9263_v21 }
 0x334   : > { %v9287_v62 = vpop.permute.xlu1 %3665  ;;  %7156 = vset.pattern.permute.xlu1 %v11985_v30  ;;  %v3242_v30 = vrot.slane %v9000_v26, %v9293_v19 }
 0x335   : > { %12058 = vst [vmem:[#allocation34_spill] sm:$0xff] %v9287_v62  ;;  %v9289_v34 = vpop.permute.xlu0 %3151  ;;  %12064 = vst [vmem:[#allocation14_spill] sm:$0xff] %v9321_v27  ;;  %v3263_v48 = vrot.slane %v9026_v32, %v9321_v27 }
 0x336   : > { %v3244_v25 = vsel %vm3243_vm1, %v3242_v30, %v3237_v56  ;;  %v3273_v56 = vadd.s32 4294967240, %v9263_v21  ;;  %v9328_v30 = vsub.s32 %v3266_v52, %v12055_v28 }
 0x337   : > { %v3251_v26 = vsel %vm3250_vm2, %v3249_v55, %v3244_v25  ;;  %v3322_v55 = vadd.s32 4294967184, %v9263_v21 }
 0x338   : > { %v9302_v62 = vpop.permute.xlu1 %3675  ;;  %12065 = vst [vmem:[#allocation63_spill] sm:$0xff] %v9328_v30  ;;  %v3258_v25 = vsel %vm3257_vm3, %v3256_v61, %v3251_v26  ;;  %v9342_v52 = vsub.s32 %v3273_v56, %v12055_v28  ;;  %v3422_v26 = vrot.slane %v9260_v45, %v9278_v42  ;;  %v3270_v32 = vrot.slane %v9040_v17, %v9328_v30 }
 0x339   : > { %12061 = vst [vmem:[#allocation73_spill] sm:$0xff] %v9302_v62  ;;  %v9304_v63 = vpop.permute.xlu0 %3157  ;;  %v3265_v9 = vsel %vm3264_vm4, %v3263_v48, %v3258_v25  ;;  %v9357_v56 = vsub.s32 %v3294_v6, %v12055_v28  ;;  %v9367_v25 = vsub.s32 %v3322_v55, %v12055_v28  ;;  %v3418_v45 = vrot.slane %v9165_v57, %v9282_v8 }
 0x33a   : > { %12067 = vst [vmem:[#allocation65_spill] sm:$0xff] %v9342_v52  ;;  %v3287_v17 = vadd.s32 4294967224, %v9263_v21  ;;  %v3272_v6 = vsel %vm3271_vm5, %v3270_v32, %v3265_v9  ;;  %v3353_v48 = vrot.slane %v9224_v38, %v9299_v46  ;;  %v3348_v55 = vrot.slane %v9103_v20, %v9293_v19 }
 0x33b   : > { %12070 = vst [vmem:[#allocation33_spill] sm:$0xff] %v9357_v56  ;;  %12073 = vst [vmem:[#allocation11_spill] sm:$0xff] %v9367_v25  ;;  %v3432_v57 = vrot.slane %v9268_v5, %v9299_v46  ;;  %v3427_v9 = vrot.slane %v9170_v31, %v9293_v19  ;;  %v3284_v20 = vrot.slane %v9058_v51, %v9347_v11 }
 0x33c   : > { %v9316_v15 = vpop.permute.xlu1 %3685  ;;  %v9394_v32 = vsub.s32 %v3287_v17, %v12055_v28  ;;  %v3506_v51 = vrot.slane %v9216_v22, %v9293_v19 }
 0x33d   : > { %12063 = vst [vmem:[#allocation77_spill] sm:$0xff] %v9316_v15  ;;  %v9318_v62 = vpop.permute.xlu0 %3163 }
 0x33e   : > { %12075 = vst [vmem:[#allocation61_spill] sm:$0xff] %v9394_v32 }
 0x340   : > { %v9331_v2 = vpop.permute.xlu1 %3695 }
 0x341   : > { %12066 = vst [vmem:[#allocation68_spill] sm:$0xff] %v9331_v2  ;;  %v9333_v15 = vpop.permute.xlu0 %3169  ;;  %v3343_v2 = vrot.slane %v9218_v24, %v9278_v42  ;;  %v3339_v24 = vrot.slane %v9094_v54, %v9282_v8  ;;  %v3277_v54 = vrot.slane %v9049_v13, %v9342_v52 }
 0x343   : > { %v3344_v1 = vsel %vm3236_vm0, %v3343_v2, %v3339_v24  ;;  %v3497_v2 = vrot.slane %v9210_v0, %v9282_v8  ;;  %v3363_v24 = vrot.slane %v9230_v58, %v9321_v27  ;;  %v3301_v58 = vadd.s32 4294967208, %v9263_v21 }
 0x344   : > { %v3349_v5 = vsel %vm3243_vm1, %v3348_v55, %v3344_v1 }
 0x345   : > { %v9352_v61 = vpop.permute.xlu0 %3175  ;;  %v9364_v43 = vpop.permute.xlu1 %3784  ;;  %v3354_v31 = vsel %vm3250_vm2, %v3353_v48, %v3349_v5  ;;  %v3437_v48 = vrot.slane %v9175_v36, %v9310_v14  ;;  %v3373_v36 = vrot.slane %v9235_v33, %v9342_v52  ;;  %v9435_v33 = vsub.s32 %v3301_v58, %v12055_v28 }
 0x346   : > { %12069 = vst [vmem:[#allocation12_spill] sm:$0xff] %v9352_v61  ;;  %12072 = vst [vmem:[#allocation25_spill] sm:$0xff] %v9364_v43  ;;  %v3423_v43 = vsel %vm3236_vm0, %v3422_v26, %v3418_v45  ;;  %v3279_v26 = vsel %vm3278_vm6, %v3277_v54, %v3272_v6  ;;  %v3442_v6 = vrot.slane %v9274_v50, %v9321_v27 }
 0x347   : > { %v3428_v0 = vsel %vm3243_vm1, %v3427_v9, %v3423_v43  ;;  %v3286_v22 = vsel %vm3285_vm7, %v3284_v20, %v3279_v26  ;;  %v3452_v26 = vrot.slane %v9289_v34, %v9342_v52  ;;  %12077 = vst [vmem:[#allocation7_spill] sm:$0xff] %v9435_v33  ;;  %v3462_v58 = vrot.slane %v9304_v63, %v9394_v32 }
 0x348   : > { %v3433_v17 = vsel %vm3250_vm2, %v3432_v57, %v3428_v0 }
 0x349   : > { %v3182_v61 = vpop.permute.xlu0 %3181  ;;  %v9387_v38 = vpop.permute.xlu1 %3792  ;;  %v3438_v9 = vsel %vm3257_vm3, %v3437_v48, %v3433_v17 }
 0x34a   : > { %12074 = vst [vmem:[#allocation13_spill] sm:$0xff] %v9387_v38  ;;  %v3501_v13 = vrot.slane %v3182_v61, %v9278_v42  ;;  %v3358_v61 = vrot.slane %v9113_v44, %v9310_v14  ;;  %v3368_v44 = vrot.slane %v9122_v7, %v9328_v30  ;;  %v3516_v7 = vrot.slane %v9222_v29, %v9310_v14  ;;  %v12130_v42 = vld [vmem:[#allocation44_spill] sm:$0xff] }
 0x34b   : > { %v3443_v20 = vsel %vm3264_vm4, %v3442_v6, %v3438_v9  ;;  %v3298_v29 = vrot.slane %v9067_v3, %v9357_v56  ;;  %v3526_v3 = vrot.slane %v9227_v40, %v9328_v30  ;;  %v3388_v40 = vrot.slane %v9140_v10, %v9357_v56 }
 0x34c   : > { %v3502_v45 = vsel %vm3236_vm0, %v3501_v13, %v3497_v2  ;;  %v3359_v55 = vsel %vm3257_vm3, %v3358_v61, %v3354_v31  ;;  %v3291_v13 = vrot.slane %v9194_v39, %v9394_v32  ;;  %v3447_v31 = vrot.slane %v9182_v12, %v9328_v30 }
 0x34d   : > { %v3188_v1 = vpop.permute.xlu0 %3187  ;;  %v9412_v43 = vpop.permute.xlu1 %3796  ;;  %v3507_v50 = vsel %vm3243_vm1, %v3506_v51, %v3502_v45  ;;  %v3364_v57 = vsel %vm3264_vm4, %v3363_v24, %v3359_v55  ;;  %v3315_v24 = vadd.s32 4294967192, %v9263_v21  ;;  %v3383_v51 = vrot.slane %v9240_v4, %v9394_v32 }
 0x34e   : > { %12076 = vst [vmem:[#allocation66_spill] sm:$0xff] %v9412_v43  ;;  %v3511_v54 = vrot.slane %v3188_v1, %v9299_v46  ;;  %v3293_v45 = vsel %vm3292_vm8, %v3291_v13, %v3286_v22  ;;  %v3369_v34 = vsel %vm3271_vm5, %v3368_v44, %v3364_v57  ;;  %v3448_v17 = vsel %vm3271_vm5, %v3447_v31, %v3443_v20 }
 0x34f   : > { %v3374_v12 = vsel %vm3278_vm6, %v3373_v36, %v3369_v34  ;;  %v3378_v1 = vrot.slane %v9131_v49, %v9347_v11  ;;  %v3453_v48 = vsel %vm3278_vm6, %v3452_v26, %v3448_v17  ;;  %v3457_v44 = vrot.slane %v9186_v16, %v9347_v11 }
 0x350   : > { %v3512_v2 = vsel %vm3250_vm2, %v3511_v54, %v3507_v50  ;;  %v9461_v4 = vsub.s32 %v3315_v24, %v12055_v28  ;;  %v3300_v55 = vsel %vm3299_vm9, %v3298_v29, %v3293_v45  ;;  %v3393_v57 = vrot.slane %v9245_v41, %v9435_v33 }
 0x351   : > { %v3194_v5 = vpop.permute.xlu0 %3193  ;;  %v9438_v0 = vpop.permute.xlu1 %3804  ;;  %v3517_v61 = vsel %vm3257_vm3, %v3516_v7, %v3512_v2  ;;  %v3379_v63 = vsel %vm3285_vm7, %v3378_v1, %v3374_v12  ;;  %v3458_v36 = vsel %vm3285_vm7, %v3457_v44, %v3453_v48  ;;  %v3305_v2 = vrot.slane %v9200_v37, %v9435_v33  ;;  %v12086_v48 = vld [vmem:[#allocation51_spill] sm:$0xff] }
 0x352   : > { %12078 = vst [vmem:[#allocation29_spill] sm:$0xff] %v9438_v0  ;;  %v3521_v39 = vrot.slane %v3194_v5, %v9321_v27  ;;  %12079 = vst [vmem:[#allocation41_spill] sm:$0xff] %v9461_v4  ;;  %v3384_v16 = vsel %vm3292_vm8, %v3383_v51, %v3379_v63  ;;  %v3536_v10 = vrot.slane %v9232_v59, %v9347_v11  ;;  %v3329_v41 = vadd.s32 4294967176, %v9263_v21  ;;  %v12082_v51 = vld [vmem:[#allocation42_spill] sm:$0xff] }
 0x353   : > { %v3463_v13 = vsel %vm3292_vm8, %v3462_v58, %v3458_v36  ;;  %v3472_v7 = vrot.slane %v9318_v62, %v9435_v33  ;;  %v3467_v26 = vrot.slane %v9192_v47, %v9357_v56  ;;  %v3312_v37 = vrot.slane %v9076_v53, %v9360_v18  ;;  %v12089_v36 = vld [vmem:[#allocation12_spill] sm:$0xff]  ;;  %v12126_v11 = vld [vmem:[#allocation26_spill] sm:$0xff] }
 0x354   : > { %v3522_v6 = vsel %vm3264_vm4, %v3521_v39, %v3517_v61  ;;  %v3307_v59 = vsel %vm11477_vm10, %v3305_v2, %v3300_v55  ;;  %v3389_v24 = vsel %vm3299_vm9, %v3388_v40, %v3384_v16  ;;  %v3403_v47 = vrot.slane %v9250_v35, %v9461_v4  ;;  %v12083_v35 = vld [vmem:[#allocation74_spill] sm:$0xff] }
 0x355   : > { %v3200_v54 = vpop.permute.xlu0 %3199  ;;  %v9463_v22 = vpop.permute.xlu1 %3812  ;;  %v3527_v50 = vsel %vm3271_vm5, %v3526_v3, %v3522_v6  ;;  %v3394_v39 = vsel %vm11477_vm10, %v3393_v57, %v3389_v24  ;;  %v3468_v21 = vsel %vm3299_vm9, %v3467_v26, %v3463_v13  ;;  %v3398_v45 = vrot.slane %v9149_v23, %v9360_v18  ;;  %v12087_v40 = vld [vmem:[#allocation50_spill] sm:$0xff]  ;;  %v12090_v13 = vld [vmem:[#allocation71_spill] sm:$0xff]  ;;  %v12091_v26 = vld [vmem:[#allocation76_spill] sm:$0xff] }
 0x356   : > { %12080 = vst [vmem:[#allocation47_spill] sm:$0xff] %v9463_v22  ;;  %v3531_v49 = vrot.slane %v3200_v54, %v9342_v52  ;;  %v3546_v53 = vrot.slane %v9237_v60, %v9357_v56  ;;  %v3473_v34 = vsel %vm11477_vm10, %v3472_v7, %v3468_v21  ;;  %v3482_v61 = vrot.slane %v9333_v15, %v9461_v4  ;;  %v3599_v60 = vld [vmem:[%s7298_s18] sm:$0x3] }
 0x357   : > { %v3477_v17 = vrot.slane %v12082_v51, %v9360_v18  ;;  %v3319_v6 = vrot.slane %v12083_v35, %v9461_v4  ;;  %v9511_v1 = vsub.s32 %v3329_v41, %v12055_v28  ;;  %v3408_v58 = vrot.slane %v12086_v48, %v9367_v25  ;;  %v2008_v48 = vld [vmem:[#allocation2] sm:$0xf] }
 0x358   : > { %v3532_v9 = vsel %vm3278_vm6, %v3531_v49, %v3527_v50  ;;  %v3314_v15 = vsel %vm11478_vm11, %v3312_v37, %v3307_v59  ;;  %v3399_v54 = vsel %vm11478_vm11, %v3398_v45, %v3394_v39  ;;  %v12088_v50 = vld [vmem:[#allocation40_spill] sm:$0xff]  ;;  %v3487_v7 = vrot.slane %v12090_v13, %v9367_v25 }
 0x359   : > { %v3206_v20 = vpop.permute.xlu0 %3205  ;;  %v9486_v5 = vpop.permute.xlu1 %3820  ;;  %v3537_v62 = vsel %vm3285_vm7, %v3536_v10, %v3532_v9  ;;  %12084 = vst [vmem:[#allocation31_spill] sm:$0xff] %v9511_v1  ;;  %v3404_v49 = vsel %vm3320_vm12, %v3403_v47, %v3399_v54  ;;  %v3413_v28 = vrot.slane %v12087_v40, %v9511_v1  ;;  %v3478_v55 = vsel %vm11478_vm11, %v3477_v17, %v3473_v34  ;;  %v12093_v59 = vld [vmem:[#allocation20_spill] sm:$0xff] }
 0x35a   : > { %12081 = vst [vmem:[#allocation27_spill] sm:$0xff] %v9486_v5  ;;  %v3541_v31 = vrot.slane %v3206_v20, %v9394_v32  ;;  %v3556_v16 = vrot.slane %v12088_v50, %v9360_v18  ;;  %v3483_v57 = vsel %vm3320_vm12, %v3482_v61, %v3478_v55  ;;  %v3492_v9 = vrot.slane %v12089_v36, %v9511_v1  ;;  %v12099_v50 = vld [vmem:[#allocation70_spill] sm:$0xff] }
 0x35b   : > { %v3603_v10 = vunpack.c.l.bf16 %v3599_v60  ;;  %v3321_v20 = vsel %vm3320_vm12, %v3319_v6, %v3314_v15  ;;  %v3333_v41 = vrot.slane %v12091_v26, %v9511_v1  ;;  %v3326_v24 = vrot.slane %v12093_v59, %v9367_v25  ;;  %v12096_v6 = vld [vmem:[#allocation52_spill] sm:$0xff] }
 0x35c   : > { %v3542_v29 = vsel %vm3292_vm8, %v3541_v31, %v3537_v62  ;;  %v3409_v62 = vsel %vm3327_vm13, %v3408_v58, %v3404_v49  ;;  %v3488_v21 = vsel %vm3327_vm13, %v3487_v7, %v3483_v57  ;;  %v12100_v57 = vld [vmem:[#allocation56_spill] sm:$0xff] }
 0x35d   : > { %v3212_v12 = vpop.permute.xlu0 %3211  ;;  %v9513_v3 = vpop.permute.xlu1 %3828  ;;  %v3547_v44 = vsel %vm3299_vm9, %v3546_v53, %v3542_v29  ;;  %v3414_v47 = vsel %vm3334_vm14, %v3413_v28, %v3409_v62  ;;  %v3328_v45 = vsel %vm3327_vm13, %v3326_v24, %v3321_v20  ;;  %v12094_v53 = vld [vmem:[#allocation15_spill] sm:$0xff]  ;;  %v3493_v61 = vsel %vm3334_vm14, %v3492_v9, %v3488_v21  ;;  %v12103_v26 = vld [vmem:[#allocation48_spill] sm:$0xff]  ;;  %v12105_v62 = vld [vmem:[#allocation30_spill] sm:$0xff] }
 0x35e   : > { %12085 = vst [vmem:[#allocation16_spill] sm:$0xff] %v9513_v3  ;;  %v3551_v23 = vrot.slane %v3212_v12, %v9435_v33  ;;  %v3566_v34 = vrot.slane %v12094_v53, %v9367_v25  ;;  %v3335_v51 = vsel %vm3334_vm14, %v3333_v41, %v3328_v45  ;;  %v9573_v36 = vrot.slane %v3603_v10, %v12100_v57  ;;  %v12120_v25 = vld [vmem:[#allocation19_spill] sm:$0xff]  ;;  %v12124_v33 = vld [vmem:[#allocation60_spill] sm:$0xff] }
 0x35f   : > { %v3574_v60 = vsel %vm3573_vm15, %v3414_v47, %v3335_v51  ;;  %v12109_v51 = vld [vmem:[#allocation46_spill] sm:$0xff] }
 0x360   : > { %v3552_v63 = vsel %vm11477_vm10, %v3551_v23, %v3547_v44  ;;  %vm11619_vm10 = vcmask 1042434   ;;  %v9556_v23 = vrot.slane %v3603_v10, %v12096_v6  ;;  %v12097_v44 = vld [vmem:[#allocation55_spill] sm:$0xff] }
 0x361   : > { %v3218_v2 = vpop.permute.xlu0 %3217  ;;  %v9537_v31 = vpop.permute.xlu1 %3836  ;;  %v3557_v39 = vsel %vm11478_vm11, %v3556_v16, %v3552_v63  ;;  %vm11618_vm11 = vcmask 1043459   ;;  %v3576_v15 = vsel %vm11619_vm10, %v3493_v61, %v3574_v60  ;;  %v9563_v49 = vrot.slane %v3603_v10, %v12097_v44 }
 0x362   : > { %12092 = vst [vmem:[#allocation17_spill] sm:$0xff] %v9537_v31  ;;  %v3561_v37 = vrot.slane %v3218_v2, %v9461_v4  ;;  %v3848_v16 = vmul.f32 %v12099_v50, %v9556_v23  ;;  %v3851_v10 = vmul.f32 %v12105_v62, %v9556_v23  ;;  %vm12456_vm10 = vcmask 851712  }
 0x363   : > { %v3703_v52 = vmul.f32 %v12126_v11, %v9563_v49 }
 0x364   : > { %v3562_v29 = vsel %vm3320_vm12, %v3561_v37, %v3557_v39  ;;  %v12104_v37 = vld [vmem:[#allocation62_spill] sm:$0xff] }
 0x365   : > { %v3224_v12 = vpop.permute.xlu0 %3223  ;;  %v9552_v17 = vpop.permute.xlu1 %3844  ;;  %v3567_v58 = vsel %vm3327_vm13, %v3566_v34, %v3562_v29  ;;  %v3707_v59 = vmul.f32 %v12104_v37, %v9563_v49  ;;  %v12106_v29 = vld [vmem:[#allocation35_spill] sm:$0xff]  ;;  %v12107_v34 = vld [vmem:[#allocation53_spill] sm:$0xff] }
 0x366   : > { %12095 = vst [vmem:[#allocation45_spill] sm:$0xff] %v9552_v17  ;;  %v3571_v35 = vrot.slane %v3224_v12, %v9511_v1  ;;  %v3709_v45 = vmul.f32 %v12106_v29, %v9563_v49  ;;  %v3853_v61 = vmul.f32 %v12107_v34, %v9556_v23 }
 0x367   : > { %v3915_v47 = vadd.f32 %v3851_v10, %v3707_v59  ;;  %v12115_v10 = vld [vmem:[#allocation73_spill] sm:$0xff] }
 0x368   : > { %v3572_v54 = vsel %vm3334_vm14, %v3571_v35, %v3567_v58  ;;  %v3917_v60 = vadd.f32 %v3853_v61, %v3709_v45  ;;  %v12110_v58 = vld [vmem:[#allocation34_spill] sm:$0xff] }
 0x369   : > { %v3578_v40 = vsel %vm11618_vm11, %v3572_v54, %v3576_v15  ;;  %v9566_v28 = vpop.permute.xlu0 %3630  ;;  %v3711_v15 = vmul.f32 %v12110_v58, %v9563_v49  ;;  %vm12453_vm11 = vcmask 786112  }
 0x36a   : > { %12098 = vst [vmem:[#allocation49_spill] sm:$0xff] %v9566_v28  ;;  %v3580_v55 = vadd.f32 %v3578_v40, %v2008_v48  ;;  %v3704_v63 = vmul.f32 %v9566_v28, %v9563_v49  ;;  %v9575_v9 = vpop.permute.xlu1 %3996 }
 0x36b   : > { %12101 = vst [vmem:[#allocation42_spill] sm:$0xff] %v9575_v9  ;;  %v4056_v13 = vmul.f32 %v9575_v9, %v9573_v36 }
 0x36c   : > { %3581 = vst [vmem:[#allocation2] sm:$0xf] %v3580_v55  ;;  %v3912_v2 = vadd.f32 %v3848_v16, %v3704_v63  ;;  %v12111_v55 = vld [vmem:[#allocation18_spill] sm:$0xff] }
 0x36d   : > { %v3855_v63 = vmul.f32 %v12111_v55, %v9556_v23 }
 0x36e   : > { %v4120_v7 = vadd.f32 %v4056_v13, %v3912_v2  ;;  %v9579_v20 = vpop.permute.xlu1 %4000  ;;  %v3600_v2 = vld [vmem:[%s7298_s18 + $0x4] sm:$0x3]  ;;  %v9606_v13 = vpop.permute.xlu0 %3640 }
 0x36f   : > { %12102 = vst [vmem:[#allocation74_spill] sm:$0xff] %v9579_v20  ;;  %12113 = vst [vmem:[#allocation40_spill] sm:$0xff] %v9606_v13  ;;  %v3919_v59 = vadd.f32 %v3855_v63, %v3711_v15 }
 0x370   : > { %v4248_v41 = vadd.f32 %v12103_v26, %v4120_v7  ;;  %v12114_v7 = vld [vmem:[#allocation9_spill] sm:$0xff] }
 0x372   : > { %v4312_v24 = vmax.f32 %v4248_v41, 0.0  ;;  %v9586_v39 = vpop.permute.xlu1 %4008 }
 0x373   : > { %v4059_v21 = vmul.f32 %v9586_v39, %v9573_v36 }
 0x374   : > { %4377 = vadd.xlane.f32.xlu1 %v4312_v24 }
 0x375   : > { %v4123_v53 = vadd.f32 %v4059_v21, %v3915_v47  ;;  %v3713_v47 = vmul.f32 %v12115_v10, %v9563_v49 }
 0x376   : > { %v9594_v12 = vpop.permute.xlu1 %4016 }
 0x377   : > { %12108 = vst [vmem:[#allocation51_spill] sm:$0xff] %v9594_v12  ;;  %v4251_v35 = vadd.f32 %v12109_v51, %v4123_v53  ;;  %v4061_v48 = vmul.f32 %v9594_v12, %v9573_v36  ;;  %v12116_v53 = vld [vmem:[#allocation67_spill] sm:$0xff] }
 0x378   : > { %v3857_v61 = vmul.f32 %v12116_v53, %v9556_v23 }
 0x379   : > { %v4315_v54 = vmax.f32 %v4251_v35, 0.0  ;;  %v4125_v40 = vadd.f32 %v4061_v48, %v3917_v60  ;;  %v3604_v35 = vunpack.c.l.bf16 %v3600_v2  ;;  %v12118_v48 = vld [vmem:[#allocation77_spill] sm:$0xff] }
 0x37a   : > { %v9603_v16 = vpop.permute.xlu1 %4024  ;;  %v3921_v63 = vadd.f32 %v3857_v61, %v3713_v47  ;;  %v12123_v47 = vld [vmem:[#allocation25_spill] sm:$0xff] }
 0x37b   : > { %12112 = vst [vmem:[#allocation50_spill] sm:$0xff] %v9603_v16  ;;  %4383 = vadd.xlane.f32.xlu1 %v4315_v54  ;;  %v4253_v41 = vadd.f32 %v12114_v7, %v4125_v40  ;;  %v4063_v24 = vmul.f32 %v9603_v16, %v9573_v36  ;;  %v3715_v54 = vmul.f32 %v12118_v48, %v9563_v49  ;;  %v12119_v40 = vld [vmem:[#allocation10_spill] sm:$0xff] }
 0x37c   : > { %v9627_v2 = vrot.slane %v3604_v35, %v12097_v44  ;;  %v9630_v18 = vrot.slane %v3604_v35, %v12096_v6  ;;  %v3847_v61 = vmul.f32 %v12123_v47, %v9556_v23 }
 0x37d   : > { %v4317_v21 = vmax.f32 %v4253_v41, 0.0  ;;  %v4127_v45 = vadd.f32 %v4063_v24, %v3919_v59  ;;  %v3859_v41 = vmul.f32 %v12120_v25, %v9556_v23  ;;  %v9624_v59 = vpop.permute.xlu0 %3650 }
 0x37e   : > { %v9615_v60 = vpop.permute.xlu1 %4032  ;;  %12121 = vst [vmem:[#allocation71_spill] sm:$0xff] %v9624_v59  ;;  %v3719_v27 = vmul.f32 %v12126_v11, %v9627_v2  ;;  %v3911_v46 = vadd.f32 %v3847_v61, %v3703_v52  ;;  %v3849_v11 = vmul.f32 %v9387_v38, %v9556_v23 }
 0x37f   : > { %12117 = vst [vmem:[#allocation12_spill] sm:$0xff] %v9615_v60  ;;  %4387 = vadd.xlane.f32.xlu1 %v4317_v21  ;;  %v4255_v15 = vadd.f32 %v12119_v40, %v4127_v45  ;;  %v4065_v1 = vmul.f32 %v9615_v60, %v9573_v36  ;;  %v3923_v45 = vadd.f32 %v3859_v41, %v3715_v54 }
 0x380   : > { %v9646_v54 = vrot.slane %v3604_v35, %v12100_v57 }
 0x381   : > { %v4319_v24 = vmax.f32 %v4255_v15, 0.0  ;;  %v4129_v4 = vadd.f32 %v4065_v1, %v3921_v63  ;;  %v12125_v1 = vld [vmem:[#allocation68_spill] sm:$0xff]  ;;  %v3863_v63 = vmul.f32 %v12123_v47, %v9630_v18  ;;  %v9654_v19 = vpop.permute.xlu0 %3660 }
 0x382   : > { %v9632_v21 = vpop.permute.xlu1 %4040  ;;  %v3717_v15 = vmul.f32 %v12125_v1, %v9563_v49  ;;  %12129 = vst [vmem:[#allocation15_spill] sm:$0xff] %v9654_v19 }
 0x383   : > { %12122 = vst [vmem:[#allocation76_spill] sm:$0xff] %v9632_v21  ;;  %4391 = vadd.xlane.f32.xlu1 %v4319_v24  ;;  %v4257_v56 = vadd.f32 %v12124_v33, %v4129_v4  ;;  %v4067_v32 = vmul.f32 %v9632_v21, %v9573_v36  ;;  %v12127_v24 = vld [vmem:[#allocation72_spill] sm:$0xff] }
 0x384   : > { %v3861_v4 = vmul.f32 %v12127_v24, %v9556_v23 }
 0x385   : > { %v4321_v41 = vmax.f32 %v4257_v56, 0.0  ;;  %v4131_v30 = vadd.f32 %v4067_v32, %v3923_v45  ;;  %v3927_v56 = vadd.f32 %v3863_v63, %v3719_v27  ;;  %v12131_v32 = vld [vmem:[#allocation69_spill] sm:$0xff]  ;;  %v4057_v27 = vmul.f32 %v9579_v20, %v9573_v36  ;;  %v9687_v50 = vpop.permute.xlu0 %3670 }
 0x386   : > { %v9652_v14 = vpop.permute.xlu1 %4048  ;;  %v3925_v26 = vadd.f32 %v3861_v4, %v3717_v15  ;;  %v4055_v45 = vmul.f32 %v12131_v32, %v9573_v36  ;;  %v4071_v9 = vmul.f32 %v12131_v32, %v9646_v54  ;;  %v3706_v4 = vmul.f32 %v9606_v13, %v9563_v49  ;;  %12134 = vst [vmem:[#allocation10_spill] sm:$0xff] %v9687_v50 }
 0x387   : > { %12128 = vst [vmem:[#allocation20_spill] sm:$0xff] %v9652_v14  ;;  %4395 = vadd.xlane.f32.xlu1 %v4321_v41  ;;  %v4259_v8 = vadd.f32 %v12130_v42, %v4131_v30  ;;  %v4069_v35 = vmul.f32 %v9652_v14, %v9573_v36  ;;  %v12132_v41 = vld [vmem:[#allocation36_spill] sm:$0xff]  ;;  %v3865_v30 = vmul.f32 %v9387_v38, %v9630_v18 }
 0x388   : > { %v3705_v17 = vmul.f32 %v12132_v41, %v9563_v49  ;;  %v4119_v15 = vadd.f32 %v4055_v45, %v3911_v46  ;;  %v3721_v63 = vmul.f32 %v12132_v41, %v9627_v2  ;;  %v4073_v42 = vmul.f32 %v9579_v20, %v9646_v54 }
 0x389   : > { %v4323_v52 = vmax.f32 %v4259_v8, 0.0  ;;  %v4133_v61 = vadd.f32 %v4069_v35, %v3925_v26  ;;  %v12133_v8 = vld [vmem:[#allocation22_spill] sm:$0xff]  ;;  %v4135_v35 = vadd.f32 %v4071_v9, %v3927_v56  ;;  %v3723_v46 = vmul.f32 %v12104_v37, %v9627_v2 }
 0x38a   : > { %v3913_v38 = vadd.f32 %v3849_v11, %v3705_v17  ;;  %v3850_v41 = vmul.f32 %v9412_v43, %v9556_v23  ;;  %v3867_v13 = vmul.f32 %v12105_v62, %v9630_v18  ;;  %v3929_v56 = vadd.f32 %v3865_v30, %v3721_v63  ;;  %v12136_v63 = vld [vmem:[#allocation32_spill] sm:$0xff] }
 0x38b   : > { %v9675_v32 = vpop.permute.xlu1 %4184  ;;  %4399 = vadd.xlane.f32.xlu1 %v4323_v52  ;;  %v4261_v26 = vadd.f32 %v12133_v8, %v4133_v61  ;;  %v4075_v61 = vmul.f32 %v9586_v39, %v9646_v54  ;;  %v3708_v11 = vmul.f32 %v9624_v59, %v9563_v49 }
 0x38c   : > { %v4247_v45 = vadd.f32 %v9675_v32, %v4119_v15  ;;  %v4263_v9 = vadd.f32 %v9675_v32, %v4135_v35  ;;  %v4121_v37 = vadd.f32 %v4057_v27, %v3913_v38  ;;  %v3914_v8 = vadd.f32 %v3850_v41, %v3706_v4 }
 0x38d   : > { %v4325_v52 = vmax.f32 %v4261_v26, 0.0  ;;  %v4137_v15 = vadd.f32 %v4073_v42, %v3929_v56  ;;  %v3931_v62 = vadd.f32 %v3867_v13, %v3723_v46  ;;  %v3725_v26 = vmul.f32 %v12106_v29, %v9627_v2 }
 0x38e   : > { %v4311_v20 = vmax.f32 %v4247_v45, 0.0  ;;  %v4058_v35 = vmul.f32 %v12136_v63, %v9573_v36  ;;  %v3852_v38 = vmul.f32 %v9438_v0, %v9556_v23  ;;  %v3869_v41 = vmul.f32 %v12107_v34, %v9630_v18 }
 0x38f   : > { %v9694_v17 = vpop.permute.xlu1 %4192  ;;  %4403 = vadd.xlane.f32.xlu1 %v4325_v52  ;;  %v4327_v27 = vmax.f32 %v4263_v9, 0.0  ;;  %v4139_v42 = vadd.f32 %v4075_v61, %v3931_v62  ;;  %v4077_v13 = vmul.f32 %v9594_v12, %v9646_v54  ;;  %v3710_v45 = vmul.f32 %v9654_v19, %v9563_v49  ;;  %v9710_v52 = vpop.permute.xlu0 %3680  ;;  %v12139_v61 = vld [vmem:[#allocation57_spill] sm:$0xff] }
 0x390   : > { %12135 = vst [vmem:[#allocation78_spill] sm:$0xff] %v9694_v17  ;;  %4375 = vadd.xlane.f32.xlu0 %v4311_v20  ;;  %v4249_v30 = vadd.f32 %v9694_v17, %v4121_v37  ;;  %v4265_v4 = vadd.f32 %v9694_v17, %v4137_v15  ;;  %v4122_v46 = vadd.f32 %v4058_v35, %v3914_v8  ;;  %12137 = vst [vmem:[#allocation79_spill] sm:$0xff] %v9710_v52 }
 0x391   : > { %v3916_v37 = vadd.f32 %v3852_v38, %v3708_v11  ;;  %v3933_v34 = vadd.f32 %v3869_v41, %v3725_v26  ;;  %v3727_v9 = vmul.f32 %v12110_v58, %v9627_v2  ;;  %v4060_v15 = vmul.f32 %v12139_v61, %v9573_v36 }
 0x392   : > { %v4313_v20 = vmax.f32 %v4249_v30, 0.0  ;;  %v3854_v8 = vmul.f32 %v9463_v22, %v9556_v23  ;;  %v3871_v11 = vmul.f32 %v12111_v55, %v9630_v18  ;;  %v3601_v30 = vld [vmem:[%s7298_s18 + $0x8] sm:$0x3]  ;;  %v4329_v35 = vmax.f32 %v4265_v4, 0.0 }
 0x393   : > { %v9712_v56 = vpop.permute.xlu1 %4196  ;;  %4407 = vadd.xlane.f32.xlu1 %v4327_v27  ;;  %v4267_v38 = vadd.f32 %v12109_v51, %v4139_v42  ;;  %v4141_v26 = vadd.f32 %v4077_v13, %v3933_v34  ;;  %v4079_v41 = vmul.f32 %v9603_v16, %v9646_v54  ;;  %v3712_v58 = vmul.f32 %v9687_v50, %v9563_v49  ;;  %v12141_v42 = vld [vmem:[#allocation21_spill] sm:$0xff] }
 0x394   : > { %12138 = vst [vmem:[#allocation80_spill] sm:$0xff] %v9712_v56  ;;  %4379 = vadd.xlane.f32.xlu0 %v4313_v20  ;;  %v4250_v62 = vadd.f32 %v9712_v56, %v4122_v46  ;;  %v4124_v20 = vadd.f32 %v4060_v15, %v3916_v37  ;;  %v3918_v46 = vadd.f32 %v3854_v8, %v3710_v45  ;;  %v3605_v4 = vunpack.c.l.bf16 %v3601_v30 }
 0x395   : > { %v3935_v22 = vadd.f32 %v3871_v11, %v3727_v9  ;;  %v3729_v55 = vmul.f32 %v12115_v10, %v9627_v2  ;;  %v4062_v13 = vmul.f32 %v12141_v42, %v9573_v36  ;;  %v3856_v37 = vmul.f32 %v9486_v5, %v9556_v23 }
 0x396   : > { %v4314_v27 = vmax.f32 %v4250_v62, 0.0  ;;  %v3873_v45 = vmul.f32 %v12116_v53, %v9630_v18  ;;  %v9740_v62 = vpop.permute.xlu0 %3690  ;;  %v4331_v15 = vmax.f32 %v4267_v38, 0.0  ;;  %v4269_v9 = vadd.f32 %v12114_v7, %v4141_v26  ;;  %v12144_v26 = vld [vmem:[#allocation39_spill] sm:$0xff] }
 0x397   : > { %v9729_v61 = vpop.permute.xlu1 %4204  ;;  %4411 = vadd.xlane.f32.xlu1 %v4329_v35  ;;  %12142 = vst [vmem:[#allocation82_spill] sm:$0xff] %v9740_v62  ;;  %v4143_v8 = vadd.f32 %v4079_v41, %v3935_v22  ;;  %v4081_v11 = vmul.f32 %v9615_v60, %v9646_v54  ;;  %v4126_v35 = vadd.f32 %v4062_v13, %v3918_v46 }
 0x398   : > { %12140 = vst [vmem:[#allocation81_spill] sm:$0xff] %v9729_v61  ;;  %4381 = vadd.xlane.f32.xlu0 %v4314_v27  ;;  %v4252_v34 = vadd.f32 %v9729_v61, %v4124_v20  ;;  %v3920_v27 = vadd.f32 %v3856_v37, %v3712_v58  ;;  %v3714_v20 = vmul.f32 %v9710_v52, %v9563_v49 }
 0x399   : > { %v3937_v5 = vadd.f32 %v3873_v45, %v3729_v55  ;;  %v3731_v53 = vmul.f32 %v12118_v48, %v9627_v2  ;;  %v9752_v38 = vrot.slane %v3605_v4, %v12096_v6  ;;  %v4064_v41 = vmul.f32 %v12144_v26, %v9573_v36 }
 0x39a   : > { %v4316_v30 = vmax.f32 %v4252_v34, 0.0  ;;  %v3858_v58 = vmul.f32 %v9513_v3, %v9556_v23  ;;  %v3875_v46 = vmul.f32 %v12120_v25, %v9630_v18  ;;  %v4333_v34 = vmax.f32 %v4269_v9, 0.0  ;;  %v9766_v6 = vpop.permute.xlu0 %3700  ;;  %v12146_v25 = vld [vmem:[#allocation54_spill] sm:$0xff] }
 0x39b   : > { %v9747_v10 = vpop.permute.xlu1 %4212  ;;  %4415 = vadd.xlane.f32.xlu1 %v4331_v15  ;;  %v4271_v55 = vadd.f32 %v12119_v40, %v4143_v8  ;;  %v4145_v13 = vadd.f32 %v4081_v11, %v3937_v5  ;;  %v4083_v37 = vmul.f32 %v9632_v21, %v9646_v54  ;;  %v4128_v15 = vadd.f32 %v4064_v41, %v3920_v27 }
 0x39c   : > { %12143 = vst [vmem:[#allocation83_spill] sm:$0xff] %v9747_v10  ;;  %4385 = vadd.xlane.f32.xlu0 %v4316_v30  ;;  %v4254_v22 = vadd.f32 %v9747_v10, %v4126_v35  ;;  %v3922_v30 = vadd.f32 %v3858_v58, %v3714_v20  ;;  %v3716_v35 = vmul.f32 %v9740_v62, %v9563_v49 }
 0x39d   : > { %v4066_v9 = vmul.f32 %v12146_v25, %v9573_v36  ;;  %v3939_v3 = vadd.f32 %v3875_v46, %v3731_v53  ;;  %v3733_v5 = vmul.f32 %v12125_v1, %v9627_v2  ;;  %v3877_v8 = vmul.f32 %v12127_v24, %v9630_v18 }
 0x39e   : > { %v4318_v45 = vmax.f32 %v4254_v22, 0.0  ;;  %v3860_v27 = vmul.f32 %v9537_v31, %v9556_v23  ;;  %v9780_v20 = vrot.slane %v3605_v4, %v12097_v44  ;;  %v3720_v22 = vmul.f32 %v9566_v28, %v9627_v2 }
 0x39f   : > { %v9768_v48 = vpop.permute.xlu1 %4220  ;;  %4419 = vadd.xlane.f32.xlu1 %v4333_v34  ;;  %v4335_v41 = vmax.f32 %v4271_v55, 0.0  ;;  %v4273_v53 = vadd.f32 %v12124_v33, %v4145_v13  ;;  %v4147_v58 = vadd.f32 %v4083_v37, %v3939_v3  ;;  %v4085_v46 = vmul.f32 %v9652_v14, %v9646_v54  ;;  %v12148_v3 = vld [vmem:[#allocation70_spill] sm:$0xff] }
 0x3a0   : > { %12145 = vst [vmem:[#allocation84_spill] sm:$0xff] %v9768_v48  ;;  %4389 = vadd.xlane.f32.xlu0 %v4318_v45  ;;  %v4256_v11 = vadd.f32 %v9768_v48, %v4128_v15  ;;  %v4130_v45 = vadd.f32 %v4066_v9, %v3922_v30  ;;  %v3924_v24 = vadd.f32 %v3860_v27, %v3716_v35  ;;  %v12149_v30 = vld [vmem:[#allocation37_spill] sm:$0xff]  ;;  %v12152_v27 = vld [vmem:[#allocation44_spill] sm:$0xff] }
 0x3a1   : > { %v3718_v15 = vmul.f32 %v9766_v6, %v9563_v49  ;;  %v3941_v44 = vadd.f32 %v3877_v8, %v3733_v5  ;;  %v3879_v28 = vmul.f32 %v12123_v47, %v9752_v38  ;;  %v9794_v55 = vrot.slane %v3605_v4, %v12100_v57  ;;  %v12150_v49 = vld [vmem:[#allocation45_spill] sm:$0xff]  ;;  %v12151_v5 = vld [vmem:[#allocation26_spill] sm:$0xff] }
 0x3a2   : > { %v4320_v34 = vmax.f32 %v4256_v11, 0.0  ;;  %v3864_v13 = vmul.f32 %v12148_v3, %v9630_v18  ;;  %v4068_v35 = vmul.f32 %v12149_v30, %v9573_v36  ;;  %v3862_v9 = vmul.f32 %v12150_v49, %v9556_v23 }
 0x3a3   : > { %v9789_v1 = vpop.permute.xlu1 %4228  ;;  %4423 = vadd.xlane.f32.xlu1 %v4335_v41  ;;  %v3735_v8 = vmul.f32 %v12151_v5, %v9780_v20  ;;  %v4337_v11 = vmax.f32 %v4273_v53, 0.0  ;;  %v4275_v41 = vadd.f32 %v12152_v27, %v4147_v58  ;;  %v4149_v4 = vadd.f32 %v4085_v46, %v3941_v44  ;;  %v12154_v5 = vld [vmem:[#allocation24_spill] sm:$0xff]  ;;  %v12156_v46 = vld [vmem:[#allocation22_spill] sm:$0xff] }
 0x3a4   : > { %12147 = vst [vmem:[#allocation85_spill] sm:$0xff] %v9789_v1  ;;  %4393 = vadd.xlane.f32.xlu0 %v4320_v34  ;;  %v4258_v37 = vadd.f32 %v9789_v1, %v4130_v45  ;;  %v3928_v57 = vadd.f32 %v3864_v13, %v3720_v22  ;;  %v4132_v14 = vadd.f32 %v4068_v35, %v3924_v24  ;;  %v12153_v34 = vld [vmem:[#allocation42_spill] sm:$0xff]  ;;  %v12155_v58 = vld [vmem:[#allocation40_spill] sm:$0xff] }
 0x3a5   : > { %v3926_v3 = vadd.f32 %v3862_v9, %v3718_v15  ;;  %v4072_v45 = vmul.f32 %v12153_v34, %v9646_v54  ;;  %v3943_v33 = vadd.f32 %v3879_v28, %v3735_v8  ;;  %v4070_v53 = vmul.f32 %v12154_v5, %v9573_v36  ;;  %v12157_v15 = vld [vmem:[#allocation69_spill] sm:$0xff] }
 0x3a6   : > { %v4322_v47 = vmax.f32 %v4258_v37, 0.0  ;;  %v3722_v44 = vmul.f32 %v12155_v58, %v9627_v2  ;;  %v4339_v22 = vmax.f32 %v4275_v41, 0.0  ;;  %v4277_v24 = vadd.f32 %v12156_v46, %v4149_v4  ;;  %v12158_v37 = vld [vmem:[#allocation13_spill] sm:$0xff]  ;;  %v12160_v4 = vld [vmem:[#allocation74_spill] sm:$0xff] }
 0x3a7   : > { %v9808_v1 = vpop.permute.xlu1 %4236  ;;  %4427 = vadd.xlane.f32.xlu1 %v4337_v11  ;;  %v4087_v13 = vmul.f32 %v12157_v15, %v9794_v55  ;;  %v3881_v35 = vmul.f32 %v12158_v37, %v9752_v38  ;;  %v4134_v28 = vadd.f32 %v4070_v53, %v3926_v3  ;;  %v12159_v11 = vld [vmem:[#allocation36_spill] sm:$0xff]  ;;  %v4089_v46 = vmul.f32 %v12160_v4, %v9794_v55  ;;  %v12161_v15 = vld [vmem:[#allocation62_spill] sm:$0xff] }
 0x3a8   : > { %4397 = vadd.xlane.f32.xlu0 %v4322_v47  ;;  %v4260_v23 = vadd.f32 %v9808_v1, %v4132_v14  ;;  %v4136_v47 = vadd.f32 %v4072_v45, %v3928_v57  ;;  %v3866_v14 = vmul.f32 %v9412_v43, %v9630_v18  ;;  %v3737_v41 = vmul.f32 %v12159_v11, %v9780_v20  ;;  %v12162_v45 = vld [vmem:[#allocation30_spill] sm:$0xff]  ;;  %v12163_v43 = vld [vmem:[#allocation48_spill] sm:$0xff] }
 0x3a9   : > { %v4151_v36 = vadd.f32 %v4087_v13, %v3943_v33  ;;  %v3739_v58 = vmul.f32 %v12161_v15, %v9780_v20  ;;  %v3724_v53 = vmul.f32 %v9624_v59, %v9627_v2  ;;  %v4341_v33 = vmax.f32 %v4277_v24, 0.0 }
 0x3aa   : > { %v4324_v9 = vmax.f32 %v4260_v23, 0.0  ;;  %v3930_v57 = vadd.f32 %v3866_v14, %v3722_v44  ;;  %v3883_v23 = vmul.f32 %v12162_v45, %v9752_v38  ;;  %v3945_v13 = vadd.f32 %v3881_v35, %v3737_v41  ;;  %v12164_v41 = vld [vmem:[#allocation53_spill] sm:$0xff] }
 0x3ab   : > { %v9822_v8 = vpop.permute.xlu1 %4244  ;;  %4431 = vadd.xlane.f32.xlu1 %v4339_v22  ;;  %v4279_v22 = vadd.f32 %v9675_v32, %v4151_v36  ;;  %v4091_v4 = vmul.f32 %v9586_v39, %v9794_v55  ;;  %v4264_v15 = vadd.f32 %v12163_v43, %v4136_v47  ;;  %v3868_v44 = vmul.f32 %v9438_v0, %v9630_v18 }
 0x3ac   : > { %4401 = vadd.xlane.f32.xlu0 %v4324_v9  ;;  %v4262_v3 = vadd.f32 %v9822_v8, %v4134_v28  ;;  %v4074_v9 = vmul.f32 %v12136_v63, %v9646_v54  ;;  %v4153_v28 = vadd.f32 %v4089_v46, %v3945_v13  ;;  %v3947_v14 = vadd.f32 %v3883_v23, %v3739_v58 }
 0x3ad   : > { %v3741_v24 = vmul.f32 %v12106_v29, %v9780_v20  ;;  %v3932_v36 = vadd.f32 %v3868_v44, %v3724_v53  ;;  %v3726_v47 = vmul.f32 %v9654_v19, %v9627_v2  ;;  %v4343_v43 = vmax.f32 %v4279_v22, 0.0  ;;  %v12166_v53 = vld [vmem:[#allocation47_spill] sm:$0xff]  ;;  %v12167_v22 = vld [vmem:[#allocation34_spill] sm:$0xff] }
 0x3ae   : > { %v4326_v11 = vmax.f32 %v4262_v3, 0.0  ;;  %v4138_v35 = vadd.f32 %v4074_v9, %v3930_v57  ;;  %v3885_v3 = vmul.f32 %v12164_v41, %v9752_v38  ;;  %v4281_v63 = vadd.f32 %v9694_v17, %v4153_v28  ;;  %v12168_v28 = vld [vmem:[#allocation18_spill] sm:$0xff] }
 0x3af   : > { %4435 = vadd.xlane.f32.xlu1 %v4341_v33  ;;  %v4155_v0 = vadd.f32 %v4091_v4, %v3947_v14  ;;  %v4093_v58 = vmul.f32 %v9594_v12, %v9794_v55  ;;  %v4328_v46 = vmax.f32 %v4264_v15, 0.0  ;;  %v3870_v33 = vmul.f32 %v12166_v53, %v9630_v18 }
 0x3b0   : > { %4405 = vadd.xlane.f32.xlu0 %v4326_v11  ;;  %v4266_v23 = vadd.f32 %v9712_v56, %v4138_v35  ;;  %v12165_v11 = vld [vmem:[#allocation57_spill] sm:$0xff]  ;;  %v3949_v13 = vadd.f32 %v3885_v3, %v3741_v24  ;;  %v3743_v9 = vmul.f32 %v12167_v22, %v9780_v20  ;;  %v3887_v14 = vmul.f32 %v12168_v28, %v9752_v38  ;;  %v3602_v35 = vld [vmem:[%s7298_s18 + $0xc] sm:$0x3] }
 0x3b1   : > { %v4076_v57 = vmul.f32 %v12165_v11, %v9646_v54  ;;  %v3934_v4 = vadd.f32 %v3870_v33, %v3726_v47  ;;  %v3728_v15 = vmul.f32 %v9687_v50, %v9627_v2  ;;  %v4345_v56 = vmax.f32 %v4281_v63, 0.0  ;;  %v12169_v47 = vld [vmem:[#allocation27_spill] sm:$0xff]  ;;  %v12170_v33 = vld [vmem:[#allocation73_spill] sm:$0xff] }
 0x3b2   : > { %v4283_v12 = vadd.f32 %v12109_v51, %v4155_v0  ;;  %v4157_v17 = vadd.f32 %v4093_v58, %v3949_v13  ;;  %v4330_v24 = vmax.f32 %v4266_v23, 0.0  ;;  %v3745_v63 = vmul.f32 %v12170_v33, %v9780_v20  ;;  %v12171_v13 = vld [vmem:[#allocation67_spill] sm:$0xff] }
 0x3b3   : > { %4439 = vadd.xlane.f32.xlu1 %v4343_v43  ;;  %v4140_v44 = vadd.f32 %v4076_v57, %v3932_v36  ;;  %v4095_v43 = vmul.f32 %v9603_v16, %v9794_v55  ;;  %v4078_v36 = vmul.f32 %v12141_v42, %v9646_v54  ;;  %v3951_v57 = vadd.f32 %v3887_v14, %v3743_v9 }
 0x3b4   : > { %4409 = vadd.xlane.f32.xlu0 %v4328_v46  ;;  %v3872_v46 = vmul.f32 %v12169_v47, %v9630_v18  ;;  %v3606_v50 = vunpack.c.l.bf16 %v3602_v35  ;;  %v3889_v23 = vmul.f32 %v12171_v13, %v9752_v38  ;;  %v4285_v42 = vadd.f32 %v12114_v7, %v4157_v17 }
 0x3b5   : > { %v4268_v3 = vadd.f32 %v9729_v61, %v4140_v44  ;;  %v4142_v0 = vadd.f32 %v4078_v36, %v3934_v4  ;;  %v3730_v44 = vmul.f32 %v9710_v52, %v9627_v2  ;;  %v4347_v61 = vmax.f32 %v4283_v12, 0.0  ;;  %v12173_v36 = vld [vmem:[#allocation77_spill] sm:$0xff] }
 0x3b6   : > { %v3936_v58 = vadd.f32 %v3872_v46, %v3728_v15  ;;  %v4159_v51 = vadd.f32 %v4095_v43, %v3951_v57  ;;  %v4080_v4 = vmul.f32 %v12144_v26, %v9646_v54  ;;  %v12172_v15 = vld [vmem:[#allocation16_spill] sm:$0xff]  ;;  %v3747_v12 = vmul.f32 %v12173_v36, %v9780_v20 }
 0x3b7   : > { %4443 = vadd.xlane.f32.xlu1 %v4345_v56  ;;  %v4097_v56 = vmul.f32 %v9615_v60, %v9794_v55  ;;  %v4332_v9 = vmax.f32 %v4268_v3, 0.0  ;;  %v4270_v14 = vadd.f32 %v9747_v10, %v4142_v0  ;;  %v3874_v35 = vmul.f32 %v12172_v15, %v9630_v18  ;;  %v12174_v46 = vld [vmem:[#allocation52_spill] sm:$0xff]  ;;  %v12175_v3 = vld [vmem:[#allocation19_spill] sm:$0xff] }
 0x3b8   : > { %4413 = vadd.xlane.f32.xlu0 %v4330_v24  ;;  %v3953_v24 = vadd.f32 %v3889_v23, %v3745_v63  ;;  %v9889_v17 = vrot.slane %v3606_v50, %v12174_v46  ;;  %v4144_v43 = vadd.f32 %v4080_v4, %v3936_v58  ;;  %v3891_v0 = vmul.f32 %v12175_v3, %v9752_v38  ;;  %v12177_v4 = vld [vmem:[#allocation72_spill] sm:$0xff]  ;;  %v12181_v3 = vld [vmem:[#allocation85_spill] sm:$0xff] }
 0x3b9   : > { %v3938_v57 = vadd.f32 %v3874_v35, %v3730_v44  ;;  %v3732_v26 = vmul.f32 %v9740_v62, %v9627_v2  ;;  %v4349_v10 = vmax.f32 %v4285_v42, 0.0  ;;  %v4287_v15 = vadd.f32 %v12119_v40, %v4159_v51  ;;  %v12176_v51 = vld [vmem:[#allocation68_spill] sm:$0xff] }
 0x3ba   : > { %v4099_v63 = vmul.f32 %v9632_v21, %v9794_v55  ;;  %v4334_v23 = vmax.f32 %v4270_v14, 0.0  ;;  %v4272_v46 = vadd.f32 %v9768_v48, %v4144_v43  ;;  %v4082_v58 = vmul.f32 %v12146_v25, %v9646_v54  ;;  %v12178_v25 = vld [vmem:[#allocation55_spill] sm:$0xff] }
 0x3bb   : > { %4447 = vadd.xlane.f32.xlu1 %v4347_v61  ;;  %v4161_v61 = vadd.f32 %v4097_v56, %v3953_v24  ;;  %v3876_v44 = vmul.f32 %v9537_v31, %v9630_v18  ;;  %v4084_v42 = vmul.f32 %v12149_v30, %v9646_v54  ;;  %v3749_v56 = vmul.f32 %v12176_v51, %v9780_v20  ;;  %v12180_v30 = vld [vmem:[#allocation20_spill] sm:$0xff] }
 0x3bc   : > { %4417 = vadd.xlane.f32.xlu0 %v4332_v9  ;;  %v3955_v9 = vadd.f32 %v3891_v0, %v3747_v12  ;;  %v3893_v35 = vmul.f32 %v12177_v4, %v9752_v38  ;;  %v4146_v14 = vadd.f32 %v4082_v58, %v3938_v57  ;;  %v3734_v43 = vmul.f32 %v9766_v6, %v9627_v2  ;;  %v12179_v12 = vld [vmem:[#allocation60_spill] sm:$0xff]  ;;  %v12183_v58 = vld [vmem:[#allocation25_spill] sm:$0xff] }
 0x3bd   : > { %v3940_v24 = vadd.f32 %v3876_v44, %v3732_v26  ;;  %v9912_v48 = vrot.slane %v3606_v50, %v12178_v25  ;;  %v4289_v0 = vadd.f32 %v12179_v12, %v4161_v61  ;;  %v4101_v21 = vmul.f32 %v12180_v30, %v9794_v55  ;;  %v12182_v26 = vld [vmem:[#allocation49_spill] sm:$0xff]  ;;  %v12184_v61 = vld [vmem:[#allocation70_spill] sm:$0xff] }
 0x3be   : > { %v4163_v31 = vadd.f32 %v4099_v63, %v3955_v9  ;;  %v4336_v51 = vmax.f32 %v4272_v46, 0.0  ;;  %v4274_v62 = vadd.f32 %v12181_v3, %v4146_v14  ;;  %v3878_v57 = vmul.f32 %v12150_v49, %v9630_v18  ;;  %v12185_v14 = vld [vmem:[#allocation56_spill] sm:$0xff] }
 0x3bf   : > { %4451 = vadd.xlane.f32.xlu1 %v4349_v10  ;;  %v4351_v10 = vmax.f32 %v4287_v15, 0.0  ;;  %v3957_v2 = vadd.f32 %v3893_v35, %v3749_v56  ;;  %v3895_v15 = vmul.f32 %v12183_v58, %v9889_v17  ;;  %v3880_v63 = vmul.f32 %v12184_v61, %v9752_v38  ;;  %v12186_v56 = vld [vmem:[#allocation26_spill] sm:$0xff] }
 0x3c0   : > { %4421 = vadd.xlane.f32.xlu0 %v4334_v23  ;;  %v3736_v23 = vmul.f32 %v12182_v26, %v9780_v20  ;;  %v4148_v44 = vadd.f32 %v4084_v42, %v3940_v24  ;;  %v3942_v9 = vadd.f32 %v3878_v57, %v3734_v43  ;;  %v4086_v46 = vmul.f32 %v12154_v5, %v9646_v54 }
 0x3c1   : > { %v9929_v3 = vrot.slane %v3606_v50, %v12185_v14  ;;  %v4353_v18 = vmax.f32 %v4289_v0, 0.0  ;;  %v4291_v26 = vadd.f32 %v12152_v27, %v4163_v31  ;;  %v3751_v35 = vmul.f32 %v12186_v56, %v9912_v48  ;;  %v12187_v50 = vld [vmem:[#allocation40_spill] sm:$0xff]  ;;  %v12188_v31 = vld [vmem:[#allocation22_spill] sm:$0xff]  ;;  %v12189_v0 = vld [vmem:[#allocation69_spill] sm:$0xff] }
 0x3c2   : > { %v4338_v58 = vmax.f32 %v4274_v62, 0.0  ;;  %v4276_v49 = vadd.f32 %v9808_v1, %v4148_v44  ;;  %v3944_v61 = vadd.f32 %v3880_v63, %v3736_v23  ;;  %v4088_v42 = vmul.f32 %v12153_v34, %v9794_v55 }
 0x3c3   : > { %4455 = vadd.xlane.f32.xlu1 %v4351_v10  ;;  %v4165_v10 = vadd.f32 %v4101_v21, %v3957_v2  ;;  %v4150_v54 = vadd.f32 %v4086_v46, %v3942_v9  ;;  %v3738_v24 = vmul.f32 %v12187_v50, %v9780_v20  ;;  %v4355_v43 = vmax.f32 %v4291_v26, 0.0  ;;  %v12191_v9 = vld [vmem:[#allocation36_spill] sm:$0xff]  ;;  %v12192_v46 = vld [vmem:[#allocation74_spill] sm:$0xff] }
 0x3c4   : > { %4425 = vadd.xlane.f32.xlu0 %v4336_v51  ;;  %v3959_v51 = vadd.f32 %v3895_v15, %v3751_v35  ;;  %v4103_v57 = vmul.f32 %v12189_v0, %v9929_v3  ;;  %v3897_v62 = vmul.f32 %v12158_v37, %v9889_v17  ;;  %v4340_v23 = vmax.f32 %v4276_v49, 0.0  ;;  %v12190_v15 = vld [vmem:[#allocation66_spill] sm:$0xff] }
 0x3c5   : > { %v4293_v21 = vadd.f32 %v12188_v31, %v4165_v10  ;;  %v4278_v2 = vadd.f32 %v9822_v8, %v4150_v54  ;;  %v4152_v63 = vadd.f32 %v4088_v42, %v3944_v61  ;;  %v3753_v26 = vmul.f32 %v12191_v9, %v9912_v48  ;;  %v12193_v10 = vld [vmem:[#allocation62_spill] sm:$0xff] }
 0x3c6   : > { %v4167_v44 = vadd.f32 %v4103_v57, %v3959_v51  ;;  %v3755_v35 = vmul.f32 %v12193_v10, %v9912_v48  ;;  %v3899_v49 = vmul.f32 %v12162_v45, %v9889_v17  ;;  %v3740_v61 = vmul.f32 %v9624_v59, %v9780_v20  ;;  %v12195_v10 = vld [vmem:[#allocation32_spill] sm:$0xff] }
 0x3c7   : > { %4459 = vadd.xlane.f32.xlu1 %v4353_v18  ;;  %v4105_v18 = vmul.f32 %v12192_v46, %v9929_v3  ;;  %v4357_v42 = vmax.f32 %v4293_v21, 0.0  ;;  %v3961_v54 = vadd.f32 %v3897_v62, %v3753_v26  ;;  %v4342_v57 = vmax.f32 %v4278_v2, 0.0  ;;  %v12194_v46 = vld [vmem:[#allocation48_spill] sm:$0xff] }
 0x3c8   : > { %4429 = vadd.xlane.f32.xlu0 %v4338_v58  ;;  %v3882_v58 = vmul.f32 %v12190_v15, %v9752_v38  ;;  %v4295_v51 = vadd.f32 %v9675_v32, %v4167_v44  ;;  %v4280_v9 = vadd.f32 %v12194_v46, %v4152_v63  ;;  %v3963_v15 = vadd.f32 %v3899_v49, %v3755_v35  ;;  %v12198_v49 = vld [vmem:[#allocation51_spill] sm:$0xff] }
 0x3c9   : > { %v4169_v45 = vadd.f32 %v4105_v18, %v3961_v54  ;;  %v3757_v21 = vmul.f32 %v12106_v29, %v9912_v48  ;;  %v3901_v62 = vmul.f32 %v12164_v41, %v9889_v17  ;;  %v4092_v63 = vmul.f32 %v12165_v11, %v9794_v55  ;;  %v12199_v29 = vld [vmem:[#allocation80_spill] sm:$0xff] }
 0x3ca   : > { %v3946_v37 = vadd.f32 %v3882_v58, %v3738_v24  ;;  %v12196_v24 = vld [vmem:[#allocation29_spill] sm:$0xff]  ;;  %v3742_v26 = vmul.f32 %v9654_v19, %v9780_v20  ;;  %v4344_v54 = vmax.f32 %v4280_v9, 0.0  ;;  %v12200_v9 = vld [vmem:[#allocation10_spill] sm:$0xff] }
 0x3cb   : > { %4463 = vadd.xlane.f32.xlu1 %v4355_v43  ;;  %v4107_v43 = vmul.f32 %v9586_v39, %v9929_v3  ;;  %v3884_v58 = vmul.f32 %v12196_v24, %v9752_v38  ;;  %v12197_v24 = vld [vmem:[#allocation78_spill] sm:$0xff] }
 0x3cc   : > { %4433 = vadd.xlane.f32.xlu0 %v4340_v23  ;;  %v4090_v23 = vmul.f32 %v12195_v10, %v9794_v55  ;;  %v4359_v10 = vmax.f32 %v4295_v51, 0.0  ;;  %v4297_v18 = vadd.f32 %v12197_v24, %v4169_v45  ;;  %v3903_v51 = vmul.f32 %v12168_v28, %v9889_v17 }
 0x3cd   : > { %v3948_v2 = vadd.f32 %v3884_v58, %v3740_v61  ;;  %v4171_v35 = vadd.f32 %v4107_v43, %v3963_v15  ;;  %v3759_v61 = vmul.f32 %v12167_v22, %v9912_v48  ;;  %v4111_v43 = vmul.f32 %v9603_v16, %v9929_v3  ;;  %v7055_v58 = vld [vmem:[%s7298_s18 + $0x2] sm:$0x3]  ;;  %v12203_v22 = vld [vmem:[#allocation81_spill] sm:$0xff] }
 0x3ce   : > { %v4154_v44 = vadd.f32 %v4090_v23, %v3946_v37  ;;  %v3886_v37 = vmul.f32 %v12166_v53, %v9752_v38  ;;  %v3744_v23 = vmul.f32 %v12200_v9, %v9780_v20  ;;  %v12201_v53 = vld [vmem:[#allocation46_spill] sm:$0xff] }
 0x3cf   : > { %4467 = vadd.xlane.f32.xlu1 %v4357_v42  ;;  %v4109_v42 = vmul.f32 %v12198_v49, %v9929_v3  ;;  %v4156_v45 = vadd.f32 %v4092_v63, %v3948_v2  ;;  %v3888_v2 = vmul.f32 %v12169_v47, %v9752_v38  ;;  %v3761_v63 = vmul.f32 %v12170_v33, %v9912_v48 }
 0x3d0   : > { %4437 = vadd.xlane.f32.xlu0 %v4342_v57  ;;  %v4282_v41 = vadd.f32 %v12199_v29, %v4154_v44  ;;  %v3965_v57 = vadd.f32 %v3901_v62, %v3757_v21  ;;  %v3950_v15 = vadd.f32 %v3886_v37, %v3742_v26  ;;  %v4361_v44 = vmax.f32 %v4297_v18, 0.0 }
 0x3d1   : > { %v4299_v29 = vadd.f32 %v12201_v53, %v4171_v35  ;;  %v4284_v28 = vadd.f32 %v12203_v22, %v4156_v45  ;;  %v4571_v26 = vunpack.c.l.bf16 %v7055_v58  ;;  %v3952_v35 = vadd.f32 %v3888_v2, %v3744_v23  ;;  %v12205_v58 = vld [vmem:[#allocation39_spill] sm:$0xff] }
 0x3d2   : > { %v4173_v49 = vadd.f32 %v4109_v42, %v3965_v57  ;;  %v4346_v62 = vmax.f32 %v4282_v41, 0.0  ;;  %v3746_v42 = vmul.f32 %v9710_v52, %v9780_v20 }
 0x3d3   : > { %4471 = vadd.xlane.f32.xlu1 %v4359_v10  ;;  %v12202_v10 = vld [vmem:[#allocation21_spill] sm:$0xff]  ;;  %v4363_v57 = vmax.f32 %v4299_v29, 0.0  ;;  %v4348_v45 = vmax.f32 %v4284_v28, 0.0  ;;  %v3763_v29 = vmul.f32 %v12173_v36, %v9912_v48 }
 0x3d4   : > { %4441 = vadd.xlane.f32.xlu0 %v4344_v54  ;;  %v4094_v21 = vmul.f32 %v12202_v10, %v9794_v55  ;;  %v3967_v54 = vadd.f32 %v3903_v51, %v3759_v61  ;;  %v4301_v41 = vadd.f32 %v12114_v7, %v4173_v49  ;;  %v3905_v61 = vmul.f32 %v12171_v13, %v9889_v17  ;;  %v12207_v49 = vld [vmem:[#allocation52_spill] sm:$0xff] }
 0x3d5   : > { %v4113_v51 = vmul.f32 %v9615_v60, %v9929_v3  ;;  %v12211_v13 = vld [vmem:[#allocation84_spill] sm:$0xff] }
 0x3d6   : > { %v4158_v18 = vadd.f32 %v4094_v21, %v3950_v15  ;;  %v4175_v37 = vadd.f32 %v4111_v43, %v3967_v54  ;;  %v4096_v15 = vmul.f32 %v12205_v58, %v9794_v55  ;;  %v12206_v43 = vld [vmem:[#allocation16_spill] sm:$0xff]  ;;  %v3969_v21 = vadd.f32 %v3905_v61, %v3761_v63 }
 0x3d7   : > { %4475 = vadd.xlane.f32.xlu1 %v4361_v44  ;;  %v12204_v44 = vld [vmem:[#allocation83_spill] sm:$0xff]  ;;  %v3890_v23 = vmul.f32 %v12206_v43, %v9752_v38  ;;  %v4365_v58 = vmax.f32 %v4301_v41, 0.0  ;;  %v12210_v63 = vld [vmem:[#allocation76_spill] sm:$0xff]  ;;  %v12214_v41 = vld [vmem:[#allocation37_spill] sm:$0xff] }
 0x3d8   : > { %4445 = vadd.xlane.f32.xlu0 %v4346_v62  ;;  %v4286_v33 = vadd.f32 %v12204_v44, %v4158_v18  ;;  %v10011_v62 = vrot.slane %v4571_v26, %v12207_v49  ;;  %v4303_v54 = vadd.f32 %v12119_v40, %v4175_v37  ;;  %v4160_v28 = vadd.f32 %v4096_v15, %v3952_v35  ;;  %v12208_v18 = vld [vmem:[#allocation82_spill] sm:$0xff]  ;;  %v12209_v43 = vld [vmem:[#allocation19_spill] sm:$0xff]  ;;  %v12213_v37 = vld [vmem:[#allocation17_spill] sm:$0xff] }
 0x3d9   : > { %v3954_v2 = vadd.f32 %v3890_v23, %v3746_v42  ;;  %v3748_v44 = vmul.f32 %v12208_v18, %v9780_v20  ;;  %v4177_v60 = vadd.f32 %v4113_v51, %v3969_v21  ;;  %v4115_v61 = vmul.f32 %v12210_v63, %v9929_v3  ;;  %v12215_v15 = vld [vmem:[#allocation68_spill] sm:$0xff] }
 0x3da   : > { %v4350_v36 = vmax.f32 %v4286_v33, 0.0  ;;  %v4288_v49 = vadd.f32 %v12211_v13, %v4160_v28  ;;  %v3892_v35 = vmul.f32 %v12213_v37, %v9752_v38  ;;  %v4100_v51 = vmul.f32 %v12214_v41, %v9794_v55  ;;  %v12216_v41 = vld [vmem:[#allocation85_spill] sm:$0xff] }
 0x3db   : > { %4479 = vadd.xlane.f32.xlu1 %v4363_v57  ;;  %v3907_v57 = vmul.f32 %v12209_v43, %v9889_v17  ;;  %v3765_v23 = vmul.f32 %v12215_v15, %v9912_v48  ;;  %v3909_v21 = vmul.f32 %v12177_v4, %v9889_v17  ;;  %v4367_v33 = vmax.f32 %v4303_v54, 0.0 }
 0x3dc   : > { %4449 = vadd.xlane.f32.xlu0 %v4348_v45  ;;  %v12212_v45 = vld [vmem:[#allocation54_spill] sm:$0xff]  ;;  %v3956_v13 = vadd.f32 %v3892_v35, %v3748_v44  ;;  %v4305_v37 = vadd.f32 %v12179_v12, %v4177_v60  ;;  %v4352_v15 = vmax.f32 %v4288_v49, 0.0  ;;  %v4102_v49 = vmul.f32 %v12154_v5, %v9794_v55 }
 0x3dd   : > { %v4098_v7 = vmul.f32 %v12212_v45, %v9794_v55  ;;  %v3971_v42 = vadd.f32 %v3907_v57, %v3763_v29  ;;  %v3750_v45 = vmul.f32 %v9766_v6, %v9780_v20  ;;  %v4117_v29 = vmul.f32 %v12180_v30, %v9929_v3 }
 0x3de   : > { %v10037_v57 = vrot.slane %v4571_v26, %v12178_v25  ;;  %v3973_v20 = vadd.f32 %v3909_v21, %v3765_v23 }
 0x3df   : > { %4483 = vadd.xlane.f32.xlu1 %v4365_v58  ;;  %v4162_v28 = vadd.f32 %v4098_v7, %v3954_v2  ;;  %v4179_v58 = vadd.f32 %v4115_v61, %v3971_v42  ;;  %v12218_v7 = vld [vmem:[#allocation49_spill] sm:$0xff]  ;;  %v12220_v61 = vld [vmem:[#allocation70_spill] sm:$0xff]  ;;  %v4164_v42 = vadd.f32 %v4100_v51, %v3956_v13  ;;  %v4104_v13 = vmul.f32 %v12153_v34, %v9929_v3 }
 0x3e0   : > { %4453 = vadd.xlane.f32.xlu0 %v4350_v36  ;;  %v12217_v36 = vld [vmem:[#allocation45_spill] sm:$0xff]  ;;  %v3752_v44 = vmul.f32 %v12218_v7, %v9912_v48  ;;  %v3896_v35 = vmul.f32 %v12220_v61, %v9889_v17  ;;  %v4591_v23 = vmul.f32 %v10037_v57, %v12186_v56 }
 0x3e1   : > { %v4290_v63 = vadd.f32 %v12216_v41, %v4162_v28  ;;  %v3894_v54 = vmul.f32 %v12217_v36, %v9752_v38  ;;  %v12219_v2 = vld [vmem:[#allocation25_spill] sm:$0xff]  ;;  %v10051_v28 = vrot.slane %v4571_v26, %v12185_v14  ;;  %v4369_v38 = vmax.f32 %v4305_v37, 0.0 }
 0x3e2   : > { %v4671_v60 = vmul.f32 %v10011_v62, %v12219_v2  ;;  %v4307_v7 = vadd.f32 %v12152_v27, %v4179_v58  ;;  %v4292_v2 = vadd.f32 %v9808_v1, %v4164_v42  ;;  %v3960_v61 = vadd.f32 %v3896_v35, %v3752_v44  ;;  %v12223_v35 = vld [vmem:[#allocation36_spill] sm:$0xff]  ;;  %v12224_v42 = vld [vmem:[#allocation74_spill] sm:$0xff] }
 0x3e3   : > { %4487 = vadd.xlane.f32.xlu1 %v4367_v33  ;;  %v3958_v25 = vadd.f32 %v3894_v54, %v3750_v45  ;;  %v4181_v33 = vadd.f32 %v4117_v29, %v3973_v20  ;;  %v4354_v21 = vmax.f32 %v4290_v63, 0.0  ;;  %v3754_v26 = vmul.f32 %v12187_v50, %v9912_v48  ;;  %v12221_v63 = vld [vmem:[#allocation13_spill] sm:$0xff]  ;;  %v12222_v20 = vld [vmem:[#allocation66_spill] sm:$0xff] }
 0x3e4   : > { %4457 = vadd.xlane.f32.xlu0 %v4352_v15  ;;  %v4735_v45 = vadd.f32 %v4671_v60, %v4591_v23  ;;  %v4371_v37 = vmax.f32 %v4307_v7, 0.0  ;;  %v4815_v15 = vmul.f32 %v10051_v28, %v12189_v0  ;;  %v4673_v58 = vmul.f32 %v10011_v62, %v12221_v63 }
 0x3e5   : > { %v4166_v55 = vadd.f32 %v4102_v49, %v3958_v25  ;;  %v4309_v51 = vadd.f32 %v12188_v31, %v4181_v33  ;;  %v4356_v29 = vmax.f32 %v4292_v2, 0.0  ;;  %v4168_v44 = vadd.f32 %v4104_v13, %v3960_v61  ;;  %v12226_v2 = vld [vmem:[#allocation30_spill] sm:$0xff] }
 0x3e6   : > { %v3898_v60 = vmul.f32 %v12222_v20, %v9889_v17  ;;  %v4879_v25 = vadd.f32 %v4815_v15, %v4735_v45  ;;  %v4593_v7 = vmul.f32 %v10037_v57, %v12223_v35  ;;  %v4817_v49 = vmul.f32 %v10051_v28, %v12224_v42 }
 0x3e7   : > { %4491 = vadd.xlane.f32.xlu1 %v4369_v38  ;;  %v4294_v54 = vadd.f32 %v9822_v8, %v4166_v55  ;;  %v12225_v38 = vld [vmem:[#allocation62_spill] sm:$0xff]  ;;  %v3756_v61 = vmul.f32 %v9624_v59, %v9912_v48  ;;  %v4373_v13 = vmax.f32 %v4309_v51, 0.0  ;;  %v4296_v42 = vadd.f32 %v12194_v46, %v4168_v44  ;;  %v12229_v59 = vld [vmem:[#allocation35_spill] sm:$0xff] }
 0x3e8   : > { %4461 = vadd.xlane.f32.xlu0 %v4354_v21  ;;  %v4595_v33 = vmul.f32 %v10037_v57, %v12225_v38  ;;  %v3962_v23 = vadd.f32 %v3898_v60, %v3754_v26  ;;  %v4675_v21 = vmul.f32 %v10011_v62, %v12226_v2  ;;  %v4943_v45 = vadd.f32 %v4879_v25, %v9675_v32  ;;  %v12227_v38 = vld [vmem:[#allocation32_spill] sm:$0xff]  ;;  %v12228_v26 = vld [vmem:[#allocation29_spill] sm:$0xff] }
 0x3e9   : > { %v4737_v55 = vadd.f32 %v4673_v58, %v4593_v7  ;;  %v4358_v15 = vmax.f32 %v4294_v54, 0.0  ;;  %v3900_v60 = vmul.f32 %v12228_v26, %v9889_v17  ;;  %v4597_v51 = vmul.f32 %v10037_v57, %v12229_v59  ;;  %v12230_v25 = vld [vmem:[#allocation53_spill] sm:$0xff]  ;;  %v12232_v59 = vld [vmem:[#allocation80_spill] sm:$0xff] }
 0x3ea   : > { %v4739_v35 = vadd.f32 %v4675_v21, %v4595_v33  ;;  %v4677_v58 = vmul.f32 %v10011_v62, %v12230_v25  ;;  %v4108_v44 = vmul.f32 %v12165_v11, %v9929_v3  ;;  %v5007_v46 = vmax.f32 %v4943_v45, 0.0  ;;  %v12231_v21 = vld [vmem:[#allocation51_spill] sm:$0xff] }
 0x3eb   : > { %4495 = vadd.xlane.f32.xlu1 %v4371_v37  ;;  %v4819_v37 = vmul.f32 %v10051_v28, %v9586_v39  ;;  %v4881_v2 = vadd.f32 %v4817_v49, %v4737_v55  ;;  %v3964_v54 = vadd.f32 %v3900_v60, %v3756_v61  ;;  %v4360_v55 = vmax.f32 %v4296_v42, 0.0 }
 0x3ec   : > { %4465 = vadd.xlane.f32.xlu0 %v4356_v29  ;;  %v4106_v29 = vmul.f32 %v12227_v38, %v9929_v3  ;;  %v3758_v38 = vmul.f32 %v9654_v19, %v9912_v48  ;;  %v4741_v60 = vadd.f32 %v4677_v58, %v4597_v51  ;;  %v12235_v19 = vld [vmem:[#allocation18_spill] sm:$0xff]  ;;  %v3760_v42 = vmul.f32 %v12200_v9, %v9912_v48 }
 0x3ed   : > { %v4945_v49 = vadd.f32 %v4881_v2, %v12197_v24  ;;  %v4883_v33 = vadd.f32 %v4819_v37, %v4739_v35  ;;  %v4679_v45 = vmul.f32 %v10011_v62, %v12235_v19  ;;  %v4172_v2 = vadd.f32 %v4108_v44, %v3964_v54  ;;  %v12236_v54 = vld [vmem:[#allocation73_spill] sm:$0xff] }
 0x3ee   : > { %v4170_v7 = vadd.f32 %v4106_v29, %v3962_v23  ;;  %v12233_v23 = vld [vmem:[#allocation47_spill] sm:$0xff]  ;;  %v4823_v37 = vmul.f32 %v10051_v28, %v9603_v16  ;;  %v4601_v44 = vmul.f32 %v10037_v57, %v12236_v54 }
 0x3ef   : > { %4499 = vadd.xlane.f32.xlu1 %v4373_v13  ;;  %v4821_v13 = vmul.f32 %v10051_v28, %v12231_v21  ;;  %v3902_v61 = vmul.f32 %v12233_v23, %v9889_v17  ;;  %v4947_v23 = vadd.f32 %v4883_v33, %v12201_v53  ;;  %v4300_v58 = vadd.f32 %v12203_v22, %v4172_v2  ;;  %v12238_v2 = vld [vmem:[#allocation67_spill] sm:$0xff] }
 0x3f0   : > { %4469 = vadd.xlane.f32.xlu0 %v4358_v15  ;;  %v4298_v25 = vadd.f32 %v12232_v59, %v4170_v7  ;;  %v12234_v15 = vld [vmem:[#allocation34_spill] sm:$0xff]  ;;  %v7056_v7 = vld [vmem:[%s7298_s18 + $0x6] sm:$0x3]  ;;  %v5009_v59 = vmax.f32 %v4945_v49, 0.0 }
 0x3f1   : > { %v4599_v29 = vmul.f32 %v10037_v57, %v12234_v15  ;;  %v3966_v35 = vadd.f32 %v3902_v61, %v3758_v38  ;;  %v4885_v21 = vadd.f32 %v4821_v13, %v4741_v60  ;;  %v3904_v38 = vmul.f32 %v12169_v47, %v9889_v17  ;;  %v12240_v22 = vld [vmem:[#allocation83_spill] sm:$0xff] }
 0x3f2   : > { %v4362_v51 = vmax.f32 %v4298_v25, 0.0  ;;  %v4572_v61 = vunpack.c.l.bf16 %v7056_v7  ;;  %v3762_v13 = vmul.f32 %v9710_v52, %v9912_v48  ;;  %v5011_v60 = vmax.f32 %v4947_v23, 0.0  ;;  %v12237_v25 = vld [vmem:[#allocation9_spill] sm:$0xff]  ;;  %v12241_v7 = vld [vmem:[#allocation39_spill] sm:$0xff] }
 0x3f3   : > { %5071 = vadd.xlane.f32.xlu1 %v5007_v46  ;;  %v4110_v46 = vmul.f32 %v12202_v10, %v9929_v3  ;;  %v3968_v33 = vadd.f32 %v3904_v38, %v3760_v42  ;;  %v4949_v10 = vadd.f32 %v4885_v21, %v12237_v25  ;;  %v4364_v47 = vmax.f32 %v4300_v58, 0.0  ;;  %v12243_v23 = vld [vmem:[#allocation77_spill] sm:$0xff] }
 0x3f4   : > { %4473 = vadd.xlane.f32.xlu0 %v4360_v55  ;;  %v4743_v55 = vadd.f32 %v4679_v45, %v4599_v29  ;;  %v4681_v29 = vmul.f32 %v10011_v62, %v12238_v2  ;;  %v12239_v45 = vld [vmem:[#allocation12_spill] sm:$0xff]  ;;  %v4603_v21 = vmul.f32 %v10037_v57, %v12243_v23 }
 0x3f5   : > { %v4174_v49 = vadd.f32 %v4110_v46, %v3966_v35  ;;  %v4112_v35 = vmul.f32 %v12241_v7, %v9929_v3  ;;  %v5013_v7 = vmax.f32 %v4949_v10, 0.0  ;;  %v12249_v10 = vld [vmem:[#allocation37_spill] sm:$0xff] }
 0x3f6   : > { %v4887_v9 = vadd.f32 %v4823_v37, %v4743_v55  ;;  %v12242_v37 = vld [vmem:[#allocation16_spill] sm:$0xff]  ;;  %v4745_v46 = vadd.f32 %v4681_v29, %v4601_v44 }
 0x3f7   : > { %5075 = vadd.xlane.f32.xlu1 %v5009_v59  ;;  %v4825_v59 = vmul.f32 %v10051_v28, %v12239_v45  ;;  %v4302_v54 = vadd.f32 %v12240_v22, %v4174_v49  ;;  %v3906_v42 = vmul.f32 %v12242_v37, %v9889_v17  ;;  %v4176_v58 = vadd.f32 %v4112_v35, %v3968_v33  ;;  %v12245_v44 = vld [vmem:[#allocation76_spill] sm:$0xff] }
 0x3f8   : > { %4477 = vadd.xlane.f32.xlu0 %v4362_v51  ;;  %v12244_v51 = vld [vmem:[#allocation52_spill] sm:$0xff]  ;;  %v4951_v38 = vadd.f32 %v4887_v9, %v12119_v40  ;;  %v3764_v49 = vmul.f32 %v12208_v18, %v9912_v48  ;;  %v4827_v29 = vmul.f32 %v10051_v28, %v12245_v44  ;;  %v12248_v9 = vld [vmem:[#allocation17_spill] sm:$0xff] }
 0x3f9   : > { %v10133_v55 = vrot.slane %v4572_v61, %v12244_v51  ;;  %v3970_v45 = vadd.f32 %v3906_v42, %v3762_v13  ;;  %v4889_v22 = vadd.f32 %v4825_v59, %v4745_v46  ;;  %v4366_v23 = vmax.f32 %v4302_v54, 0.0  ;;  %v12246_v37 = vld [vmem:[#allocation84_spill] sm:$0xff] }
 0x3fa   : > { %v4304_v51 = vadd.f32 %v12246_v37, %v4176_v58  ;;  %v3908_v33 = vmul.f32 %v12248_v9, %v9889_v17  ;;  %v4116_v59 = vmul.f32 %v12249_v10, %v9929_v3  ;;  %v12250_v35 = vld [vmem:[#allocation68_spill] sm:$0xff]  ;;  %v4685_v46 = vmul.f32 %v10011_v62, %v12177_v4  ;;  %v12252_v10 = vld [vmem:[#allocation55_spill] sm:$0xff] }
 0x3fb   : > { %5079 = vadd.xlane.f32.xlu1 %v5011_v60  ;;  %v4683_v60 = vmul.f32 %v10011_v62, %v12209_v43  ;;  %v4605_v42 = vmul.f32 %v10037_v57, %v12250_v35  ;;  %v5015_v58 = vmax.f32 %v4951_v38, 0.0  ;;  %v3766_v9 = vmul.f32 %v9766_v6, %v9912_v48  ;;  %v12254_v38 = vld [vmem:[#allocation25_spill] sm:$0xff] }
 0x3fc   : > { %4481 = vadd.xlane.f32.xlu0 %v4364_v47  ;;  %v12247_v47 = vld [vmem:[#allocation54_spill] sm:$0xff]  ;;  %v10161_v35 = vrot.slane %v4572_v61, %v12252_v10  ;;  %v4368_v44 = vmax.f32 %v4304_v51, 0.0 }
 0x3fd   : > { %v4114_v2 = vmul.f32 %v12247_v47, %v9929_v3  ;;  %v4747_v13 = vadd.f32 %v4683_v60, %v4603_v21  ;;  %v10153_v54 = vpop.xlane.xlu1 %4377  ;;  %v3972_v47 = vadd.f32 %v3908_v33, %v3764_v49  ;;  %v4829_v60 = vmul.f32 %v10051_v28, %v12180_v30  ;;  %v12255_v49 = vld [vmem:[#allocation70_spill] sm:$0xff] }
 0x3fe   : > { %12251 = vst [vmem:[#allocation44_spill] sm:$0xff] %v10153_v54  ;;  %v4749_v48 = vadd.f32 %v4685_v46, %v4605_v42 }
 0x3ff   : > { %5083 = vadd.xlane.f32.xlu1 %v5013_v7  ;;  %v4178_v37 = vadd.f32 %v4114_v2, %v3970_v45  ;;  %v4953_v7 = vadd.f32 %v4889_v22, %v12179_v12  ;;  %v4891_v21 = vadd.f32 %v4827_v29, %v4747_v13  ;;  %v12253_v2 = vld [vmem:[#allocation49_spill] sm:$0xff]  ;;  %v4687_v22 = vmul.f32 %v10133_v55, %v12254_v38 }
 0x400   : > { %4485 = vadd.xlane.f32.xlu0 %v4366_v23  ;;  %v3910_v23 = vmul.f32 %v12217_v36, %v9889_v17  ;;  %v4592_v45 = vmul.f32 %v10037_v57, %v12253_v2  ;;  %v4672_v29 = vmul.f32 %v10011_v62, %v12255_v49  ;;  %v4180_v51 = vadd.f32 %v4116_v59, %v3972_v47 }
 0x401   : > { %v4306_v4 = vadd.f32 %v12216_v41, %v4178_v37  ;;  %v4118_v37 = vmul.f32 %v12154_v5, %v9929_v3  ;;  %v10177_v17 = vrot.slane %v4572_v61, %v12185_v14  ;;  %v5017_v54 = vmax.f32 %v4953_v7, 0.0 }
 0x402   : > { %v3974_v13 = vadd.f32 %v3910_v23, %v3766_v9  ;;  %v4955_v42 = vadd.f32 %v4891_v21, %v12152_v27  ;;  %v4893_v46 = vadd.f32 %v4829_v60, %v4749_v48  ;;  %v4308_v49 = vadd.f32 %v9808_v1, %v4180_v51 }
 0x403   : > { %5087 = vadd.xlane.f32.xlu1 %v5015_v58  ;;  %v4607_v58 = vmul.f32 %v10161_v35, %v12186_v56  ;;  %v4370_v38 = vmax.f32 %v4306_v4, 0.0  ;;  %v4594_v9 = vmul.f32 %v10037_v57, %v12187_v50  ;;  %v4831_v4 = vmul.f32 %v10177_v17, %v12189_v0 }
 0x404   : > { %v10172_v33 = vpop.xlane.xlu1 %4383  ;;  %4489 = vadd.xlane.f32.xlu0 %v4368_v44  ;;  %v4816_v44 = vmul.f32 %v10051_v28, %v12153_v34  ;;  %v4182_v61 = vadd.f32 %v4118_v37, %v3974_v13  ;;  %v5019_v59 = vmax.f32 %v4955_v42, 0.0  ;;  %v4957_v7 = vadd.f32 %v4893_v46, %v12188_v31  ;;  %v12260_v13 = vld [vmem:[#allocation62_spill] sm:$0xff] }
 0x405   : > { %12256 = vst [vmem:[#allocation42_spill] sm:$0xff] %v10172_v33  ;;  %v4736_v33 = vadd.f32 %v4672_v29, %v4592_v45  ;;  %v4751_v47 = vadd.f32 %v4687_v22, %v4607_v58  ;;  %v4689_v21 = vmul.f32 %v10133_v55, %v12221_v63  ;;  %v4372_v60 = vmax.f32 %v4308_v49, 0.0  ;;  %v12259_v29 = vld [vmem:[#allocation74_spill] sm:$0xff]  ;;  %v12263_v58 = vld [vmem:[#allocation71_spill] sm:$0xff] }
 0x406   : > { %v4674_v45 = vmul.f32 %v10011_v62, %v12222_v20  ;;  %v4833_v51 = vmul.f32 %v10177_v17, %v12259_v29  ;;  %v4611_v37 = vmul.f32 %v10161_v35, %v12260_v13  ;;  %v12262_v46 = vld [vmem:[#allocation30_spill] sm:$0xff]  ;;  %v12264_v29 = vld [vmem:[#allocation48_spill] sm:$0xff] }
 0x407   : > { %5091 = vadd.xlane.f32.xlu1 %v5017_v54  ;;  %v4310_v54 = vadd.f32 %v9822_v8, %v4182_v61  ;;  %v4880_v23 = vadd.f32 %v4816_v44, %v4736_v33  ;;  %v4895_v48 = vadd.f32 %v4831_v4, %v4751_v47  ;;  %v4691_v33 = vmul.f32 %v10133_v55, %v12262_v46 }
 0x408   : > { %v10185_v3 = vpop.xlane.xlu1 %4387  ;;  %4493 = vadd.xlane.f32.xlu0 %v4370_v38  ;;  %v12258_v38 = vld [vmem:[#allocation36_spill] sm:$0xff]  ;;  %v4738_v49 = vadd.f32 %v4674_v45, %v4594_v9  ;;  %v4596_v44 = vmul.f32 %v10037_v57, %v12263_v58  ;;  %v5021_v47 = vmax.f32 %v4957_v7, 0.0  ;;  %v4835_v4 = vmul.f32 %v10177_v17, %v9586_v39  ;;  %v12266_v58 = vld [vmem:[#allocation35_spill] sm:$0xff] }
 0x409   : > { %12257 = vst [vmem:[#allocation24_spill] sm:$0xff] %v10185_v3  ;;  %v4609_v22 = vmul.f32 %v10161_v35, %v12258_v38  ;;  %v4959_v61 = vadd.f32 %v4895_v48, %v9675_v32  ;;  %v4374_v3 = vmax.f32 %v4310_v54, 0.0  ;;  %v4944_v13 = vadd.f32 %v4880_v23, %v12264_v29  ;;  %v12265_v38 = vld [vmem:[#allocation32_spill] sm:$0xff]  ;;  %v12267_v48 = vld [vmem:[#allocation53_spill] sm:$0xff]  ;;  %v12269_v29 = vld [vmem:[#allocation15_spill] sm:$0xff] }
 0x40a   : > { %v4676_v9 = vmul.f32 %v10011_v62, %v12228_v26  ;;  %v4613_v7 = vmul.f32 %v10161_v35, %v12266_v58  ;;  %v4598_v26 = vmul.f32 %v10037_v57, %v12269_v29  ;;  %v12271_v58 = vld [vmem:[#allocation80_spill] sm:$0xff] }
 0x40b   : > { %5095 = vadd.xlane.f32.xlu1 %v5019_v59  ;;  %v4753_v59 = vadd.f32 %v4689_v21, %v4609_v22  ;;  %v4693_v21 = vmul.f32 %v10133_v55, %v12267_v48  ;;  %v5008_v48 = vmax.f32 %v4944_v13, 0.0  ;;  %v4839_v13 = vmul.f32 %v10177_v17, %v9603_v16 }
 0x40c   : > { %v10203_v42 = vpop.xlane.xlu1 %4391  ;;  %4497 = vadd.xlane.f32.xlu0 %v4372_v60  ;;  %v4818_v60 = vmul.f32 %v10051_v28, %v12265_v38  ;;  %v4740_v23 = vadd.f32 %v4676_v9, %v4596_v44  ;;  %v4820_v38 = vmul.f32 %v10051_v28, %v12165_v11  ;;  %v4615_v44 = vmul.f32 %v10161_v35, %v12234_v15 }
 0x40d   : > { %12261 = vst [vmem:[#allocation60_spill] sm:$0xff] %v10203_v42  ;;  %v4897_v45 = vadd.f32 %v4833_v51, %v4753_v59  ;;  %v4755_v42 = vadd.f32 %v4691_v33, %v4611_v37  ;;  %v12270_v33 = vld [vmem:[#allocation51_spill] sm:$0xff] }
 0x40e   : > { %v4882_v54 = vadd.f32 %v4818_v60, %v4738_v49  ;;  %v4837_v59 = vmul.f32 %v10177_v17, %v12270_v33  ;;  %v4757_v60 = vadd.f32 %v4693_v21, %v4613_v7  ;;  %v12275_v7 = vld [vmem:[#allocation21_spill] sm:$0xff] }
 0x40f   : > { %5099 = vadd.xlane.f32.xlu1 %v5021_v47  ;;  %v5023_v47 = vmax.f32 %v4959_v61, 0.0  ;;  %v4961_v51 = vadd.f32 %v4897_v45, %v12197_v24  ;;  %v4899_v37 = vadd.f32 %v4835_v4, %v4755_v42  ;;  %v4695_v61 = vmul.f32 %v10133_v55, %v12235_v19  ;;  %v12274_v45 = vld [vmem:[#allocation10_spill] sm:$0xff]  ;;  %v12276_v33 = vld [vmem:[#allocation81_spill] sm:$0xff] }
 0x410   : > { %v10221_v22 = vpop.xlane.xlu1 %4395  ;;  %4501 = vadd.xlane.f32.xlu0 %v4374_v3  ;;  %v12272_v3 = vld [vmem:[#allocation47_spill] sm:$0xff]  ;;  %v4884_v42 = vadd.f32 %v4820_v38, %v4740_v23  ;;  %v4822_v21 = vmul.f32 %v10051_v28, %v12275_v7  ;;  %v12278_v23 = vld [vmem:[#allocation73_spill] sm:$0xff] }
 0x411   : > { %12268 = vst [vmem:[#allocation20_spill] sm:$0xff] %v10221_v22  ;;  %v4946_v22 = vadd.f32 %v4882_v54, %v12271_v58  ;;  %v4678_v49 = vmul.f32 %v10011_v62, %v12272_v3  ;;  %v4600_v54 = vmul.f32 %v10037_v57, %v12274_v45  ;;  %v7057_v3 = vld [vmem:[%s7298_s18 + $0xa] sm:$0x3]  ;;  %v5025_v58 = vmax.f32 %v4961_v51, 0.0 }
 0x412   : > { %v4963_v15 = vadd.f32 %v4899_v37, %v12201_v53  ;;  %v12277_v38 = vld [vmem:[#allocation27_spill] sm:$0xff]  ;;  %v10252_v45 = vunpack.c.l.bf16 %v7057_v3 }
 0x413   : > { %5103 = vadd.xlane.f32.xlu1 %v5023_v47  ;;  %v4742_v4 = vadd.f32 %v4678_v49, %v4598_v26  ;;  %v4901_v47 = vadd.f32 %v4837_v59, %v4757_v60  ;;  %v5010_v19 = vmax.f32 %v4946_v22, 0.0  ;;  %v4680_v26 = vmul.f32 %v10011_v62, %v12277_v38 }
 0x414   : > { %v10237_v9 = vpop.xlane.xlu1 %4399  ;;  %5073 = vadd.xlane.f32.xlu0 %v5008_v48  ;;  %v4759_v48 = vadd.f32 %v4695_v61, %v4615_v44  ;;  %v4617_v49 = vmul.f32 %v10161_v35, %v12278_v23  ;;  %v4602_v22 = vmul.f32 %v10037_v57, %v9710_v52  ;;  %v5027_v44 = vmax.f32 %v4963_v15, 0.0  ;;  %v12282_v23 = vld [vmem:[#allocation12_spill] sm:$0xff]  ;;  %v12286_v15 = vld [vmem:[#allocation77_spill] sm:$0xff] }
 0x415   : > { %12273 = vst [vmem:[#allocation56_spill] sm:$0xff] %v10237_v9  ;;  %v4948_v9 = vadd.f32 %v4884_v42, %v12276_v33  ;;  %v4886_v37 = vadd.f32 %v4822_v21, %v4742_v4  ;;  %v4744_v60 = vadd.f32 %v4680_v26, %v4600_v54  ;;  %v4965_v61 = vadd.f32 %v4901_v47, %v12237_v25  ;;  %v12284_v4 = vld [vmem:[#allocation39_spill] sm:$0xff]  ;;  %v12285_v54 = vld [vmem:[#allocation16_spill] sm:$0xff]  ;;  %v12292_v25 = vld [vmem:[#allocation54_spill] sm:$0xff] }
 0x416   : > { %v4903_v59 = vadd.f32 %v4839_v13, %v4759_v48  ;;  %v4841_v3 = vmul.f32 %v10177_v17, %v12282_v23  ;;  %v4824_v13 = vmul.f32 %v10051_v28, %v12284_v4  ;;  %v4682_v21 = vmul.f32 %v10011_v62, %v12285_v54  ;;  %v12287_v26 = vld [vmem:[#allocation52_spill] sm:$0xff] }
 0x417   : > { %5107 = vadd.xlane.f32.xlu1 %v5025_v58  ;;  %v12281_v58 = vld [vmem:[#allocation67_spill] sm:$0xff]  ;;  %v5012_v33 = vmax.f32 %v4948_v9, 0.0  ;;  %v4619_v47 = vmul.f32 %v10161_v35, %v12286_v15  ;;  %v4604_v4 = vmul.f32 %v10037_v57, %v12208_v18  ;;  %v12290_v15 = vld [vmem:[#allocation76_spill] sm:$0xff] }
 0x418   : > { %v10254_v51 = vpop.xlane.xlu1 %4403  ;;  %5077 = vadd.xlane.f32.xlu0 %v5010_v19  ;;  %v4697_v38 = vmul.f32 %v10133_v55, %v12281_v58  ;;  %v4967_v9 = vadd.f32 %v4903_v59, %v12119_v40  ;;  %v4826_v59 = vmul.f32 %v10051_v28, %v12292_v25 }
 0x419   : > { %12279 = vst [vmem:[#allocation26_spill] sm:$0xff] %v10254_v51  ;;  %v10258_v42 = vpop.xlane.xlu0 %4375  ;;  %v12283_v51 = vld [vmem:[#allocation83_spill] sm:$0xff] }
 0x41a   : > { %12280 = vst [vmem:[#allocation40_spill] sm:$0xff] %v10258_v42  ;;  %v4950_v19 = vadd.f32 %v4886_v37, %v12283_v51  ;;  %v4761_v48 = vadd.f32 %v4697_v38, %v4617_v49  ;;  %v10274_v42 = vrot.slane %v10252_v45, %v12287_v26  ;;  %v4888_v37 = vadd.f32 %v4824_v13, %v4744_v60  ;;  %v12293_v60 = vld [vmem:[#allocation17_spill] sm:$0xff] }
 0x41b   : > { %5111 = vadd.xlane.f32.xlu1 %v5027_v44  ;;  %v4746_v51 = vadd.f32 %v4682_v21, %v4602_v22  ;;  %v5029_v38 = vmax.f32 %v4965_v61, 0.0  ;;  %v4699_v44 = vmul.f32 %v10133_v55, %v12209_v43  ;;  %v4843_v26 = vmul.f32 %v10177_v17, %v12290_v15  ;;  %v12294_v21 = vld [vmem:[#allocation37_spill] sm:$0xff] }
 0x41c   : > { %v10276_v58 = vpop.xlane.xlu1 %4407  ;;  %5081 = vadd.xlane.f32.xlu0 %v5012_v33  ;;  %v4905_v49 = vadd.f32 %v4841_v3, %v4761_v48  ;;  %v5014_v23 = vmax.f32 %v4950_v19, 0.0  ;;  %v4684_v22 = vmul.f32 %v10011_v62, %v12293_v60  ;;  %v4828_v61 = vmul.f32 %v10051_v28, %v12294_v21  ;;  %v12295_v3 = vld [vmem:[#allocation68_spill] sm:$0xff] }
 0x41d   : > { %12288 = vst [vmem:[#allocation22_spill] sm:$0xff] %v10276_v58  ;;  %v10281_v54 = vpop.xlane.xlu0 %4379  ;;  %v12291_v58 = vld [vmem:[#allocation84_spill] sm:$0xff]  ;;  %v4763_v13 = vadd.f32 %v4699_v44, %v4619_v47  ;;  %v4621_v48 = vmul.f32 %v10161_v35, %v12295_v3  ;;  %v4606_v60 = vmul.f32 %v10037_v57, %v9766_v6  ;;  %v4845_v3 = vmul.f32 %v10177_v17, %v12180_v30 }
 0x41e   : > { %12289 = vst [vmem:[#allocation69_spill] sm:$0xff] %v10281_v54  ;;  %v4952_v33 = vadd.f32 %v4888_v37, %v12291_v58  ;;  %v12296_v54 = vld [vmem:[#allocation72_spill] sm:$0xff]  ;;  %v5031_v37 = vmax.f32 %v4967_v9, 0.0  ;;  %v4890_v58 = vadd.f32 %v4826_v59, %v4746_v51  ;;  %v4748_v25 = vadd.f32 %v4684_v22, %v4604_v4  ;;  %v12299_v9 = vld [vmem:[#allocation25_spill] sm:$0xff] }
 0x41f   : > { %5115 = vadd.xlane.f32.xlu1 %v5029_v38  ;;  %v4701_v15 = vmul.f32 %v10133_v55, %v12296_v54  ;;  %v4969_v47 = vadd.f32 %v4905_v49, %v12179_v12  ;;  %v4907_v44 = vadd.f32 %v4843_v26, %v4763_v13  ;;  %v10309_v54 = vrot.slane %v10252_v45, %v12252_v10  ;;  %v12300_v49 = vld [vmem:[#allocation70_spill] sm:$0xff] }
 0x420   : > { %v10298_v19 = vpop.xlane.xlu1 %4411  ;;  %5085 = vadd.xlane.f32.xlu0 %v5014_v23  ;;  %v4954_v23 = vadd.f32 %v4890_v58, %v12216_v41  ;;  %v4686_v51 = vmul.f32 %v10011_v62, %v12217_v36  ;;  %v4608_v57 = vmul.f32 %v10161_v35, %v12253_v2  ;;  %v4703_v26 = vmul.f32 %v10274_v42, %v12299_v9 }
 0x421   : > { %12297 = vst [vmem:[#allocation78_spill] sm:$0xff] %v10298_v19  ;;  %v10302_v38 = vpop.xlane.xlu0 %4381  ;;  %v5016_v19 = vmax.f32 %v4952_v33, 0.0  ;;  %v4765_v4 = vadd.f32 %v4701_v15, %v4621_v48  ;;  %v4688_v59 = vmul.f32 %v10133_v55, %v12300_v49  ;;  %v4892_v33 = vadd.f32 %v4828_v61, %v4748_v25 }
 0x422   : > { %12298 = vst [vmem:[#allocation46_spill] sm:$0xff] %v10302_v38  ;;  %v4750_v13 = vadd.f32 %v4686_v51, %v4606_v60  ;;  %v4830_v58 = vmul.f32 %v10051_v28, %v12154_v5  ;;  %v10326_v62 = vrot.slane %v10252_v45, %v12185_v14  ;;  %v5033_v15 = vmax.f32 %v4969_v47, 0.0 }
 0x423   : > { %5119 = vadd.xlane.f32.xlu1 %v5031_v37  ;;  %v4971_v48 = vadd.f32 %v4907_v44, %v12152_v27  ;;  %v4909_v38 = vadd.f32 %v4845_v3, %v4765_v4  ;;  %v4623_v49 = vmul.f32 %v10309_v54, %v12186_v56  ;;  %v4956_v25 = vadd.f32 %v4892_v33, %v9808_v1  ;;  %v12305_v33 = vld [vmem:[#allocation36_spill] sm:$0xff] }
 0x424   : > { %v10320_v22 = vpop.xlane.xlu1 %4415  ;;  %5089 = vadd.xlane.f32.xlu0 %v5016_v19  ;;  %v4752_v60 = vadd.f32 %v4688_v59, %v4608_v57  ;;  %v4832_v28 = vmul.f32 %v10177_v17, %v12153_v34  ;;  %v4894_v19 = vadd.f32 %v4830_v58, %v4750_v13  ;;  %v4610_v47 = vmul.f32 %v10161_v35, %v12187_v50  ;;  %v12306_v58 = vld [vmem:[#allocation74_spill] sm:$0xff] }
 0x425   : > { %12301 = vst [vmem:[#allocation82_spill] sm:$0xff] %v10320_v22  ;;  %v10328_v37 = vpop.xlane.xlu0 %4385  ;;  %v5018_v22 = vmax.f32 %v4954_v23, 0.0  ;;  %v4767_v61 = vadd.f32 %v4703_v26, %v4623_v49  ;;  %v5035_v44 = vmax.f32 %v4971_v48, 0.0  ;;  %v4973_v23 = vadd.f32 %v4909_v38, %v12188_v31 }
 0x426   : > { %12302 = vst [vmem:[#allocation19_spill] sm:$0xff] %v10328_v37  ;;  %v4847_v51 = vmul.f32 %v10326_v62, %v12189_v0  ;;  %v4705_v57 = vmul.f32 %v10274_v42, %v12221_v63  ;;  %v5020_v4 = vmax.f32 %v4956_v25, 0.0  ;;  %v4958_v26 = vadd.f32 %v4894_v19, %v9822_v8 }
 0x427   : > { %5123 = vadd.xlane.f32.xlu1 %v5033_v15  ;;  %v4896_v49 = vadd.f32 %v4832_v28, %v4752_v60  ;;  %v4690_v59 = vmul.f32 %v10133_v55, %v12222_v20  ;;  %v4625_v13 = vmul.f32 %v10309_v54, %v12305_v33  ;;  %v4849_v38 = vmul.f32 %v10326_v62, %v12306_v58  ;;  %v12307_v15 = vld [vmem:[#allocation62_spill] sm:$0xff]  ;;  %v12309_v28 = vld [vmem:[#allocation71_spill] sm:$0xff]  ;;  %v12311_v58 = vld [vmem:[#allocation48_spill] sm:$0xff] }
 0x428   : > { %v10336_v45 = vpop.xlane.xlu1 %4419  ;;  %5093 = vadd.xlane.f32.xlu0 %v5018_v22  ;;  %v4911_v22 = vadd.f32 %v4847_v51, %v4767_v61  ;;  %v4627_v48 = vmul.f32 %v10309_v54, %v12307_v15  ;;  %v4707_v60 = vmul.f32 %v10274_v42, %v12262_v46  ;;  %v4612_v19 = vmul.f32 %v10161_v35, %v12309_v28 }
 0x429   : > { %12303 = vst [vmem:[#allocation85_spill] sm:$0xff] %v10336_v45  ;;  %v10340_v3 = vpop.xlane.xlu0 %4389  ;;  %v4754_v25 = vadd.f32 %v4690_v59, %v4610_v47  ;;  %v4851_v37 = vmul.f32 %v10326_v62, %v9586_v39  ;;  %v5022_v15 = vmax.f32 %v4958_v26, 0.0  ;;  %v12313_v59 = vld [vmem:[#allocation29_spill] sm:$0xff] }
 0x42a   : > { %12304 = vst [vmem:[#allocation45_spill] sm:$0xff] %v10340_v3  ;;  %v4975_v51 = vadd.f32 %v4911_v22, %v9675_v32  ;;  %v4769_v3 = vadd.f32 %v4705_v57, %v4625_v13  ;;  %v4692_v46 = vmul.f32 %v10133_v55, %v12313_v59  ;;  %v4771_v33 = vadd.f32 %v4707_v60, %v4627_v48  ;;  %v12315_v22 = vld [vmem:[#allocation53_spill] sm:$0xff]  ;;  %v12318_v60 = vld [vmem:[#allocation51_spill] sm:$0xff] }
 0x42b   : > { %5127 = vadd.xlane.f32.xlu1 %v5035_v44  ;;  %v5037_v44 = vmax.f32 %v4973_v23, 0.0  ;;  %v4709_v57 = vmul.f32 %v10274_v42, %v12315_v22  ;;  %v4614_v59 = vmul.f32 %v10161_v35, %v12269_v29  ;;  %v4853_v22 = vmul.f32 %v10326_v62, %v12318_v60 }
 0x42c   : > { %v10356_v45 = vpop.xlane.xlu1 %4423  ;;  %5097 = vadd.xlane.f32.xlu0 %v5020_v4  ;;  %v12312_v4 = vld [vmem:[#allocation32_spill] sm:$0xff]  ;;  %v4913_v28 = vadd.f32 %v4849_v38, %v4769_v3  ;;  %v5039_v3 = vmax.f32 %v4975_v51, 0.0  ;;  %v4915_v48 = vadd.f32 %v4851_v37, %v4771_v33 }
 0x42d   : > { %12308 = vst [vmem:[#allocation13_spill] sm:$0xff] %v10356_v45  ;;  %v10362_v61 = vpop.xlane.xlu0 %4393  ;;  %v4960_v45 = vadd.f32 %v4896_v49, %v12311_v58  ;;  %v4834_v47 = vmul.f32 %v10177_v17, %v12312_v4  ;;  %v4756_v49 = vadd.f32 %v4692_v46, %v4612_v19  ;;  %v4836_v4 = vmul.f32 %v10177_v17, %v12165_v11  ;;  %v12320_v46 = vld [vmem:[#allocation47_spill] sm:$0xff] }
 0x42e   : > { %12310 = vst [vmem:[#allocation66_spill] sm:$0xff] %v10362_v61  ;;  %v12314_v61 = vld [vmem:[#allocation35_spill] sm:$0xff]  ;;  %v4977_v38 = vadd.f32 %v4913_v28, %v12197_v24  ;;  %v4694_v19 = vmul.f32 %v10133_v55, %v12320_v46  ;;  %v7058_v46 = vld [vmem:[%s7298_s18 + $0xe] sm:$0x3] }
 0x42f   : > { %5131 = vadd.xlane.f32.xlu1 %v5037_v44  ;;  %v4629_v23 = vmul.f32 %v10309_v54, %v12314_v61  ;;  %v4898_v26 = vadd.f32 %v4834_v47, %v4754_v25  ;;  %v12321_v47 = vld [vmem:[#allocation34_spill] sm:$0xff]  ;;  %v4900_v37 = vadd.f32 %v4836_v4, %v4756_v49  ;;  %v12327_v49 = vld [vmem:[#allocation27_spill] sm:$0xff] }
 0x430   : > { %v10376_v13 = vpop.xlane.xlu1 %4427  ;;  %5101 = vadd.xlane.f32.xlu0 %v5022_v15  ;;  %v12319_v15 = vld [vmem:[#allocation80_spill] sm:$0xff]  ;;  %v4631_v11 = vmul.f32 %v10309_v54, %v12321_v47  ;;  %v4758_v33 = vadd.f32 %v4694_v19, %v4614_v59  ;;  %v5041_v47 = vmax.f32 %v4977_v38, 0.0  ;;  %v4696_v19 = vmul.f32 %v10133_v55, %v12327_v49 }
 0x431   : > { %12316 = vst [vmem:[#allocation49_spill] sm:$0xff] %v10376_v13  ;;  %v10382_v44 = vpop.xlane.xlu0 %4397  ;;  %v5024_v13 = vmax.f32 %v4960_v45, 0.0  ;;  %v4962_v25 = vadd.f32 %v4898_v26, %v12319_v15  ;;  %v4773_v29 = vadd.f32 %v4709_v57, %v4629_v23  ;;  %v4855_v45 = vmul.f32 %v10326_v62, %v9603_v16  ;;  %v12324_v26 = vld [vmem:[#allocation10_spill] sm:$0xff]  ;;  %v12328_v16 = vld [vmem:[#allocation73_spill] sm:$0xff] }
 0x432   : > { %12317 = vst [vmem:[#allocation25_spill] sm:$0xff] %v10382_v44  ;;  %v12322_v44 = vld [vmem:[#allocation18_spill] sm:$0xff]  ;;  %v4616_v15 = vmul.f32 %v10161_v35, %v12324_v26  ;;  %v4979_v23 = vadd.f32 %v4915_v48, %v12201_v53  ;;  %v4633_v26 = vmul.f32 %v10309_v54, %v12328_v16  ;;  %v12333_v16 = vld [vmem:[#allocation12_spill] sm:$0xff] }
 0x433   : > { %5135 = vadd.xlane.f32.xlu1 %v5039_v3  ;;  %v4711_v51 = vmul.f32 %v10274_v42, %v12322_v44  ;;  %v4917_v57 = vadd.f32 %v4853_v22, %v4773_v29  ;;  %v4838_v3 = vmul.f32 %v10177_v17, %v12275_v7  ;;  %v10411_v44 = vunpack.c.l.bf16 %v7058_v46 }
 0x434   : > { %v10394_v28 = vpop.xlane.xlu1 %4431  ;;  %5105 = vadd.xlane.f32.xlu0 %v5024_v13  ;;  %v12326_v13 = vld [vmem:[#allocation81_spill] sm:$0xff]  ;;  %v4760_v48 = vadd.f32 %v4696_v19, %v4616_v15  ;;  %v4857_v46 = vmul.f32 %v10326_v62, %v12333_v16  ;;  %v12338_v19 = vld [vmem:[#allocation52_spill] sm:$0xff] }
 0x435   : > { %12323 = vst [vmem:[#allocation48_spill] sm:$0xff] %v10394_v28  ;;  %v10401_v60 = vpop.xlane.xlu0 %4401  ;;  %v5026_v28 = vmax.f32 %v4962_v25, 0.0  ;;  %v4964_v4 = vadd.f32 %v4900_v37, %v12326_v13  ;;  %v4775_v59 = vadd.f32 %v4711_v51, %v4631_v11  ;;  %v4902_v29 = vadd.f32 %v4838_v3, %v4758_v33  ;;  %v12331_v51 = vld [vmem:[#allocation9_spill] sm:$0xff]  ;;  %v12335_v33 = vld [vmem:[#allocation39_spill] sm:$0xff] }
 0x436   : > { %12325 = vst [vmem:[#allocation35_spill] sm:$0xff] %v10401_v60  ;;  %v4618_v25 = vmul.f32 %v10161_v35, %v9710_v52  ;;  %v5043_v11 = vmax.f32 %v4979_v23, 0.0  ;;  %v4981_v60 = vadd.f32 %v4917_v57, %v12331_v51  ;;  %v4840_v15 = vmul.f32 %v10177_v17, %v12335_v33  ;;  %v12337_v23 = vld [vmem:[#allocation77_spill] sm:$0xff]  ;;  %v12343_v52 = vld [vmem:[#allocation54_spill] sm:$0xff] }
 0x437   : > { %5139 = vadd.xlane.f32.xlu1 %v5041_v47  ;;  %v4919_v22 = vadd.f32 %v4855_v45, %v4775_v59  ;;  %v12332_v47 = vld [vmem:[#allocation67_spill] sm:$0xff]  ;;  %v5028_v7 = vmax.f32 %v4964_v4, 0.0  ;;  %v12336_v45 = vld [vmem:[#allocation16_spill] sm:$0xff]  ;;  %v4635_v57 = vmul.f32 %v10309_v54, %v12337_v23  ;;  %v4620_v33 = vmul.f32 %v10161_v35, %v12208_v18 }
 0x438   : > { %v10413_v38 = vpop.xlane.xlu1 %4435  ;;  %5109 = vadd.xlane.f32.xlu0 %v5026_v28  ;;  %v4713_v49 = vmul.f32 %v10274_v42, %v12332_v47  ;;  %v4698_v3 = vmul.f32 %v10133_v55, %v12336_v45  ;;  %v12341_v23 = vld [vmem:[#allocation76_spill] sm:$0xff] }
 0x439   : > { %12329 = vst [vmem:[#allocation81_spill] sm:$0xff] %v10413_v38  ;;  %v10417_v37 = vpop.xlane.xlu0 %4405  ;;  %v12334_v38 = vld [vmem:[#allocation83_spill] sm:$0xff]  ;;  %v4983_v4 = vadd.f32 %v4919_v22, %v12119_v40  ;;  %v4842_v22 = vmul.f32 %v10177_v17, %v12343_v52 }
 0x43a   : > { %12330 = vst [vmem:[#allocation86_spill] sm:$0xff] %v10417_v37  ;;  %v4966_v28 = vadd.f32 %v4902_v29, %v12334_v38  ;;  %v4777_v59 = vadd.f32 %v4713_v49, %v4633_v26  ;;  %v10433_v37 = vrot.slane %v10411_v44, %v12338_v19  ;;  %v4904_v29 = vadd.f32 %v4840_v15, %v4760_v48  ;;  %v12344_v48 = vld [vmem:[#allocation17_spill] sm:$0xff] }
 0x43b   : > { %5143 = vadd.xlane.f32.xlu1 %v5043_v11  ;;  %v4762_v38 = vadd.f32 %v4698_v3, %v4618_v25  ;;  %v5045_v26 = vmax.f32 %v4981_v60, 0.0  ;;  %v4715_v11 = vmul.f32 %v10274_v42, %v12209_v43  ;;  %v4859_v19 = vmul.f32 %v10326_v62, %v12341_v23 }
 0x43c   : > { %v10435_v51 = vpop.xlane.xlu1 %4439  ;;  %5113 = vadd.xlane.f32.xlu0 %v5028_v7  ;;  %v4921_v49 = vadd.f32 %v4857_v46, %v4777_v59  ;;  %v5030_v16 = vmax.f32 %v4966_v28, 0.0  ;;  %v4700_v25 = vmul.f32 %v10133_v55, %v12344_v48  ;;  %v4844_v60 = vmul.f32 %v10177_v17, %v12294_v21  ;;  %v12345_v46 = vld [vmem:[#allocation68_spill] sm:$0xff] }
 0x43d   : > { %12339 = vst [vmem:[#allocation67_spill] sm:$0xff] %v10435_v51  ;;  %v10440_v45 = vpop.xlane.xlu0 %4409  ;;  %v12342_v51 = vld [vmem:[#allocation84_spill] sm:$0xff]  ;;  %v4779_v15 = vadd.f32 %v4715_v11, %v4635_v57  ;;  %v4637_v3 = vmul.f32 %v10309_v54, %v12345_v46  ;;  %v4622_v48 = vmul.f32 %v10161_v35, %v9766_v6  ;;  %v4861_v21 = vmul.f32 %v10326_v62, %v12180_v30 }
 0x43e   : > { %12340 = vst [vmem:[#allocation87_spill] sm:$0xff] %v10440_v45  ;;  %v4968_v7 = vadd.f32 %v4904_v29, %v12342_v51  ;;  %v12346_v59 = vld [vmem:[#allocation72_spill] sm:$0xff]  ;;  %v5047_v29 = vmax.f32 %v4983_v4, 0.0  ;;  %v4906_v51 = vadd.f32 %v4842_v22, %v4762_v38  ;;  %v4764_v52 = vadd.f32 %v4700_v25, %v4620_v33 }
 0x43f   : > { %5147 = vadd.xlane.f32.xlu1 %v5045_v26  ;;  %v4717_v45 = vmul.f32 %v10274_v42, %v12346_v59  ;;  %v4985_v57 = vadd.f32 %v4921_v49, %v12179_v12  ;;  %v4923_v11 = vadd.f32 %v4859_v19, %v4779_v15  ;;  %v10468_v59 = vrot.slane %v10411_v44, %v12252_v10  ;;  %v12349_v49 = vld [vmem:[#allocation70_spill] sm:$0xff] }
 0x440   : > { %v10457_v28 = vpop.xlane.xlu1 %4443  ;;  %5117 = vadd.xlane.f32.xlu0 %v5030_v16  ;;  %v4970_v16 = vadd.f32 %v4906_v51, %v12216_v41  ;;  %v4702_v38 = vmul.f32 %v10133_v55, %v12217_v36  ;;  %v4624_v35 = vmul.f32 %v10309_v54, %v12253_v2  ;;  %v4719_v4 = vmul.f32 %v10433_v37, %v12299_v9 }
 0x441   : > { %12347 = vst [vmem:[#allocation76_spill] sm:$0xff] %v10457_v28  ;;  %v10461_v26 = vpop.xlane.xlu0 %4413  ;;  %v5032_v28 = vmax.f32 %v4968_v7, 0.0  ;;  %v4781_v33 = vadd.f32 %v4717_v45, %v4637_v3  ;;  %v4704_v19 = vmul.f32 %v10274_v42, %v12349_v49  ;;  %v4908_v10 = vadd.f32 %v4844_v60, %v4764_v52 }
 0x442   : > { %12348 = vst [vmem:[#allocation68_spill] sm:$0xff] %v10461_v26  ;;  %v4766_v7 = vadd.f32 %v4702_v38, %v4622_v48  ;;  %v4846_v51 = vmul.f32 %v10177_v17, %v12154_v5  ;;  %v10485_v55 = vrot.slane %v10411_v44, %v12185_v14  ;;  %v5049_v45 = vmax.f32 %v4985_v57, 0.0 }
 0x443   : > { %5151 = vadd.xlane.f32.xlu1 %v5047_v29  ;;  %v4987_v9 = vadd.f32 %v4923_v11, %v12152_v27  ;;  %v4925_v15 = vadd.f32 %v4861_v21, %v4781_v33  ;;  %v4639_v3 = vmul.f32 %v10468_v59, %v12186_v56  ;;  %v5034_v29 = vmax.f32 %v4970_v16, 0.0 }
 0x444   : > { %v10479_v22 = vpop.xlane.xlu1 %4447  ;;  %5121 = vadd.xlane.f32.xlu0 %v5032_v28  ;;  %v4972_v52 = vadd.f32 %v4908_v10, %v9808_v1  ;;  %v4768_v48 = vadd.f32 %v4704_v19, %v4624_v35  ;;  %v4848_v17 = vmul.f32 %v10326_v62, %v12153_v34  ;;  %v4910_v44 = vadd.f32 %v4846_v51, %v4766_v7  ;;  %v12354_v10 = vld [vmem:[#allocation36_spill] sm:$0xff]  ;;  %v12355_v51 = vld [vmem:[#allocation74_spill] sm:$0xff] }
 0x445   : > { %12350 = vst [vmem:[#allocation70_spill] sm:$0xff] %v10479_v22  ;;  %v10487_v25 = vpop.xlane.xlu0 %4417  ;;  %v4783_v60 = vadd.f32 %v4719_v4, %v4639_v3  ;;  %v4626_v28 = vmul.f32 %v10309_v54, %v12187_v50  ;;  %v5051_v57 = vmax.f32 %v4987_v9, 0.0  ;;  %v4989_v56 = vadd.f32 %v4925_v15, %v12188_v31  ;;  %v12356_v9 = vld [vmem:[#allocation62_spill] sm:$0xff] }
 0x446   : > { %12351 = vst [vmem:[#allocation88_spill] sm:$0xff] %v10487_v25  ;;  %v4863_v11 = vmul.f32 %v10485_v55, %v12189_v0  ;;  %v4721_v16 = vmul.f32 %v10433_v37, %v12221_v63  ;;  %v5036_v38 = vmax.f32 %v4972_v52, 0.0  ;;  %v4974_v35 = vadd.f32 %v4910_v44, %v9822_v8  ;;  %v12358_v3 = vld [vmem:[#allocation30_spill] sm:$0xff]  ;;  %v12359_v52 = vld [vmem:[#allocation71_spill] sm:$0xff]  ;;  %v12383_v25 = vld [vmem:[#allocation9_spill] sm:$0xff] }
 0x447   : > { %5155 = vadd.xlane.f32.xlu1 %v5049_v45  ;;  %v4912_v33 = vadd.f32 %v4848_v17, %v4768_v48  ;;  %v4706_v4 = vmul.f32 %v10274_v42, %v12222_v20  ;;  %v4641_v7 = vmul.f32 %v10468_v59, %v12354_v10  ;;  %v4865_v45 = vmul.f32 %v10485_v55, %v12355_v51 }
 0x448   : > { %v10495_v14 = vpop.xlane.xlu1 %4451  ;;  %5125 = vadd.xlane.f32.xlu0 %v5034_v29  ;;  %v4927_v19 = vadd.f32 %v4863_v11, %v4783_v60  ;;  %v4643_v0 = vmul.f32 %v10468_v59, %v12356_v9  ;;  %v4723_v29 = vmul.f32 %v10433_v37, %v12358_v3  ;;  %v4628_v48 = vmul.f32 %v10309_v54, %v12359_v52 }
 0x449   : > { %12352 = vst [vmem:[#allocation89_spill] sm:$0xff] %v10495_v14  ;;  %v10499_v21 = vpop.xlane.xlu0 %4421  ;;  %v4770_v63 = vadd.f32 %v4706_v4, %v4626_v28  ;;  %v5053_v60 = vmax.f32 %v4989_v56, 0.0  ;;  %v4867_v11 = vmul.f32 %v10485_v55, %v9586_v39  ;;  %v5038_v10 = vmax.f32 %v4974_v35, 0.0  ;;  %v12362_v4 = vld [vmem:[#allocation29_spill] sm:$0xff] }
 0x44a   : > { %12353 = vst [vmem:[#allocation90_spill] sm:$0xff] %v10499_v21  ;;  %v4991_v44 = vadd.f32 %v4927_v19, %v9675_v32  ;;  %v4976_v51 = vadd.f32 %v4912_v33, %v12311_v58  ;;  %v4708_v9 = vmul.f32 %v10274_v42, %v12362_v4  ;;  %v4645_v56 = vmul.f32 %v10468_v59, %v12314_v61  ;;  %v12364_v35 = vld [vmem:[#allocation53_spill] sm:$0xff]  ;;  %v12365_v19 = vld [vmem:[#allocation15_spill] sm:$0xff] }
 0x44b   : > { %5159 = vadd.xlane.f32.xlu1 %v5051_v57  ;;  %v4785_v57 = vadd.f32 %v4721_v16, %v4641_v7  ;;  %v4725_v33 = vmul.f32 %v10433_v37, %v12364_v35  ;;  %v4630_v7 = vmul.f32 %v10309_v54, %v12365_v19 }
 0x44c   : > { %v10515_v15 = vpop.xlane.xlu1 %4455  ;;  %5129 = vadd.xlane.f32.xlu0 %v5036_v38  ;;  %v12361_v38 = vld [vmem:[#allocation32_spill] sm:$0xff]  ;;  %v4772_v39 = vadd.f32 %v4708_v9, %v4628_v48  ;;  %v5055_v22 = vmax.f32 %v4991_v44, 0.0 }
 0x44d   : > { %12357 = vst [vmem:[#allocation36_spill] sm:$0xff] %v10515_v15  ;;  %v10521_v17 = vpop.xlane.xlu0 %4425  ;;  %v4850_v28 = vmul.f32 %v10326_v62, %v12361_v38  ;;  %v4929_v3 = vadd.f32 %v4865_v45, %v4785_v57  ;;  %v4787_v15 = vadd.f32 %v4723_v29, %v4643_v0  ;;  %v12367_v29 = vld [vmem:[#allocation51_spill] sm:$0xff]  ;;  %v12368_v57 = vld [vmem:[#allocation80_spill] sm:$0xff]  ;;  %v4789_v35 = vadd.f32 %v4725_v33, %v4645_v56  ;;  %v12376_v33 = vld [vmem:[#allocation50_spill] sm:$0xff] }
 0x44e   : > { %12360 = vst [vmem:[#allocation74_spill] sm:$0xff] %v10521_v17  ;;  %v4869_v61 = vmul.f32 %v10485_v55, %v12367_v29 }
 0x44f   : > { %5163 = vadd.xlane.f32.xlu1 %v5053_v60  ;;  %v4914_v16 = vadd.f32 %v4850_v28, %v4770_v63  ;;  %v4993_v45 = vadd.f32 %v4929_v3, %v12197_v24  ;;  %v4931_v0 = vadd.f32 %v4867_v11, %v4787_v15  ;;  %v5040_v60 = vmax.f32 %v4976_v51, 0.0  ;;  %v12369_v63 = vld [vmem:[#allocation57_spill] sm:$0xff]  ;;  %v12370_v28 = vld [vmem:[#allocation47_spill] sm:$0xff]  ;;  %v12373_v11 = vld [vmem:[#allocation18_spill] sm:$0xff] }
 0x450   : > { %v10533_v32 = vpop.xlane.xlu1 %4459  ;;  %5133 = vadd.xlane.f32.xlu0 %v5038_v10  ;;  %v4852_v48 = vmul.f32 %v10326_v62, %v12369_v63  ;;  %v4710_v9 = vmul.f32 %v10274_v42, %v12370_v28  ;;  %v4727_v51 = vmul.f32 %v10433_v37, %v12373_v11  ;;  %v12374_v3 = vld [vmem:[#allocation10_spill] sm:$0xff]  ;;  %v4933_v56 = vadd.f32 %v4869_v61, %v4789_v35 }
 0x451   : > { %12363 = vst [vmem:[#allocation62_spill] sm:$0xff] %v10533_v32  ;;  %v10539_v14 = vpop.xlane.xlu0 %4429  ;;  %v4978_v10 = vadd.f32 %v4914_v16, %v12368_v57  ;;  %v12371_v32 = vld [vmem:[#allocation34_spill] sm:$0xff]  ;;  %v4632_v16 = vmul.f32 %v10309_v54, %v12374_v3  ;;  %v5057_v17 = vmax.f32 %v4993_v45, 0.0  ;;  %v4729_v61 = vmul.f32 %v10433_v37, %v12332_v47 }
 0x452   : > { %12366 = vst [vmem:[#allocation30_spill] sm:$0xff] %v10539_v14  ;;  %v4647_v44 = vmul.f32 %v10468_v59, %v12371_v32  ;;  %v4916_v24 = vadd.f32 %v4852_v48, %v4772_v39  ;;  %v4774_v15 = vadd.f32 %v4710_v9, %v4630_v7  ;;  %v4871_v32 = vmul.f32 %v10485_v55, %v12376_v33  ;;  %v12377_v39 = vld [vmem:[#allocation21_spill] sm:$0xff]  ;;  %v12378_v48 = vld [vmem:[#allocation27_spill] sm:$0xff] }
 0x453   : > { %5167 = vadd.xlane.f32.xlu1 %v5055_v22  ;;  %v4995_v22 = vadd.f32 %v4931_v0, %v12201_v53  ;;  %v5042_v21 = vmax.f32 %v4978_v10, 0.0  ;;  %v4854_v7 = vmul.f32 %v10326_v62, %v12377_v39  ;;  %v4712_v9 = vmul.f32 %v10274_v42, %v12378_v48  ;;  %v12381_v10 = vld [vmem:[#allocation79_spill] sm:$0xff] }
 0x454   : > { %v10551_v14 = vpop.xlane.xlu1 %4463  ;;  %5137 = vadd.xlane.f32.xlu0 %v5040_v60  ;;  %v4980_v60 = vadd.f32 %v4916_v24, %v12326_v13  ;;  %v4791_v11 = vadd.f32 %v4727_v51, %v4647_v44  ;;  %v4634_v35 = vmul.f32 %v10309_v54, %v12381_v10  ;;  %v12384_v51 = vld [vmem:[#allocation12_spill] sm:$0xff]  ;;  %v12388_v10 = vld [vmem:[#allocation77_spill] sm:$0xff] }
 0x455   : > { %12372 = vst [vmem:[#allocation71_spill] sm:$0xff] %v10551_v14  ;;  %v10557_v29 = vpop.xlane.xlu0 %4433  ;;  %v12379_v14 = vld [vmem:[#allocation73_spill] sm:$0xff]  ;;  %v4918_v53 = vadd.f32 %v4854_v7, %v4774_v15  ;;  %v4776_v0 = vadd.f32 %v4712_v9, %v4632_v16  ;;  %v5059_v33 = vmax.f32 %v4995_v22, 0.0  ;;  %v12386_v15 = vld [vmem:[#allocation39_spill] sm:$0xff]  ;;  %v12387_v7 = vld [vmem:[#allocation16_spill] sm:$0xff]  ;;  %v4651_v22 = vmul.f32 %v10468_v59, %v12388_v10 }
 0x456   : > { %12375 = vst [vmem:[#allocation32_spill] sm:$0xff] %v10557_v29  ;;  %v4649_v45 = vmul.f32 %v10468_v59, %v12379_v14  ;;  %v4935_v44 = vadd.f32 %v4871_v32, %v4791_v11  ;;  %v4873_v14 = vmul.f32 %v10485_v55, %v12384_v51  ;;  %v5044_v26 = vmax.f32 %v4980_v60, 0.0  ;;  %v12391_v51 = vld [vmem:[#allocation84_spill] sm:$0xff] }
 0x457   : > { %5171 = vadd.xlane.f32.xlu1 %v5057_v17  ;;  %v4997_v17 = vadd.f32 %v4933_v56, %v12383_v25  ;;  %v4856_v16 = vmul.f32 %v10326_v62, %v12386_v15  ;;  %v4714_v47 = vmul.f32 %v10274_v42, %v12387_v7  ;;  %v4731_v32 = vmul.f32 %v10433_v37, %v12209_v43 }
 0x458   : > { %v10569_v29 = vpop.xlane.xlu1 %4467  ;;  %5141 = vadd.xlane.f32.xlu0 %v5042_v21  ;;  %v4793_v9 = vadd.f32 %v4729_v61, %v4649_v45  ;;  %v4636_v60 = vmul.f32 %v10309_v54, %v12208_v18  ;;  %v4875_v61 = vmul.f32 %v10485_v55, %v12341_v23 }
 0x459   : > { %12380 = vst [vmem:[#allocation29_spill] sm:$0xff] %v10569_v29  ;;  %v10575_v24 = vpop.xlane.xlu0 %4437  ;;  %v12385_v29 = vld [vmem:[#allocation83_spill] sm:$0xff]  ;;  %v4920_v25 = vadd.f32 %v4856_v16, %v4776_v0  ;;  %v4778_v56 = vadd.f32 %v4714_v47, %v4634_v35  ;;  %v12392_v0 = vld [vmem:[#allocation54_spill] sm:$0xff]  ;;  %v12393_v16 = vld [vmem:[#allocation17_spill] sm:$0xff]  ;;  %v4795_v47 = vadd.f32 %v4731_v32, %v4651_v22 }
 0x45a   : > { %12382 = vst [vmem:[#allocation53_spill] sm:$0xff] %v10575_v24  ;;  %v4982_v21 = vadd.f32 %v4918_v53, %v12385_v29  ;;  %v5061_v53 = vmax.f32 %v4997_v17, 0.0  ;;  %v4937_v45 = vadd.f32 %v4873_v14, %v4793_v9  ;;  %v4858_v35 = vmul.f32 %v10326_v62, %v12392_v0 }
 0x45b   : > { %5175 = vadd.xlane.f32.xlu1 %v5059_v33  ;;  %v4999_v33 = vadd.f32 %v4935_v44, %v12119_v40  ;;  %v4716_v43 = vmul.f32 %v10274_v42, %v12393_v16  ;;  %v4653_v17 = vmul.f32 %v10468_v59, %v12345_v46  ;;  %v4939_v46 = vadd.f32 %v4875_v61, %v4795_v47 }
 0x45c   : > { %v10587_v24 = vpop.xlane.xlu1 %4471  ;;  %5145 = vadd.xlane.f32.xlu0 %v5044_v26  ;;  %v5046_v10 = vmax.f32 %v4982_v21, 0.0  ;;  %v4984_v26 = vadd.f32 %v4920_v25, %v12391_v51  ;;  %v4922_v23 = vadd.f32 %v4858_v35, %v4778_v56  ;;  %v12395_v21 = vld [vmem:[#allocation37_spill] sm:$0xff]  ;;  %v4638_v25 = vmul.f32 %v10309_v54, %v9766_v6 }
 0x45d   : > { %12389 = vst [vmem:[#allocation15_spill] sm:$0xff] %v10587_v24  ;;  %v10593_v11 = vpop.xlane.xlu0 %4441  ;;  %v12394_v24 = vld [vmem:[#allocation72_spill] sm:$0xff]  ;;  %v4780_v14 = vadd.f32 %v4716_v43, %v4636_v60  ;;  %v4860_v9 = vmul.f32 %v10326_v62, %v12395_v21  ;;  %v5063_v22 = vmax.f32 %v4999_v33, 0.0  ;;  %v5001_v32 = vadd.f32 %v4937_v45, %v12179_v12 }
 0x45e   : > { %12390 = vst [vmem:[#allocation51_spill] sm:$0xff] %v10593_v11  ;;  %v4733_v40 = vmul.f32 %v10433_v37, %v12394_v24  ;;  %v4877_v24 = vmul.f32 %v10485_v55, %v12180_v30  ;;  %v4718_v56 = vmul.f32 %v10274_v42, %v12217_v36  ;;  %v4640_v60 = vmul.f32 %v10468_v59, %v12253_v2 }
 0x45f   : > { %5179 = vadd.xlane.f32.xlu1 %v5061_v53  ;;  %v5048_v53 = vmax.f32 %v4984_v26, 0.0  ;;  %v4924_v33 = vadd.f32 %v4860_v9, %v4780_v14  ;;  %v4720_v45 = vmul.f32 %v10433_v37, %v12349_v49  ;;  %v5065_v61 = vmax.f32 %v5001_v32, 0.0 }
 0x460   : > { %v10607_v44 = vpop.xlane.xlu1 %4475  ;;  %5149 = vadd.xlane.f32.xlu0 %v5046_v10  ;;  %v4986_v10 = vadd.f32 %v4922_v23, %v12216_v41  ;;  %v4797_v54 = vadd.f32 %v4733_v40, %v4653_v17  ;;  %v4782_v12 = vadd.f32 %v4718_v56, %v4638_v25  ;;  %v5003_v26 = vadd.f32 %v4939_v46, %v12152_v27 }
 0x461   : > { %v10613_v11 = vpop.xlane.xlu0 %4445  ;;  %v4862_v42 = vmul.f32 %v10326_v62, %v12154_v5  ;;  %v4988_v47 = vadd.f32 %v4924_v33, %v9808_v1  ;;  %v4784_v17 = vadd.f32 %v4720_v45, %v4640_v60  ;;  %v4864_v40 = vmul.f32 %v10485_v55, %v12153_v34 }
 0x462   : > { %v4941_v43 = vadd.f32 %v4877_v24, %v4797_v54  ;;  %v5050_v2 = vmax.f32 %v4986_v10, 0.0  ;;  %v4642_v14 = vmul.f32 %v10468_v59, %v12187_v50  ;;  %v5067_v9 = vmax.f32 %v5003_v26, 0.0 }
 0x463   : > { %5183 = vadd.xlane.f32.xlu1 %v5063_v22  ;;  %v4926_v49 = vadd.f32 %v4862_v42, %v4782_v12  ;;  %v5052_v25 = vmax.f32 %v4988_v47, 0.0  ;;  %v4928_v32 = vadd.f32 %v4864_v40, %v4784_v17  ;;  %v4722_v34 = vmul.f32 %v10433_v37, %v12222_v20 }
 0x464   : > { %v10623_v35 = vpop.xlane.xlu1 %4479  ;;  %5153 = vadd.xlane.f32.xlu0 %v5048_v53  ;;  %v5005_v62 = vadd.f32 %v4941_v43, %v12188_v31  ;;  %v4644_v50 = vmul.f32 %v10468_v59, %v12359_v52  ;;  %v4866_v60 = vmul.f32 %v10485_v55, %v12361_v38  ;;  %v4724_v20 = vmul.f32 %v10433_v37, %v12362_v4 }
 0x465   : > { %v10627_v30 = vpop.xlane.xlu0 %4449  ;;  %v4990_v22 = vadd.f32 %v4926_v49, %v9822_v8  ;;  %v4786_v24 = vadd.f32 %v4722_v34, %v4642_v14  ;;  %v4992_v31 = vadd.f32 %v4928_v32, %v12311_v58  ;;  %v4646_v52 = vmul.f32 %v10468_v59, %v12365_v19  ;;  %v12396_v14 = vld [vmem:[#allocation79_spill] sm:$0xff] }
 0x466   : > { %v5069_v10 = vmax.f32 %v5005_v62, 0.0  ;;  %v4788_v12 = vadd.f32 %v4724_v20, %v4644_v50  ;;  %v4868_v38 = vmul.f32 %v10485_v55, %v12369_v63  ;;  %v4726_v4 = vmul.f32 %v10433_v37, %v12370_v28  ;;  %v12399_v20 = vld [vmem:[#allocation38_spill] sm:$0xff] }
 0x467   : > { %5187 = vadd.xlane.f32.xlu1 %v5065_v61  ;;  %v5054_v56 = vmax.f32 %v4990_v22, 0.0  ;;  %v4930_v33 = vadd.f32 %v4866_v60, %v4786_v24  ;;  %v5056_v61 = vmax.f32 %v4992_v31, 0.0  ;;  %v4728_v63 = vmul.f32 %v10433_v37, %v12378_v48  ;;  %v12397_v24 = vld [vmem:[#allocation40_spill] sm:$0xff] }
 0x468   : > { %v10635_v23 = vpop.xlane.xlu1 %4483  ;;  %5157 = vadd.xlane.f32.xlu0 %v5050_v2  ;;  %v4932_v43 = vadd.f32 %v4868_v38, %v4788_v12  ;;  %v4790_v42 = vadd.f32 %v4726_v4, %v4646_v52  ;;  %v4648_v2 = vmul.f32 %v10468_v59, %v12374_v3  ;;  %v4652_v34 = vmul.f32 %v10468_v59, %v12208_v18  ;;  %v12398_v31 = vld [vmem:[#allocation64_spill] sm:$0xff]  ;;  %v12400_v38 = vld [vmem:[#allocation69_spill] sm:$0xff] }
 0x469   : > { %v10639_v27 = vpop.xlane.xlu0 %4453  ;;  %v4994_v58 = vadd.f32 %v4930_v33, %v12368_v57  ;;  %v4870_v57 = vmul.f32 %v10485_v55, %v12377_v39  ;;  %v4730_v39 = vmul.f32 %v10433_v37, %v12387_v7  ;;  %v4732_v7 = vmul.f32 %v10433_v37, %v12393_v16 }
 0x46a   : > { %v4996_v17 = vadd.f32 %v4932_v43, %v12326_v13  ;;  %v4792_v49 = vadd.f32 %v4728_v63, %v4648_v2  ;;  %v4872_v13 = vmul.f32 %v10485_v55, %v12386_v15  ;;  %v4874_v15 = vmul.f32 %v10485_v55, %v12392_v0 }
 0x46b   : > { %5191 = vadd.xlane.f32.xlu1 %v5067_v9  ;;  %v5058_v47 = vmax.f32 %v4994_v58, 0.0  ;;  %v4934_v40 = vadd.f32 %v4870_v57, %v4790_v42  ;;  %v4650_v9 = vmul.f32 %v10468_v59, %v12396_v14  ;;  %v4796_v52 = vadd.f32 %v4732_v7, %v4652_v34  ;;  %v12401_v34 = vld [vmem:[#allocation44_spill] sm:$0xff]  ;;  %v12402_v7 = vld [vmem:[#allocation42_spill] sm:$0xff] }
 0x46c   : > { %v10645_v46 = vpop.xlane.xlu1 %4487  ;;  %5161 = vadd.xlane.f32.xlu0 %v5052_v25  ;;  %v5060_v62 = vmax.f32 %v4996_v17, 0.0  ;;  %v4936_v22 = vadd.f32 %v4872_v13, %v4792_v49  ;;  %v4876_v16 = vmul.f32 %v10485_v55, %v12395_v21  ;;  %v4734_v42 = vmul.f32 %v10433_v37, %v12217_v36 }
 0x46d   : > { %v10649_v53 = vpop.xlane.xlu0 %4457  ;;  %v4998_v25 = vadd.f32 %v4934_v40, %v12385_v29  ;;  %v4794_v32 = vadd.f32 %v4730_v39, %v4650_v9  ;;  %v4878_v21 = vmul.f32 %v10485_v55, %v12154_v5 }
 0x46e   : > { %v5000_v29 = vadd.f32 %v4936_v22, %v12391_v51 }
 0x46f   : > { %5195 = vadd.xlane.f32.xlu1 %v5069_v10  ;;  %v4938_v18 = vadd.f32 %v4874_v15, %v4794_v32 }
 0x470   : > { %v10656_v54 = vpop.xlane.xlu1 %4491  ;;  %5165 = vadd.xlane.f32.xlu0 %v5054_v56  ;;  %v5062_v56 = vmax.f32 %v4998_v25, 0.0  ;;  %v5064_v0 = vmax.f32 %v5000_v29, 0.0 }
 0x471   : > { %v10660_v45 = vpop.xlane.xlu0 %4461  ;;  %v5002_v43 = vadd.f32 %v4938_v18, %v12216_v41 }
 0x473   : > { %v5066_v40 = vmax.f32 %v5002_v43, 0.0 }
 0x474   : > { %v10667_v26 = vpop.xlane.xlu1 %4495  ;;  %5169 = vadd.xlane.f32.xlu0 %v5056_v61  ;;  %v4654_v61 = vmul.f32 %v10468_v59, %v9766_v6  ;;  %v4940_v59 = vadd.f32 %v4876_v16, %v4796_v52  ;;  %v12404_v16 = vld [vmem:[#allocation19_spill] sm:$0xff] }
 0x475   : > { %v10671_v19 = vpop.xlane.xlu0 %4465 }
 0x476   : > { %v4798_v17 = vadd.f32 %v4734_v42, %v4654_v61  ;;  %v5004_v41 = vadd.f32 %v4940_v59, %v9808_v1 }
 0x478   : > { %v10678_v28 = vpop.xlane.xlu1 %4499  ;;  %5173 = vadd.xlane.f32.xlu0 %v5058_v47  ;;  %v4942_v37 = vadd.f32 %v4878_v21, %v4798_v17  ;;  %v5068_v14 = vmax.f32 %v5004_v41, 0.0 }
 0x479   : > { %v10682_v3 = vpop.xlane.xlu0 %4469 }
 0x47a   : > { %v5006_v9 = vadd.f32 %v4942_v37, %v9822_v8 }
 0x47c   : > { %v5072_v48 = vpop.xlane.xlu1 %5071  ;;  %5177 = vadd.xlane.f32.xlu0 %v5060_v62  ;;  %v5070_v13 = vmax.f32 %v5006_v9, 0.0 }
 0x47d   : > { %v5199_v50 = vadd.f32 %v5072_v48, %v12397_v24  ;;  %v10692_v10 = vpop.xlane.xlu0 %4473 }
 0x47f   : > { %v5335_v60 = vrot.slane %v5199_v50, %v12398_v31  ;;  %v5342_v33 = vrot.slane %v5199_v50, %v12399_v20 }
 0x480   : > { %v5076_v12 = vpop.xlane.xlu1 %5075  ;;  %5181 = vadd.xlane.f32.xlu0 %v5062_v56 }
 0x481   : > { %v6225_v58 = vcombine.low %v5335_v60, %v5342_v33  ;;  %v5201_v51 = vadd.f32 %v5076_v12, %v12400_v38  ;;  %v10704_v4 = vpop.xlane.xlu0 %4477  ;;  %v12403_v33 = vld [vmem:[#allocation46_spill] sm:$0xff] }
 0x483   : > { %v5363_v2 = vrot.slane %v5201_v51, %v12398_v31  ;;  %v5370_v47 = vrot.slane %v5201_v51, %v12399_v20  ;;  %6290 = vperm.xlu1 %7156, %v6225_v58  }
 0x484   : > { %v5080_v6 = vpop.xlane.xlu1 %5079  ;;  %5185 = vadd.xlane.f32.xlu0 %v5064_v0 }
 0x485   : > { %v6227_v57 = vcombine.low %v5363_v2, %v5370_v47  ;;  %v10713_v63 = vpop.xlane.xlu0 %4481  ;;  %v5203_v60 = vadd.f32 %v5080_v6, %v12402_v7  ;;  %v12405_v47 = vld [vmem:[#allocation24_spill] sm:$0xff] }
 0x486   : > { %v12408_v7 = vld [vmem:[#allocation60_spill] sm:$0xff] }
 0x487   : > { %6296 = vperm.xlu1 %7156, %v6227_v57   ;;  %v5391_v51 = vrot.slane %v5203_v60, %v12398_v31  ;;  %v5398_v0 = vrot.slane %v5203_v60, %v12399_v20 }
 0x488   : > { %v5084_v36 = vpop.xlane.xlu1 %5083  ;;  %5189 = vadd.xlane.f32.xlu0 %v5066_v40 }
 0x489   : > { %v10718_v49 = vpop.xlane.xlu0 %4485  ;;  %v5205_v6 = vadd.f32 %v5084_v36, %v12405_v47  ;;  %v6229_v17 = vcombine.low %v5391_v51, %v5398_v0 }
 0x48b   : > { %v5419_v21 = vrot.slane %v5205_v6, %v12398_v31  ;;  %v5426_v37 = vrot.slane %v5205_v6, %v12399_v20 }
 0x48c   : > { %v5088_v62 = vpop.xlane.xlu1 %5087  ;;  %5193 = vadd.xlane.f32.xlu0 %v5068_v14 }
 0x48d   : > { %v10721_v25 = vpop.xlane.xlu0 %4489  ;;  %v5207_v60 = vadd.f32 %v5088_v62, %v12408_v7 }
 0x48f   : > { %v5454_v6 = vrot.slane %v5207_v60, %v12399_v20 }
 0x490   : > { %v5092_v39 = vpop.xlane.xlu1 %5091  ;;  %5197 = vadd.xlane.f32.xlu0 %v5070_v13  ;;  %v12406_v13 = vld [vmem:[#allocation45_spill] sm:$0xff] }
 0x491   : > { %v10723_v1 = vpop.xlane.xlu0 %4493 }
 0x494   : > { %v10725_v48 = vpop.xlane.xlu1 %5095 }
 0x495   : > { %v10727_v5 = vpop.xlane.xlu0 %4497 }
 0x498   : > { %v10729_v55 = vpop.xlane.xlu1 %5099 }
 0x499   : > { %v10731_v22 = vpop.xlane.xlu0 %4501 }
 0x49c   : > { %v10733_v32 = vpop.xlane.xlu1 %5103 }
 0x49d   : > { %v5074_v8 = vpop.xlane.xlu0 %5073 }
 0x49e   : > { %v5200_v24 = vadd.f32 %v5074_v8, %v12401_v34  ;;  %v12407_v34 = vld [vmem:[#allocation66_spill] sm:$0xff] }
 0x4a0   : > { %v5349_v50 = vrot.slane %v5200_v24, %v12398_v31  ;;  %v5356_v56 = vrot.slane %v5200_v24, %v12399_v20  ;;  %v10738_v29 = vpop.xlane.xlu1 %5107 }
 0x4a1   : > { %v5078_v15 = vpop.xlane.xlu0 %5077 }
 0x4a2   : > { %v5202_v12 = vadd.f32 %v5078_v15, %v12403_v33  ;;  %v6226_v18 = vcombine.low %v5349_v50, %v5356_v56  ;;  %v6231_v15 = vcombine.low %v5419_v21, %v5426_v37 }
 0x4a4   : > { %v5377_v52 = vrot.slane %v5202_v12, %v12398_v31  ;;  %v5384_v61 = vrot.slane %v5202_v12, %v12399_v20  ;;  %v10744_v58 = vpop.xlane.xlu1 %5111 }
 0x4a5   : > { %v5082_v38 = vpop.xlane.xlu0 %5081 }
 0x4a6   : > { %v6228_v43 = vcombine.low %v5377_v52, %v5384_v61  ;;  %v5204_v42 = vadd.f32 %v5082_v38, %v12404_v16  ;;  %6293 = vperm.xlu0 %7155, %v6226_v18   ;;  %v12409_v61 = vld [vmem:[#allocation25_spill] sm:$0xff]  ;;  %v5447_v16 = vrot.slane %v5207_v60, %v12398_v31 }
 0x4a8   : > { %v10749_v2 = vpop.xlane.xlu1 %5115  ;;  %6299 = vperm.xlu1 %7156, %v6228_v43   ;;  %v5405_v57 = vrot.slane %v5204_v42, %v12398_v31  ;;  %v5412_v40 = vrot.slane %v5204_v42, %v12399_v20  ;;  %v12410_v42 = vld [vmem:[#allocation20_spill] sm:$0xff] }
 0x4a9   : > { %v5086_v59 = vpop.xlane.xlu0 %5085  ;;  %v5209_v62 = vadd.f32 %v5092_v39, %v12410_v42 }
 0x4aa   : > { %v6230_v9 = vcombine.low %v5405_v57, %v5412_v40  ;;  %v5206_v8 = vadd.f32 %v5086_v59, %v12406_v13  ;;  %v12411_v57 = vld [vmem:[#allocation35_spill] sm:$0xff] }
 0x4ab   : > { %v5482_v13 = vrot.slane %v5209_v62, %v12399_v20 }
 0x4ac   : > { %v10754_v41 = vpop.xlane.xlu1 %5119  ;;  %6302 = vperm.xlu1 %7156, %v6229_v17   ;;  %v5433_v12 = vrot.slane %v5206_v8, %v12398_v31  ;;  %v5440_v18 = vrot.slane %v5206_v8, %v12399_v20  ;;  %v6233_v8 = vcombine.low %v5447_v16, %v5454_v6 }
 0x4ad   : > { %v5090_v14 = vpop.xlane.xlu0 %5089 }
 0x4ae   : > { %v5208_v24 = vadd.f32 %v5090_v14, %v12407_v34  ;;  %v6232_v59 = vcombine.low %v5433_v12, %v5440_v18  ;;  %v12412_v34 = vld [vmem:[#allocation56_spill] sm:$0xff]  ;;  %v12414_v18 = vld [vmem:[#allocation26_spill] sm:$0xff] }
 0x4b0   : > { %v5461_v36 = vrot.slane %v5208_v24, %v12398_v31  ;;  %v5468_v50 = vrot.slane %v5208_v24, %v12399_v20  ;;  %v10762_v56 = vpop.xlane.xlu1 %5123  ;;  %6305 = vperm.xlu1 %7156, %v6230_v9   ;;  %v5475_v9 = vrot.slane %v5209_v62, %v12398_v31  ;;  %v5211_v24 = vadd.f32 %v10725_v48, %v12412_v34  ;;  %v12418_v34 = vld [vmem:[#allocation78_spill] sm:$0xff] }
 0x4b1   : > { %v5094_v33 = vpop.xlane.xlu0 %5093 }
 0x4b2   : > { %v6234_v52 = vcombine.low %v5461_v36, %v5468_v50  ;;  %v5210_v38 = vadd.f32 %v5094_v33, %v12409_v61  ;;  %v12413_v50 = vld [vmem:[#allocation86_spill] sm:$0xff]  ;;  %v6235_v12 = vcombine.low %v5475_v9, %v5482_v13  ;;  %v5510_v48 = vrot.slane %v5211_v24, %v12399_v20 }
 0x4b4   : > { %v5489_v51 = vrot.slane %v5210_v38, %v12398_v31  ;;  %v5496_v0 = vrot.slane %v5210_v38, %v12399_v20  ;;  %v10770_v43 = vpop.xlane.xlu1 %5127  ;;  %6308 = vperm.xlu1 %7156, %v6231_v15   ;;  %6317 = vperm.xlu0 %7155, %v6234_v52   ;;  %v5213_v52 = vadd.f32 %v10729_v55, %v12414_v18 }
 0x4b5   : > { %v5098_v47 = vpop.xlane.xlu0 %5097  ;;  %v5503_v38 = vrot.slane %v5211_v24, %v12398_v31  ;;  %v5217_v24 = vadd.f32 %v10738_v29, %v12418_v34 }
 0x4b6   : > { %v6236_v17 = vcombine.low %v5489_v51, %v5496_v0  ;;  %v5212_v40 = vadd.f32 %v5098_v47, %v12411_v57  ;;  %v12415_v0 = vld [vmem:[#allocation87_spill] sm:$0xff]  ;;  %v5531_v47 = vrot.slane %v5213_v52, %v12398_v31  ;;  %v5538_v6 = vrot.slane %v5213_v52, %v12399_v20  ;;  %v12416_v57 = vld [vmem:[#allocation22_spill] sm:$0xff] }
 0x4b7   : > { %v5594_v29 = vrot.slane %v5217_v24, %v12399_v20 }
 0x4b8   : > { %v5517_v21 = vrot.slane %v5212_v40, %v12398_v31  ;;  %v5524_v37 = vrot.slane %v5212_v40, %v12399_v20  ;;  %v10778_v14 = vpop.xlane.xlu1 %5131  ;;  %6311 = vperm.xlu1 %7156, %v6232_v59   ;;  %6323 = vperm.xlu0 %7155, %v6236_v17   ;;  %v6237_v17 = vcombine.low %v5503_v38, %v5510_v48 }
 0x4b9   : > { %v5102_v39 = vpop.xlane.xlu0 %5101  ;;  %v5215_v40 = vadd.f32 %v10733_v32, %v12416_v57  ;;  %v12419_v32 = vld [vmem:[#allocation88_spill] sm:$0xff] }
 0x4ba   : > { %v6238_v36 = vcombine.low %v5517_v21, %v5524_v37  ;;  %v5214_v15 = vadd.f32 %v5102_v39, %v12413_v50  ;;  %v12417_v37 = vld [vmem:[#allocation68_spill] sm:$0xff] }
 0x4bb   : > { %v5559_v50 = vrot.slane %v5215_v40, %v12398_v31 }
 0x4bc   : > { %v5545_v7 = vrot.slane %v5214_v15, %v12398_v31  ;;  %v5552_v60 = vrot.slane %v5214_v15, %v12399_v20  ;;  %v10787_v33 = vpop.xlane.xlu1 %5135  ;;  %6314 = vperm.xlu1 %7156, %v6233_v8   ;;  %6329 = vperm.xlu0 %7155, %v6238_v36   ;;  %v6239_v8 = vcombine.low %v5531_v47, %v5538_v6 }
 0x4bd   : > { %v5106_v61 = vpop.xlane.xlu0 %5105  ;;  %v5566_v15 = vrot.slane %v5215_v40, %v12399_v20 }
 0x4be   : > { %v6240_v51 = vcombine.low %v5545_v7, %v5552_v60  ;;  %v5216_v16 = vadd.f32 %v5106_v61, %v12415_v0  ;;  %v5587_v61 = vrot.slane %v5217_v24, %v12398_v31 }
 0x4bf   : > { %v6241_v48 = vcombine.low %v5559_v50, %v5566_v15  ;;  %v12424_v15 = vld [vmem:[#allocation13_spill] sm:$0xff] }
 0x4c0   : > { %v5573_v42 = vrot.slane %v5216_v16, %v12398_v31  ;;  %v5580_v62 = vrot.slane %v5216_v16, %v12399_v20  ;;  %6320 = vperm.xlu1 %7156, %v6235_v12   ;;  %6335 = vperm.xlu0 %7155, %v6240_v51   ;;  %v10798_v59 = vpop.xlane.xlu1 %5139  ;;  %v12420_v51 = vld [vmem:[#allocation82_spill] sm:$0xff] }
 0x4c1   : > { %v5110_v55 = vpop.xlane.xlu0 %5109  ;;  %v5219_v0 = vadd.f32 %v10744_v58, %v12420_v51 }
 0x4c2   : > { %v6242_v21 = vcombine.low %v5573_v42, %v5580_v62  ;;  %v5218_v9 = vadd.f32 %v5110_v55, %v12417_v37  ;;  %v12421_v42 = vld [vmem:[#allocation90_spill] sm:$0xff]  ;;  %v6243_v55 = vcombine.low %v5587_v61, %v5594_v29 }
 0x4c3   : > { %v5615_v37 = vrot.slane %v5219_v0, %v12398_v31  ;;  %v5622_v58 = vrot.slane %v5219_v0, %v12399_v20 }
 0x4c4   : > { %v5601_v13 = vrot.slane %v5218_v9, %v12398_v31  ;;  %v5608_v39 = vrot.slane %v5218_v9, %v12399_v20  ;;  %6326 = vperm.xlu1 %7156, %v6237_v17   ;;  %6341 = vperm.xlu0 %7155, %v6242_v21   ;;  %v10810_v12 = vpop.xlane.xlu1 %5143  ;;  %v12422_v17 = vld [vmem:[#allocation85_spill] sm:$0xff] }
 0x4c5   : > { %v5114_v36 = vpop.xlane.xlu0 %5113  ;;  %v5221_v57 = vadd.f32 %v10749_v2, %v12422_v17  ;;  %v6245_v50 = vcombine.low %v5615_v37, %v5622_v58  ;;  %v12428_v58 = vld [vmem:[#allocation48_spill] sm:$0xff] }
 0x4c6   : > { %v6244_v7 = vcombine.low %v5601_v13, %v5608_v39  ;;  %v5220_v60 = vadd.f32 %v5114_v36, %v12419_v32  ;;  %v12423_v13 = vld [vmem:[#allocation74_spill] sm:$0xff] }
 0x4c7   : > { %v5643_v24 = vrot.slane %v5221_v57, %v12398_v31  ;;  %v5650_v2 = vrot.slane %v5221_v57, %v12399_v20 }
 0x4c8   : > { %v5629_v18 = vrot.slane %v5220_v60, %v12398_v31  ;;  %v5636_v52 = vrot.slane %v5220_v60, %v12399_v20  ;;  %6332 = vperm.xlu1 %7156, %v6239_v8   ;;  %6347 = vperm.xlu0 %7155, %v6244_v7   ;;  %v10823_v40 = vpop.xlane.xlu1 %5147  ;;  %v5223_v7 = vadd.f32 %v10754_v41, %v12424_v15  ;;  %v12425_v60 = vld [vmem:[#allocation30_spill] sm:$0xff] }
 0x4c9   : > { %v5118_v38 = vpop.xlane.xlu0 %5117 }
 0x4ca   : > { %v6246_v16 = vcombine.low %v5629_v18, %v5636_v52  ;;  %v5222_v62 = vadd.f32 %v5118_v38, %v12421_v42  ;;  %v6247_v38 = vcombine.low %v5643_v24, %v5650_v2  ;;  %v5678_v41 = vrot.slane %v5223_v7, %v12399_v20 }
 0x4cc   : > { %v5657_v47 = vrot.slane %v5222_v62, %v12398_v31  ;;  %v5664_v6 = vrot.slane %v5222_v62, %v12399_v20  ;;  %6338 = vperm.xlu1 %7156, %v6241_v48   ;;  %6353 = vperm.xlu0 %7155, %v6246_v16   ;;  %v10835_v52 = vpop.xlane.xlu1 %5151  ;;  %v12426_v48 = vld [vmem:[#allocation49_spill] sm:$0xff]  ;;  %v5671_v16 = vrot.slane %v5223_v7, %v12398_v31  ;;  %v12427_v62 = vld [vmem:[#allocation32_spill] sm:$0xff] }
 0x4cd   : > { %v5122_v21 = vpop.xlane.xlu0 %5121  ;;  %v5225_v51 = vadd.f32 %v10762_v56, %v12426_v48 }
 0x4ce   : > { %v6248_v9 = vcombine.low %v5657_v47, %v5664_v6  ;;  %v5224_v39 = vadd.f32 %v5122_v21, %v12423_v13  ;;  %v6249_v37 = vcombine.low %v5671_v16, %v5678_v41  ;;  %v12432_v16 = vld [vmem:[#allocation67_spill] sm:$0xff] }
 0x4cf   : > { %v5699_v17 = vrot.slane %v5225_v51, %v12398_v31  ;;  %v5706_v57 = vrot.slane %v5225_v51, %v12399_v20  ;;  %v5231_v41 = vadd.f32 %v10787_v33, %v12432_v16 }
 0x4d0   : > { %v5685_v8 = vrot.slane %v5224_v39, %v12398_v31  ;;  %v5692_v34 = vrot.slane %v5224_v39, %v12399_v20  ;;  %6344 = vperm.xlu1 %7156, %v6243_v55   ;;  %6359 = vperm.xlu0 %7155, %v6248_v9   ;;  %v10848_v21 = vpop.xlane.xlu1 %5155  ;;  %v5227_v9 = vadd.f32 %v10770_v43, %v12428_v58  ;;  %v12429_v39 = vld [vmem:[#allocation53_spill] sm:$0xff]  ;;  %v12431_v43 = vld [vmem:[#allocation51_spill] sm:$0xff] }
 0x4d1   : > { %v5126_v36 = vpop.xlane.xlu0 %5125  ;;  %v6251_v2 = vcombine.low %v5699_v17, %v5706_v57  ;;  %v12433_v17 = vld [vmem:[#allocation76_spill] sm:$0xff]  ;;  %v5783_v58 = vrot.slane %v5231_v41, %v12398_v31  ;;  %v5790_v33 = vrot.slane %v5231_v41, %v12399_v20 }
 0x4d2   : > { %v6250_v32 = vcombine.low %v5685_v8, %v5692_v34  ;;  %v5226_v18 = vadd.f32 %v5126_v36, %v12425_v60  ;;  %v12430_v36 = vld [vmem:[#allocation81_spill] sm:$0xff]  ;;  %v5727_v7 = vrot.slane %v5227_v9, %v12398_v31  ;;  %v5233_v57 = vadd.f32 %v10798_v59, %v12433_v17 }
 0x4d4   : > { %v5713_v61 = vrot.slane %v5226_v18, %v12398_v31  ;;  %v5720_v29 = vrot.slane %v5226_v18, %v12399_v20  ;;  %6350 = vperm.xlu1 %7156, %v6245_v50   ;;  %6365 = vperm.xlu0 %7155, %v6250_v32   ;;  %v5229_v50 = vadd.f32 %v10778_v14, %v12430_v36 }
 0x4d5   : > { %v5130_v0 = vpop.xlane.xlu0 %5129  ;;  %v5734_v32 = vrot.slane %v5227_v9, %v12399_v20  ;;  %v5818_v59 = vrot.slane %v5233_v57, %v12399_v20 }
 0x4d6   : > { %v6252_v42 = vcombine.low %v5713_v61, %v5720_v29  ;;  %v5228_v47 = vadd.f32 %v5130_v0, %v12427_v62  ;;  %v10860_v61 = vpop.xlane.xlu1 %5159  ;;  %v5755_v48 = vrot.slane %v5229_v50, %v12398_v31  ;;  %v5762_v14 = vrot.slane %v5229_v50, %v12399_v20 }
 0x4d7   : > { %v6253_v0 = vcombine.low %v5727_v7, %v5734_v32 }
 0x4d8   : > { %v5741_v6 = vrot.slane %v5228_v47, %v12398_v31  ;;  %v5748_v55 = vrot.slane %v5228_v47, %v12399_v20  ;;  %6356 = vperm.xlu1 %7156, %v6247_v38   ;;  %6371 = vperm.xlu0 %7155, %v6252_v42  }
 0x4d9   : > { %v5134_v56 = vpop.xlane.xlu0 %5133 }
 0x4da   : > { %v6254_v13 = vcombine.low %v5741_v6, %v5748_v55  ;;  %v5230_v8 = vadd.f32 %v5134_v56, %v12429_v39  ;;  %v6255_v55 = vcombine.low %v5755_v48, %v5762_v14  ;;  %v10873_v56 = vpop.xlane.xlu1 %5163 }
 0x4dc   : > { %v5769_v34 = vrot.slane %v5230_v8, %v12398_v31  ;;  %v5776_v24 = vrot.slane %v5230_v8, %v12399_v20  ;;  %6362 = vperm.xlu1 %7156, %v6249_v37   ;;  %6377 = vperm.xlu0 %7155, %v6254_v13   ;;  %v5811_v8 = vrot.slane %v5233_v57, %v12398_v31 }
 0x4dd   : > { %v5138_v15 = vpop.xlane.xlu0 %5137 }
 0x4de   : > { %v6256_v60 = vcombine.low %v5769_v34, %v5776_v24  ;;  %v5232_v18 = vadd.f32 %v5138_v15, %v12431_v43  ;;  %v6257_v24 = vcombine.low %v5783_v58, %v5790_v33  ;;  %v5168_v7 = vpop.xlane.xlu1 %5167  ;;  %v12435_v43 = vld [vmem:[#allocation89_spill] sm:$0xff] }
 0x4e0   : > { %v5797_v29 = vrot.slane %v5232_v18, %v12398_v31  ;;  %v5804_v38 = vrot.slane %v5232_v18, %v12399_v20  ;;  %6368 = vperm.xlu1 %7156, %v6251_v2   ;;  %6383 = vperm.xlu0 %7155, %v6256_v60   ;;  %v12434_v2 = vld [vmem:[#allocation70_spill] sm:$0xff]  ;;  %v6259_v60 = vcombine.low %v5811_v8, %v5818_v59 }
 0x4e1   : > { %v5142_v51 = vpop.xlane.xlu0 %5141  ;;  %v5235_v36 = vadd.f32 %v10810_v12, %v12434_v2  ;;  %v5237_v18 = vadd.f32 %v10823_v40, %v12435_v43 }
 0x4e2   : > { %v6258_v42 = vcombine.low %v5797_v29, %v5804_v38  ;;  %v5234_v62 = vadd.f32 %v5142_v51, %v10613_v11  ;;  %v5172_v41 = vpop.xlane.xlu1 %5171 }
 0x4e3   : > { %v5839_v38 = vrot.slane %v5235_v36, %v12398_v31  ;;  %v5846_v48 = vrot.slane %v5235_v36, %v12399_v20  ;;  %v5874_v16 = vrot.slane %v5237_v18, %v12399_v20  ;;  %v5249_v2 = vadd.f32 %v5172_v41, %v10607_v44 }
 0x4e4   : > { %v5825_v47 = vrot.slane %v5234_v62, %v12398_v31  ;;  %v5832_v6 = vrot.slane %v5234_v62, %v12399_v20  ;;  %6374 = vperm.xlu1 %7156, %v6253_v0   ;;  %6389 = vperm.xlu0 %7155, %v6258_v42   ;;  %v5867_v0 = vrot.slane %v5237_v18, %v12398_v31  ;;  %v12436_v62 = vld [vmem:[#allocation36_spill] sm:$0xff] }
 0x4e5   : > { %v5146_v37 = vpop.xlane.xlu0 %5145  ;;  %v6261_v42 = vcombine.low %v5839_v38, %v5846_v48  ;;  %v6035_v18 = vrot.slane %v5249_v2, %v12398_v31 }
 0x4e6   : > { %v6260_v9 = vcombine.low %v5825_v47, %v5832_v6  ;;  %v5236_v11 = vadd.f32 %v5146_v37, %v10627_v30  ;;  %v5239_v47 = vadd.f32 %v10835_v52, %v12436_v62  ;;  %v6263_v57 = vcombine.low %v5867_v0, %v5874_v16 }
 0x4e8   : > { %v5853_v13 = vrot.slane %v5236_v11, %v12398_v31  ;;  %v5860_v39 = vrot.slane %v5236_v11, %v12399_v20  ;;  %6380 = vperm.xlu1 %7156, %v6255_v55   ;;  %6395 = vperm.xlu0 %7155, %v6260_v9   ;;  %v5895_v58 = vrot.slane %v5239_v47, %v12398_v31  ;;  %v12437_v9 = vld [vmem:[#allocation62_spill] sm:$0xff] }
 0x4e9   : > { %v5150_v34 = vpop.xlane.xlu0 %5149  ;;  %v5902_v33 = vrot.slane %v5239_v47, %v12399_v20  ;;  %v5241_v11 = vadd.f32 %v10848_v21, %v12437_v9  ;;  %v12439_v9 = vld [vmem:[#allocation71_spill] sm:$0xff] }
 0x4ea   : > { %v6262_v50 = vcombine.low %v5853_v13, %v5860_v39  ;;  %v5238_v15 = vadd.f32 %v5150_v34, %v10639_v27  ;;  %v5176_v13 = vpop.xlane.xlu1 %5175  ;;  %v12438_v34 = vld [vmem:[#allocation15_spill] sm:$0xff] }
 0x4eb   : > { %v6265_v39 = vcombine.low %v5895_v58, %v5902_v33  ;;  %v5923_v8 = vrot.slane %v5241_v11, %v12398_v31  ;;  %v5930_v59 = vrot.slane %v5241_v11, %v12399_v20  ;;  %v5251_v38 = vadd.f32 %v5176_v13, %v10623_v35 }
 0x4ec   : > { %v5881_v30 = vrot.slane %v5238_v15, %v12398_v31  ;;  %v5888_v32 = vrot.slane %v5238_v15, %v12399_v20  ;;  %6386 = vperm.xlu1 %7156, %v6257_v24   ;;  %6401 = vperm.xlu0 %7155, %v6262_v50   ;;  %v5247_v24 = vadd.f32 %v5168_v7, %v12438_v34 }
 0x4ed   : > { %v5154_v29 = vpop.xlane.xlu0 %5153  ;;  %v6267_v15 = vcombine.low %v5923_v8, %v5930_v59  ;;  %v6042_v7 = vrot.slane %v5249_v2, %v12399_v20  ;;  %v6063_v41 = vrot.slane %v5251_v38, %v12398_v31  ;;  %v5243_v11 = vadd.f32 %v10860_v61, %v12439_v9 }
 0x4ee   : > { %v6264_v12 = vcombine.low %v5881_v30, %v5888_v32  ;;  %v5240_v14 = vadd.f32 %v5154_v29, %v10649_v53  ;;  %v5180_v36 = vpop.xlane.xlu1 %5179  ;;  %v6007_v21 = vrot.slane %v5247_v24, %v12398_v31  ;;  %v6014_v30 = vrot.slane %v5247_v24, %v12399_v20 }
 0x4ef   : > { %v5253_v0 = vadd.f32 %v5180_v36, %v10635_v23  ;;  %v5951_v61 = vrot.slane %v5243_v11, %v12398_v31  ;;  %v5958_v36 = vrot.slane %v5243_v11, %v12399_v20  ;;  %v12443_v11 = vld [vmem:[#allocation58_spill] sm:$0xff] }
 0x4f0   : > { %v5909_v27 = vrot.slane %v5240_v14, %v12398_v31  ;;  %v5916_v51 = vrot.slane %v5240_v14, %v12399_v20  ;;  %6392 = vperm.xlu1 %7156, %v6259_v60   ;;  %6407 = vperm.xlu0 %7155, %v6264_v12   ;;  %v6273_v44 = vcombine.low %v6007_v21, %v6014_v30 }
 0x4f1   : > { %v5158_v40 = vpop.xlane.xlu0 %5157  ;;  %v6091_v47 = vrot.slane %v5253_v0, %v12398_v31 }
 0x4f2   : > { %v6266_v6 = vcombine.low %v5909_v27, %v5916_v51  ;;  %v5242_v55 = vadd.f32 %v5158_v40, %v10660_v45  ;;  %v5184_v14 = vpop.xlane.xlu1 %5183  ;;  %v6275_v51 = vcombine.low %v6035_v18, %v6042_v7  ;;  %v6070_v40 = vrot.slane %v5251_v38, %v12399_v20 }
 0x4f4   : > { %v5937_v53 = vrot.slane %v5242_v55, %v12398_v31  ;;  %v5944_v17 = vrot.slane %v5242_v55, %v12399_v20  ;;  %6398 = vperm.xlu1 %7156, %v6261_v42   ;;  %6413 = vperm.xlu0 %7155, %v6266_v6   ;;  %v6098_v6 = vrot.slane %v5253_v0, %v12399_v20 }
 0x4f5   : > { %v10901_v37 = vpop.xlane.xlu0 %5161 }
 0x4f6   : > { %v6268_v52 = vcombine.low %v5937_v53, %v5944_v17  ;;  %v5188_v55 = vpop.xlane.xlu1 %5187  ;;  %v6277_v53 = vcombine.low %v6063_v41, %v6070_v40  ;;  %v5255_v17 = vadd.f32 %v5184_v14, %v10645_v46 }
 0x4f7   : > { %v5257_v13 = vadd.f32 %v5188_v55, %v10656_v54 }
 0x4f8   : > { %6404 = vperm.xlu1 %7156, %v6263_v57   ;;  %6419 = vperm.xlu0 %7155, %v6268_v52   ;;  %v6279_v52 = vcombine.low %v6091_v47, %v6098_v6  ;;  %v6119_v8 = vrot.slane %v5255_v17, %v12398_v31  ;;  %v6126_v46 = vrot.slane %v5255_v17, %v12399_v20 }
 0x4f9   : > { %v10907_v45 = vpop.xlane.xlu0 %5165  ;;  %v6147_v54 = vrot.slane %v5257_v13, %v12398_v31 }
 0x4fa   : > { %v5192_v34 = vpop.xlane.xlu1 %5191  ;;  %v6281_v21 = vcombine.low %v6119_v8, %v6126_v46 }
 0x4fc   : > { %6410 = vperm.xlu1 %7156, %v6265_v39  }
 0x4fd   : > { %v5170_v50 = vpop.xlane.xlu0 %5169 }
 0x4fe   : > { %v5248_v32 = vadd.f32 %v5170_v50, %v10692_v10  ;;  %v6154_v50 = vrot.slane %v5257_v13, %v12399_v20 }
 0x500   : > { %v6021_v60 = vrot.slane %v5248_v32, %v12398_v31  ;;  %v6028_v43 = vrot.slane %v5248_v32, %v12399_v20  ;;  %6416 = vperm.xlu1 %7156, %v6267_v15   ;;  %v6283_v7 = vcombine.low %v6147_v54, %v6154_v50 }
 0x501   : > { %v5174_v29 = vpop.xlane.xlu0 %5173 }
 0x502   : > { %v6274_v48 = vcombine.low %v6021_v60, %v6028_v43  ;;  %v5250_v12 = vadd.f32 %v5174_v29, %v10704_v4  ;;  %v6269_v60 = vcombine.low %v5951_v61, %v5958_v36  ;;  %v12440_v43 = vld [vmem:[#allocation29_spill] sm:$0xff]  ;;  %v5259_v29 = vadd.f32 %v5192_v34, %v10667_v26  ;;  %v12446_v36 = vld [vmem:[#allocation14_spill] sm:$0xff] }
 0x503   : > { %v5245_v18 = vadd.f32 %v10873_v56, %v12440_v43  ;;  %v5246_v26 = vadd.f32 %v10907_v45, %v10682_v3 }
 0x504   : > { %v6049_v27 = vrot.slane %v5250_v12, %v12398_v31  ;;  %v6056_v10 = vrot.slane %v5250_v12, %v12399_v20  ;;  %6434 = vperm.xlu1 %7156, %v6273_v44   ;;  %6437 = vperm.xlu0 %7155, %v6274_v48   ;;  %v5196_v44 = vpop.xlane.xlu1 %5195  ;;  %v6175_v56 = vrot.slane %v5259_v29, %v12398_v31 }
 0x505   : > { %v5178_v16 = vpop.xlane.xlu0 %5177  ;;  %v5986_v14 = vrot.slane %v5245_v18, %v12399_v20 }
 0x506   : > { %v6276_v42 = vcombine.low %v6049_v27, %v6056_v10  ;;  %v5252_v35 = vadd.f32 %v5178_v16, %v10713_v63  ;;  %v6182_v10 = vrot.slane %v5259_v29, %v12399_v20 }
 0x508   : > { %v6077_v4 = vrot.slane %v5252_v35, %v12398_v31  ;;  %v6084_v62 = vrot.slane %v5252_v35, %v12399_v20  ;;  %6440 = vperm.xlu1 %7156, %v6275_v51   ;;  %6443 = vperm.xlu0 %7155, %v6276_v42   ;;  %v6291_v27 = vpop.permute.xlu1 %6290  ;;  %v5261_v42 = vadd.f32 %v5196_v44, %v10678_v28  ;;  %v12441_v28 = vld [vmem:[#allocation43_spill] sm:$0xff] }
 0x509   : > { %v5182_v23 = vpop.xlane.xlu0 %5181  ;;  %v5993_v35 = vrot.slane %v5246_v26, %v12398_v31 }
 0x50a   : > { %v6278_v57 = vcombine.low %v6077_v4, %v6084_v62  ;;  %v5254_v58 = vadd.f32 %v5182_v23, %v10718_v49  ;;  %v6000_v4 = vrot.slane %v5246_v26, %v12399_v20  ;;  %v6285_v62 = vcombine.low %v6175_v56, %v6182_v10 }
 0x50b   : > { %v6210_v55 = vrot.slane %v5261_v42, %v12399_v20 }
 0x50c   : > { %v6105_v63 = vrot.slane %v5254_v58, %v12398_v31  ;;  %v6112_v33 = vrot.slane %v5254_v58, %v12399_v20  ;;  %6446 = vperm.xlu1 %7156, %v6277_v53   ;;  %6449 = vperm.xlu0 %7155, %v6278_v57   ;;  %v6297_v6 = vpop.permute.xlu1 %6296  ;;  %v6272_v23 = vcombine.low %v5993_v35, %v6000_v4  ;;  %v12454_v35 = vld [vmem:[#allocation59_spill] sm:$0xff] }
 0x50d   : > { %v5186_v39 = vpop.xlane.xlu0 %5185  ;;  %v6484_v53 = vrot.slane %v6291_v27, %v12441_v28  ;;  %v12451_v27 = vld [vmem:[#allocation33_spill] sm:$0xff] }
 0x50e   : > { %v6280_v59 = vcombine.low %v6105_v63, %v6112_v33  ;;  %v5256_v49 = vadd.f32 %v5186_v39, %v10721_v25  ;;  %v5244_v25 = vadd.f32 %v10901_v37, %v10671_v19  ;;  %v12442_v33 = vld [vmem:[#allocation8_spill] sm:$0xff]  ;;  %v12444_v39 = vld [vmem:[#allocation23_spill] sm:$0xff] }
 0x510   : > { %v6133_v24 = vrot.slane %v5256_v49, %v12398_v31  ;;  %v6140_v2 = vrot.slane %v5256_v49, %v12399_v20  ;;  %6452 = vperm.xlu1 %7156, %v6279_v52   ;;  %6455 = vperm.xlu0 %7155, %v6280_v59   ;;  %v5965_v48 = vrot.slane %v5244_v25, %v12398_v31 }
 0x511   : > { %v5190_v15 = vpop.xlane.xlu0 %5189  ;;  %v5972_v12 = vrot.slane %v5244_v25, %v12399_v20  ;;  %v12447_v25 = vld [vmem:[#allocation63_spill] sm:$0xff] }
 0x512   : > { %v6282_v30 = vcombine.low %v6133_v24, %v6140_v2  ;;  %v5258_v32 = vadd.f32 %v5190_v15, %v10723_v1  ;;  %v5979_v1 = vrot.slane %v5245_v18, %v12398_v31  ;;  %v12445_v24 = vld [vmem:[#allocation75_spill] sm:$0xff]  ;;  %v12448_v18 = vld [vmem:[#allocation65_spill] sm:$0xff] }
 0x513   : > { %v6270_v51 = vcombine.low %v5965_v48, %v5972_v12  ;;  %v12449_v48 = vld [vmem:[#allocation28_spill] sm:$0xff] }
 0x514   : > { %6458 = vperm.xlu1 %7156, %v6281_v21   ;;  %6461 = vperm.xlu0 %7155, %v6282_v30   ;;  %v6161_v19 = vrot.slane %v5258_v32, %v12398_v31  ;;  %v6168_v37 = vrot.slane %v5258_v32, %v12399_v20  ;;  %v6271_v40 = vcombine.low %v5979_v1, %v5986_v14 }
 0x515   : > { %v5194_v38 = vpop.xlane.xlu0 %5193 }
 0x516   : > { %v6284_v0 = vcombine.low %v6161_v19, %v6168_v37  ;;  %v5260_v16 = vadd.f32 %v5194_v38, %v10727_v5  ;;  %v6203_v5 = vrot.slane %v5261_v42, %v12398_v31  ;;  %v12450_v19 = vld [vmem:[#allocation61_spill] sm:$0xff] }
 0x518   : > { %6464 = vperm.xlu1 %7156, %v6283_v7   ;;  %6422 = vperm.xlu0 %7155, %v6269_v60   ;;  %v6189_v3 = vrot.slane %v5260_v16, %v12398_v31  ;;  %v6196_v45 = vrot.slane %v5260_v16, %v12399_v20  ;;  %v6287_v59 = vcombine.low %v6203_v5, %v6210_v55  ;;  %v12457_v55 = vld [vmem:[#allocation11_spill] sm:$0xff] }
 0x519   : > { %v5198_v41 = vpop.xlane.xlu0 %5197 }
 0x51a   : > { %v5262_v47 = vadd.f32 %v5198_v41, %v10731_v22  ;;  %v6286_v57 = vcombine.low %v6189_v3, %v6196_v45  ;;  %v6493_v22 = vrot.slane %v6297_v6, %v12443_v11 }
 0x51c   : > { %6425 = vperm.xlu0 %7155, %v6270_v51   ;;  %6467 = vperm.xlu1 %7156, %v6284_v0   ;;  %v6217_v58 = vrot.slane %v5262_v47, %v12398_v31  ;;  %v6224_v63 = vrot.slane %v5262_v47, %v12399_v20  ;;  %v12452_v51 = vld [vmem:[#allocation7_spill] sm:$0xff] }
 0x51e   : > { %v6288_v49 = vcombine.low %v6217_v58, %v6224_v63 }
 0x520   : > { %6428 = vperm.xlu0 %7155, %v6271_v40   ;;  %6470 = vperm.xlu1 %7156, %v6285_v62   ;;  %v12455_v62 = vld [vmem:[#allocation41_spill] sm:$0xff] }
 0x521   : > { %v6294_v17 = vpop.permute.xlu0 %6293 }
 0x522   : > { %v6488_v9 = vrot.slane %v6294_v17, %v12442_v33 }
 0x523   : > { %v6300_v52 = vpop.permute.xlu1 %6299 }
 0x524   : > { %v6489_v13 = vsel %vm3236_vm0, %v6488_v9, %v6484_v53  ;;  %v6498_v8 = vrot.slane %v6300_v52, %v12444_v39  ;;  %6431 = vperm.xlu0 %7155, %v6272_v23   ;;  %6473 = vperm.xlu1 %7156, %v6286_v57   ;;  %v12458_v53 = vld [vmem:[#allocation31_spill] sm:$0xff] }
 0x525   : > { %v6494_v46 = vsel %vm3243_vm1, %v6493_v22, %v6489_v13 }
 0x526   : > { %v6499_v34 = vsel %vm3250_vm2, %v6498_v8, %v6494_v46 }
 0x527   : > { %v6303_v31 = vpop.permute.xlu1 %6302 }
 0x528   : > { %v6503_v20 = vrot.slane %v6303_v31, %v12445_v24  ;;  %6476 = vperm.xlu1 %7156, %v6287_v59   ;;  %6479 = vperm.xlu0 %7155, %v6288_v49  }
 0x52a   : > { %v6504_v2 = vsel %vm3257_vm3, %v6503_v20, %v6499_v34 }
 0x52b   : > { %v6306_v61 = vpop.permute.xlu1 %6305 }
 0x52c   : > { %v6508_v54 = vrot.slane %v6306_v61, %v12446_v36 }
 0x52e   : > { %v6509_v50 = vsel %vm3264_vm4, %v6508_v54, %v6504_v2 }
 0x52f   : > { %v6309_v15 = vpop.permute.xlu1 %6308  ;;  %v6318_v21 = vpop.permute.xlu0 %6317 }
 0x530   : > { %v6513_v30 = vrot.slane %v6309_v15, %v12447_v25  ;;  %v6528_v37 = vrot.slane %v6318_v21, %v12450_v19 }
 0x532   : > { %v6514_v32 = vsel %vm3271_vm5, %v6513_v30, %v6509_v50 }
 0x533   : > { %v6312_v60 = vpop.permute.xlu1 %6311  ;;  %v6324_v43 = vpop.permute.xlu0 %6323 }
 0x534   : > { %v6518_v7 = vrot.slane %v6312_v60, %v12448_v18  ;;  %v6538_v0 = vrot.slane %v6324_v43, %v12452_v51 }
 0x536   : > { %v6519_v29 = vsel %vm3278_vm6, %v6518_v7, %v6514_v32 }
 0x537   : > { %v6315_v44 = vpop.permute.xlu1 %6314  ;;  %v6330_v38 = vpop.permute.xlu0 %6329 }
 0x538   : > { %v6523_v12 = vrot.slane %v6315_v44, %v12449_v48  ;;  %v6548_v3 = vrot.slane %v6330_v38, %v12455_v62 }
 0x53a   : > { %v6524_v1 = vsel %vm3285_vm7, %v6523_v12, %v6519_v29 }
 0x53b   : > { %v6321_v14 = vpop.permute.xlu1 %6320  ;;  %v6529_v56 = vsel %vm3292_vm8, %v6528_v37, %v6524_v1  ;;  %v6336_v26 = vpop.permute.xlu0 %6335 }
 0x53c   : > { %v6533_v10 = vrot.slane %v6321_v14, %v12451_v27  ;;  %v6558_v17 = vrot.slane %v6336_v26, %v12458_v53 }
 0x53e   : > { %v6534_v16 = vsel %vm3299_vm9, %v6533_v10, %v6529_v56 }
 0x53f   : > { %v6327_v41 = vpop.permute.xlu1 %6326  ;;  %v6539_v40 = vsel %vm12453_vm11, %v6538_v0, %v6534_v16  ;;  %v6342_v42 = vpop.permute.xlu0 %6341 }
 0x540   : > { %v6543_v4 = vrot.slane %v6327_v41, %v12454_v35  ;;  %v6567_v22 = vrot.slane %v6342_v42, %v12442_v33 }
 0x542   : > { %v6544_v45 = vsel %vm12456_vm10, %v6543_v4, %v6539_v40  ;;  %vm12459_vm10 = vmmov %vm12453_vm11  ;;  %vm12460_vm11 = vcmask 851712  }
 0x543   : > { %v6333_v47 = vpop.permute.xlu1 %6332  ;;  %v6549_v6 = vsel %vm3320_vm12, %v6548_v3, %v6544_v45  ;;  %v6348_v5 = vpop.permute.xlu0 %6347 }
 0x544   : > { %v6553_v23 = vrot.slane %v6333_v47, %v12457_v55  ;;  %v6577_v49 = vrot.slane %v6348_v5, %v12444_v39 }
 0x546   : > { %v6554_v57 = vsel %vm3327_vm13, %v6553_v23, %v6549_v6 }
 0x547   : > { %v6559_v58 = vsel %vm3334_vm14, %v6558_v17, %v6554_v57  ;;  %v6339_v63 = vpop.permute.xlu1 %6338  ;;  %v6354_v9 = vpop.permute.xlu0 %6353 }
 0x548   : > { %v6563_v52 = vrot.slane %v6339_v63, %v12441_v28  ;;  %v6587_v54 = vrot.slane %v6354_v9, %v12446_v36 }
 0x54a   : > { %v6568_v13 = vsel %vm3236_vm0, %v6567_v22, %v6563_v52 }
 0x54b   : > { %v6345_v8 = vpop.permute.xlu1 %6344  ;;  %v6360_v46 = vpop.permute.xlu0 %6359 }
 0x54c   : > { %v6572_v59 = vrot.slane %v6345_v8, %v12443_v11  ;;  %v6597_v60 = vrot.slane %v6360_v46, %v12448_v18 }
 0x54e   : > { %v6573_v34 = vsel %vm3243_vm1, %v6572_v59, %v6568_v13 }
 0x54f   : > { %v6351_v31 = vpop.permute.xlu1 %6350  ;;  %v6578_v20 = vsel %vm3250_vm2, %v6577_v49, %v6573_v34  ;;  %v6366_v2 = vpop.permute.xlu0 %6365 }
 0x550   : > { %v6582_v61 = vrot.slane %v6351_v31, %v12445_v24  ;;  %v6607_v12 = vrot.slane %v6366_v2, %v12450_v19 }
 0x552   : > { %v6583_v50 = vsel %vm3257_vm3, %v6582_v61, %v6578_v20 }
 0x553   : > { %v6357_v15 = vpop.permute.xlu1 %6356  ;;  %v6588_v21 = vsel %vm3264_vm4, %v6587_v54, %v6583_v50  ;;  %v6372_v30 = vpop.permute.xlu0 %6371 }
 0x554   : > { %v6592_v32 = vrot.slane %v6357_v15, %v12447_v25  ;;  %v6617_v10 = vrot.slane %v6372_v30, %v12452_v51 }
 0x556   : > { %v6593_v43 = vsel %vm3271_vm5, %v6592_v32, %v6588_v21 }
 0x557   : > { %v6363_v7 = vpop.permute.xlu1 %6362  ;;  %v6598_v29 = vsel %vm3278_vm6, %v6597_v60, %v6593_v43  ;;  %v6378_v44 = vpop.permute.xlu0 %6377 }
 0x558   : > { %v6602_v38 = vrot.slane %v6363_v7, %v12449_v48  ;;  %v6627_v4 = vrot.slane %v6378_v44, %v12455_v62 }
 0x55a   : > { %v6603_v37 = vsel %vm3285_vm7, %v6602_v38, %v6598_v29 }
 0x55b   : > { %v6369_v1 = vpop.permute.xlu1 %6368  ;;  %v6608_v14 = vsel %vm3292_vm8, %v6607_v12, %v6603_v37  ;;  %v6384_v56 = vpop.permute.xlu0 %6383 }
 0x55c   : > { %v6612_v26 = vrot.slane %v6369_v1, %v12451_v27  ;;  %v6637_v23 = vrot.slane %v6384_v56, %v12458_v53 }
 0x55e   : > { %v6613_v0 = vsel %vm3299_vm9, %v6612_v26, %v6608_v14 }
 0x55f   : > { %v6375_v16 = vpop.permute.xlu1 %6374  ;;  %v6618_v41 = vsel %vm12459_vm10, %v6617_v10, %v6613_v0  ;;  %v6390_v40 = vpop.permute.xlu0 %6389 }
 0x560   : > { %v6622_v42 = vrot.slane %v6375_v16, %v12454_v35  ;;  %v6646_v30 = vrot.slane %v6390_v40, %v12442_v33 }
 0x562   : > { %v6623_v3 = vsel %vm12460_vm11, %v6622_v42, %v6618_v41 }
 0x563   : > { %v6381_v45 = vpop.permute.xlu1 %6380  ;;  %v6628_v47 = vsel %vm3320_vm12, %v6627_v4, %v6623_v3  ;;  %v6396_v6 = vpop.permute.xlu0 %6395 }
 0x564   : > { %v6632_v5 = vrot.slane %v6381_v45, %v12457_v55  ;;  %v6656_v12 = vrot.slane %v6396_v6, %v12444_v39 }
 0x566   : > { %v6633_v17 = vsel %vm3327_vm13, %v6632_v5, %v6628_v47 }
 0x567   : > { %v6638_v57 = vsel %vm3334_vm14, %v6637_v23, %v6633_v17  ;;  %v6387_v63 = vpop.permute.xlu1 %6386  ;;  %v6402_v22 = vpop.permute.xlu0 %6401 }
 0x568   : > { %v11038_v9 = vsel %vm3573_vm15, %v6638_v57, %v6559_v58  ;;  %v6642_v21 = vrot.slane %v6387_v63, %v12441_v28 }
 0x56a   : > { %v6647_v43 = vsel %vm3236_vm0, %v6646_v30, %v6642_v21 }
 0x56b   : > { %v6393_v52 = vpop.permute.xlu1 %6392  ;;  %v6408_v13 = vpop.permute.xlu0 %6407 }
 0x56c   : > { %v6651_v58 = vrot.slane %v6393_v52, %v12443_v11 }
 0x56e   : > { %v6652_v7 = vsel %vm3243_vm1, %v6651_v58, %v6647_v43 }
 0x56f   : > { %v6399_v8 = vpop.permute.xlu1 %6398  ;;  %v6414_v59 = vpop.permute.xlu0 %6413  ;;  %v6657_v56 = vsel %vm3250_vm2, %v6656_v12, %v6652_v7 }
 0x570   : > { %v6661_v29 = vrot.slane %v6399_v8, %v12445_v24 }
 0x572   : > { %v6662_v26 = vsel %vm3257_vm3, %v6661_v29, %v6657_v56  ;;  %v5264_v56 = vld [vmem:[#allocation2 + $0x4] sm:$0xf] }
 0x573   : > { %v6405_v46 = vpop.permute.xlu1 %6404  ;;  %v11040_v34 = vpop.permute.xlu0 %6419 }
 0x574   : > { %v6671_v10 = vrot.slane %v6405_v46, %v12447_v25 }
 0x577   : > { %v6411_v49 = vpop.permute.xlu1 %6410 }
 0x578   : > { %v6681_v3 = vrot.slane %v6411_v49, %v12449_v48 }
 0x57b   : > { %v6417_v31 = vpop.permute.xlu1 %6416 }
 0x57c   : > { %v6691_v63 = vrot.slane %v6417_v31, %v12451_v27 }
 0x57f   : > { %v6435_v20 = vpop.permute.xlu1 %6434  ;;  %v6438_v2 = vpop.permute.xlu0 %6437 }
 0x580   : > { %v6721_v44 = vrot.slane %v6435_v20, %v12441_v28  ;;  %v6725_v38 = vrot.slane %v6438_v2, %v12442_v33  ;;  %v6666_v28 = vrot.slane %v6402_v22, %v12446_v36 }
 0x582   : > { %v6726_v0 = vsel %vm3236_vm0, %v6725_v38, %v6721_v44  ;;  %v6667_v42 = vsel %vm3264_vm4, %v6666_v28, %v6662_v26  ;;  %vm12461_vm0 = vmmov %vm12459_vm10 }
 0x583   : > { %v6441_v61 = vpop.permute.xlu1 %6440  ;;  %v6444_v54 = vpop.permute.xlu0 %6443  ;;  %v6672_v4 = vsel %vm3271_vm5, %v6671_v10, %v6667_v42 }
 0x584   : > { %v6730_v37 = vrot.slane %v6441_v61, %v12443_v11  ;;  %v6735_v16 = vrot.slane %v6444_v54, %v12444_v39  ;;  %v6676_v39 = vrot.slane %v6408_v13, %v12448_v18 }
 0x586   : > { %v6731_v33 = vsel %vm3243_vm1, %v6730_v37, %v6726_v0  ;;  %v6677_v17 = vsel %vm3278_vm6, %v6676_v39, %v6672_v4  ;;  %vm12462_vm1 = vmmov %vm12460_vm11 }
 0x587   : > { %v6447_v50 = vpop.permute.xlu1 %6446  ;;  %v6450_v15 = vpop.permute.xlu0 %6449  ;;  %v6736_v45 = vsel %vm3250_vm2, %v6735_v16, %v6731_v33  ;;  %v6682_v57 = vsel %vm3285_vm7, %v6681_v3, %v6677_v17  ;;  %vm12463_vm2 = vmmov %vm12461_vm0 }
 0x588   : > { %v6740_v41 = vrot.slane %v6447_v50, %v12445_v24  ;;  %v6745_v47 = vrot.slane %v6450_v15, %v12446_v36  ;;  %v6686_v36 = vrot.slane %v6414_v59, %v12450_v19 }
 0x58a   : > { %v6741_v6 = vsel %vm3257_vm3, %v6740_v41, %v6736_v45  ;;  %v6687_v49 = vsel %vm3292_vm8, %v6686_v36, %v6682_v57  ;;  %vm12464_vm3 = vmmov %vm12462_vm1 }
 0x58b   : > { %v6453_v32 = vpop.permute.xlu1 %6452  ;;  %v6456_v60 = vpop.permute.xlu0 %6455  ;;  %v6746_v22 = vsel %vm3264_vm4, %v6745_v47, %v6741_v6  ;;  %v6692_v20 = vsel %vm3299_vm9, %v6691_v63, %v6687_v49  ;;  %vm12465_vm4 = vcmask 1042434  }
 0x58c   : > { %v6750_v5 = vrot.slane %v6453_v32, %v12447_v25  ;;  %v6755_v52 = vrot.slane %v6456_v60, %v12448_v18  ;;  %v6696_v18 = vrot.slane %v11040_v34, %v12452_v51 }
 0x58e   : > { %v6751_v13 = vsel %vm3271_vm5, %v6750_v5, %v6746_v22  ;;  %v6697_v30 = vsel %vm12461_vm0, %v6696_v18, %v6692_v20  ;;  %vm12466_vm5 = vcmask 1043459  }
 0x58f   : > { %v6459_v1 = vpop.permute.xlu1 %6458  ;;  %v6462_v14 = vpop.permute.xlu0 %6461  ;;  %v6756_v2 = vsel %vm3278_vm6, %v6755_v52, %v6751_v13 }
 0x590   : > { %v6760_v8 = vrot.slane %v6459_v1, %v12449_v48  ;;  %v6765_v31 = vrot.slane %v6462_v14, %v12450_v19 }
 0x592   : > { %v6761_v59 = vsel %vm3285_vm7, %v6760_v8, %v6756_v2 }
 0x593   : > { %v6465_v40 = vpop.permute.xlu1 %6464  ;;  %v6423_v11 = vpop.permute.xlu0 %6422  ;;  %v6766_v34 = vsel %vm3292_vm8, %v6765_v31, %v6761_v59 }
 0x594   : > { %v6701_v61 = vrot.slane %v6423_v11, %v12454_v35  ;;  %v6770_v54 = vrot.slane %v6465_v40, %v12451_v27 }
 0x596   : > { %v6702_v60 = vsel %vm12462_vm1, %v6701_v61, %v6697_v30  ;;  %v6771_v43 = vsel %vm3299_vm9, %v6770_v54, %v6766_v34 }
 0x597   : > { %v6468_v23 = vpop.permute.xlu1 %6467  ;;  %v6426_v24 = vpop.permute.xlu0 %6425 }
 0x598   : > { %v6706_v48 = vrot.slane %v6426_v24, %v12455_v62  ;;  %v6775_v50 = vrot.slane %v6468_v23, %v12452_v51 }
 0x59a   : > { %v6707_v51 = vsel %vm3320_vm12, %v6706_v48, %v6702_v60  ;;  %v6776_v7 = vsel %vm12463_vm2, %v6775_v50, %v6771_v43 }
 0x59b   : > { %v6471_v46 = vpop.permute.xlu1 %6470  ;;  %v6429_v25 = vpop.permute.xlu0 %6428 }
 0x59c   : > { %v6711_v15 = vrot.slane %v6429_v25, %v12457_v55  ;;  %v6780_v19 = vrot.slane %v6471_v46, %v12454_v35 }
 0x59e   : > { %v6712_v29 = vsel %vm3327_vm13, %v6711_v15, %v6707_v51  ;;  %v6781_v35 = vsel %vm12464_vm3, %v6780_v19, %v6776_v7 }
 0x59f   : > { %v6474_v21 = vpop.permute.xlu1 %6473  ;;  %v6432_v58 = vpop.permute.xlu0 %6431 }
 0x5a0   : > { %v6716_v32 = vrot.slane %v6432_v58, %v12458_v53  ;;  %v6785_v27 = vrot.slane %v6474_v21, %v12455_v62 }
 0x5a2   : > { %v6717_v12 = vsel %vm3334_vm14, %v6716_v32, %v6712_v29  ;;  %v6786_v62 = vsel %vm3320_vm12, %v6785_v27, %v6781_v35 }
 0x5a3   : > { %v6477_v44 = vpop.permute.xlu1 %6476  ;;  %v6480_v38 = vpop.permute.xlu0 %6479  ;;  %v6798_v26 = vsel %vm12465_vm4, %v6717_v12, %v11038_v9 }
 0x5a4   : > { %v6790_v37 = vrot.slane %v6477_v44, %v12457_v55  ;;  %v6795_v1 = vrot.slane %v6480_v38, %v12458_v53 }
 0x5a6   : > { %v6791_v14 = vsel %vm3327_vm13, %v6790_v37, %v6786_v62 }
 0x5a7   : > { %v6796_v10 = vsel %vm3334_vm14, %v6795_v1, %v6791_v14  ;;  %6806 = sbr.rel (%p7059_p9) target bundleno = 1741 (0x6cd), region = 97 }
 0x5a8   : > { %v6799_v0 = vsel %vm12466_vm5, %v6796_v10, %v6798_v26 }
 0x5a9   : > { %v6801_v16 = vadd.f32 %v6799_v0, %v5264_v56 }
 0x5ab   : > { %6802 = vst [vmem:[#allocation2 + $0x4] sm:$0xf] %v6801_v16 }
 0x5ac   : > { %v6853_v55 = vld [vmem:[%s11244_s3 + $0xf8] sm:$0xff]  ;;  %v6852_v9 = vld [vmem:[%s11244_s3 + $0xf0] sm:$0xff]  ;;  %v6851_v33 = vld [vmem:[%s11244_s3 + $0xe8] sm:$0xff]  ;;  %vm6934_vm6 = vcmask 1043456  }
 0x5ad   : > { %v6837_v53 = vld [vmem:[%s11244_s3 + $0x78] sm:$0xff]  ;;  %7068 = vmatprep.subr.mxu0 %v6853_v55  ;;  %v6836_v28 = vld [vmem:[%s11244_s3 + $0x70] sm:$0xff]  ;;  %v6835_v41 = vld [vmem:[%s11244_s3 + $0x68] sm:$0xff] }
 0x5ae   : > { %7069 = vmatpush3.msra.mxu0 %v6837_v53  ;;  %v6850_v40 = vld [vmem:[%s11244_s3 + $0xe0] sm:$0xff]  ;;  %v6849_v42 = vld [vmem:[%s11244_s3 + $0xd8] sm:$0xff]  ;;  %v6848_v3 = vld [vmem:[%s11244_s3 + $0xd0] sm:$0xff] }
 0x5af   : > { %7070 = vmatprep.subr.mxu0 %v6852_v9  ;;  %v6834_v11 = vld [vmem:[%s11244_s3 + $0x60] sm:$0xff]  ;;  %v6833_v4 = vld [vmem:[%s11244_s3 + $0x58] sm:$0xff]  ;;  %v6832_v45 = vld [vmem:[%s11244_s3 + $0x50] sm:$0xff] }
 0x5b0   : > { %7071 = vmatpush3.msra.mxu0 %v6836_v28  ;;  %v6847_v47 = vld [vmem:[%s11244_s3 + $0xc8] sm:$0xff]  ;;  %v6809_v5 = vld [vmem:[%s11243_s2] sm:$0x3]  ;;  %v12468_v63 = vld [vmem:[#allocation52_spill] sm:$0xff] }
 0x5b1   : > { %7072 = vmatprep.subr.mxu0 %v6851_v33  ;;  %v6831_v6 = vld [vmem:[%s11244_s3 + $0x48] sm:$0xff]  ;;  %v6846_v23 = vld [vmem:[%s11244_s3 + $0xc0] sm:$0xff]  ;;  %v6818_v22 = vrot.slane %v6809_v5, %v12468_v63  ;;  %v6845_v36 = vld [vmem:[%s11244_s3 + $0xb8] sm:$0xff] }
 0x5b2   : > { %7073 = vmatpush3.msra.mxu0 %v6835_v41  ;;  %v6807_v39 = vld [vmem:[#allocation2] sm:$0xff]  ;;  %v12467_v17 = vld [vmem:[#allocation55_spill] sm:$0xff]  ;;  %v6829_v8 = vld [vmem:[%s11244_s3 + $0x38] sm:$0xff] }
 0x5b3   : > { %7074 = vmatprep.subr.mxu0 %v6850_v40  ;;  %v6808_v24 = vmul.f32 0.0030864198, %v6807_v39  ;;  %v6814_v57 = vrot.slane %v6809_v5, %v12467_v17  ;;  %v6830_v52 = vld [vmem:[%s11244_s3 + $0x40] sm:$0xff]  ;;  %v6844_v46 = vld [vmem:[%s11244_s3 + $0xb0] sm:$0xff]  ;;  %v6843_v20 = vld [vmem:[%s11244_s3 + $0xa8] sm:$0xff] }
 0x5b4   : > { %7075 = vmatpush3.msra.mxu0 %v6834_v11  ;;  %v6828_v49 = vld [vmem:[%s11244_s3 + $0x30] sm:$0xff]  ;;  %v6827_v31 = vld [vmem:[%s11244_s3 + $0x28] sm:$0xff]  ;;  %v6842_v61 = vld [vmem:[%s11244_s3 + $0xa0] sm:$0xff] }
 0x5b5   : > { %7076 = vmatprep.subr.mxu0 %v6849_v42  ;;  %v6819_v13 = vcombine.low %v6814_v57, %v6818_v22  ;;  %v6826_v18 = vld [vmem:[%s11244_s3 + $0x20] sm:$0xff]  ;;  %v6841_v59 = vld [vmem:[%s11244_s3 + $0x98] sm:$0xff]  ;;  %v6840_v48 = vld [vmem:[%s11244_s3 + $0x90] sm:$0xff] }
 0x5b6   : > { %7077 = vmatpush3.msra.mxu0 %v6833_v4  ;;  %v6825_v54 = vld [vmem:[%s11244_s3 + $0x18] sm:$0xff]  ;;  %v6824_v50 = vld [vmem:[%s11244_s3 + $0x10] sm:$0xff]  ;;  %v6839_v15 = vld [vmem:[%s11244_s3 + $0x88] sm:$0xff] }
 0x5b7   : > { %7078 = vmatprep.subr.mxu0 %v6848_v3  ;;  %v6821_v25 = vsub.f32 %v6808_v24, %v6819_v13  ;;  %v6823_v21 = vld [vmem:[%s11244_s3 + $0x8] sm:$0xff]  ;;  %v6838_v58 = vld [vmem:[%s11244_s3 + $0x80] sm:$0xff] }
 0x5b8   : > { %7079 = vmatpush3.msra.mxu0 %v6832_v45  ;;  %v6822_v30 = vld [vmem:[%s11244_s3] sm:$0xff] }
 0x5b9   : > { %7080 = vmatprep.subr.mxu0 %v6847_v47  ;;  %v6862_v2 = vcombine.high %v6821_v25, %v6821_v25  ;;  %v7060_v32 = vld [vmem:[%s11245_s4] ss:$0 sm:$0xff] }
 0x5ba   : > { %7081 = vmatpush3.msra.mxu0 %v6831_v6  ;;  %v7061_v28 = vld [vmem:[%s11246_s5] ss:$0 sm:$0xff] }
 0x5bb   : > { %7082 = vmatprep.subr.mxu0 %v6846_v23  ;;  %6928 = vmatprep.mubr.f32.mxu0 %v6862_v2  ;;  %v7062_v41 = vld [vmem:[%s11247_s6] ss:$0 sm:$0xff] }
 0x5bc   : > { %7083 = vmatpush3.msra.mxu0 %v6830_v52 }
 0x5bd   : > { %7084 = vmatprep.subr.mxu0 %v6845_v36 }
 0x5be   : > { %7085 = vmatpush3.msra.mxu0 %v6829_v8 }
 0x5bf   : > { %7086 = vmatprep.subr.mxu0 %v6844_v46 }
 0x5c0   : > { %7087 = vmatpush3.msra.mxu0 %v6828_v49 }
 0x5c1   : > { %7088 = vmatprep.subr.mxu0 %v6843_v20 }
 0x5c2   : > { %7089 = vmatpush3.msra.mxu0 %v6827_v31 }
 0x5c3   : > { %7090 = vmatprep.subr.mxu0 %v6842_v61 }
 0x5c4   : > { %7091 = vmatpush3.msra.mxu0 %v6826_v18 }
 0x5c5   : > { %7092 = vmatprep.subr.mxu0 %v6841_v59 }
 0x5c6   : > { %7093 = vmatpush3.msra.mxu0 %v6825_v54 }
 0x5c7   : > { %7094 = vmatprep.subr.mxu0 %v6840_v48 }
 0x5c8   : > { %7095 = vmatpush3.msra.mxu0 %v6824_v50 }
 0x5c9   : > { %7096 = vmatprep.subr.mxu0 %v6839_v15 }
 0x5ca   : > { %7097 = vmatpush3.msra.mxu0 %v6823_v21 }
 0x5cb   : > { %7098 = vmatprep.subr.mxu0 %v6838_v58 }
 0x5cc   : > { %7099 = vmatpush3.msra.mxu0 %v6822_v30 }
 0x5cd   : > { %6929 = vmatmul.mubr.f32.vlgmr.msra.gmra.mxu0 %v6821_v25 }
 0x68d   : > { %v7100_v19 = vpop.f32.mrf.mxu0 }
 0x68f   : > { %v7101_v34 = vpop.f32.mrf.mxu0 }
 0x690   : > { %v7102_v60 = vadd.f32 %v7101_v34, %v7100_v19 }
 0x692   : > { %v6931_v27 = vadd.f32 %v7102_v60, %v7060_v32 }
 0x694   : > { %v6935_v43 = vsel %vm6934_vm6, %v6931_v27, 0.0 }
 0x695   : > { %v6936_v51 = vrot.slane %v6935_v43, 4 }
 0x697   : > { %v6937_v7 = vadd.f32 %v6936_v51, %v6935_v43 }
 0x699   : > { %v6938_v29 = vrot.slane %v6937_v7, 2 }
 0x69b   : > { %v6939_v44 = vadd.f32 %v6938_v29, %v6937_v7 }
 0x69d   : > { %v6940_v38 = vrot.slane %v6939_v44, 1 }
 0x69f   : > { %v6941_v35 = vadd.f32 %v6940_v38, %v6939_v44 }
 0x6a1   : > { %v6943_v12 = vmul.f32 0.25, %v6941_v35 }
 0x6a3   : > { %v6944_v37 = vsub.f32 %v6931_v27, %v6943_v12 }
 0x6a5   : > { %v6945_v1 = vmul.f32 %v6944_v37, %v6944_v37 }
 0x6a7   : > { %v6946_v62 = vsel %vm6934_vm6, %v6945_v1, 0.0 }
 0x6a8   : > { %v6947_v14 = vrot.slane %v6946_v62, 4 }
 0x6aa   : > { %v6948_v56 = vadd.f32 %v6947_v14, %v6946_v62 }
 0x6ac   : > { %v6949_v26 = vrot.slane %v6948_v56, 2 }
 0x6ae   : > { %v6950_v10 = vadd.f32 %v6949_v26, %v6948_v56 }
 0x6b0   : > { %v6951_v0 = vrot.slane %v6950_v10, 1 }
 0x6b2   : > { %v6952_v16 = vadd.f32 %v6951_v0, %v6950_v10 }
 0x6b4   : > { %v6953_v55 = vmul.f32 0.25, %v6952_v16 }
 0x6b6   : > { %v6954_v53 = vadd.f32 1e-05, %v6953_v55 }
 0x6b8   : > { %7157 = vrsqrt.f32 %v6954_v53 }
 0x6c5   : > { %v7158_v9 = vpop.eup %7157 }
 0x6c6   : > { %v6956_v33 = vmul.f32 %v7158_v9, %v6944_v37 }
 0x6c8   : > { %v6964_v40 = vmul.f32 %v7061_v28, %v6956_v33 }
 0x6ca   : > { %v6972_v11 = vadd.f32 %v7062_v41, %v6964_v40 }
 0x6cc   : > { %6973 = vst [vmem:[#allocation4] sm:$0xf] %v6972_v11 }
 0x6cd PF: > { %p7107_p10 = scmp.eq.s32.totalorder %s7275_s27, 1  ;;  %s7218_s26 = smov [#allocation4]  }
 0x6ce   : > { %s6981_s29 = sshll.u32 %s7218_s26, 4  ;;  %s6982_s29 = int_to_ptr.vmem [resolvable:$true] %s6981_s29 }
 0x6cf   : > { %s7159_s30 = scalar_lea.vmem %s6982_s29, 64  ;;  %p7166_p0 = scmp.lt.s32.totalorder %s6982_s29, %s6982_s29 }
 0x6d0   : > { %p7160_p11 = scmp.ne.s32.totalorder %s6982_s29, %s7159_s30  ;;  %p7167_p1 = scmp.lt.s32.totalorder %s7159_s30, %s7159_s30 }
 0x6d2   : > { %p7161_p12 = pnand %p7160_p11, %p7107_p10  ;;  %p7168_p2 = por %p7167_p1, %p7166_p0 }
 0x6d4   : > { %p7162_p13 = pneg %p7161_p12 }
 0x6d6   : > { %p7169_p3 = pnand %p7168_p2, %p7162_p13 }
 0x6d8   : > { %7172 = shalt.err (!%p7169_p3)
}
 0x6d9   : > { %7104 = dma.vmem_to_hbm [thread:$0]  (%p7107_p10), %s6982_s29, 64, %s11248_s7, [#allocation5]  }
 0x6da   : > { %7196 = dma.done.wait (%p7107_p10), [#allocation5], 64  }
 0x6db   : > { %7198 = vsyncadd (%p7107_p10), [#allocation5], 4294967232 }
 0x6dc PF: > { %p15_p4 = scmp.ge.s32.totalorder %s7278_s28, 4   ;;  %s12469_s24 = smov %s7205_s25 }
 0x6dd   : > { %s12470_s25 = smov %s7287_s8  ;;  %s12471_s26 = smov %s7278_s28 }
 0x6de   :  { %17 = sbr.rel (!%p15_p4) target bundleno = 2 (0x2), region = 132 }
 0x6e3   :  { %6994 = vsyncpa [#allocation5], 1 }
 0x6e4   :  { %6996 = vsyncpa [#allocation5 + $0x1], 1 }

</bundles_post_ra>
